<compile_context>
chip_gen: v5e
topology: v5e:2x2
jax: 0.10.0
libtpu: 0.0.40
codegen_flags: <defaults>
</compile_context>

<pallas_src>
import functools

import jax
import jax.numpy as jnp
from jax import lax
from jax.experimental import pallas as pl
from jax.experimental.pallas import tpu as pltpu

EPS = 1e-8                       # nn.GroupNorm(1, dim, eps=1e-08)
_LANE = 128


def _round_up(x, m):
    return (x + m - 1) // m * m


def _pick_tile(s, target):
    """Largest multiple of 128 that divides s and is <= target, else s (full)."""
    t = min(target, s)
    t -= t % _LANE
    while t >= _LANE:
        if s % t == 0:
            return t
        t -= _LANE
    return s


def _tpu_config():
    """Generation-aware VMEM budget, tile defaults and exp precision."""
    kind = ""
    try:
        kind = jax.devices()[0].device_kind.lower()
    except Exception:
        kind = ""
    vmem_cap = None
    try:
        vmem_cap = pltpu.get_tpu_info().vmem_capacity_bytes
    except Exception:
        vmem_cap = None
    if vmem_cap is None:
        vmem_cap = 64 * 1024 * 1024 if "7" in kind else 128 * 1024 * 1024
    is_v5 = "v5" in kind
    if vmem_cap >= 100 * 1024 * 1024:
        # v5e / v6e: 128 MiB physical VMEM -> large tiles, large scoped limit.
        return dict(vmem_limit=100 * 1024 * 1024,
                    tile_s=1024,
                    tile_q=256 if is_v5 else 1024,   # v5e: small tq, big tk
                    tile_kv=1024,
                    bf16_exp=not is_v5)              # v5e has no bf16 EUP/VPU
    # v7x: 64 MiB physical VMEM.
    return dict(vmem_limit=48 * 1024 * 1024,
                tile_s=512, tile_q=512, tile_kv=512, bf16_exp=True)


# ---------------------------------------------------------------------------
# Kernel 1: folded GroupNorm affine -> 1x1 encoder -> +pos-enc -> fused K/V.
# ---------------------------------------------------------------------------
def _encode_kernel(p_out, x_ref, scale_ref, shift_ref, emb_ref, wenc_ref,
                   wkv_ref, y_ref, k_ref, v_ref):
    # GroupNorm(1, n_in): per-sample stats folded into scale/shift (wrapper).
    xn = x_ref[0] * scale_ref[0] + shift_ref[0]                 # (ts, n_in) f32
    y = jnp.dot(xn.astype(jnp.bfloat16), wenc_ref[...],
                preferred_element_type=jnp.float32)
    y = y + emb_ref[...].astype(jnp.float32)                    # pos-enc (bf16 HBM)
    yb = y.astype(jnp.bfloat16)
    y_ref[0] = yb
    # Fused K/V projection (Q is recomputed from y inside kernel 2).
    kv = jnp.dot(yb, wkv_ref[...], preferred_element_type=jnp.float32)
    k_ref[0] = kv[:, :p_out].astype(jnp.bfloat16)
    v_ref[0] = kv[:, p_out:].astype(jnp.bfloat16)


# ---------------------------------------------------------------------------
# Kernel 2: online-softmax (flash) attention + output projection + per-lane
#           partial sum / sum-of-squares for the attention GroupNorm.
# ---------------------------------------------------------------------------
def _flash_attn_kernel(tk, kv_resident, bf16_exp,
                       y_ref, k_ref, v_ref, wq_ref, wo_ref,
                       att_ref, stats_ref, q_sc, m_sc, l_sc, acc_sc):
    # TODO(synk): the real att_model (MossFormerM gated-attention stack) is an
    # external constructor argument; a single-head scaled-dot-product attention
    # is used as a deterministic stand-in.
    ki = pl.program_id(2)

    @pl.when(ki == 0)
    def _init():
        # Recompute Q from the y tile (1/sqrt(d) folded into wq) instead of
        # materializing a B*S*p_out q array in HBM.
        q = jnp.dot(y_ref[0], wq_ref[...], preferred_element_type=jnp.float32)
        q_sc[...] = q.astype(jnp.bfloat16)
        m_sc[...] = jnp.full(m_sc.shape, -jnp.inf, jnp.float32)
        l_sc[...] = jnp.zeros(l_sc.shape, jnp.float32)
        acc_sc[...] = jnp.zeros(acc_sc.shape, jnp.float32)

    if kv_resident:
        # K/V live in VMEM for the whole sample; slice the current kv tile.
        start = pl.multiple_of(ki * tk, tk)
        k = k_ref[0, pl.ds(start, tk), :]                       # (tk, P_out) bf16
        v = v_ref[0, pl.ds(start, tk), :]
    else:
        k = k_ref[0]
        v = v_ref[0]

    # NT matmul: contract last dims directly, no materialized k.T.
    s = lax.dot_general(q_sc[...], k, (((1,), (1,)), ((), ())),
                        preferred_element_type=jnp.float32)     # (tq, tk) f32
    m_prev = m_sc[...]
    m_new = jnp.maximum(m_prev, jnp.max(s, axis=-1, keepdims=True))
    corr = jnp.exp(m_prev - m_new)
    if bf16_exp:
        # v6e/v7x: the kv loop is EUP-bound; bf16 exp runs ~2x the f32 rate.
        p = jnp.exp((s - m_new).astype(jnp.bfloat16))
        p_sum = jnp.sum(p.astype(jnp.float32), axis=-1, keepdims=True)
        pv = jnp.dot(p, v, preferred_element_type=jnp.float32)
    else:
        p = jnp.exp(s - m_new)
        p_sum = jnp.sum(p, axis=-1, keepdims=True)
        pv = jnp.dot(p.astype(jnp.bfloat16), v, preferred_element_type=jnp.float32)
    l_sc[...] = corr * l_sc[...] + p_sum
    acc_sc[...] = corr * acc_sc[...] + pv
    m_sc[...] = m_new

    @pl.when(ki == pl.num_programs(2) - 1)
    def _finalize():
        o = acc_sc[...] * pl.reciprocal(l_sc[...], approx=True)
        o = jnp.dot(o.astype(jnp.bfloat16), wo_ref[...],
                    preferred_element_type=jnp.float32)         # (tq, P_out) f32
        ob = o.astype(att_ref.dtype)
        att_ref[0] = ob
        # Per-lane partials (sublane reduce only); stats are taken from the
        # stored (bf16-rounded) values so normalization matches the data.
        o32 = ob.astype(jnp.float32)
        s1 = jnp.sum(o32, axis=0, keepdims=True)                # (1, P_out)
        s2 = jnp.sum(o32 * o32, axis=0, keepdims=True)
        stats_ref[0, 0] = jnp.concatenate([s1, s2], axis=0)     # (2, P_out)


# ---------------------------------------------------------------------------
# Kernel 3: att-norm (folded affine) + skip -> PReLU -> conv1d_out ->
#           per-speaker tanh*sigmoid gate -> 1x1 decoder -> ReLU ->
#           channel-major store.
# ---------------------------------------------------------------------------
def _mask_kernel(p_out, n_in, num_spks, att_ref, y_ref, scale2_ref, shift2_ref,
                 alpha_ref, wout_ref, bout_ref, wgate_ref, bgate_ref, wdec_ref,
                 out_ref):
    att = att_ref[0].astype(jnp.float32)
    y = y_ref[0].astype(jnp.float32)
    h = att * scale2_ref[0] + shift2_ref[0] + y                 # norm + skip
    alpha = alpha_ref[0, 0]                                     # PReLU (SMEM)
    h = jnp.where(h > 0, h, alpha * h)
    hb = h.astype(jnp.bfloat16)
    z = jnp.dot(hb, wout_ref[...],
                preferred_element_type=jnp.float32) + bout_ref[0]
    # TODO(synk): if production p_out == 128, stack speakers along rows into a
    # single (num_spks*ts, p_out) gate matmul; moot for d_model >= 256.
    for spk in range(num_spks):                                 # static unroll
        # 128-aligned per-speaker slice (columns re-packed in the wrapper).
        zs = z[:, spk * p_out:(spk + 1) * p_out].astype(jnp.bfloat16)
        g = jnp.dot(zs, wgate_ref[...],
                    preferred_element_type=jnp.float32) + bgate_ref[0]
        m = jnp.tanh(g[:, :p_out]) * jax.nn.sigmoid(g[:, p_out:])
        d = jnp.dot(m.astype(jnp.bfloat16), wdec_ref[...],
                    preferred_element_type=jnp.float32)         # (ts, P_in) f32
        # Channel-major store: (ts, P_in) -> (P_in, ts) in-kernel transpose
        # (lane-dense, ts % 128 == 0), drop padded channels at the store.
        out_ref[spk, 0] = jnp.maximum(d, 0.0).T[:n_in]


# ---------------------------------------------------------------------------
# Wrapper glue: padding / fusion / folded affines / pos-enc table.
# ---------------------------------------------------------------------------
def _prepare_params(params, n_in, n_out, num_spks, p_in, p_out):
    bf16 = jnp.bfloat16

    def pad2(w, rows, cols):
        return jnp.pad(w, ((0, rows - w.shape[0]), (0, cols - w.shape[1])))

    ga = jnp.pad(params['ga'][0], (0, p_out - n_out))
    ba = jnp.pad(params['ba'][0], (0, p_out - n_out))

    wenc = pad2(params['wenc'], n_in, p_out).astype(bf16)       # (n_in, P_out)

    wq = pad2(params['wq'] * (1.0 / jnp.sqrt(jnp.float32(n_out))),
              p_out, p_out).astype(bf16)
    wkv = jnp.concatenate([pad2(params['wk'], p_out, p_out),
                           pad2(params['wv'], p_out, p_out)],
                          axis=1).astype(bf16)                  # (P_out, 2*P_out)
    wo = pad2(params['wo'], p_out, p_out).astype(bf16)

    # conv1d_out: re-pack columns so speaker s occupies [s*p_out, s*p_out+n_out)
    wout = jnp.zeros((p_out, num_spks * p_out), jnp.float32)
    bout = jnp.zeros((1, num_spks * p_out), jnp.float32)
    for s in range(num_spks):
        wout = wout.at[:n_out, s * p_out:s * p_out + n_out].set(
            params['wout'][:, s * n_out:(s + 1) * n_out])
        bout = bout.at[:, s * p_out:s * p_out + n_out].set(
            params['bout'][:, s * n_out:(s + 1) * n_out])
    wout = wout.astype(bf16)

    wgate = jnp.concatenate([pad2(params['wo1'], p_out, p_out),
                             pad2(params['wg1'], p_out, p_out)],
                            axis=1).astype(bf16)                # (P_out, 2*P_out)
    bgate = jnp.concatenate(
        [jnp.pad(params['bo1'], ((0, 0), (0, p_out - n_out))),
         jnp.pad(params['bg1'], ((0, 0), (0, p_out - n_out)))], axis=1)
    wdec = pad2(params['wdec'], p_out, p_in).astype(bf16)

    return dict(ga=ga, ba=ba, wenc=wenc, wq=wq, wkv=wkv, wo=wo,
                wout=wout, bout=bout, wgate=wgate, bgate=bgate, wdec=wdec)


def mossformer_masknet(x_bns, params, *, n_in, n_out, num_spks,
                       tile_s=None, tile_q=None, tile_kv=None,
                       kv_resident=None):
    """x_bns: PyTorch-layout input [B, N_in, S]. Returns [spks, B, N_in, S]."""
    B, N, S = x_bns.shape
    assert N == n_in and n_out % 2 == 0

    cfg = _tpu_config()
    tile_s = cfg['tile_s'] if tile_s is None else tile_s
    tile_q = cfg['tile_q'] if tile_q is None else tile_q
    tile_kv = cfg['tile_kv'] if tile_kv is None else tile_kv

    p_in = _round_up(n_in, _LANE)
    p_out = _round_up(n_out, _LANE)
    ts = _pick_tile(S, tile_s)
    tq = _pick_tile(S, tile_q)
    tk = _pick_tile(S, tile_kv)
    n_s, n_q, n_k = S // ts, S // tq, S // tk

    # K/V VMEM-resident (DMA'd once per sample) when both double-buffered bf16
    # copies fit a third of the scoped VMEM budget; otherwise stream per tile.
    if kv_resident is None:
        kv_resident = (4 * S * p_out * 2) <= cfg['vmem_limit'] // 3

    w = _prepare_params(params, n_in, n_out, num_spks, p_in, p_out)

    # self.norm: GroupNorm(1, n_in) per-sample stats (exact, native layout),
    # folded with the affine into per-(sample, channel) scale/shift vectors.
    x32 = x_bns.astype(jnp.float32)
    mu = jnp.mean(x32, axis=(1, 2))
    var = jnp.mean(jnp.square(x32 - mu[:, None, None]), axis=(1, 2))
    rstd = lax.rsqrt(var + EPS)
    g0, b0 = params['g0'][0], params['b0'][0]
    scale_in = (rstd[:, None] * g0)[:, None, :]                 # (B, 1, n_in)
    shift_in = (b0 - (mu * rstd)[:, None] * g0)[:, None, :]

    # Channel-last, *unpadded* (legal block: last dim equals full array dim).
    # TODO(synk): this remaining transpose pass could also be folded into
    # kernel 1 by reading native [B, N, S] blocks and transposing in-kernel.
    x_cl = jnp.transpose(x32, (0, 2, 1))                        # (B, S, n_in)

    # ScaledSinuEmbedding (data independent); stored bf16 to halve its DMA.
    inv_freq = 1.0 / (10000.0 ** (jnp.arange(0, n_out, 2, dtype=jnp.float32) / n_out))
    t = jnp.arange(S, dtype=jnp.float32)
    sinu = t[:, None] * inv_freq[None, :]
    emb = jnp.concatenate([jnp.sin(sinu), jnp.cos(sinu)], axis=-1) * params['scale']
    emb = jnp.pad(emb, ((0, 0), (0, p_out - n_out))).astype(jnp.bfloat16)

    vmem = cfg['vmem_limit']
    once = pl.Buffered(1)       # single-buffer constant-index weight blocks

    # ---- Kernel 1: norm-affine -> encoder -> +pos-enc -> fused K/V ----------
    # Grid (n_s, B): B innermost so emb is fetched once per s tile, not B times.
    y, k, v = pl.pallas_call(
        functools.partial(_encode_kernel, p_out),
        grid=(n_s, B),
        in_specs=[
            pl.BlockSpec((1, ts, n_in), lambda s, b: (b, s, 0)),
            pl.BlockSpec((1, 1, n_in), lambda s, b: (b, 0, 0)),
            pl.BlockSpec((1, 1, n_in), lambda s, b: (b, 0, 0)),
            pl.BlockSpec((ts, p_out), lambda s, b: (s, 0)),
            pl.BlockSpec((n_in, p_out), lambda s, b: (0, 0), pipeline_mode=once),
            pl.BlockSpec((p_out, 2 * p_out), lambda s, b: (0, 0), pipeline_mode=once),
        ],
        out_specs=[pl.BlockSpec((1, ts, p_out), lambda s, b: (b, s, 0))] * 3,
        out_shape=[jax.ShapeDtypeStruct((B, S, p_out), jnp.bfloat16)] * 3,
        compiler_params=pltpu.CompilerParams(
            dimension_semantics=("parallel", "parallel"),
            vmem_limit_bytes=vmem),
    )(x_cl, scale_in, shift_in, emb, w['wenc'], w['wkv'])

    # ---- Kernel 2: flash attention + output projection + norm partials ------
    if kv_resident:
        kv_block, kv_map = (1, S, p_out), (lambda b, i, j: (b, 0, 0))
    else:
        kv_block, kv_map = (1, tk, p_out), (lambda b, i, j: (b, j, 0))

    att, att_stats = pl.pallas_call(
        functools.partial(_flash_attn_kernel, tk, kv_resident, cfg['bf16_exp']),
        grid=(B, n_q, n_k),
        in_specs=[
            pl.BlockSpec((1, tq, p_out), lambda b, i, j: (b, i, 0)),     # y
            pl.BlockSpec(kv_block, kv_map),                              # k
            pl.BlockSpec(kv_block, kv_map),                              # v
            pl.BlockSpec((p_out, p_out), lambda b, i, j: (0, 0), pipeline_mode=once),
            pl.BlockSpec((p_out, p_out), lambda b, i, j: (0, 0), pipeline_mode=once),
        ],
        out_specs=[
            pl.BlockSpec((1, tq, p_out), lambda b, i, j: (b, i, 0)),
            pl.BlockSpec((1, 1, 2, p_out), lambda b, i, j: (b, i, 0, 0)),
        ],
        out_shape=[
            jax.ShapeDtypeStruct((B, S, p_out), jnp.bfloat16),
            jax.ShapeDtypeStruct((B, n_q, 2, p_out), jnp.float32),
        ],
        scratch_shapes=[
            pltpu.VMEM((tq, p_out), jnp.bfloat16),   # q tile
            pltpu.VMEM((tq, 1), jnp.float32),        # running max
            pltpu.VMEM((tq, 1), jnp.float32),        # running denominator
            pltpu.VMEM((tq, p_out), jnp.float32),    # running accumulator
        ],
        compiler_params=pltpu.CompilerParams(
            dimension_semantics=("parallel", "parallel", "arbitrary"),
            vmem_limit_bytes=vmem),
    )(y, k, v, w['wq'], w['wo'])

    # att_norm (GroupNorm(1, n_out)): reduce per-lane partials, fold affine.
    # (Padded channels are exactly zero, so summing all lanes is exact.)
    cnt = jnp.float32(S * n_out)
    s1 = jnp.sum(att_stats[:, :, 0, :], axis=(1, 2))
    s2 = jnp.sum(att_stats[:, :, 1, :], axis=(1, 2))
    mu2 = s1 / cnt
    var2 = jnp.maximum(s2 / cnt - mu2 * mu2, 0.0)
    rstd2 = lax.rsqrt(var2 + EPS)
    scale2 = (rstd2[:, None] * w['ga'])[:, None, :]             # (B, 1, P_out)
    shift2 = (w['ba'] - (mu2 * rstd2)[:, None] * w['ga'])[:, None, :]

    # ---- Kernel 3: norm + skip -> PReLU -> conv_out -> gates -> dec -> ReLU -
    masks = pl.pallas_call(
        functools.partial(_mask_kernel, p_out, n_in, num_spks),
        grid=(B, n_s),
        in_specs=[
            pl.BlockSpec((1, ts, p_out), lambda b, s: (b, s, 0)),    # att
            pl.BlockSpec((1, ts, p_out), lambda b, s: (b, s, 0)),    # y (skip)
            pl.BlockSpec((1, 1, p_out), lambda b, s: (b, 0, 0)),     # scale2
            pl.BlockSpec((1, 1, p_out), lambda b, s: (b, 0, 0)),     # shift2
            pl.BlockSpec(memory_space=pltpu.MemorySpace.SMEM),       # PReLU alpha
            pl.BlockSpec((p_out, num_spks * p_out), lambda b, s: (0, 0), pipeline_mode=once),
            pl.BlockSpec((1, num_spks * p_out), lambda b, s: (0, 0), pipeline_mode=once),
            pl.BlockSpec((p_out, 2 * p_out), lambda b, s: (0, 0), pipeline_mode=once),
            pl.BlockSpec((1, 2 * p_out), lambda b, s: (0, 0), pipeline_mode=once),
            pl.BlockSpec((p_out, p_in), lambda b, s: (0, 0), pipeline_mode=once),
        ],
        out_specs=pl.BlockSpec((num_spks, 1, n_in, ts), lambda b, s: (0, b, 0, s)),
        out_shape=jax.ShapeDtypeStruct((num_spks, B, n_in, S), jnp.float32),
        compiler_params=pltpu.CompilerParams(
            dimension_semantics=("parallel", "parallel"),
            vmem_limit_bytes=vmem),
    )(att, y, scale2, shift2, params['alpha'], w['wout'], w['bout'],
      w['wgate'], w['bgate'], w['wdec'])

    return masks                                                # [spks, B, N, S]


# ---------------------------------------------------------------------------
# Parameters + pure-JAX reference (torch-like semantics, f32) for testing.
# ---------------------------------------------------------------------------
def init_params(key, n_in, n_out, num_spks):
    ks = jax.random.split(key, 16)

    def w(k, shape, scale=0.1):
        return scale * jax.random.normal(k, shape, jnp.float32)

    return dict(
        g0=1.0 + 0.1 * jax.random.normal(ks[0], (1, n_in), jnp.float32),
        b0=0.1 * jax.random.normal(ks[1], (1, n_in), jnp.float32),
        wenc=w(ks[2], (n_in, n_out)),
        scale=jnp.float32(1.0),                     # ScaledSinuEmbedding.scale
        wq=w(ks[3], (n_out, n_out)),
        wk=w(ks[4], (n_out, n_out)),
        wv=w(ks[5], (n_out, n_out)),
        wo=w(ks[6], (n_out, n_out)),
        ga=1.0 + 0.1 * jax.random.normal(ks[7], (1, n_out), jnp.float32),
        ba=0.1 * jax.random.normal(ks[8], (1, n_out), jnp.float32),
        alpha=jnp.full((1, 1), 0.25, jnp.float32),  # nn.PReLU default
        wout=w(ks[9], (n_out, num_spks * n_out)),
        bout=w(ks[10], (1, num_spks * n_out)),
        wo1=w(ks[11], (n_out, n_out)),
        bo1=w(ks[12], (1, n_out)),
        wg1=w(ks[13], (n_out, n_out)),
        bg1=w(ks[14], (1, n_out)),
        wdec=w(ks[15], (n_out, n_in)),
    )


def ref_forward(x_bns, p, *, n_in, n_out, num_spks):
    B, _, S = x_bns.shape
    x = jnp.transpose(x_bns, (0, 2, 1)).astype(jnp.float32)     # [B, S, N_in]
    mu = jnp.mean(x, axis=(1, 2), keepdims=True)
    var = jnp.mean((x - mu) ** 2, axis=(1, 2), keepdims=True)
    xn = (x - mu) / jnp.sqrt(var + EPS) * p['g0'] + p['b0']

    inv_freq = 1.0 / (10000.0 ** (jnp.arange(0, n_out, 2, dtype=jnp.float32) / n_out))
    t = jnp.arange(S, dtype=jnp.float32)
    sinu = t[:, None] * inv_freq[None, :]
    emb = jnp.concatenate([jnp.sin(sinu), jnp.cos(sinu)], axis=-1) * p['scale']

    y = xn @ p['wenc'] + emb[None]
    q = y @ p['wq']
    k = y @ p['wk']
    v = y @ p['wv']
    s = jnp.einsum('bqd,bkd->bqk', q, k) / jnp.sqrt(jnp.float32(n_out))
    a = jax.nn.softmax(s, axis=-1)
    att = jnp.einsum('bqk,bkd->bqd', a, v) @ p['wo']
    mu2 = jnp.mean(att, axis=(1, 2), keepdims=True)
    var2 = jnp.mean((att - mu2) ** 2, axis=(1, 2), keepdims=True)
    attn = (att - mu2) / jnp.sqrt(var2 + EPS) * p['ga'] + p['ba']
    h = attn + y
    h = jnp.where(h > 0, h, p['alpha'][0, 0] * h)
    z = h @ p['wout'] + p['bout']
    outs = []
    for spk in range(num_spks):
        zs = z[..., spk * n_out:(spk + 1) * n_out]
        m = jnp.tanh(zs @ p['wo1'] + p['bo1']) * jax.nn.sigmoid(zs @ p['wg1'] + p['bg1'])
        outs.append(jnp.maximum(m @ p['wdec'], 0.0))
    out = jnp.stack(outs, 0)                                    # (spks, B, S, N_in)
    return jnp.transpose(out, (0, 1, 3, 2))                     # (spks, B, N_in, S)


if __name__ == "__main__":
    B, N_IN, N_OUT, S, SPKS = 2, 8, 32, 512, 2
    key = jax.random.PRNGKey(0)
    pkey, xkey = jax.random.split(key)
    params = init_params(pkey, N_IN, N_OUT, SPKS)
    x = jax.random.normal(xkey, (B, N_IN, S), jnp.float32)      # torch layout [B, N, S]

    ref = ref_forward(x, params, n_in=N_IN, n_out=N_OUT, num_spks=SPKS)

    # Small tiles so the demo exercises multi-step flash accumulation; both the
    # VMEM-resident and the streamed K/V paths are compiled and checked.
    for resident in (True, False):
        fwd = jax.jit(functools.partial(
            mossformer_masknet, n_in=N_IN, n_out=N_OUT, num_spks=SPKS,
            tile_s=256, tile_q=128, tile_kv=128, kv_resident=resident))
        out = jax.block_until_ready(fwd(x, params))
        assert out.shape == (SPKS, B, N_IN, S)
        assert bool(jnp.allclose(out, ref, rtol=5e-2, atol=5e-2)), \
            f"mismatch vs JAX reference (kv_resident={resident})"

    print("KERNEL_OK")
</pallas_src>

<mosaic_0001>
module attributes {stable_mosaic.version = 11 : i64} {
  func.func @_flash_attn_kernel(%arg0: i32, %arg1: i32, %arg2: i32, %arg3: memref<1x128x128xbf16, #tpu.memory_space<vmem>>, %arg4: memref<1x512x128xbf16, #tpu.memory_space<vmem>>, %arg5: memref<1x512x128xbf16, #tpu.memory_space<vmem>>, %arg6: memref<128x128xbf16, #tpu.memory_space<vmem>>, %arg7: memref<128x128xbf16, #tpu.memory_space<vmem>>, %arg8: memref<1x128x128xbf16, #tpu.memory_space<vmem>>, %arg9: memref<1x1x2x128xf32, #tpu.memory_space<vmem>>, %arg10: memref<128x128xbf16, #tpu.memory_space<vmem>>, %arg11: memref<128x1xf32, #tpu.memory_space<vmem>>, %arg12: memref<128x1xf32, #tpu.memory_space<vmem>>, %arg13: memref<128x128xf32, #tpu.memory_space<vmem>>) attributes {dimension_semantics = [#tpu.dimension_semantics<parallel>, #tpu.dimension_semantics<parallel>, #tpu.dimension_semantics<arbitrary>], iteration_bounds = array<i64: 2, 4, 4>, scalar_prefetch = 0 : i64, scratch_operands = 4 : i64, tpu.core_type = #tpu.core_type<tc>, window_params = [{transform_indices = @transform_0, window_bounds = array<i64: 1, 128, 128>}, {transform_indices = @transform_1, window_bounds = array<i64: 1, 512, 128>}, {transform_indices = @transform_2, window_bounds = array<i64: 1, 512, 128>}, {pipeline_mode = #tpu.pipeline_mode<synchronous>, transform_indices = @transform_3, window_bounds = array<i64: 128, 128>}, {pipeline_mode = #tpu.pipeline_mode<synchronous>, transform_indices = @transform_4, window_bounds = array<i64: 128, 128>}, {transform_indices = @transform_5, window_bounds = array<i64: 1, 128, 128>}, {transform_indices = @transform_6, window_bounds = array<i64: 1, 1, 2, 128>}]} {
    %c0_i32 = arith.constant 0 : i32
    %0 = arith.cmpi eq, %arg2, %c0_i32 : i32
    %1 = arith.extui %0 : i1 to i32
    %c0_i32_0 = arith.constant 0 : i32
    %2 = arith.cmpi ne, %1, %c0_i32_0 : i32
    scf.if %2 {
      %c0_22 = arith.constant 0 : index
      %c0_23 = arith.constant 0 : index
      %c0_24 = arith.constant 0 : index
      %40 = vector.load %arg3[%c0_22, %c0_23, %c0_24] : memref<1x128x128xbf16, #tpu.memory_space<vmem>>, vector<1x128x128xbf16>
      %41 = vector.shape_cast %40 : vector<1x128x128xbf16> to vector<128x128xbf16>
      %c0_25 = arith.constant 0 : index
      %c0_26 = arith.constant 0 : index
      %42 = vector.load %arg6[%c0_25, %c0_26] : memref<128x128xbf16, #tpu.memory_space<vmem>>, vector<128x128xbf16>
      %cst_27 = arith.constant dense<0.000000e+00> : vector<128x128xf32>
      %43 = tpu.matmul %41, %42, %cst_27 {dimension_numbers = #tpu.dot_dimension_numbers<[1], [0], [0], [1], [0, 0, 1, 1], [], []>} : vector<128x128xbf16>, vector<128x128xbf16>, vector<128x128xf32> -> vector<128x128xf32>
      %44 = arith.truncf %43 : vector<128x128xf32> to vector<128x128xbf16>
      %c0_28 = arith.constant 0 : index
      %c0_29 = arith.constant 0 : index
      %45 = vector.load %arg10[%c0_28, %c0_29] : memref<128x128xbf16, #tpu.memory_space<vmem>>, vector<128x128xbf16>
      tpu.vector_store %arg10[%c0_28, %c0_29], %44 {strides = array<i32>} : memref<128x128xbf16, #tpu.memory_space<vmem>>, vector<128x128xbf16>,
      %cst_30 = arith.constant 0xFF800000 : f32
      %46 = vector.broadcast %cst_30 : f32 to vector<128x1xf32>
      %c0_31 = arith.constant 0 : index
      %c0_32 = arith.constant 0 : index
      %47 = vector.load %arg11[%c0_31, %c0_32] : memref<128x1xf32, #tpu.memory_space<vmem>>, vector<128x1xf32>
      tpu.vector_store %arg11[%c0_31, %c0_32], %46 {strides = array<i32>} : memref<128x1xf32, #tpu.memory_space<vmem>>, vector<128x1xf32>,
      %cst_33 = arith.constant 0.000000e+00 : f32
      %48 = vector.broadcast %cst_33 : f32 to vector<128x1xf32>
      %c0_34 = arith.constant 0 : index
      %c0_35 = arith.constant 0 : index
      %49 = vector.load %arg12[%c0_34, %c0_35] : memref<128x1xf32, #tpu.memory_space<vmem>>, vector<128x1xf32>
      tpu.vector_store %arg12[%c0_34, %c0_35], %48 {strides = array<i32>} : memref<128x1xf32, #tpu.memory_space<vmem>>, vector<128x1xf32>,
      %cst_36 = arith.constant 0.000000e+00 : f32
      %50 = vector.broadcast %cst_36 : f32 to vector<128x128xf32>
      %c0_37 = arith.constant 0 : index
      %c0_38 = arith.constant 0 : index
      %51 = vector.load %arg13[%c0_37, %c0_38] : memref<128x128xf32, #tpu.memory_space<vmem>>, vector<128x128xf32>
      tpu.vector_store %arg13[%c0_37, %c0_38], %50 {strides = array<i32>} : memref<128x128xf32, #tpu.memory_space<vmem>>, vector<128x128xf32>,
    } else {
    }
    %c128_i32 = arith.constant 128 : i32
    %3 = arith.muli %arg2, %c128_i32 : i32
    %4 = tpu.assume_multiple %3, 128 : i32
    %c0 = arith.constant 0 : index
    %5 = arith.index_cast %4 : i32 to index
    %c0_1 = arith.constant 0 : index
    %6 = vector.load %arg4[%c0, %5, %c0_1] : memref<1x512x128xbf16, #tpu.memory_space<vmem>>, vector<1x128x128xbf16>
    %7 = vector.shape_cast %6 : vector<1x128x128xbf16> to vector<128x128xbf16>
    %c0_2 = arith.constant 0 : index
    %8 = arith.index_cast %4 : i32 to index
    %c0_3 = arith.constant 0 : index
    %9 = vector.load %arg5[%c0_2, %8, %c0_3] : memref<1x512x128xbf16, #tpu.memory_space<vmem>>, vector<1x128x128xbf16>
    %10 = vector.shape_cast %9 : vector<1x128x128xbf16> to vector<128x128xbf16>
    %c0_4 = arith.constant 0 : index
    %c0_5 = arith.constant 0 : index
    %11 = vector.load %arg10[%c0_4, %c0_5] : memref<128x128xbf16, #tpu.memory_space<vmem>>, vector<128x128xbf16>
    %cst = arith.constant dense<0.000000e+00> : vector<128x128xf32>
    %12 = tpu.matmul %11, %7, %cst {dimension_numbers = #tpu.dot_dimension_numbers<[1], [1], [0], [0], [0, 0, 1, 0], [], []>} : vector<128x128xbf16>, vector<128x128xbf16>, vector<128x128xf32> -> vector<128x128xf32>
    %c0_6 = arith.constant 0 : index
    %c0_7 = arith.constant 0 : index
    %13 = vector.load %arg11[%c0_6, %c0_7] : memref<128x1xf32, #tpu.memory_space<vmem>>, vector<128x1xf32>
    %cst_8 = arith.constant dense<0xFF800000> : vector<128xf32>
    %14 = vector.multi_reduction <maximumf>, %12, %cst_8 [1] : vector<128x128xf32> to vector<128xf32>
    %15 = vector.shape_cast %14 : vector<128xf32> to vector<128x1xf32>
    %16 = arith.maximumf %13, %15 : vector<128x1xf32>
    %17 = arith.subf %13, %16 : vector<128x1xf32>
    %18 = math.exp %17 : vector<128x1xf32>
    %19 = vector.broadcast %16 : vector<128x1xf32> to vector<128x128xf32>
    %20 = arith.subf %12, %19 : vector<128x128xf32>
    %21 = arith.truncf %20 : vector<128x128xf32> to vector<128x128xbf16>
    %22 = math.exp %21 : vector<128x128xbf16>
    %23 = arith.extf %22 : vector<128x128xbf16> to vector<128x128xf32>
    %cst_9 = arith.constant dense<0.000000e+00> : vector<128xf32>
    %24 = vector.multi_reduction <add>, %23, %cst_9 [1] : vector<128x128xf32> to vector<128xf32>
    %25 = vector.shape_cast %24 : vector<128xf32> to vector<128x1xf32>
    %cst_10 = arith.constant dense<0.000000e+00> : vector<128x128xf32>
    %26 = tpu.matmul %22, %10, %cst_10 {dimension_numbers = #tpu.dot_dimension_numbers<[1], [0], [0], [1], [0, 0, 1, 1], [], []>} : vector<128x128xbf16>, vector<128x128xbf16>, vector<128x128xf32> -> vector<128x128xf32>
    %c0_11 = arith.constant 0 : index
    %c0_12 = arith.constant 0 : index
    %27 = vector.load %arg12[%c0_11, %c0_12] : memref<128x1xf32, #tpu.memory_space<vmem>>, vector<128x1xf32>
    %28 = arith.mulf %18, %27 : vector<128x1xf32>
    %29 = arith.addf %28, %25 : vector<128x1xf32>
    %c0_13 = arith.constant 0 : index
    %c0_14 = arith.constant 0 : index
    %30 = vector.load %arg12[%c0_13, %c0_14] : memref<128x1xf32, #tpu.memory_space<vmem>>, vector<128x1xf32>
    tpu.vector_store %arg12[%c0_13, %c0_14], %29 {strides = array<i32>} : memref<128x1xf32, #tpu.memory_space<vmem>>, vector<128x1xf32>,
    %c0_15 = arith.constant 0 : index
    %c0_16 = arith.constant 0 : index
    %31 = vector.load %arg13[%c0_15, %c0_16] : memref<128x128xf32, #tpu.memory_space<vmem>>, vector<128x128xf32>
    %32 = vector.broadcast %18 : vector<128x1xf32> to vector<128x128xf32>
    %33 = arith.mulf %32, %31 : vector<128x128xf32>
    %34 = arith.addf %33, %26 : vector<128x128xf32>
    %c0_17 = arith.constant 0 : index
    %c0_18 = arith.constant 0 : index
    %35 = vector.load %arg13[%c0_17, %c0_18] : memref<128x128xf32, #tpu.memory_space<vmem>>, vector<128x128xf32>
    tpu.vector_store %arg13[%c0_17, %c0_18], %34 {strides = array<i32>} : memref<128x128xf32, #tpu.memory_space<vmem>>, vector<128x128xf32>,
    %c0_19 = arith.constant 0 : index
    %c0_20 = arith.constant 0 : index
    %36 = vector.load %arg11[%c0_19, %c0_20] : memref<128x1xf32, #tpu.memory_space<vmem>>, vector<128x1xf32>
    tpu.vector_store %arg11[%c0_19, %c0_20], %16 {strides = array<i32>} : memref<128x1xf32, #tpu.memory_space<vmem>>, vector<128x1xf32>,
    %c3_i32 = arith.constant 3 : i32
    %37 = arith.cmpi eq, %arg2, %c3_i32 : i32
    %38 = arith.extui %37 : i1 to i32
    %c0_i32_21 = arith.constant 0 : i32
    %39 = arith.cmpi ne, %38, %c0_i32_21 : i32
    scf.if %39 {
      %c0_22 = arith.constant 0 : index
      %c0_23 = arith.constant 0 : index
      %40 = vector.load %arg13[%c0_22, %c0_23] : memref<128x128xf32, #tpu.memory_space<vmem>>, vector<128x128xf32>
      %c0_24 = arith.constant 0 : index
      %c0_25 = arith.constant 0 : index
      %41 = vector.load %arg12[%c0_24, %c0_25] : memref<128x1xf32, #tpu.memory_space<vmem>>, vector<128x1xf32>
      %42 = tpu.reciprocal %41 {approx = true} : vector<128x1xf32> -> vector<128x1xf32>
      %43 = vector.broadcast %42 : vector<128x1xf32> to vector<128x128xf32>
      %44 = arith.mulf %40, %43 : vector<128x128xf32>
      %45 = arith.truncf %44 : vector<128x128xf32> to vector<128x128xbf16>
      %c0_26 = arith.constant 0 : index
      %c0_27 = arith.constant 0 : index
      %46 = vector.load %arg7[%c0_26, %c0_27] : memref<128x128xbf16, #tpu.memory_space<vmem>>, vector<128x128xbf16>
      %cst_28 = arith.constant dense<0.000000e+00> : vector<128x128xf32>
      %47 = tpu.matmul %45, %46, %cst_28 {dimension_numbers = #tpu.dot_dimension_numbers<[1], [0], [0], [1], [0, 0, 1, 1], [], []>} : vector<128x128xbf16>, vector<128x128xbf16>, vector<128x128xf32> -> vector<128x128xf32>
      %48 = arith.truncf %47 : vector<128x128xf32> to vector<128x128xbf16>
      %c0_29 = arith.constant 0 : index
      %c0_30 = arith.constant 0 : index
      %c0_31 = arith.constant 0 : index
      %49 = vector.load %arg8[%c0_29, %c0_30, %c0_31] : memref<1x128x128xbf16, #tpu.memory_space<vmem>>, vector<1x128x128xbf16>
      %50 = vector.shape_cast %49 : vector<1x128x128xbf16> to vector<128x128xbf16>
      %51 = vector.shape_cast %48 : vector<128x128xbf16> to vector<1x128x128xbf16>
      tpu.vector_store %arg8[%c0_29, %c0_30, %c0_31], %51 {strides = array<i32>} : memref<1x128x128xbf16, #tpu.memory_space<vmem>>, vector<1x128x128xbf16>,
      %52 = arith.extf %48 : vector<128x128xbf16> to vector<128x128xf32>
      %cst_32 = arith.constant dense<0.000000e+00> : vector<128xf32>
      %53 = vector.multi_reduction <add>, %52, %cst_32 [0] : vector<128x128xf32> to vector<128xf32>
      %54 = vector.shape_cast %53 : vector<128xf32> to vector<1x128xf32>
      %55 = arith.mulf %52, %52 : vector<128x128xf32>
      %cst_33 = arith.constant dense<0.000000e+00> : vector<128xf32>
      %56 = vector.multi_reduction <add>, %55, %cst_33 [0] : vector<128x128xf32> to vector<128xf32>
      %57 = vector.shape_cast %56 : vector<128xf32> to vector<1x128xf32>
      %58 = tpu.concatenate %54, %57 in 0 : vector<1x128xf32>, vector<1x128xf32> -> vector<2x128xf32>
      %c0_34 = arith.constant 0 : index
      %c0_35 = arith.constant 0 : index
      %c0_36 = arith.constant 0 : index
      %c0_37 = arith.constant 0 : index
      %59 = vector.load %arg9[%c0_34, %c0_35, %c0_36, %c0_37] : memref<1x1x2x128xf32, #tpu.memory_space<vmem>>, vector<1x1x2x128xf32>
      %60 = vector.shape_cast %59 : vector<1x1x2x128xf32> to vector<2x128xf32>
      %61 = vector.shape_cast %58 : vector<2x128xf32> to vector<1x1x2x128xf32>
      tpu.vector_store %arg9[%c0_34, %c0_35, %c0_36, %c0_37], %61 {strides = array<i32>} : memref<1x1x2x128xf32, #tpu.memory_space<vmem>>, vector<1x1x2x128xf32>,
    } else {
    }
    return
  }
  func.func @transform_0(%arg0: i32, %arg1: i32, %arg2: i32) -> (i32, i32, i32) {
    %c0_i32 = arith.constant 0 : i32
    %c0_i32_0 = arith.constant 0 : i32
    return %arg0, %arg1, %c0_i32 : i32, i32, i32
  }
  func.func @transform_1(%arg0: i32, %arg1: i32, %arg2: i32) -> (i32, i32, i32) {
    %c0_i32 = arith.constant 0 : i32
    %c0_i32_0 = arith.constant 0 : i32
    %c0_i32_1 = arith.constant 0 : i32
    return %arg0, %c0_i32, %c0_i32_0 : i32, i32, i32
  }
  func.func @transform_2(%arg0: i32, %arg1: i32, %arg2: i32) -> (i32, i32, i32) {
    %c0_i32 = arith.constant 0 : i32
    %c0_i32_0 = arith.constant 0 : i32
    %c0_i32_1 = arith.constant 0 : i32
    return %arg0, %c0_i32, %c0_i32_0 : i32, i32, i32
  }
  func.func @transform_3(%arg0: i32, %arg1: i32, %arg2: i32) -> (i32, i32) {
    %c0_i32 = arith.constant 0 : i32
    %c0_i32_0 = arith.constant 0 : i32
    %c0_i32_1 = arith.constant 0 : i32
    return %c0_i32, %c0_i32_0 : i32, i32
  }
  func.func @transform_4(%arg0: i32, %arg1: i32, %arg2: i32) -> (i32, i32) {
    %c0_i32 = arith.constant 0 : i32
    %c0_i32_0 = arith.constant 0 : i32
    %c0_i32_1 = arith.constant 0 : i32
    return %c0_i32, %c0_i32_0 : i32, i32
  }
  func.func @transform_5(%arg0: i32, %arg1: i32, %arg2: i32) -> (i32, i32, i32) {
    %c0_i32 = arith.constant 0 : i32
    %c0_i32_0 = arith.constant 0 : i32
    return %arg0, %arg1, %c0_i32 : i32, i32, i32
  }
  func.func @transform_6(%arg0: i32, %arg1: i32, %arg2: i32) -> (i32, i32, i32, i32) {
    %c0_i32 = arith.constant 0 : i32
    %c0_i32_0 = arith.constant 0 : i32
    %c0_i32_1 = arith.constant 0 : i32
    return %arg0, %arg1, %c0_i32, %c0_i32_0 : i32, i32, i32, i32
  }
}

module attributes {stable_mosaic.version = 11 : i64} {
  func.func @_encode_kernel(%arg0: i32, %arg1: i32, %arg2: memref<1x256x8xf32, #tpu.memory_space<vmem>>, %arg3: memref<1x1x8xf32, #tpu.memory_space<vmem>>, %arg4: memref<1x1x8xf32, #tpu.memory_space<vmem>>, %arg5: memref<256x128xbf16, #tpu.memory_space<vmem>>, %arg6: memref<8x128xbf16, #tpu.memory_space<vmem>>, %arg7: memref<128x256xbf16, #tpu.memory_space<vmem>>, %arg8: memref<1x256x128xbf16, #tpu.memory_space<vmem>>, %arg9: memref<1x256x128xbf16, #tpu.memory_space<vmem>>, %arg10: memref<1x256x128xbf16, #tpu.memory_space<vmem>>) attributes {dimension_semantics = [#tpu.dimension_semantics<parallel>, #tpu.dimension_semantics<parallel>], iteration_bounds = array<i64: 2, 2>, scalar_prefetch = 0 : i64, scratch_operands = 0 : i64, tpu.core_type = #tpu.core_type<tc>, window_params = [{transform_indices = @transform_0, window_bounds = array<i64: 1, 256, 8>}, {transform_indices = @transform_1, window_bounds = array<i64: 1, 1, 8>}, {transform_indices = @transform_2, window_bounds = array<i64: 1, 1, 8>}, {transform_indices = @transform_3, window_bounds = array<i64: 256, 128>}, {pipeline_mode = #tpu.pipeline_mode<synchronous>, transform_indices = @transform_4, window_bounds = array<i64: 8, 128>}, {pipeline_mode = #tpu.pipeline_mode<synchronous>, transform_indices = @transform_5, window_bounds = array<i64: 128, 256>}, {transform_indices = @transform_6, window_bounds = array<i64: 1, 256, 128>}, {transform_indices = @transform_7, window_bounds = array<i64: 1, 256, 128>}, {transform_indices = @transform_8, window_bounds = array<i64: 1, 256, 128>}]} {
    %c0 = arith.constant 0 : index
    %c0_0 = arith.constant 0 : index
    %c0_1 = arith.constant 0 : index
    %0 = vector.load %arg2[%c0, %c0_0, %c0_1] : memref<1x256x8xf32, #tpu.memory_space<vmem>>, vector<1x256x8xf32>
    %1 = vector.shape_cast %0 : vector<1x256x8xf32> to vector<256x8xf32>
    %c0_2 = arith.constant 0 : index
    %c0_3 = arith.constant 0 : index
    %c0_4 = arith.constant 0 : index
    %2 = vector.load %arg3[%c0_2, %c0_3, %c0_4] : memref<1x1x8xf32, #tpu.memory_space<vmem>>, vector<1x1x8xf32>
    %3 = vector.shape_cast %2 : vector<1x1x8xf32> to vector<1x8xf32>
    %4 = vector.broadcast %3 : vector<1x8xf32> to vector<256x8xf32>
    %5 = arith.mulf %1, %4 : vector<256x8xf32>
    %c0_5 = arith.constant 0 : index
    %c0_6 = arith.constant 0 : index
    %c0_7 = arith.constant 0 : index
    %6 = vector.load %arg4[%c0_5, %c0_6, %c0_7] : memref<1x1x8xf32, #tpu.memory_space<vmem>>, vector<1x1x8xf32>
    %7 = vector.shape_cast %6 : vector<1x1x8xf32> to vector<1x8xf32>
    %8 = vector.broadcast %7 : vector<1x8xf32> to vector<256x8xf32>
    %9 = arith.addf %5, %8 : vector<256x8xf32>
    %10 = arith.truncf %9 : vector<256x8xf32> to vector<256x8xbf16>
    %c0_8 = arith.constant 0 : index
    %c0_9 = arith.constant 0 : index
    %11 = vector.load %arg6[%c0_8, %c0_9] : memref<8x128xbf16, #tpu.memory_space<vmem>>, vector<8x128xbf16>
    %cst = arith.constant dense<0.000000e+00> : vector<256x128xf32>
    %12 = tpu.matmul %10, %11, %cst {dimension_numbers = #tpu.dot_dimension_numbers<[1], [0], [0], [1], [0, 0, 1, 1], [], []>} : vector<256x8xbf16>, vector<8x128xbf16>, vector<256x128xf32> -> vector<256x128xf32>
    %c0_10 = arith.constant 0 : index
    %c0_11 = arith.constant 0 : index
    %13 = vector.load %arg5[%c0_10, %c0_11] : memref<256x128xbf16, #tpu.memory_space<vmem>>, vector<256x128xbf16>
    %14 = arith.extf %13 : vector<256x128xbf16> to vector<256x128xf32>
    %15 = arith.addf %12, %14 : vector<256x128xf32>
    %16 = arith.truncf %15 : vector<256x128xf32> to vector<256x128xbf16>
    %c0_12 = arith.constant 0 : index
    %c0_13 = arith.constant 0 : index
    %c0_14 = arith.constant 0 : index
    %17 = vector.load %arg8[%c0_12, %c0_13, %c0_14] : memref<1x256x128xbf16, #tpu.memory_space<vmem>>, vector<1x256x128xbf16>
    %18 = vector.shape_cast %17 : vector<1x256x128xbf16> to vector<256x128xbf16>
    %19 = vector.shape_cast %16 : vector<256x128xbf16> to vector<1x256x128xbf16>
    tpu.vector_store %arg8[%c0_12, %c0_13, %c0_14], %19 {strides = array<i32>} : memref<1x256x128xbf16, #tpu.memory_space<vmem>>, vector<1x256x128xbf16>,
    %c0_15 = arith.constant 0 : index
    %c0_16 = arith.constant 0 : index
    %20 = vector.load %arg7[%c0_15, %c0_16] : memref<128x256xbf16, #tpu.memory_space<vmem>>, vector<128x256xbf16>
    %cst_17 = arith.constant dense<0.000000e+00> : vector<256x256xf32>
    %21 = tpu.matmul %16, %20, %cst_17 {dimension_numbers = #tpu.dot_dimension_numbers<[1], [0], [0], [1], [0, 0, 1, 1], [], []>} : vector<256x128xbf16>, vector<128x256xbf16>, vector<256x256xf32> -> vector<256x256xf32>
    %22 = vector.extract_strided_slice %21 {offsets = [0, 0], sizes = [256, 128], strides = [1, 1]} : vector<256x256xf32> to vector<256x128xf32>
    %23 = arith.truncf %22 : vector<256x128xf32> to vector<256x128xbf16>
    %c0_18 = arith.constant 0 : index
    %c0_19 = arith.constant 0 : index
    %c0_20 = arith.constant 0 : index
    %24 = vector.load %arg9[%c0_18, %c0_19, %c0_20] : memref<1x256x128xbf16, #tpu.memory_space<vmem>>, vector<1x256x128xbf16>
    %25 = vector.shape_cast %24 : vector<1x256x128xbf16> to vector<256x128xbf16>
    %26 = vector.shape_cast %23 : vector<256x128xbf16> to vector<1x256x128xbf16>
    tpu.vector_store %arg9[%c0_18, %c0_19, %c0_20], %26 {strides = array<i32>} : memref<1x256x128xbf16, #tpu.memory_space<vmem>>, vector<1x256x128xbf16>,
    %27 = vector.extract_strided_slice %21 {offsets = [0, 128], sizes = [256, 128], strides = [1, 1]} : vector<256x256xf32> to vector<256x128xf32>
    %28 = arith.truncf %27 : vector<256x128xf32> to vector<256x128xbf16>
    %c0_21 = arith.constant 0 : index
    %c0_22 = arith.constant 0 : index
    %c0_23 = arith.constant 0 : index
    %29 = vector.load %arg10[%c0_21, %c0_22, %c0_23] : memref<1x256x128xbf16, #tpu.memory_space<vmem>>, vector<1x256x128xbf16>
    %30 = vector.shape_cast %29 : vector<1x256x128xbf16> to vector<256x128xbf16>
    %31 = vector.shape_cast %28 : vector<256x128xbf16> to vector<1x256x128xbf16>
    tpu.vector_store %arg10[%c0_21, %c0_22, %c0_23], %31 {strides = array<i32>} : memref<1x256x128xbf16, #tpu.memory_space<vmem>>, vector<1x256x128xbf16>,
    return
  }
  func.func @transform_0(%arg0: i32, %arg1: i32) -> (i32, i32, i32) {
    %c0_i32 = arith.constant 0 : i32
    %c0_i32_0 = arith.constant 0 : i32
    return %arg1, %arg0, %c0_i32 : i32, i32, i32
  }
  func.func @transform_1(%arg0: i32, %arg1: i32) -> (i32, i32, i32) {
    %c0_i32 = arith.constant 0 : i32
    %c0_i32_0 = arith.constant 0 : i32
    %c0_i32_1 = arith.constant 0 : i32
    return %arg1, %c0_i32, %c0_i32_0 : i32, i32, i32
  }
  func.func @transform_2(%arg0: i32, %arg1: i32) -> (i32, i32, i32) {
    %c0_i32 = arith.constant 0 : i32
    %c0_i32_0 = arith.constant 0 : i32
    %c0_i32_1 = arith.constant 0 : i32
    return %arg1, %c0_i32, %c0_i32_0 : i32, i32, i32
  }
  func.func @transform_3(%arg0: i32, %arg1: i32) -> (i32, i32) {
    %c0_i32 = arith.constant 0 : i32
    %c0_i32_0 = arith.constant 0 : i32
    return %arg0, %c0_i32 : i32, i32
  }
  func.func @transform_4(%arg0: i32, %arg1: i32) -> (i32, i32) {
    %c0_i32 = arith.constant 0 : i32
    %c0_i32_0 = arith.constant 0 : i32
    %c0_i32_1 = arith.constant 0 : i32
    return %c0_i32, %c0_i32_0 : i32, i32
  }
  func.func @transform_5(%arg0: i32, %arg1: i32) -> (i32, i32) {
    %c0_i32 = arith.constant 0 : i32
    %c0_i32_0 = arith.constant 0 : i32
    %c0_i32_1 = arith.constant 0 : i32
    return %c0_i32, %c0_i32_0 : i32, i32
  }
  func.func @transform_6(%arg0: i32, %arg1: i32) -> (i32, i32, i32) {
    %c0_i32 = arith.constant 0 : i32
    %c0_i32_0 = arith.constant 0 : i32
    return %arg1, %arg0, %c0_i32 : i32, i32, i32
  }
  func.func @transform_7(%arg0: i32, %arg1: i32) -> (i32, i32, i32) {
    %c0_i32 = arith.constant 0 : i32
    %c0_i32_0 = arith.constant 0 : i32
    return %arg1, %arg0, %c0_i32 : i32, i32, i32
  }
  func.func @transform_8(%arg0: i32, %arg1: i32) -> (i32, i32, i32) {
    %c0_i32 = arith.constant 0 : i32
    %c0_i32_0 = arith.constant 0 : i32
    return %arg1, %arg0, %c0_i32 : i32, i32, i32
  }
}

module attributes {stable_mosaic.version = 11 : i64} {
  func.func @_mask_kernel(%arg0: i32, %arg1: i32, %arg2: memref<1x256x128xbf16, #tpu.memory_space<vmem>>, %arg3: memref<1x256x128xbf16, #tpu.memory_space<vmem>>, %arg4: memref<1x1x128xf32, #tpu.memory_space<vmem>>, %arg5: memref<1x1x128xf32, #tpu.memory_space<vmem>>, %arg6: memref<1x1xf32, #tpu.memory_space<smem>>, %arg7: memref<128x256xbf16, #tpu.memory_space<vmem>>, %arg8: memref<1x256xf32, #tpu.memory_space<vmem>>, %arg9: memref<128x256xbf16, #tpu.memory_space<vmem>>, %arg10: memref<1x256xf32, #tpu.memory_space<vmem>>, %arg11: memref<128x128xbf16, #tpu.memory_space<vmem>>, %arg12: memref<2x1x8x256xf32, #tpu.memory_space<vmem>>) attributes {dimension_semantics = [#tpu.dimension_semantics<parallel>, #tpu.dimension_semantics<parallel>], iteration_bounds = array<i64: 2, 2>, scalar_prefetch = 0 : i64, scratch_operands = 0 : i64, tpu.core_type = #tpu.core_type<tc>, window_params = [{transform_indices = @transform_0, window_bounds = array<i64: 1, 256, 128>}, {transform_indices = @transform_1, window_bounds = array<i64: 1, 256, 128>}, {transform_indices = @transform_2, window_bounds = array<i64: 1, 1, 128>}, {transform_indices = @transform_3, window_bounds = array<i64: 1, 1, 128>}, {transform_indices = @transform_4, window_bounds = array<i64: 1, 1>}, {pipeline_mode = #tpu.pipeline_mode<synchronous>, transform_indices = @transform_5, window_bounds = array<i64: 128, 256>}, {pipeline_mode = #tpu.pipeline_mode<synchronous>, transform_indices = @transform_6, window_bounds = array<i64: 1, 256>}, {pipeline_mode = #tpu.pipeline_mode<synchronous>, transform_indices = @transform_7, window_bounds = array<i64: 128, 256>}, {pipeline_mode = #tpu.pipeline_mode<synchronous>, transform_indices = @transform_8, window_bounds = array<i64: 1, 256>}, {pipeline_mode = #tpu.pipeline_mode<synchronous>, transform_indices = @transform_9, window_bounds = array<i64: 128, 128>}, {transform_indices = @transform_10, window_bounds = array<i64: 2, 1, 8, 256>}]} {
    %c0 = arith.constant 0 : index
    %c0_0 = arith.constant 0 : index
    %c0_1 = arith.constant 0 : index
    %0 = vector.load %arg2[%c0, %c0_0, %c0_1] : memref<1x256x128xbf16, #tpu.memory_space<vmem>>, vector<1x256x128xbf16>
    %1 = vector.shape_cast %0 : vector<1x256x128xbf16> to vector<256x128xbf16>
    %2 = arith.extf %1 : vector<256x128xbf16> to vector<256x128xf32>
    %c0_2 = arith.constant 0 : index
    %c0_3 = arith.constant 0 : index
    %c0_4 = arith.constant 0 : index
    %3 = vector.load %arg3[%c0_2, %c0_3, %c0_4] : memref<1x256x128xbf16, #tpu.memory_space<vmem>>, vector<1x256x128xbf16>
    %4 = vector.shape_cast %3 : vector<1x256x128xbf16> to vector<256x128xbf16>
    %5 = arith.extf %4 : vector<256x128xbf16> to vector<256x128xf32>
    %c0_5 = arith.constant 0 : index
    %c0_6 = arith.constant 0 : index
    %c0_7 = arith.constant 0 : index
    %6 = vector.load %arg4[%c0_5, %c0_6, %c0_7] : memref<1x1x128xf32, #tpu.memory_space<vmem>>, vector<1x1x128xf32>
    %7 = vector.shape_cast %6 : vector<1x1x128xf32> to vector<1x128xf32>
    %8 = vector.broadcast %7 : vector<1x128xf32> to vector<256x128xf32>
    %9 = arith.mulf %2, %8 : vector<256x128xf32>
    %c0_8 = arith.constant 0 : index
    %c0_9 = arith.constant 0 : index
    %c0_10 = arith.constant 0 : index
    %10 = vector.load %arg5[%c0_8, %c0_9, %c0_10] : memref<1x1x128xf32, #tpu.memory_space<vmem>>, vector<1x1x128xf32>
    %11 = vector.shape_cast %10 : vector<1x1x128xf32> to vector<1x128xf32>
    %12 = vector.broadcast %11 : vector<1x128xf32> to vector<256x128xf32>
    %13 = arith.addf %9, %12 : vector<256x128xf32>
    %14 = arith.addf %13, %5 : vector<256x128xf32>
    %c0_11 = arith.constant 0 : index
    %c0_12 = arith.constant 0 : index
    %15 = memref.load %arg6[%c0_11, %c0_12] : memref<1x1xf32, #tpu.memory_space<smem>>
    %cst = arith.constant 0.000000e+00 : f32
    %16 = vector.broadcast %cst : f32 to vector<256x128xf32>
    %17 = arith.cmpf ogt, %14, %16 : vector<256x128xf32>
    %18 = vector.broadcast %15 : f32 to vector<256x128xf32>
    %19 = arith.mulf %18, %14 : vector<256x128xf32>
    %20 = arith.select %17, %14, %19 : vector<256x128xi1>, vector<256x128xf32>
    %21 = arith.truncf %20 : vector<256x128xf32> to vector<256x128xbf16>
    %c0_13 = arith.constant 0 : index
    %c0_14 = arith.constant 0 : index
    %22 = vector.load %arg7[%c0_13, %c0_14] : memref<128x256xbf16, #tpu.memory_space<vmem>>, vector<128x256xbf16>
    %cst_15 = arith.constant dense<0.000000e+00> : vector<256x256xf32>
    %23 = tpu.matmul %21, %22, %cst_15 {dimension_numbers = #tpu.dot_dimension_numbers<[1], [0], [0], [1], [0, 0, 1, 1], [], []>} : vector<256x128xbf16>, vector<128x256xbf16>, vector<256x256xf32> -> vector<256x256xf32>
    %c0_16 = arith.constant 0 : index
    %c0_17 = arith.constant 0 : index
    %24 = vector.load %arg8[%c0_16, %c0_17] : memref<1x256xf32, #tpu.memory_space<vmem>>, vector<1x256xf32>
    %25 = vector.shape_cast %24 : vector<1x256xf32> to vector<256xf32>
    %26 = vector.shape_cast %25 : vector<256xf32> to vector<1x256xf32>
    %27 = vector.broadcast %26 : vector<1x256xf32> to vector<256x256xf32>
    %28 = arith.addf %23, %27 : vector<256x256xf32>
    %29 = vector.extract_strided_slice %28 {offsets = [0, 0], sizes = [256, 128], strides = [1, 1]} : vector<256x256xf32> to vector<256x128xf32>
    %30 = arith.truncf %29 : vector<256x128xf32> to vector<256x128xbf16>
    %c0_18 = arith.constant 0 : index
    %c0_19 = arith.constant 0 : index
    %31 = vector.load %arg9[%c0_18, %c0_19] : memref<128x256xbf16, #tpu.memory_space<vmem>>, vector<128x256xbf16>
    %cst_20 = arith.constant dense<0.000000e+00> : vector<256x256xf32>
    %32 = tpu.matmul %30, %31, %cst_20 {dimension_numbers = #tpu.dot_dimension_numbers<[1], [0], [0], [1], [0, 0, 1, 1], [], []>} : vector<256x128xbf16>, vector<128x256xbf16>, vector<256x256xf32> -> vector<256x256xf32>
    %c0_21 = arith.constant 0 : index
    %c0_22 = arith.constant 0 : index
    %33 = vector.load %arg10[%c0_21, %c0_22] : memref<1x256xf32, #tpu.memory_space<vmem>>, vector<1x256xf32>
    %34 = vector.shape_cast %33 : vector<1x256xf32> to vector<256xf32>
    %35 = vector.shape_cast %34 : vector<256xf32> to vector<1x256xf32>
    %36 = vector.broadcast %35 : vector<1x256xf32> to vector<256x256xf32>
    %37 = arith.addf %32, %36 : vector<256x256xf32>
    %38 = vector.extract_strided_slice %37 {offsets = [0, 0], sizes = [256, 128], strides = [1, 1]} : vector<256x256xf32> to vector<256x128xf32>
    %39 = math.tanh %38 : vector<256x128xf32>
    %40 = vector.extract_strided_slice %37 {offsets = [0, 128], sizes = [256, 128], strides = [1, 1]} : vector<256x256xf32> to vector<256x128xf32>
    %41 = arith.negf %40 : vector<256x128xf32>
    %42 = math.exp %41 : vector<256x128xf32>
    %cst_23 = arith.constant 1.000000e+00 : f32
    %43 = vector.broadcast %cst_23 : f32 to vector<256x128xf32>
    %44 = arith.addf %43, %42 : vector<256x128xf32>
    %45 = arith.divf %43, %44 : vector<256x128xf32>
    %46 = arith.mulf %39, %45 : vector<256x128xf32>
    %47 = arith.truncf %46 : vector<256x128xf32> to vector<256x128xbf16>
    %c0_24 = arith.constant 0 : index
    %c0_25 = arith.constant 0 : index
    %48 = vector.load %arg11[%c0_24, %c0_25] : memref<128x128xbf16, #tpu.memory_space<vmem>>, vector<128x128xbf16>
    %cst_26 = arith.constant dense<0.000000e+00> : vector<256x128xf32>
    %49 = tpu.matmul %47, %48, %cst_26 {dimension_numbers = #tpu.dot_dimension_numbers<[1], [0], [0], [1], [0, 0, 1, 1], [], []>} : vector<256x128xbf16>, vector<128x128xbf16>, vector<256x128xf32> -> vector<256x128xf32>
    %cst_27 = arith.constant 0.000000e+00 : f32
    %50 = vector.broadcast %cst_27 : f32 to vector<256x128xf32>
    %51 = arith.maximumf %49, %50 : vector<256x128xf32>
    %52 = tpu.transpose %51, [1, 0] : vector<256x128xf32> -> vector<128x256xf32>
    %53 = vector.extract_strided_slice %52 {offsets = [0, 0], sizes = [8, 256], strides = [1, 1]} : vector<128x256xf32> to vector<8x256xf32>
    %c0_28 = arith.constant 0 : index
    %c0_29 = arith.constant 0 : index
    %c0_30 = arith.constant 0 : index
    %c0_31 = arith.constant 0 : index
    %54 = vector.load %arg12[%c0_28, %c0_29, %c0_30, %c0_31] : memref<2x1x8x256xf32, #tpu.memory_space<vmem>>, vector<1x1x8x256xf32>
    %55 = vector.shape_cast %54 : vector<1x1x8x256xf32> to vector<8x256xf32>
    %56 = vector.shape_cast %53 : vector<8x256xf32> to vector<1x1x8x256xf32>
    tpu.vector_store %arg12[%c0_28, %c0_29, %c0_30, %c0_31], %56 {strides = array<i32>} : memref<2x1x8x256xf32, #tpu.memory_space<vmem>>, vector<1x1x8x256xf32>,
    %57 = vector.extract_strided_slice %28 {offsets = [0, 128], sizes = [256, 128], strides = [1, 1]} : vector<256x256xf32> to vector<256x128xf32>
    %58 = arith.truncf %57 : vector<256x128xf32> to vector<256x128xbf16>
    %c0_32 = arith.constant 0 : index
    %c0_33 = arith.constant 0 : index
    %59 = vector.load %arg9[%c0_32, %c0_33] : memref<128x256xbf16, #tpu.memory_space<vmem>>, vector<128x256xbf16>
    %cst_34 = arith.constant dense<0.000000e+00> : vector<256x256xf32>
    %60 = tpu.matmul %58, %59, %cst_34 {dimension_numbers = #tpu.dot_dimension_numbers<[1], [0], [0], [1], [0, 0, 1, 1], [], []>} : vector<256x128xbf16>, vector<128x256xbf16>, vector<256x256xf32> -> vector<256x256xf32>
    %c0_35 = arith.constant 0 : index
    %c0_36 = arith.constant 0 : index
    %61 = vector.load %arg10[%c0_35, %c0_36] : memref<1x256xf32, #tpu.memory_space<vmem>>, vector<1x256xf32>
    %62 = vector.shape_cast %61 : vector<1x256xf32> to vector<256xf32>
    %63 = vector.shape_cast %62 : vector<256xf32> to vector<1x256xf32>
    %64 = vector.broadcast %63 : vector<1x256xf32> to vector<256x256xf32>
    %65 = arith.addf %60, %64 : vector<256x256xf32>
    %66 = vector.extract_strided_slice %65 {offsets = [0, 0], sizes = [256, 128], strides = [1, 1]} : vector<256x256xf32> to vector<256x128xf32>
    %67 = math.tanh %66 : vector<256x128xf32>
    %68 = vector.extract_strided_slice %65 {offsets = [0, 128], sizes = [256, 128], strides = [1, 1]} : vector<256x256xf32> to vector<256x128xf32>
    %69 = arith.negf %68 : vector<256x128xf32>
    %70 = math.exp %69 : vector<256x128xf32>
    %cst_37 = arith.constant 1.000000e+00 : f32
    %71 = vector.broadcast %cst_37 : f32 to vector<256x128xf32>
    %72 = arith.addf %71, %70 : vector<256x128xf32>
    %73 = arith.divf %71, %72 : vector<256x128xf32>
    %74 = arith.mulf %67, %73 : vector<256x128xf32>
    %75 = arith.truncf %74 : vector<256x128xf32> to vector<256x128xbf16>
    %c0_38 = arith.constant 0 : index
    %c0_39 = arith.constant 0 : index
    %76 = vector.load %arg11[%c0_38, %c0_39] : memref<128x128xbf16, #tpu.memory_space<vmem>>, vector<128x128xbf16>
    %cst_40 = arith.constant dense<0.000000e+00> : vector<256x128xf32>
    %77 = tpu.matmul %75, %76, %cst_40 {dimension_numbers = #tpu.dot_dimension_numbers<[1], [0], [0], [1], [0, 0, 1, 1], [], []>} : vector<256x128xbf16>, vector<128x128xbf16>, vector<256x128xf32> -> vector<256x128xf32>
    %cst_41 = arith.constant 0.000000e+00 : f32
    %78 = vector.broadcast %cst_41 : f32 to vector<256x128xf32>
    %79 = arith.maximumf %77, %78 : vector<256x128xf32>
    %80 = tpu.transpose %79, [1, 0] : vector<256x128xf32> -> vector<128x256xf32>
    %81 = vector.extract_strided_slice %80 {offsets = [0, 0], sizes = [8, 256], strides = [1, 1]} : vector<128x256xf32> to vector<8x256xf32>
    %c1 = arith.constant 1 : index
    %c0_42 = arith.constant 0 : index
    %c0_43 = arith.constant 0 : index
    %c0_44 = arith.constant 0 : index
    %82 = vector.load %arg12[%c1, %c0_42, %c0_43, %c0_44] : memref<2x1x8x256xf32, #tpu.memory_space<vmem>>, vector<1x1x8x256xf32>
    %83 = vector.shape_cast %82 : vector<1x1x8x256xf32> to vector<8x256xf32>
    %84 = vector.shape_cast %81 : vector<8x256xf32> to vector<1x1x8x256xf32>
    tpu.vector_store %arg12[%c1, %c0_42, %c0_43, %c0_44], %84 {strides = array<i32>} : memref<2x1x8x256xf32, #tpu.memory_space<vmem>>, vector<1x1x8x256xf32>,
    return
  }
  func.func @transform_0(%arg0: i32, %arg1: i32) -> (i32, i32, i32) {
    %c0_i32 = arith.constant 0 : i32
    %c0_i32_0 = arith.constant 0 : i32
    return %arg0, %arg1, %c0_i32 : i32, i32, i32
  }
  func.func @transform_1(%arg0: i32, %arg1: i32) -> (i32, i32, i32) {
    %c0_i32 = arith.constant 0 : i32
    %c0_i32_0 = arith.constant 0 : i32
    return %arg0, %arg1, %c0_i32 : i32, i32, i32
  }
  func.func @transform_2(%arg0: i32, %arg1: i32) -> (i32, i32, i32) {
    %c0_i32 = arith.constant 0 : i32
    %c0_i32_0 = arith.constant 0 : i32
    %c0_i32_1 = arith.constant 0 : i32
    return %arg0, %c0_i32, %c0_i32_0 : i32, i32, i32
  }
  func.func @transform_3(%arg0: i32, %arg1: i32) -> (i32, i32, i32) {
    %c0_i32 = arith.constant 0 : i32
    %c0_i32_0 = arith.constant 0 : i32
    %c0_i32_1 = arith.constant 0 : i32
    return %arg0, %c0_i32, %c0_i32_0 : i32, i32, i32
  }
  func.func @transform_4(%arg0: i32, %arg1: i32) -> (i32, i32) {
    %c0_i32 = arith.constant 0 : i32
    %c0_i32_0 = arith.constant 0 : i32
    %c0_i32_1 = arith.constant 0 : i32
    return %c0_i32, %c0_i32_0 : i32, i32
  }
  func.func @transform_5(%arg0: i32, %arg1: i32) -> (i32, i32) {
    %c0_i32 = arith.constant 0 : i32
    %c0_i32_0 = arith.constant 0 : i32
    %c0_i32_1 = arith.constant 0 : i32
    return %c0_i32, %c0_i32_0 : i32, i32
  }
  func.func @transform_6(%arg0: i32, %arg1: i32) -> (i32, i32) {
    %c0_i32 = arith.constant 0 : i32
    %c0_i32_0 = arith.constant 0 : i32
    %c0_i32_1 = arith.constant 0 : i32
    return %c0_i32, %c0_i32_0 : i32, i32
  }
  func.func @transform_7(%arg0: i32, %arg1: i32) -> (i32, i32) {
    %c0_i32 = arith.constant 0 : i32
    %c0_i32_0 = arith.constant 0 : i32
    %c0_i32_1 = arith.constant 0 : i32
    return %c0_i32, %c0_i32_0 : i32, i32
  }
  func.func @transform_8(%arg0: i32, %arg1: i32) -> (i32, i32) {
    %c0_i32 = arith.constant 0 : i32
    %c0_i32_0 = arith.constant 0 : i32
    %c0_i32_1 = arith.constant 0 : i32
    return %c0_i32, %c0_i32_0 : i32, i32
  }
  func.func @transform_9(%arg0: i32, %arg1: i32) -> (i32, i32) {
    %c0_i32 = arith.constant 0 : i32
    %c0_i32_0 = arith.constant 0 : i32
    %c0_i32_1 = arith.constant 0 : i32
    return %c0_i32, %c0_i32_0 : i32, i32
  }
  func.func @transform_10(%arg0: i32, %arg1: i32) -> (i32, i32, i32, i32) {
    %c0_i32 = arith.constant 0 : i32
    %c0_i32_0 = arith.constant 0 : i32
    %c0_i32_1 = arith.constant 0 : i32
    return %c0_i32, %arg0, %c0_i32_0, %arg1 : i32, i32, i32, i32
  }
}

</mosaic_0001>

<bundles_post_ra>
// kernel: mossformer_masknet.3
= control target key start
LH: loop header
LB: loop body
LE: loop exit
PB: predicated region body
PF: predicated region fallthrough
CT: control target
= control target key end

     0   :  { %s2177_s27 = smov 0   ;;  %s2179_s28 = smov 0   ;;  %s2587_s0 = inlined_call_operand.vmem [shape: f32[2,512,8], index: 0, kind: input, shape index: {}]   ;;  %s2588_s1 = inlined_call_operand.vmem [shape: f32[2,1,8], index: 1, kind: input, shape index: {}]   ;;  %s2589_s2 = inlined_call_operand.vmem [shape: f32[2,1,8], index: 2, kind: input, shape index: {}]   ;;  %s2590_s3 = inlined_call_operand.vmem [shape: bf16[512,128], index: 3, kind: input, shape index: {}]   ;;  %s2591_s4 = inlined_call_operand.vmem [shape: bf16[8,128], index: 4, kind: input, shape index: {}]   ;;  %s2592_s5 = inlined_call_operand.vmem [shape: bf16[128,256], index: 5, kind: input, shape index: {}]   ;;  %s2593_s6 = inlined_call_operand.vmem [shape: bf16[2,512,128], index: 6, kind: output, shape index: {0}]   ;;  %s2594_s7 = inlined_call_operand.vmem [shape: bf16[2,512,128], index: 7, kind: output, shape index: {1}]   ;;  %s2595_s8 = inlined_call_operand.vmem [shape: bf16[2,512,128], index: 8, kind: output, shape index: {2}]  }
   0x1   :  { %s2181_s29 = smov 0   ;;  %s2183_s30 = smov 0  }
   0x2   :  { %s2185_s9 = smov 0  }
   0x3 LB: > { %s28_s10 = sadd.s32 1, %s2122_s29  ;;  %s31_s11 = sadd.s32 1, %s2126_s30  ;;  %s2130_s9 = sphi %s2185_s9, %s19_s9   ;;  %s2126_s30 = sphi %s2183_s30, %s2599_s30   ;;  %s2122_s29 = sphi %s2181_s29, %s2598_s29   ;;  %s2118_s28 = sphi %s2179_s28, %s2597_s28   ;;  %s2114_s27 = sphi %s2177_s27, %s2596_s27  }
   0x4   : > { %p29_p0 = scmp.ge.s32.totalorder %s28_s10, 2  ;;  %p1556_p1 = scmp.ge.s32.totalorder %s2130_s9, 1 }
   0x5   : > { %p319_p2 = scmp.lt.s32.totalorder %s2130_s9, 5 }
   0x6   : > { %s2601_s10 = smov (%p29_p0, %s28_s10), 0  ;;  %s2603_s11 = smov (!%p29_p0, %s31_s11), %s2126_s30 }
   0x7   : > { %p320_p3 = pnand %p1556_p1, %p319_p2  ;;  %p33_p4 = scmp.ge.s32.totalorder %s2603_s11, 2 }
   0x8   : > { %s1557_s14 = sshll.u32 (!%p320_p3), %s2118_s28, 5  ;;  %p391_p5 = scmp.lt.s32.totalorder (!%p320_p3), %s2114_s27, 1 }
   0x9   : > { %s2605_s11 = smov (%p33_p4, %s2603_s11), 0  ;;  %323 = sbr.rel (%p320_p3) target bundleno = 615 (0x267), region = 44 }
   0xa   : > { %p393_p6 = scmp.lt.s32.totalorder (!%p320_p3), %s1557_s14, 63 }
   0xe   : > { %v563_v0 = vld [vmem:[%s2591_s4] sm:$0xf]  ;;  %vm677_vm0 = vcmask 1043456   ;;  %s2607_s27 = smov (!%p391_p5, %s2114_s27), 1  ;;  %s2609_s14 = smov (!%p393_p6, %s1557_s14), 63  ;;  %vm628_vm1 = vcmask 64512  }
   0xf   : > { %v679_v1 = vsel %vm677_vm0, %v563_v0, 0  ;;  %s1558_s15 = sshll.u32 %s2607_s27, 6  ;;  %s402_s18 = scalar_lea.vmem %s2588_s1, %s2607_s27  ;;  %v1645_v39 = vld [vmem:[%s2592_s5 + $0x70] sm:$0xf]  ;;  %v1668_v40 = vld [vmem:[%s2592_s5 + $0x74] sm:$0xf0] }
  0x10   : > { %688 = vmatpush.bf16.msra.mxu0 %v679_v1  ;;  %2033 = vmatpush.bf16.msra.mxu3 %v679_v1  ;;  %s2216_s19 = sadd.s32 %s1558_s15, %s2609_s14  ;;  %s405_s22 = scalar_lea.vmem %s2589_s2, %s2607_s27  ;;  %v2221_v2 = vld [vmem:[%s402_s18] ss:$0 sm:$0xff]  ;;  %v1667_v41 = vld [vmem:[%s2592_s5 + $0x74] sm:$0xf]  ;;  %v1646_v44 = vor.u32 %v1668_v40, %v1645_v39  ;;  %v1647_v45 = vld [vmem:[%s2592_s5 + $0x78] sm:$0xf0] }
  0x11   : > { %s1559_s23 = sshll.u32 %s2216_s19, 3  ;;  %v2229_v3 = vld [vmem:[%s405_s22] ss:$0 sm:$0xff]  ;;  %v2280_v46 = vor.u32 %v1667_v41, %v1647_v45  ;;  %v1666_v55 = vld [vmem:[%s2592_s5 + $0x64] sm:$0xf0]  ;;  %s1561_s20 = sshll.u32 %s2609_s14, 2 }
  0x12   : > { %s2227_s26 = scalar_lea.vmem %s2587_s0, %s1559_s23  ;;  %1026 = vmatpush.bf16.msra.mxu1 %v1646_v44  ;;  %v1637_v54 = vld [vmem:[%s2592_s5 + $0x60] sm:$0xf]  ;;  %v1665_v56 = vld [vmem:[%s2592_s5 + $0x64] sm:$0xf]  ;;  %v1639_v58 = vld [vmem:[%s2592_s5 + $0x68] sm:$0xf0]  ;;  %s2415_s23 = scalar_lea.vmem %s2590_s3, %s1561_s20 }
  0x13   : > { %v443_v4 = vld [vmem:[%s2227_s26] sm:$0xff]  ;;  %v444_v5 = vld [vmem:[%s2227_s26 + $0x8] sm:$0xff]  ;;  %v445_v11 = vld [vmem:[%s2227_s26 + $0x10] sm:$0xff]  ;;  %1115 = vmatpush.bf16.msra.mxu2 %v2280_v46  ;;  %v1638_v57 = vor.u32 %v1666_v55, %v1637_v54  ;;  %v2308_v61 = vor.u32 %v1665_v56, %v1639_v58  ;;  %s2424_s14 = sshll.u32 %s2216_s19, 2 }
  0x14   : > { %v479_v6 = vmul.f32 %v2221_v2, %v443_v4  ;;  %v480_v7 = vmul.f32 %v2221_v2, %v444_v5  ;;  %v446_v12 = vld [vmem:[%s2227_s26 + $0x18] sm:$0xff]  ;;  %v481_v13 = vmul.f32 %v2221_v2, %v445_v11  ;;  %v447_v18 = vld [vmem:[%s2227_s26 + $0x20] sm:$0xff]  ;;  %v448_v19 = vld [vmem:[%s2227_s26 + $0x28] sm:$0xff]  ;;  %2034 = vmatpush.bf16.msrb.mxu3 %v1646_v44  ;;  %s2432_s27 = scalar_lea.vmem %s2593_s6, %s2424_s14  ;;  %s2509_s28 = scalar_lea.vmem %s2594_s7, %s2424_s14 }
  0x15   : > { %v482_v14 = vmul.f32 %v2221_v2, %v446_v12  ;;  %v483_v20 = vmul.f32 %v2221_v2, %v447_v18  ;;  %v484_v21 = vmul.f32 %v2221_v2, %v448_v19  ;;  %v449_v25 = vld [vmem:[%s2227_s26 + $0x30] sm:$0xff]  ;;  %v450_v26 = vld [vmem:[%s2227_s26 + $0x38] sm:$0xff]  ;;  %v451_v32 = vld [vmem:[%s2227_s26 + $0x40] sm:$0xff]  ;;  %s2516_s15 = scalar_lea.vmem %s2595_s8, %s2424_s14 }
  0x16   : > { %v515_v8 = vadd.f32 %v2229_v3, %v479_v6  ;;  %v516_v9 = vadd.f32 %v2229_v3, %v480_v7  ;;  %v517_v15 = vadd.f32 %v2229_v3, %v481_v13  ;;  %v485_v27 = vmul.f32 %v2221_v2, %v449_v25  ;;  %v452_v33 = vld [vmem:[%s2227_s26 + $0x48] sm:$0xff]  ;;  %v453_v42 = vld [vmem:[%s2227_s26 + $0x50] sm:$0xff]  ;;  %v454_v43 = vld [vmem:[%s2227_s26 + $0x58] sm:$0xff]  ;;  %1027 = vmatpush.bf16.msra.mxu1 %v1638_v57 }
  0x17   : > { %v518_v16 = vadd.f32 %v2229_v3, %v482_v14  ;;  %v519_v22 = vadd.f32 %v2229_v3, %v483_v20  ;;  %v520_v23 = vadd.f32 %v2229_v3, %v484_v21  ;;  %v486_v28 = vmul.f32 %v2221_v2, %v450_v26  ;;  %v455_v52 = vld [vmem:[%s2227_s26 + $0x60] sm:$0xff]  ;;  %v456_v53 = vld [vmem:[%s2227_s26 + $0x68] sm:$0xff]  ;;  %v1629_v59 = vld [vmem:[%s2592_s5 + $0x50] sm:$0xf]  ;;  %1116 = vmatpush.bf16.msra.mxu2 %v2308_v61 }
  0x18   : > { %v547_v10 = vpack.c.bf16 %v516_v9, %v515_v8  ;;  %v521_v29 = vadd.f32 %v2229_v3, %v485_v27  ;;  %v487_v34 = vmul.f32 %v2221_v2, %v451_v32  ;;  %v488_v35 = vmul.f32 %v2221_v2, %v452_v33  ;;  %v1664_v60 = vld [vmem:[%s2592_s5 + $0x54] sm:$0xf0]  ;;  %v1663_v62 = vld [vmem:[%s2592_s5 + $0x54] sm:$0xf]  ;;  %v1631_v63 = vld [vmem:[%s2592_s5 + $0x58] sm:$0xf0]  ;;  %2035 = vmatpush.bf16.msrb.mxu3 %v1638_v57 }
  0x19   : > { %v548_v17 = vpack.c.bf16 %v518_v16, %v517_v15  ;;  %v549_v24 = vpack.c.bf16 %v520_v23, %v519_v22  ;;  %v522_v30 = vadd.f32 %v2229_v3, %v486_v28  ;;  %v489_v47 = vmul.f32 %v2221_v2, %v453_v42  ;;  %v1621_v6 = vld [vmem:[%s2592_s5 + $0x40] sm:$0xf]  ;;  %v1662_v7 = vld [vmem:[%s2592_s5 + $0x44] sm:$0xf0]  ;;  %v1661_v8 = vld [vmem:[%s2592_s5 + $0x44] sm:$0xf] }
  0x1a   : > { %1571 = vmatmul.msk.bf16.vlgmr.msra.gmra.mxu0 %vm628_vm1, %v547_v10  ;;  %v523_v36 = vadd.f32 %v2229_v3, %v487_v34  ;;  %v524_v37 = vadd.f32 %v2229_v3, %v488_v35  ;;  %v490_v48 = vmul.f32 %v2221_v2, %v454_v43  ;;  %v1630_v0 = vor.u32 %v1664_v60, %v1629_v59  ;;  %v1623_v9 = vld [vmem:[%s2592_s5 + $0x48] sm:$0xf0]  ;;  %v1613_v15 = vld [vmem:[%s2592_s5 + $0x30] sm:$0xf]  ;;  %v1660_v16 = vld [vmem:[%s2592_s5 + $0x34] sm:$0xf0] }
  0x1b   : > { %v550_v31 = vpack.c.bf16 %v522_v30, %v521_v29  ;;  %v525_v49 = vadd.f32 %v2229_v3, %v489_v47  ;;  %v491_v1 = vmul.f32 %v2221_v2, %v455_v52  ;;  %v492_v4 = vmul.f32 %v2221_v2, %v456_v53  ;;  %v1615_v19 = vld [vmem:[%s2592_s5 + $0x38] sm:$0xf0]  ;;  %v1605_v21 = vld [vmem:[%s2592_s5 + $0x20] sm:$0xf]  ;;  %v1658_v22 = vld [vmem:[%s2592_s5 + $0x24] sm:$0xf0] }
  0x1c   : > { %v551_v38 = vpack.c.bf16 %v524_v37, %v523_v36  ;;  %v526_v50 = vadd.f32 %v2229_v3, %v490_v48  ;;  %v2319_v5 = vor.u32 %v1663_v62, %v1631_v63  ;;  %1028 = vmatpush.bf16.msra.mxu1 %v1630_v0  ;;  %v1622_v10 = vor.u32 %v1662_v7, %v1621_v6  ;;  %v1657_v23 = vld [vmem:[%s2592_s5 + $0x24] sm:$0xf]  ;;  %v458_v25 = vld [vmem:[%s2227_s26 + $0x78] sm:$0xff]  ;;  %v1607_v27 = vld [vmem:[%s2592_s5 + $0x28] sm:$0xf0] }
  0x1d   : > { %2036 = vmatpush.bf16.msrb.mxu3 %v1630_v0  ;;  %v527_v11 = vadd.f32 %v2229_v3, %v491_v1  ;;  %v528_v12 = vadd.f32 %v2229_v3, %v492_v4  ;;  %v2336_v13 = vor.u32 %v1661_v8, %v1623_v9  ;;  %v1614_v18 = vor.u32 %v1660_v16, %v1613_v15  ;;  %v1656_v32 = vld [vmem:[%s2592_s5 + $0x14] sm:$0xf0]  ;;  %v1655_v33 = vld [vmem:[%s2592_s5 + $0x14] sm:$0xf]  ;;  %v1599_v35 = vld [vmem:[%s2592_s5 + $0x18] sm:$0xf0] }
  0x1e   : > { %v552_v51 = vpack.c.bf16 %v526_v50, %v525_v49  ;;  %1117 = vmatpush.bf16.msra.mxu2 %v2319_v5  ;;  %v1606_v26 = vor.u32 %v1658_v22, %v1605_v21  ;;  %v2369_v28 = vor.u32 %v1657_v23, %v1607_v27  ;;  %v494_v30 = vmul.f32 %v2221_v2, %v458_v25  ;;  %v1589_v39 = vld [vmem:[%s2592_s5] sm:$0xf]  ;;  %v1654_v40 = vld [vmem:[%s2592_s5 + $0x4] sm:$0xf0]  ;;  %v1653_v41 = vld [vmem:[%s2592_s5 + $0x4] sm:$0xf] }
  0x1f   : > { %v553_v14 = vpack.c.bf16 %v528_v12, %v527_v11  ;;  %v2386_v36 = vor.u32 %v1655_v33, %v1599_v35  ;;  %v1590_v42 = vor.u32 %v1654_v40, %v1589_v39  ;;  %v1591_v43 = vld [vmem:[%s2592_s5 + $0x8] sm:$0xf0]  ;;  %v459_v47 = vld [vmem:[%s2227_s26 + $0x80] sm:$0xff]  ;;  %v461_v57 = vld [vmem:[%s2227_s26 + $0x90] sm:$0xff] }
  0x20   : > { %1029 = vmatpush.bf16.msra.mxu1 %v1622_v10  ;;  %v2403_v44 = vor.u32 %v1653_v41, %v1591_v43  ;;  %v460_v48 = vld [vmem:[%s2227_s26 + $0x88] sm:$0xff]  ;;  %v495_v49 = vmul.f32 %v2221_v2, %v459_v47  ;;  %v1670_v53 = vld [vmem:[%s2415_s23] sm:$0xff]   ;;  %v462_v58 = vld [vmem:[%s2227_s26 + $0x98] sm:$0xff]  ;;  %v497_v62 = vmul.f32 %v2221_v2, %v461_v57 }
  0x21   : > { %2037 = vmatpush.bf16.msrb.mxu3 %v1622_v10  ;;  %v496_v50 = vmul.f32 %v2221_v2, %v460_v48  ;;  %v1671_v56 = vunpack.c.l.bf16 %v1670_v53  ;;  %v1672_v60 = vunpack.c.h.bf16 %v1670_v53  ;;  %v498_v63 = vmul.f32 %v2221_v2, %v462_v58  ;;  %v1973_v12 = vld [vmem:[%s2415_s23 + $0x8] sm:$0xff]   ;;  %v1974_v35 = vld [vmem:[%s2415_s23 + $0x10] sm:$0xff]  }
  0x22   : > { %1118 = vmatpush.bf16.msra.mxu2 %v2336_v13  ;;  %v533_v8 = vadd.f32 %v2229_v3, %v497_v62  ;;  %v1676_v22 = vunpack.c.h.bf16 %v1973_v12  ;;  %v1680_v53 = vunpack.c.h.bf16 %v1974_v35 }
  0x23   : > { %v532_v52 = vadd.f32 %v2229_v3, %v496_v50  ;;  %v534_v9 = vadd.f32 %v2229_v3, %v498_v63  ;;  %v466_v50 = vld [vmem:[%s2227_s26 + $0xb8] sm:$0xff] }
  0x24   : > { %1030 = vmatpush.bf16.msra.mxu1 %v1614_v18 }
  0x25   : > { %2038 = vmatpush.bf16.msrb.mxu3 %v1614_v18  ;;  %v556_v15 = vpack.c.bf16 %v534_v9, %v533_v8  ;;  %v463_v18 = vld [vmem:[%s2227_s26 + $0xa0] sm:$0xff] }
  0x26   : > { %v499_v23 = vmul.f32 %v2221_v2, %v463_v18 }
  0x28   : > { %1031 = vmatpush.bf16.msra.mxu1 %v1606_v26 }
  0x29   : > { %2039 = vmatpush.bf16.msrb.mxu3 %v1606_v26 }
  0x2a   : > { %1572 = vmatmul.msk.bf16.gmra.mxu0 %vm628_vm1, %v548_v17  ;;  %v1659_v17 = vld [vmem:[%s2592_s5 + $0x34] sm:$0xf] }
  0x2b   : > { %v2351_v20 = vor.u32 %v1659_v17, %v1615_v19  ;;  %v1675_v17 = vunpack.c.l.bf16 %v1973_v12  ;;  %v464_v19 = vld [vmem:[%s2227_s26 + $0xa8] sm:$0xff] }
  0x2d   : > { %1119 = vmatpush.bf16.msra.mxu2 %v2351_v20 }
  0x31   : > { %1120 = vmatpush.bf16.msra.mxu2 %v2369_v28 }
  0x35   : > { %1121 = vmatpush.bf16.msra.mxu2 %v2386_v36 }
  0x39   : > { %1122 = vmatpush.bf16.msra.mxu2 %v2403_v44 }
  0x3a   : > { %1573 = vmatmul.msk.bf16.gmra.mxu0 %vm628_vm1, %v549_v24  ;;  %v457_v24 = vld [vmem:[%s2227_s26 + $0x70] sm:$0xff] }
  0x3b   : > { %v493_v29 = vmul.f32 %v2221_v2, %v457_v24  ;;  %v500_v24 = vmul.f32 %v2221_v2, %v464_v19 }
  0x3d   : > { %v529_v37 = vadd.f32 %v2229_v3, %v493_v29 }
  0x4a   : > { %1574 = vmatmul.msk.bf16.gmra.mxu0 %vm628_vm1, %v550_v31  ;;  %v1597_v31 = vld [vmem:[%s2592_s5 + $0x10] sm:$0xf] }
  0x4b   : > { %v1598_v34 = vor.u32 %v1656_v32, %v1597_v31  ;;  %v535_v31 = vadd.f32 %v2229_v3, %v499_v23  ;;  %v536_v32 = vadd.f32 %v2229_v3, %v500_v24 }
  0x4d   : > { %1032 = vmatpush.bf16.msra.mxu1 %v1598_v34  ;;  %2040 = vmatpush.bf16.msrb.mxu3 %v1598_v34  ;;  %v557_v40 = vpack.c.bf16 %v536_v32, %v535_v31  ;;  %v1976_v31 = vld [vmem:[%s2415_s23 + $0x20] sm:$0xff]   ;;  %v473_v32 = vld [vmem:[%s2227_s26 + $0xf0] sm:$0xff] }
  0x51   : > { %1033 = vmatpush.bf16.msra.mxu1 %v1590_v42  ;;  %2041 = vmatpush.bf16.msrb.mxu3 %v1590_v42 }
  0x5a   : > { %1575 = vmatmul.msk.bf16.gmra.mxu0 %vm628_vm1, %v551_v38  ;;  %v530_v38 = vadd.f32 %v2229_v3, %v494_v30 }
  0x5c   : > { %v554_v45 = vpack.c.bf16 %v530_v38, %v529_v37  ;;  %v469_v37 = vld [vmem:[%s2227_s26 + $0xd0] sm:$0xff]  ;;  %v470_v38 = vld [vmem:[%s2227_s26 + $0xd8] sm:$0xff] }
  0x5d   : > { %v505_v41 = vmul.f32 %v2221_v2, %v469_v37  ;;  %v506_v43 = vmul.f32 %v2221_v2, %v470_v38 }
  0x5f   : > { %v541_v47 = vadd.f32 %v2229_v3, %v505_v41  ;;  %v542_v48 = vadd.f32 %v2229_v3, %v506_v43  ;;  %v1688_v43 = vunpack.c.h.bf16 %v1976_v31 }
  0x6a   : > { %1576 = vmatmul.msk.bf16.gmra.mxu0 %vm628_vm1, %v552_v51  ;;  %v531_v51 = vadd.f32 %v2229_v3, %v495_v49  ;;  %v465_v49 = vld [vmem:[%s2227_s26 + $0xb0] sm:$0xff] }
  0x6c   : > { %v555_v54 = vpack.c.bf16 %v532_v52, %v531_v51  ;;  %v560_v51 = vpack.c.bf16 %v542_v48, %v541_v47 }
  0x6e   : > { %1584 = vmatmul.msk.bf16.vlgmr.msra.gmra.mxu3 %vm628_vm1, %v560_v51  ;;  %v1977_v51 = vld [vmem:[%s2415_s23 + $0x28] sm:$0xff]  }
  0x6f   : > { %2042 = vmatpush.bf16.msra.mxu3 %v2280_v46 }
  0x73   : > { %2043 = vmatpush.bf16.msra.mxu3 %v2308_v61 }
  0x77   : > { %2044 = vmatpush.bf16.msra.mxu3 %v2319_v5 }
  0x7a   : > { %1577 = vmatmul.msk.bf16.gmra.mxu0 %vm628_vm1, %v553_v14 }
  0x7b   : > { %2045 = vmatpush.bf16.msra.mxu3 %v2336_v13 }
  0x7f   : > { %2046 = vmatpush.bf16.msra.mxu3 %v2351_v20  ;;  %v509_v20 = vmul.f32 %v2221_v2, %v473_v32 }
  0x83   : > { %2047 = vmatpush.bf16.msra.mxu3 %v2369_v28  ;;  %v545_v28 = vadd.f32 %v2229_v3, %v509_v20 }
  0x87   : > { %2048 = vmatpush.bf16.msra.mxu3 %v2386_v36 }
  0x8a   : > { %1578 = vmatmul.msk.bf16.gmra.mxu0 %vm628_vm1, %v554_v45  ;;  %v1679_v45 = vunpack.c.l.bf16 %v1974_v35 }
  0x8b   : > { %2049 = vmatpush.bf16.msra.mxu3 %v2403_v44 }
  0x97   : > { %v690_v55 = vpop.f32.mrf.mxu0 }
  0x98   : > { %v691_v59 = vadd.f32 %v1671_v56, %v690_v55  ;;  %v502_v55 = vmul.f32 %v2221_v2, %v466_v50 }
  0x9a   : > { %1579 = vmatmul.msk.bf16.gmra.mxu0 %vm628_vm1, %v555_v54  ;;  %v770_v1 = vpack.c.bf16 %v691_v59, %v691_v59  ;;  %v501_v54 = vmul.f32 %v2221_v2, %v465_v49  ;;  %v538_v63 = vadd.f32 %v2229_v3, %v502_v55 }
  0x9c   : > { %v882_v10 = vunpack.c.l.b16 %v770_v1  ;;  %v537_v62 = vadd.f32 %v2229_v3, %v501_v54  ;;  %v1692_v54 = vunpack.c.h.bf16 %v1977_v51 }
  0x9e   : > { %v558_v8 = vpack.c.bf16 %v538_v63, %v537_v62  ;;  %v1978_v63 = vld [vmem:[%s2415_s23 + $0x30] sm:$0xff]  }
  0x9f   : > { %v692_v0 = vpop.f32.mrf.mxu0 }
  0xa0   : > { %v693_v4 = vadd.f32 %v1672_v60, %v692_v0 }
  0xa2   : > { %v771_v6 = vpack.c.bf16 %v693_v4, %v693_v4  ;;  %v1736_v7 = vpack.c.bf16 %v693_v4, %v691_v59  ;;  %v1975_v4 = vld [vmem:[%s2415_s23 + $0x18] sm:$0xff]  }
  0xa3   : > { %v1683_v12 = vunpack.c.l.bf16 %v1975_v4  ;;  %v1684_v19 = vunpack.c.h.bf16 %v1975_v4  ;;  %v1695_v4 = vunpack.c.l.bf16 %v1978_v63 }
  0xa4   : > { %1737 = vst [vmem:[%s2432_s27] sm:$0xff] %v1736_v7   ;;  %v883_v11 = vunpack.c.l.b16 %v771_v6  ;;  %v471_v6 = vld [vmem:[%s2227_s26 + $0xe0] sm:$0xff]  ;;  %v472_v7 = vld [vmem:[%s2227_s26 + $0xe8] sm:$0xff] }
  0xa5   : > { %v507_v9 = vmul.f32 %v2221_v2, %v471_v6 }
  0xa6   : > { %v914_v14 = vpack.c.b16 %v883_v11, %v882_v10  ;;  %v508_v10 = vmul.f32 %v2221_v2, %v472_v7  ;;  %v1696_v7 = vunpack.c.h.bf16 %v1978_v63 }
  0xa7   : > { %v695_v16 = vpop.f32.mrf.mxu0  ;;  %v543_v61 = vadd.f32 %v2229_v3, %v507_v9 }
  0xa8   : > { %1034 = vmatmul.bf16.vlgmr.msra.gmra.mxu1 %v914_v14  ;;  %1123 = vmatmul.bf16.vlgmr.msra.gmra.mxu2 %v914_v14  ;;  %v696_v21 = vadd.f32 %v1675_v17, %v695_v16  ;;  %v544_v14 = vadd.f32 %v2229_v3, %v508_v10  ;;  %v467_v16 = vld [vmem:[%s2227_s26 + $0xc0] sm:$0xff]  ;;  %v468_v17 = vld [vmem:[%s2227_s26 + $0xc8] sm:$0xff] }
  0xa9   : > { %v503_v5 = vmul.f32 %v2221_v2, %v467_v16 }
  0xaa   : > { %1580 = vmatmul.msk.bf16.gmra.mxu0 %vm628_vm1, %v556_v15  ;;  %v772_v26 = vpack.c.bf16 %v696_v21, %v696_v21  ;;  %v561_v15 = vpack.c.bf16 %v544_v14, %v543_v61  ;;  %v1979_v14 = vld [vmem:[%s2415_s23 + $0x38] sm:$0xff]  }
  0xac   : > { %v884_v33 = vunpack.c.l.b16 %v772_v26  ;;  %1585 = vmatmul.msk.bf16.gmra.mxu3 %vm628_vm1, %v561_v15  ;;  %v539_v26 = vadd.f32 %v2229_v3, %v503_v5 }
  0xaf   : > { %v697_v25 = vpop.f32.mrf.mxu0 }
  0xb0   : > { %v698_v27 = vadd.f32 %v1676_v22, %v697_v25 }
  0xb2   : > { %v773_v29 = vpack.c.bf16 %v698_v27, %v698_v27  ;;  %v1741_v30 = vpack.c.bf16 %v698_v27, %v696_v21  ;;  %v504_v21 = vmul.f32 %v2221_v2, %v468_v17  ;;  %v1699_v17 = vunpack.c.l.bf16 %v1979_v14 }
  0xb4   : > { %1988 = vst [vmem:[%s2432_s27 + $0x8] sm:$0xff] %v1741_v30   ;;  %v885_v34 = vunpack.c.l.b16 %v773_v29  ;;  %v540_v27 = vadd.f32 %v2229_v3, %v504_v21 }
  0xb6   : > { %v915_v39 = vpack.c.b16 %v885_v34, %v884_v33  ;;  %v474_v33 = vld [vmem:[%s2227_s26 + $0xf8] sm:$0xff]  ;;  %v559_v35 = vpack.c.bf16 %v540_v27, %v539_v26  ;;  %v1980_v26 = vld [vmem:[%s2415_s23 + $0x40] sm:$0xff]  }
  0xb7   : > { %v700_v42 = vpop.f32.mrf.mxu0  ;;  %v510_v37 = vmul.f32 %v2221_v2, %v474_v33  ;;  %v1704_v32 = vunpack.c.h.bf16 %v1980_v26 }
  0xb8   : > { %1039 = vmatmul.bf16.gmra.mxu1 %v915_v39  ;;  %1128 = vmatmul.bf16.gmra.mxu2 %v915_v39  ;;  %v701_v52 = vadd.f32 %v1679_v45, %v700_v42  ;;  %v1687_v39 = vunpack.c.l.bf16 %v1976_v31 }
  0xba   : > { %1581 = vmatmul.msk.bf16.gmra.mxu0 %vm628_vm1, %v557_v40  ;;  %v774_v57 = vpack.c.bf16 %v701_v52, %v701_v52  ;;  %v546_v40 = vadd.f32 %v2229_v3, %v510_v37 }
  0xbc   : > { %v886_v0 = vunpack.c.l.b16 %v774_v57  ;;  %v562_v41 = vpack.c.bf16 %v546_v40, %v545_v28  ;;  %v1981_v40 = vld [vmem:[%s2415_s23 + $0x48] sm:$0xff]  }
  0xbe   : > { %1586 = vmatmul.msk.bf16.gmra.mxu3 %vm628_vm1, %v562_v41 }
  0xbf   : > { %v702_v56 = vpop.f32.mrf.mxu0 }
  0xc0   : > { %v703_v58 = vadd.f32 %v1680_v53, %v702_v56  ;;  %v1691_v53 = vunpack.c.l.bf16 %v1977_v51 }
  0xc2   : > { %v775_v59 = vpack.c.bf16 %v703_v58, %v703_v58  ;;  %v1746_v60 = vpack.c.bf16 %v703_v58, %v701_v52 }
  0xc4   : > { %1989 = vst [vmem:[%s2432_s27 + $0x10] sm:$0xff] %v1746_v60   ;;  %v887_v1 = vunpack.c.l.b16 %v775_v59 }
  0xc6   : > { %v916_v46 = vpack.c.b16 %v887_v1, %v886_v0 }
  0xc7   : > { %v705_v11 = vpop.f32.mrf.mxu0 }
  0xc8   : > { %1044 = vmatmul.bf16.gmra.mxu1 %v916_v46  ;;  %1133 = vmatmul.bf16.gmra.mxu2 %v916_v46  ;;  %v706_v18 = vadd.f32 %v1683_v12, %v705_v11 }
  0xca   : > { %1582 = vmatmul.msk.bf16.gmra.mxu0 %vm628_vm1, %v558_v8  ;;  %v776_v23 = vpack.c.bf16 %v706_v18, %v706_v18 }
  0xcc   : > { %v888_v29 = vunpack.c.l.b16 %v776_v23 }
  0xcf   : > { %v707_v22 = vpop.f32.mrf.mxu0 }
  0xd0   : > { %v708_v24 = vadd.f32 %v1684_v19, %v707_v22  ;;  %v1700_v19 = vunpack.c.h.bf16 %v1979_v14 }
  0xd2   : > { %v777_v13 = vpack.c.bf16 %v708_v24, %v708_v24  ;;  %v1751_v25 = vpack.c.bf16 %v708_v24, %v706_v18 }
  0xd4   : > { %1990 = vst [vmem:[%s2432_s27 + $0x18] sm:$0xff] %v1751_v25   ;;  %v889_v30 = vunpack.c.l.b16 %v777_v13 }
  0xd6   : > { %v917_v34 = vpack.c.b16 %v889_v30, %v888_v29  ;;  %v1703_v30 = vunpack.c.l.bf16 %v1980_v26 }
  0xd7   : > { %v710_v38 = vpop.f32.mrf.mxu0 }
  0xd8   : > { %1049 = vmatmul.bf16.gmra.mxu1 %v917_v34  ;;  %1138 = vmatmul.bf16.gmra.mxu2 %v917_v34  ;;  %v711_v42 = vadd.f32 %v1687_v39, %v710_v38 }
  0xda   : > { %1583 = vmatmul.msk.bf16.gmra.mxu0 %vm628_vm1, %v559_v35  ;;  %v778_v36 = vpack.c.bf16 %v711_v42, %v711_v42 }
  0xdc   : > { %v890_v49 = vunpack.c.l.b16 %v778_v36 }
  0xdf   : > { %v712_v2 = vpop.f32.mrf.mxu0 }
  0xe0   : > { %v713_v45 = vadd.f32 %v1688_v43, %v712_v2  ;;  %v1707_v43 = vunpack.c.l.bf16 %v1981_v40 }
  0xe2   : > { %v779_v47 = vpack.c.bf16 %v713_v45, %v713_v45  ;;  %v1756_v48 = vpack.c.bf16 %v713_v45, %v711_v42  ;;  %v1708_v45 = vunpack.c.h.bf16 %v1981_v40 }
  0xe4   : > { %1991 = vst [vmem:[%s2432_s27 + $0x20] sm:$0xff] %v1756_v48   ;;  %v891_v50 = vunpack.c.l.b16 %v779_v47 }
  0xe6   : > { %v918_v3 = vpack.c.b16 %v891_v50, %v890_v49 }
  0xe7   : > { %v715_v52 = vpop.f32.mrf.mxu0 }
  0xe8   : > { %1054 = vmatmul.bf16.gmra.mxu1 %v918_v3  ;;  %1143 = vmatmul.bf16.gmra.mxu2 %v918_v3  ;;  %v716_v44 = vadd.f32 %v1691_v53, %v715_v52 }
  0xea   : > { %v780_v56 = vpack.c.bf16 %v716_v44, %v716_v44 }
  0xec   : > { %v892_v60 = vunpack.c.l.b16 %v780_v56 }
  0xef   : > { %v717_v55 = vpop.f32.mrf.mxu0 }
  0xf0   : > { %v718_v57 = vadd.f32 %v1692_v54, %v717_v55 }
  0xf2   : > { %v781_v58 = vpack.c.bf16 %v718_v57, %v718_v57  ;;  %v1761_v59 = vpack.c.bf16 %v718_v57, %v716_v44  ;;  %v1982_v57 = vld [vmem:[%s2415_s23 + $0x50] sm:$0xff]  }
  0xf4   : > { %1992 = vst [vmem:[%s2432_s27 + $0x28] sm:$0xff] %v1761_v59   ;;  %v893_v62 = vunpack.c.l.b16 %v781_v58 }
  0xf6   : > { %v919_v0 = vpack.c.b16 %v893_v62, %v892_v60  ;;  %v1711_v60 = vunpack.c.l.bf16 %v1982_v57 }
  0xf7   : > { %v720_v1 = vpop.f32.mrf.mxu0 }
  0xf8   : > { %1059 = vmatmul.bf16.gmra.mxu1 %v919_v0  ;;  %1148 = vmatmul.bf16.gmra.mxu2 %v919_v0  ;;  %v721_v6 = vadd.f32 %v1695_v4, %v720_v1  ;;  %v1712_v0 = vunpack.c.h.bf16 %v1982_v57 }
  0xfa   : > { %v782_v8 = vpack.c.bf16 %v721_v6, %v721_v6 }
  0xfc   : > { %v894_v12 = vunpack.c.l.b16 %v782_v8  ;;  %v755_v8 = vpop.f32.mrf.mxu3 }
  0xff   : > { %v722_v46 = vpop.f32.mrf.mxu0 }
 0x100   : > { %v723_v9 = vadd.f32 %v1696_v7, %v722_v46 }
 0x102   : > { %v783_v10 = vpack.c.bf16 %v723_v9, %v723_v9  ;;  %v1766_v11 = vpack.c.bf16 %v723_v9, %v721_v6 }
 0x104   : > { %1993 = vst [vmem:[%s2432_s27 + $0x30] sm:$0xff] %v1766_v11   ;;  %v895_v61 = vunpack.c.l.b16 %v783_v10 }
 0x106   : > { %v920_v15 = vpack.c.b16 %v895_v61, %v894_v12 }
 0x107   : > { %v725_v16 = vpop.f32.mrf.mxu0 }
 0x108   : > { %1064 = vmatmul.bf16.gmra.mxu1 %v920_v15  ;;  %1153 = vmatmul.bf16.gmra.mxu2 %v920_v15  ;;  %v726_v18 = vadd.f32 %v1699_v17, %v725_v16  ;;  %v1985_v15 = vld [vmem:[%s2415_s23 + $0x68] sm:$0xff]   ;;  %v1983_v17 = vld [vmem:[%s2415_s23 + $0x58] sm:$0xff]  }
 0x10a   : > { %v784_v21 = vpack.c.bf16 %v726_v18, %v726_v18 }
 0x10c   : > { %v896_v13 = vunpack.c.l.b16 %v784_v21 }
 0x10f   : > { %v727_v5 = vpop.f32.mrf.mxu0 }
 0x110   : > { %v728_v22 = vadd.f32 %v1700_v19, %v727_v5  ;;  %v1724_v5 = vunpack.c.h.bf16 %v1985_v15 }
 0x112   : > { %v785_v23 = vpack.c.bf16 %v728_v22, %v728_v22  ;;  %v1771_v24 = vpack.c.bf16 %v728_v22, %v726_v18  ;;  %v1723_v18 = vunpack.c.l.bf16 %v1985_v15 }
 0x114   : > { %1994 = vst [vmem:[%s2432_s27 + $0x38] sm:$0xff] %v1771_v24   ;;  %v897_v25 = vunpack.c.l.b16 %v785_v23  ;;  %v2526_v22 = vadd.f32 %v1723_v18, %v755_v8  ;;  %v1715_v23 = vunpack.c.l.bf16 %v1983_v17  ;;  %v757_v24 = vpop.f32.mrf.mxu3 }
 0x116   : > { %v921_v27 = vpack.c.b16 %v897_v25, %v896_v13  ;;  %v2528_v13 = vadd.f32 %v1724_v5, %v757_v24 }
 0x117   : > { %v730_v29 = vpop.f32.mrf.mxu0 }
 0x118   : > { %1069 = vmatmul.bf16.gmra.mxu1 %v921_v27  ;;  %1158 = vmatmul.bf16.gmra.mxu2 %v921_v27  ;;  %v731_v31 = vadd.f32 %v1703_v30, %v730_v29  ;;  %v1801_v26 = vpack.c.bf16 %v2528_v13, %v2526_v22  ;;  %v1716_v29 = vunpack.c.h.bf16 %v1983_v17  ;;  %v797_v17 = vpack.c.bf16 %v2528_v13, %v2528_v13 }
 0x11a   : > { %v786_v34 = vpack.c.bf16 %v731_v31, %v731_v31  ;;  %2000 = vst [vmem:[%s2432_s27 + $0x68] sm:$0xff] %v1801_v26   ;;  %v909_v5 = vunpack.c.l.b16 %v797_v17 }
 0x11c   : > { %v898_v38 = vunpack.c.l.b16 %v786_v34 }
 0x11f   : > { %v732_v33 = vpop.f32.mrf.mxu0 }
 0x120   : > { %v733_v35 = vadd.f32 %v1704_v32, %v732_v33 }
 0x122   : > { %v787_v20 = vpack.c.bf16 %v733_v35, %v733_v35  ;;  %v1776_v37 = vpack.c.bf16 %v733_v35, %v731_v31  ;;  %v1986_v35 = vld [vmem:[%s2415_s23 + $0x70] sm:$0xff]  }
 0x124   : > { %1995 = vst [vmem:[%s2432_s27 + $0x40] sm:$0xff] %v1776_v37   ;;  %v899_v39 = vunpack.c.l.b16 %v787_v20 }
 0x125   : > { %v1035_v28 = vpop.f32.mrf.mxu1 }
 0x126   : > { %v922_v41 = vpack.c.b16 %v899_v39, %v898_v38 }
 0x127   : > { %v735_v42 = vpop.f32.mrf.mxu0 }
 0x128   : > { %1074 = vmatmul.bf16.gmra.mxu1 %v922_v41  ;;  %1163 = vmatmul.bf16.gmra.mxu2 %v922_v41  ;;  %v736_v36 = vadd.f32 %v1707_v43, %v735_v42 }
 0x12a   : > { %v788_v50 = vpack.c.bf16 %v736_v36, %v736_v36 }
 0x12b   : > { %v1124_v2 = vpop.f32.mrf.mxu2 }
 0x12c   : > { %v900_v44 = vunpack.c.l.b16 %v788_v50 }
 0x12d   : > { %v1037_v47 = vpop.f32.mrf.mxu1 }
 0x12e   : > { %v1816_v48 = vpack.c.bf16 %v1037_v47, %v1035_v28  ;;  %v1727_v28 = vunpack.c.l.bf16 %v1986_v35 }
 0x12f   : > { %v737_v49 = vpop.f32.mrf.mxu0  ;;  %v760_v20 = vpop.f32.mrf.mxu3 }
 0x130   : > { %1817 = vst [vmem:[%s2509_s28] sm:$0xff] %v1816_v48   ;;  %v738_v51 = vadd.f32 %v1708_v45, %v737_v49  ;;  %v1728_v45 = vunpack.c.h.bf16 %v1986_v35  ;;  %v761_v48 = vadd.f32 %v1727_v28, %v760_v20 }
 0x132   : > { %v789_v3 = vpack.c.bf16 %v738_v51, %v738_v51  ;;  %v1781_v52 = vpack.c.bf16 %v738_v51, %v736_v36 }
 0x133   : > { %v1126_v53 = vpop.f32.mrf.mxu2 }
 0x134   : > { %1996 = vst [vmem:[%s2432_s27 + $0x48] sm:$0xff] %v1781_v52   ;;  %v901_v54 = vunpack.c.l.b16 %v789_v3  ;;  %v1896_v55 = vpack.c.bf16 %v1126_v53, %v1124_v2  ;;  %v1984_v2 = vld [vmem:[%s2415_s23 + $0x60] sm:$0xff]  }
 0x135   : > { %v1040_v56 = vpop.f32.mrf.mxu1  ;;  %v1719_v49 = vunpack.c.l.bf16 %v1984_v2 }
 0x136   : > { %1897 = vst [vmem:[%s2516_s15] sm:$0xff] %v1896_v55   ;;  %v923_v58 = vpack.c.b16 %v901_v54, %v900_v44  ;;  %v1720_v44 = vunpack.c.h.bf16 %v1984_v2 }
 0x137   : > { %v740_v59 = vpop.f32.mrf.mxu0  ;;  %v762_v50 = vpop.f32.mrf.mxu3 }
 0x138   : > { %1079 = vmatmul.bf16.gmra.mxu1 %v923_v58  ;;  %1168 = vmatmul.bf16.gmra.mxu2 %v923_v58  ;;  %v741_v63 = vadd.f32 %v1711_v60, %v740_v59  ;;  %v763_v51 = vadd.f32 %v1728_v45, %v762_v50  ;;  %v1987_v59 = vld [vmem:[%s2415_s23 + $0x78] sm:$0xff]  }
 0x13a   : > { %v790_v7 = vpack.c.bf16 %v741_v63, %v741_v63  ;;  %v1806_v52 = vpack.c.bf16 %v763_v51, %v761_v48 }
 0x13b   : > { %v1129_v62 = vpop.f32.mrf.mxu2 }
 0x13c   : > { %v902_v12 = vunpack.c.l.b16 %v790_v7  ;;  %2001 = vst [vmem:[%s2432_s27 + $0x70] sm:$0xff] %v1806_v52  }
 0x13d   : > { %v1042_v1 = vpop.f32.mrf.mxu1 }
 0x13e   : > { %v1821_v4 = vpack.c.bf16 %v1042_v1, %v1040_v56  ;;  %v1731_v1 = vunpack.c.l.bf16 %v1987_v59 }
 0x13f   : > { %v742_v6 = vpop.f32.mrf.mxu0 }
 0x140   : > { %2003 = vst [vmem:[%s2509_s28 + $0x8] sm:$0xff] %v1821_v4   ;;  %v743_v46 = vadd.f32 %v1712_v0, %v742_v6 }
 0x141   : > { %v765_v60 = vpop.f32.mrf.mxu3 }
 0x142   : > { %v791_v9 = vpack.c.bf16 %v743_v46, %v743_v46  ;;  %v1786_v10 = vpack.c.bf16 %v743_v46, %v741_v63 }
 0x143   : > { %v1131_v11 = vpop.f32.mrf.mxu2 }
 0x144   : > { %1997 = vst [vmem:[%s2432_s27 + $0x50] sm:$0xff] %v1786_v10   ;;  %v903_v61 = vunpack.c.l.b16 %v791_v9  ;;  %v1901_v14 = vpack.c.bf16 %v1131_v11, %v1129_v62  ;;  %v1732_v9 = vunpack.c.h.bf16 %v1987_v59  ;;  %v766_v10 = vadd.f32 %v1731_v1, %v765_v60 }
 0x145   : > { %v1045_v16 = vpop.f32.mrf.mxu1 }
 0x146   : > { %2018 = vst [vmem:[%s2516_s15 + $0x8] sm:$0xff] %v1901_v14   ;;  %v924_v19 = vpack.c.b16 %v903_v61, %v902_v12 }
 0x147   : > { %v745_v21 = vpop.f32.mrf.mxu0 }
 0x148   : > { %1084 = vmatmul.bf16.gmra.mxu1 %v924_v19  ;;  %1173 = vmatmul.bf16.gmra.mxu2 %v924_v19  ;;  %v746_v27 = vadd.f32 %v1715_v23, %v745_v21 }
 0x149   : > { %v767_v11 = vpop.f32.mrf.mxu3 }
 0x14a   : > { %v792_v33 = vpack.c.bf16 %v746_v27, %v746_v27  ;;  %v768_v12 = vadd.f32 %v1732_v9, %v767_v11 }
 0x14b   : > { %v1134_v25 = vpop.f32.mrf.mxu2 }
 0x14c   : > { %v904_v40 = vunpack.c.l.b16 %v792_v33  ;;  %v1811_v14 = vpack.c.bf16 %v768_v12, %v766_v10 }
 0x14d   : > { %v1047_v30 = vpop.f32.mrf.mxu1 }
 0x14e   : > { %v1826_v31 = vpack.c.bf16 %v1047_v30, %v1045_v16  ;;  %2002 = vst [vmem:[%s2432_s27 + $0x78] sm:$0xff] %v1811_v14   ;;  %v796_v16 = vpack.c.bf16 %v2526_v22, %v2526_v22  ;;  %v799_v30 = vpack.c.bf16 %v763_v51, %v763_v51 }
 0x14f   : > { %v747_v32 = vpop.f32.mrf.mxu0 }
 0x150   : > { %2004 = vst [vmem:[%s2509_s28 + $0x10] sm:$0xff] %v1826_v31   ;;  %v748_v34 = vadd.f32 %v1716_v29, %v747_v32  ;;  %v908_v19 = vunpack.c.l.b16 %v796_v16  ;;  %v798_v29 = vpack.c.bf16 %v761_v48, %v761_v48  ;;  %v911_v31 = vunpack.c.l.b16 %v799_v30 }
 0x152   : > { %v793_v37 = vpack.c.bf16 %v748_v34, %v748_v34  ;;  %v1791_v38 = vpack.c.bf16 %v748_v34, %v746_v27  ;;  %v910_v13 = vunpack.c.l.b16 %v798_v29 }
 0x153   : > { %v1136_v39 = vpop.f32.mrf.mxu2 }
 0x154   : > { %1998 = vst [vmem:[%s2432_s27 + $0x58] sm:$0xff] %v1791_v38   ;;  %v905_v41 = vunpack.c.l.b16 %v793_v37  ;;  %v1906_v42 = vpack.c.bf16 %v1136_v39, %v1134_v25  ;;  %v927_v25 = vpack.c.b16 %v909_v5, %v908_v19  ;;  %v928_v35 = vpack.c.b16 %v911_v31, %v910_v13 }
 0x155   : > { %v1050_v43 = vpop.f32.mrf.mxu1  ;;  %v800_v38 = vpack.c.bf16 %v766_v10, %v766_v10  ;;  %v801_v39 = vpack.c.bf16 %v768_v12, %v768_v12 }
 0x156   : > { %2019 = vst [vmem:[%s2516_s15 + $0x10] sm:$0xff] %v1906_v42   ;;  %v925_v36 = vpack.c.b16 %v905_v41, %v904_v40 }
 0x157   : > { %v750_v47 = vpop.f32.mrf.mxu0  ;;  %v912_v40 = vunpack.c.l.b16 %v800_v38  ;;  %v913_v41 = vunpack.c.l.b16 %v801_v39 }
 0x158   : > { %1089 = vmatmul.bf16.gmra.mxu1 %v925_v36  ;;  %1178 = vmatmul.bf16.gmra.mxu2 %v925_v36  ;;  %v751_v53 = vadd.f32 %v1719_v49, %v750_v47 }
 0x159   : > { %v929_v36 = vpack.c.b16 %v913_v41, %v912_v40 }
 0x15a   : > { %v794_v57 = vpack.c.bf16 %v751_v53, %v751_v53 }
 0x15b   : > { %v1139_v3 = vpop.f32.mrf.mxu2 }
 0x15c   : > { %v906_v4 = vunpack.c.l.b16 %v794_v57 }
 0x15d   : > { %v1052_v54 = vpop.f32.mrf.mxu1 }
 0x15e   : > { %v1831_v55 = vpack.c.bf16 %v1052_v54, %v1050_v43 }
 0x15f   : > { %v752_v56 = vpop.f32.mrf.mxu0 }
 0x160   : > { %2005 = vst [vmem:[%s2509_s28 + $0x18] sm:$0xff] %v1831_v55   ;;  %v753_v58 = vadd.f32 %v1720_v44, %v752_v56 }
 0x162   : > { %v795_v62 = vpack.c.bf16 %v753_v58, %v753_v58  ;;  %v1796_v63 = vpack.c.bf16 %v753_v58, %v751_v53 }
 0x163   : > { %v1141_v0 = vpop.f32.mrf.mxu2 }
 0x164   : > { %1999 = vst [vmem:[%s2432_s27 + $0x60] sm:$0xff] %v1796_v63   ;;  %v907_v6 = vunpack.c.l.b16 %v795_v62  ;;  %v1911_v7 = vpack.c.bf16 %v1141_v0, %v1139_v3 }
 0x165   : > { %v1055_v46 = vpop.f32.mrf.mxu1 }
 0x166   : > { %2020 = vst [vmem:[%s2516_s15 + $0x18] sm:$0xff] %v1911_v7   ;;  %v926_v8 = vpack.c.b16 %v907_v6, %v906_v4 }
 0x168   : > { %1094 = vmatmul.bf16.vlgmr.msrb.gmra.mxu3 %v926_v8 }
 0x16b   : > { %v1144_v61 = vpop.f32.mrf.mxu2 }
 0x16d   : > { %v1057_v15 = vpop.f32.mrf.mxu1 }
 0x16e   : > { %v1836_v18 = vpack.c.bf16 %v1057_v15, %v1055_v46 }
 0x170   : > { %2006 = vst [vmem:[%s2509_s28 + $0x20] sm:$0xff] %v1836_v18  }
 0x173   : > { %v1146_v21 = vpop.f32.mrf.mxu2 }
 0x174   : > { %v1916_v23 = vpack.c.bf16 %v1146_v21, %v1144_v61 }
 0x175   : > { %v1060_v24 = vpop.f32.mrf.mxu1 }
 0x176   : > { %2021 = vst [vmem:[%s2516_s15 + $0x20] sm:$0xff] %v1916_v23  }
 0x178   : > { %1099 = vmatmul.bf16.gmra.mxu3 %v927_v25 }
 0x17b   : > { %v1149_v26 = vpop.f32.mrf.mxu2 }
 0x17d   : > { %v1062_v27 = vpop.f32.mrf.mxu1 }
 0x17e   : > { %v1841_v22 = vpack.c.bf16 %v1062_v27, %v1060_v24 }
 0x180   : > { %2007 = vst [vmem:[%s2509_s28 + $0x28] sm:$0xff] %v1841_v22  }
 0x183   : > { %v1151_v32 = vpop.f32.mrf.mxu2 }
 0x184   : > { %v1921_v33 = vpack.c.bf16 %v1151_v32, %v1149_v26 }
 0x185   : > { %v1065_v34 = vpop.f32.mrf.mxu1 }
 0x186   : > { %2022 = vst [vmem:[%s2516_s15 + $0x28] sm:$0xff] %v1921_v33  }
 0x188   : > { %1104 = vmatmul.bf16.gmra.mxu3 %v928_v35 }
 0x18b   : > { %v1154_v20 = vpop.f32.mrf.mxu2 }
 0x18d   : > { %v1067_v37 = vpop.f32.mrf.mxu1 }
 0x18e   : > { %v1846_v28 = vpack.c.bf16 %v1067_v37, %v1065_v34 }
 0x190   : > { %2008 = vst [vmem:[%s2509_s28 + $0x30] sm:$0xff] %v1846_v28  }
 0x193   : > { %v1156_v42 = vpop.f32.mrf.mxu2 }
 0x194   : > { %v1926_v43 = vpack.c.bf16 %v1156_v42, %v1154_v20 }
 0x195   : > { %v1070_v2 = vpop.f32.mrf.mxu1 }
 0x196   : > { %2023 = vst [vmem:[%s2516_s15 + $0x30] sm:$0xff] %v1926_v43  }
 0x198   : > { %1109 = vmatmul.bf16.gmra.mxu3 %v929_v36 }
 0x19b   : > { %v1159_v45 = vpop.f32.mrf.mxu2 }
 0x19d   : > { %v1072_v47 = vpop.f32.mrf.mxu1 }
 0x19e   : > { %v1851_v48 = vpack.c.bf16 %v1072_v47, %v1070_v2 }
 0x1a0   : > { %2009 = vst [vmem:[%s2509_s28 + $0x38] sm:$0xff] %v1851_v48  }
 0x1a3   : > { %v1161_v49 = vpop.f32.mrf.mxu2 }
 0x1a4   : > { %v1931_v50 = vpack.c.bf16 %v1161_v49, %v1159_v45 }
 0x1a5   : > { %v1075_v51 = vpop.f32.mrf.mxu1 }
 0x1a6   : > { %2024 = vst [vmem:[%s2516_s15 + $0x38] sm:$0xff] %v1931_v50  }
 0x1a8   : > { %1183 = vmatmul.bf16.vlgmr.msra.gmra.mxu3 %v926_v8 }
 0x1ab   : > { %v1164_v3 = vpop.f32.mrf.mxu2 }
 0x1ad   : > { %v1077_v52 = vpop.f32.mrf.mxu1 }
 0x1ae   : > { %v1856_v53 = vpack.c.bf16 %v1077_v52, %v1075_v51 }
 0x1b0   : > { %2010 = vst [vmem:[%s2509_s28 + $0x40] sm:$0xff] %v1856_v53  }
 0x1b3   : > { %v1166_v44 = vpop.f32.mrf.mxu2 }
 0x1b4   : > { %v1936_v54 = vpack.c.bf16 %v1166_v44, %v1164_v3 }
 0x1b5   : > { %v1080_v55 = vpop.f32.mrf.mxu1 }
 0x1b6   : > { %2025 = vst [vmem:[%s2516_s15 + $0x40] sm:$0xff] %v1936_v54  }
 0x1b8   : > { %1188 = vmatmul.bf16.gmra.mxu3 %v927_v25 }
 0x1bb   : > { %v1169_v56 = vpop.f32.mrf.mxu2 }
 0x1bd   : > { %v1082_v57 = vpop.f32.mrf.mxu1 }
 0x1be   : > { %v1861_v58 = vpack.c.bf16 %v1082_v57, %v1080_v55 }
 0x1c0   : > { %2011 = vst [vmem:[%s2509_s28 + $0x48] sm:$0xff] %v1861_v58  }
 0x1c3   : > { %v1171_v59 = vpop.f32.mrf.mxu2 }
 0x1c4   : > { %v1941_v60 = vpack.c.bf16 %v1171_v59, %v1169_v56 }
 0x1c5   : > { %v1085_v62 = vpop.f32.mrf.mxu1 }
 0x1c6   : > { %2026 = vst [vmem:[%s2516_s15 + $0x48] sm:$0xff] %v1941_v60  }
 0x1c8   : > { %1193 = vmatmul.bf16.gmra.mxu3 %v928_v35 }
 0x1cb   : > { %v1174_v63 = vpop.f32.mrf.mxu2 }
 0x1cd   : > { %v1087_v0 = vpop.f32.mrf.mxu1 }
 0x1ce   : > { %v1866_v1 = vpack.c.bf16 %v1087_v0, %v1085_v62 }
 0x1d0   : > { %2012 = vst [vmem:[%s2509_s28 + $0x50] sm:$0xff] %v1866_v1  }
 0x1d3   : > { %v1176_v4 = vpop.f32.mrf.mxu2 }
 0x1d4   : > { %v1946_v6 = vpack.c.bf16 %v1176_v4, %v1174_v63 }
 0x1d5   : > { %v1090_v7 = vpop.f32.mrf.mxu1 }
 0x1d6   : > { %2027 = vst [vmem:[%s2516_s15 + $0x50] sm:$0xff] %v1946_v6  }
 0x1d8   : > { %1198 = vmatmul.bf16.gmra.mxu3 %v929_v36 }
 0x1db   : > { %v1179_v46 = vpop.f32.mrf.mxu2 }
 0x1dd   : > { %v1092_v8 = vpop.f32.mrf.mxu1 }
 0x1de   : > { %v1871_v9 = vpack.c.bf16 %v1092_v8, %v1090_v7 }
 0x1e0   : > { %2013 = vst [vmem:[%s2509_s28 + $0x58] sm:$0xff] %v1871_v9  }
 0x1e3   : > { %v1181_v10 = vpop.f32.mrf.mxu2 }
 0x1e4   : > { %v1951_v11 = vpack.c.bf16 %v1181_v10, %v1179_v46 }
 0x1e6   : > { %2028 = vst [vmem:[%s2516_s15 + $0x58] sm:$0xff] %v1951_v11  }
 0x1eb   : > { %v1095_v12 = vpop.f32.mrf.mxu3 }
 0x1f3   : > { %v1097_v61 = vpop.f32.mrf.mxu3 }
 0x1f4   : > { %v1876_v14 = vpack.c.bf16 %v1097_v61, %v1095_v12 }
 0x1f6   : > { %2014 = vst [vmem:[%s2509_s28 + $0x60] sm:$0xff] %v1876_v14  }
 0x1fb   : > { %v1100_v15 = vpop.f32.mrf.mxu3 }
 0x203   : > { %v1102_v16 = vpop.f32.mrf.mxu3 }
 0x204   : > { %v1881_v17 = vpack.c.bf16 %v1102_v16, %v1100_v15 }
 0x206   : > { %2015 = vst [vmem:[%s2509_s28 + $0x68] sm:$0xff] %v1881_v17  }
 0x20b   : > { %v1105_v18 = vpop.f32.mrf.mxu3 }
 0x213   : > { %v1107_v19 = vpop.f32.mrf.mxu3 }
 0x214   : > { %v1886_v5 = vpack.c.bf16 %v1107_v19, %v1105_v18 }
 0x216   : > { %2016 = vst [vmem:[%s2509_s28 + $0x70] sm:$0xff] %v1886_v5  }
 0x21b   : > { %v1110_v21 = vpop.f32.mrf.mxu3 }
 0x223   : > { %v1112_v23 = vpop.f32.mrf.mxu3 }
 0x224   : > { %v1891_v24 = vpack.c.bf16 %v1112_v23, %v1110_v21 }
 0x226   : > { %2017 = vst [vmem:[%s2509_s28 + $0x78] sm:$0xff] %v1891_v24  }
 0x22b   : > { %v1184_v25 = vpop.f32.mrf.mxu3 }
 0x233   : > { %v1186_v26 = vpop.f32.mrf.mxu3 }
 0x234   : > { %v1956_v27 = vpack.c.bf16 %v1186_v26, %v1184_v25 }
 0x236   : > { %2029 = vst [vmem:[%s2516_s15 + $0x60] sm:$0xff] %v1956_v27  }
 0x23b   : > { %v1189_v29 = vpop.f32.mrf.mxu3 }
 0x243   : > { %v1191_v30 = vpop.f32.mrf.mxu3 }
 0x244   : > { %v1961_v22 = vpack.c.bf16 %v1191_v30, %v1189_v29 }
 0x246   : > { %2030 = vst [vmem:[%s2516_s15 + $0x68] sm:$0xff] %v1961_v22  }
 0x24b   : > { %v1194_v13 = vpop.f32.mrf.mxu3 }
 0x253   : > { %v1196_v31 = vpop.f32.mrf.mxu3 }
 0x254   : > { %v1966_v32 = vpack.c.bf16 %v1196_v31, %v1194_v13 }
 0x256   : > { %2031 = vst [vmem:[%s2516_s15 + $0x70] sm:$0xff] %v1966_v32  }
 0x25b   : > { %v1199_v33 = vpop.f32.mrf.mxu3 }
 0x263   : > { %v1201_v34 = vpop.f32.mrf.mxu3 }
 0x264   : > { %v1971_v35 = vpack.c.bf16 %v1201_v34, %v1199_v33 }
 0x266   : > { %2032 = vst [vmem:[%s2516_s15 + $0x78] sm:$0xff] %v1971_v35  }
 0x267 PF: > { %s19_s9 = sadd.s32 1, %s2130_s9   ;;  %s2596_s27 = smov %s2122_s29 }
 0x268   : > { %p16_p7 = scmp.ge.s32.totalorder %s19_s9, 6   ;;  %s2597_s28 = smov %s2126_s30 }
 0x269   : > { %s2598_s29 = smov %s2601_s10  ;;  %s2599_s30 = smov %s2605_s11 }
 0x26a   :  { %18 = sbr.rel (!%p16_p7) target bundleno = 3 (0x3), region = 107 }

// kernel: mossformer_masknet.4
= control target key start
LH: loop header
LB: loop body
LE: loop exit
PB: predicated region body
PF: predicated region fallthrough
CT: control target
= control target key end

     0   :  { %s2693_s21 = smov 0   ;;  %s2695_s22 = smov 0   ;;  %s3260_s0 = inlined_call_operand.vmem [shape: bf16[2,512,128], index: 0, kind: input, shape index: {}]   ;;  %s3261_s1 = inlined_call_operand.vmem [shape: bf16[2,512,128], index: 1, kind: input, shape index: {}]   ;;  %s3262_s2 = inlined_call_operand.vmem [shape: bf16[2,512,128], index: 2, kind: input, shape index: {}]   ;;  %s3263_s3 = inlined_call_operand.vmem [shape: bf16[128,128], index: 3, kind: input, shape index: {}]   ;;  %s3264_s4 = inlined_call_operand.vmem [shape: bf16[128,128], index: 4, kind: input, shape index: {}]   ;;  %s3265_s5 = inlined_call_operand.vmem [shape: bf16[2,512,128], index: 5, kind: output, shape index: {0}]   ;;  %s3266_s6 = inlined_call_operand.vmem [shape: f32[2,4,2,128], index: 6, kind: output, shape index: {1}]  }
   0x1   :  { %3267 = sst [smem:[#allocation8_spill]] %s3261_s1  ;;  %s2697_s23 = smov 0  }
   0x2   :  { %s2699_s24 = smov 0   ;;  %s2701_s25 = smov 0  }
   0x3   :  { %s2703_s26 = smov 0   ;;  %s2705_s27 = smov 0  }
   0x4 LB: > { %s29_s28 = sadd.s32 1, %s2640_s24  ;;  %s32_s29 = sadd.s32 1, %s2644_s25  ;;  %s2652_s27 = sphi %s2705_s27, %s17_s27   ;;  %s2648_s26 = sphi %s2703_s26, %s3278_s26   ;;  %s2644_s25 = sphi %s2701_s25, %s3277_s25   ;;  %s2640_s24 = sphi %s2699_s24, %s3276_s24   ;;  %s2636_s23 = sphi %s2697_s23, %s3275_s23   ;;  %s2632_s22 = sphi %s2695_s22, %s3274_s22   ;;  %s2628_s21 = sphi %s2693_s21, %s3273_s21  }
   0x5   : > { %p30_p0 = scmp.ge.s32.totalorder %s29_s28, 4  ;;  %p2016_p1 = scmp.ge.s32.totalorder %s2652_s27, 1 }
   0x6   : > { %p265_p2 = scmp.lt.s32.totalorder %s2652_s27, 33  ;;  %s36_s30 = sadd.s32 1, %s2648_s26 }
   0x7   : > { %s3280_s28 = smov (%p30_p0, %s29_s28), 0  ;;  %s3282_s29 = smov (!%p30_p0, %s32_s29), %s2644_s25 }
   0x8   : > { %p266_p3 = pnand %p2016_p1, %p265_p2  ;;  %p34_p4 = scmp.ge.s32.totalorder %s3282_s29, 4 }
   0x9   : > { %s2017_s7 = sshll.u32 (!%p266_p3), %s2632_s22, 4  ;;  %p322_p6 = scmp.lt.s32.totalorder (!%p266_p3), %s2636_s23, 1 }
   0xa   : > { %s3284_s29 = smov (%p34_p4, %s3282_s29), 0  ;;  %s3286_s30 = smov (!%p34_p4, %s36_s30), %s2648_s26 }
   0xb   : > { %3268 = sst [smem:[#allocation6_spill]] %s3284_s29  ;;  %p38_p5 = scmp.ge.s32.totalorder %s3286_s30, 2 }
   0xc   : > { %269 = sbr.rel (%p266_p3) target bundleno = 1237 (0x4d5), region = 40  ;;  %p324_p7 = scmp.lt.s32.totalorder (!%p266_p3), %s2017_s7, 63 }
   0xd   : > { %s3288_s30 = smov (%p38_p5, %s3286_s30), 0  ;;  %p353_p8 = scmp.lt.s32.totalorder (!%p266_p3), %s2632_s22, 3 }
   0xe   : > { %3269 = sst [smem:[#allocation7_spill]] %s3288_s30  ;;  %p2029_p9 = scmp.ne.s32.totalorder (!%p266_p3), %s2628_s21, 0 }
   0xf   : > { %s3270_s1 = sld [smem:[#allocation8_spill]] (!%p266_p3) }
  0x11   : > { %s3290_s23 = smov (!%p322_p6, %s2636_s23), 1  ;;  %s3292_s7 = smov (!%p324_p7, %s2017_s7), 63 }
  0x12   : > { %s2018_s8 = sshll.u32 %s3290_s23, 6  ;;  %s2228_s9 = sshll.u32 %s3290_s23, 8 }
  0x13   : > { %s327_s10 = sadd.s32 %s2018_s8, %s3292_s7  ;;  %s2749_s17 = scalar_lea.vmem %s3262_s2, %s2228_s9 }
  0x14   : > { %s2019_s14 = sshll.u32 %s327_s10, 2  ;;  %s3294_s22 = smov (!%p353_p8, %s2632_s22), 3 }
  0x15   : > { %s2744_s13 = scalar_lea.vmem %s3270_s1, %s2228_s9  ;;  %s2754_s20 = scalar_lea.vmem %s3260_s0, %s2019_s14 }
  0x16   : > { %s2759_s7 = scalar_lea.vmem %s3265_s5, %s2019_s14  ;;  %s2027_s8 = sshll.u32 %s3290_s23, 2 }
  0x17   : > { %s356_s11 = sadd.s32 %s2027_s8, %s3294_s22  ;;  %362 = sbr.rel (%p2029_p9) target bundleno = 221 (0xdd), region = 44 }
  0x18   : > { %s2028_s12 = sshll.u32 %s356_s11, 1 }
  0x19   : > { %s2765_s15 = scalar_lea.vmem %s3266_s6, %s2028_s12 }
  0x1c   : > { %v2245_v0 = vld [vmem:[%s3263_s3 + $0x38] sm:$0xff]  ;;  %v2244_v1 = vld [vmem:[%s3263_s3 + $0x30] sm:$0xff]  ;;  %v2243_v2 = vld [vmem:[%s3263_s3 + $0x28] sm:$0xff]  ;;  %vm572_vm0 = vcmask 7168   ;;  %v2654_v18 = vmov -inf   ;;  %v2655_v33 = vmov 0.0  }
  0x1d   : > { %491 = vmatpush.bf16.msra.mxu0 %v2245_v0  ;;  %2372 = vmatpush.bf16.msra.mxu1 %v2245_v0  ;;  %v2242_v3 = vld [vmem:[%s3263_s3 + $0x20] sm:$0xff]  ;;  %v2241_v4 = vld [vmem:[%s3263_s3 + $0x18] sm:$0xff]  ;;  %v2240_v5 = vld [vmem:[%s3263_s3 + $0x10] sm:$0xff]  ;;  %573 = vst.msk [vmem:[#allocation3] sm:$0xff] %vm572_vm0, %v2654_v18 }
  0x1e   : > { %2373 = vmatpush.bf16.msra.mxu2 %v2245_v0  ;;  %2374 = vmatpush.bf16.msra.mxu3 %v2245_v0  ;;  %v2239_v6 = vld [vmem:[%s3263_s3 + $0x8] sm:$0xff]  ;;  %v2238_v7 = vld [vmem:[%s3263_s3] sm:$0xff]  ;;  %v2232_v9 = vld [vmem:[%s2754_s20 + $0x10] sm:$0xff]  ;;  %574 = vst.msk [vmem:[#allocation3 + $0x8] sm:$0xff] %vm572_vm0, %v2654_v18 }
  0x1f   : > { %v2230_v8 = vld [vmem:[%s2754_s20] sm:$0xff]  ;;  %v2236_v11 = vld [vmem:[%s2754_s20 + $0x30] sm:$0xff]  ;;  %v2231_v12 = vld [vmem:[%s2754_s20 + $0x8] sm:$0xff]  ;;  %575 = vst.msk [vmem:[#allocation3 + $0x10] sm:$0xff] %vm572_vm0, %v2654_v18 }
  0x20   : > { %v2234_v10 = vld [vmem:[%s2754_s20 + $0x20] sm:$0xff]  ;;  %v2233_v13 = vld [vmem:[%s2754_s20 + $0x18] sm:$0xff]  ;;  %v2235_v14 = vld [vmem:[%s2754_s20 + $0x28] sm:$0xff]  ;;  %576 = vst.msk [vmem:[#allocation3 + $0x18] sm:$0xff] %vm572_vm0, %v2654_v18 }
  0x21   : > { %492 = vmatpush.bf16.msra.mxu0 %v2244_v1  ;;  %2375 = vmatpush.bf16.msra.mxu1 %v2244_v1  ;;  %v2237_v15 = vld [vmem:[%s2754_s20 + $0x38] sm:$0xff]  ;;  %577 = vst.msk [vmem:[#allocation3 + $0x20] sm:$0xff] %vm572_vm0, %v2654_v18 }
  0x22   : > { %2376 = vmatpush.bf16.msra.mxu2 %v2244_v1  ;;  %2377 = vmatpush.bf16.msra.mxu3 %v2244_v1  ;;  %578 = vst.msk [vmem:[#allocation3 + $0x28] sm:$0xff] %vm572_vm0, %v2654_v18 }
  0x23   : > { %579 = vst.msk [vmem:[#allocation3 + $0x30] sm:$0xff] %vm572_vm0, %v2654_v18 }
  0x24   : > { %580 = vst.msk [vmem:[#allocation3 + $0x38] sm:$0xff] %vm572_vm0, %v2654_v18 }
  0x25   : > { %493 = vmatpush.bf16.msra.mxu0 %v2243_v2  ;;  %2378 = vmatpush.bf16.msra.mxu1 %v2243_v2  ;;  %581 = vst.msk [vmem:[#allocation3 + $0x40] sm:$0xff] %vm572_vm0, %v2654_v18 }
  0x26   : > { %2379 = vmatpush.bf16.msra.mxu2 %v2243_v2  ;;  %2380 = vmatpush.bf16.msra.mxu3 %v2243_v2  ;;  %582 = vst.msk [vmem:[#allocation3 + $0x48] sm:$0xff] %vm572_vm0, %v2654_v18 }
  0x27   : > { %583 = vst.msk [vmem:[#allocation3 + $0x50] sm:$0xff] %vm572_vm0, %v2654_v18 }
  0x28   : > { %584 = vst.msk [vmem:[#allocation3 + $0x58] sm:$0xff] %vm572_vm0, %v2654_v18 }
  0x29   : > { %494 = vmatpush.bf16.msra.mxu0 %v2242_v3  ;;  %2381 = vmatpush.bf16.msra.mxu1 %v2242_v3  ;;  %585 = vst.msk [vmem:[#allocation3 + $0x60] sm:$0xff] %vm572_vm0, %v2654_v18 }
  0x2a   : > { %2382 = vmatpush.bf16.msra.mxu2 %v2242_v3  ;;  %2383 = vmatpush.bf16.msra.mxu3 %v2242_v3  ;;  %586 = vst.msk [vmem:[#allocation3 + $0x68] sm:$0xff] %vm572_vm0, %v2654_v18 }
  0x2b   : > { %587 = vst.msk [vmem:[#allocation3 + $0x70] sm:$0xff] %vm572_vm0, %v2654_v18 }
  0x2c   : > { %588 = vst.msk [vmem:[#allocation3 + $0x78] sm:$0xff] %vm572_vm0, %v2654_v18 }
  0x2d   : > { %495 = vmatpush.bf16.msra.mxu0 %v2241_v4  ;;  %2384 = vmatpush.bf16.msra.mxu1 %v2241_v4  ;;  %589 = vst.msk [vmem:[#allocation4] sm:$0xff] %vm572_vm0, %v2655_v33 }
  0x2e   : > { %2385 = vmatpush.bf16.msra.mxu2 %v2241_v4  ;;  %2386 = vmatpush.bf16.msra.mxu3 %v2241_v4  ;;  %590 = vst.msk [vmem:[#allocation4 + $0x8] sm:$0xff] %vm572_vm0, %v2655_v33 }
  0x2f   : > { %591 = vst.msk [vmem:[#allocation4 + $0x10] sm:$0xff] %vm572_vm0, %v2655_v33 }
  0x30   : > { %592 = vst.msk [vmem:[#allocation4 + $0x18] sm:$0xff] %vm572_vm0, %v2655_v33 }
  0x31   : > { %496 = vmatpush.bf16.msra.mxu0 %v2240_v5  ;;  %2387 = vmatpush.bf16.msra.mxu1 %v2240_v5  ;;  %593 = vst.msk [vmem:[#allocation4 + $0x20] sm:$0xff] %vm572_vm0, %v2655_v33 }
  0x32   : > { %2388 = vmatpush.bf16.msra.mxu2 %v2240_v5  ;;  %2389 = vmatpush.bf16.msra.mxu3 %v2240_v5  ;;  %594 = vst.msk [vmem:[#allocation4 + $0x28] sm:$0xff] %vm572_vm0, %v2655_v33 }
  0x33   : > { %595 = vst.msk [vmem:[#allocation4 + $0x30] sm:$0xff] %vm572_vm0, %v2655_v33 }
  0x34   : > { %596 = vst.msk [vmem:[#allocation4 + $0x38] sm:$0xff] %vm572_vm0, %v2655_v33 }
  0x35   : > { %497 = vmatpush.bf16.msra.mxu0 %v2239_v6  ;;  %2390 = vmatpush.bf16.msra.mxu1 %v2239_v6  ;;  %597 = vst.msk [vmem:[#allocation4 + $0x40] sm:$0xff] %vm572_vm0, %v2655_v33 }
  0x36   : > { %2391 = vmatpush.bf16.msra.mxu2 %v2239_v6  ;;  %2392 = vmatpush.bf16.msra.mxu3 %v2239_v6  ;;  %598 = vst.msk [vmem:[#allocation4 + $0x48] sm:$0xff] %vm572_vm0, %v2655_v33 }
  0x37   : > { %599 = vst.msk [vmem:[#allocation4 + $0x50] sm:$0xff] %vm572_vm0, %v2655_v33 }
  0x38   : > { %600 = vst.msk [vmem:[#allocation4 + $0x58] sm:$0xff] %vm572_vm0, %v2655_v33 }
  0x39   : > { %498 = vmatpush.bf16.msra.mxu0 %v2238_v7  ;;  %2393 = vmatpush.bf16.msra.mxu1 %v2238_v7  ;;  %601 = vst.msk [vmem:[#allocation4 + $0x60] sm:$0xff] %vm572_vm0, %v2655_v33 }
  0x3a   : > { %2394 = vmatpush.bf16.msra.mxu2 %v2238_v7  ;;  %2395 = vmatpush.bf16.msra.mxu3 %v2238_v7  ;;  %602 = vst.msk [vmem:[#allocation4 + $0x68] sm:$0xff] %vm572_vm0, %v2655_v33 }
  0x3b   : > { %603 = vst.msk [vmem:[#allocation4 + $0x70] sm:$0xff] %vm572_vm0, %v2655_v33 }
  0x3c   : > { %499 = vmatmul.bf16.vlgmr.msra.gmra.mxu0 %v2230_v8  ;;  %509 = vmatmul.bf16.vlgmr.msra.gmra.mxu1 %v2232_v9  ;;  %604 = vst.msk [vmem:[#allocation4 + $0x78] sm:$0xff] %vm572_vm0, %v2655_v33 }
  0x3d   : > { %519 = vmatmul.bf16.vlgmr.msra.gmra.mxu2 %v2234_v10  ;;  %529 = vmatmul.bf16.vlgmr.msra.gmra.mxu3 %v2236_v11  ;;  %605 = vst [vmem:[#allocation5] sm:$0xff] %v2655_v33 }
  0x3e   : > { %606 = vst [vmem:[#allocation5 + $0x18] sm:$0xff] %v2655_v33 }
  0x3f   : > { %607 = vst [vmem:[#allocation5 + $0x50] sm:$0xff] %v2655_v33 }
  0x40   : > { %608 = vst [vmem:[#allocation5 + $0x60] sm:$0xff] %v2655_v33 }
  0x41   : > { %609 = vst [vmem:[#allocation5 + $0x68] sm:$0xff] %v2655_v33 }
  0x42   : > { %610 = vst [vmem:[#allocation5 + $0x20] sm:$0xff] %v2655_v33 }
  0x43   : > { %611 = vst [vmem:[#allocation5 + $0x70] sm:$0xff] %v2655_v33 }
  0x44   : > { %612 = vst [vmem:[#allocation5 + $0x10] sm:$0xff] %v2655_v33 }
  0x45   : > { %613 = vst [vmem:[#allocation5 + $0x28] sm:$0xff] %v2655_v33 }
  0x46   : > { %614 = vst [vmem:[#allocation5 + $0x40] sm:$0xff] %v2655_v33 }
  0x47   : > { %615 = vst [vmem:[#allocation5 + $0x38] sm:$0xff] %v2655_v33 }
  0x48   : > { %616 = vst [vmem:[#allocation5 + $0x8] sm:$0xff] %v2655_v33 }
  0x49   : > { %617 = vst [vmem:[#allocation5 + $0x58] sm:$0xff] %v2655_v33 }
  0x4a   : > { %618 = vst [vmem:[#allocation5 + $0x48] sm:$0xff] %v2655_v33 }
  0x4b   : > { %619 = vst [vmem:[#allocation5 + $0x78] sm:$0xff] %v2655_v33 }
  0x4c   : > { %504 = vmatmul.bf16.gmra.mxu0 %v2231_v12  ;;  %514 = vmatmul.bf16.gmra.mxu1 %v2233_v13  ;;  %620 = vst [vmem:[#allocation5 + $0x30] sm:$0xff] %v2655_v33 }
  0x4d   : > { %524 = vmatmul.bf16.gmra.mxu2 %v2235_v14  ;;  %534 = vmatmul.bf16.gmra.mxu3 %v2237_v15 }
  0xb9   : > { %v500_v16 = vpop.f32.mrf.mxu0  ;;  %v510_v17 = vpop.f32.mrf.mxu1 }
  0xc0   : > { %v520_v19 = vpop.f32.mrf.mxu2  ;;  %v530_v20 = vpop.f32.mrf.mxu3 }
  0xc1   : > { %v502_v21 = vpop.f32.mrf.mxu0  ;;  %v512_v22 = vpop.f32.mrf.mxu1 }
  0xc2   : > { %v2281_v23 = vpack.c.bf16 %v502_v21, %v500_v16  ;;  %v2291_v24 = vpack.c.bf16 %v512_v22, %v510_v17 }
  0xc4   : > { %2282 = vst [vmem:[#allocation2 + $0x30] sm:$0xff] %v2281_v23  }
  0xc5   : > { %2359 = vst [vmem:[#allocation2 + $0x18] sm:$0xff] %v2291_v24  }
  0xc8   : > { %v522_v25 = vpop.f32.mrf.mxu2  ;;  %v532_v26 = vpop.f32.mrf.mxu3 }
  0xc9   : > { %v2301_v27 = vpack.c.bf16 %v522_v25, %v520_v19  ;;  %v2311_v28 = vpack.c.bf16 %v532_v26, %v530_v20  ;;  %v505_v29 = vpop.f32.mrf.mxu0  ;;  %v515_v30 = vpop.f32.mrf.mxu1 }
  0xcb   : > { %2361 = vst [vmem:[#allocation2 + $0x8] sm:$0xff] %v2301_v27  }
  0xcc   : > { %2363 = vst [vmem:[#allocation2 + $0x28] sm:$0xff] %v2311_v28  }
  0xd0   : > { %v525_v31 = vpop.f32.mrf.mxu2  ;;  %v535_v32 = vpop.f32.mrf.mxu3 }
  0xd1   : > { %v507_v34 = vpop.f32.mrf.mxu0  ;;  %v517_v35 = vpop.f32.mrf.mxu1 }
  0xd2   : > { %v2286_v36 = vpack.c.bf16 %v507_v34, %v505_v29  ;;  %v2296_v37 = vpack.c.bf16 %v517_v35, %v515_v30 }
  0xd4   : > { %2358 = vst [vmem:[#allocation2] sm:$0xff] %v2286_v36  }
  0xd5   : > { %2360 = vst [vmem:[#allocation2 + $0x10] sm:$0xff] %v2296_v37  }
  0xd8   : > { %v527_v38 = vpop.f32.mrf.mxu2  ;;  %v537_v39 = vpop.f32.mrf.mxu3 }
  0xd9   : > { %v2306_v40 = vpack.c.bf16 %v527_v38, %v525_v31  ;;  %v2316_v41 = vpack.c.bf16 %v537_v39, %v535_v32 }
  0xdb   : > { %2362 = vst [vmem:[#allocation2 + $0x20] sm:$0xff] %v2306_v40  }
  0xdc   : > { %2364 = vst [vmem:[#allocation2 + $0x38] sm:$0xff] %v2316_v41  }
  0xdd PF: > { %s2094_s20 = sshll.u32 %s2628_s21, 7  ;;  %v2262_v50 = vld [vmem:[#allocation2 + $0x30] sm:$0xff]  ;;  %v2263_v52 = vld [vmem:[#allocation2] sm:$0xff]  ;;  %v2266_v53 = vld [vmem:[#allocation2 + $0x8] sm:$0xff]  ;;  %v2656_v10 = vmov 0   ;;  %vm1286_vm1 = vcmask 7168  }
  0xde   : > { %s2833_s29 = sshra.s32 %s2094_s20, 3  ;;  %v2265_v51 = vld [vmem:[#allocation2 + $0x10] sm:$0xff]  ;;  %v2264_v54 = vld [vmem:[#allocation2 + $0x18] sm:$0xff]  ;;  %v2268_v56 = vld [vmem:[#allocation2 + $0x28] sm:$0xff]  ;;  %2496 = vset.pattern.permute.xlu1 %v2656_v10  ;;  %2497 = vset.pattern.permute.xlu2 %v2656_v10  ;;  %p2193_p10 = scmp.ne.s32.totalorder %s2628_s21, 3 }
  0xdf   : > { %s2095_s30 = sshll.u32 %s2833_s29, 2  ;;  %2498 = vset.pattern.permute.xlu0 %v2656_v10  ;;  %v2887_v11 = vld [vmem:[#allocation3] sm:$0xff]  ;;  %v2897_v15 = vld [vmem:[#allocation3 + $0x30] sm:$0xff]  ;;  %v2906_v19 = vld [vmem:[#allocation3 + $0x38] sm:$0xff] }
  0xe0   : > { %s625_s1 = scalar_lea.vmem %s2744_s13, %s2095_s30  ;;  %v2908_v21 = vld [vmem:[#allocation3 + $0x8] sm:$0xff]  ;;  %v2923_v26 = vld [vmem:[#allocation3 + $0x10] sm:$0xff]  ;;  %v2925_v27 = vld [vmem:[#allocation3 + $0x40] sm:$0xff]  ;;  %s3002_s13 = scalar_lea.vmem %s2749_s17, %s2095_s30 }
  0xe1   : > { %v2253_v42 = vld [vmem:[%s625_s1 + $0x38] sm:$0xff]  ;;  %v2252_v43 = vld [vmem:[%s625_s1 + $0x30] sm:$0xff]  ;;  %v2251_v44 = vld [vmem:[%s625_s1 + $0x28] sm:$0xff] }
  0xe2   : > { %772 = vmatpush.bf16.xpose.msra.mxu0 %v2253_v42  ;;  %2396 = vmatpush.bf16.xpose.msra.mxu2 %v2253_v42  ;;  %v2250_v45 = vld [vmem:[%s625_s1 + $0x20] sm:$0xff]  ;;  %v2249_v46 = vld [vmem:[%s625_s1 + $0x18] sm:$0xff]  ;;  %v2248_v47 = vld [vmem:[%s625_s1 + $0x10] sm:$0xff] }
  0xe3   : > { %v2247_v48 = vld [vmem:[%s625_s1 + $0x8] sm:$0xff]  ;;  %v2246_v49 = vld [vmem:[%s625_s1] sm:$0xff]  ;;  %v2269_v57 = vld [vmem:[#allocation2 + $0x38] sm:$0xff] }
  0xe4   : > { %v2267_v55 = vld [vmem:[#allocation2 + $0x20] sm:$0xff]  ;;  %v2940_v33 = vld [vmem:[#allocation3 + $0x48] sm:$0xff]  ;;  %v2942_v34 = vld [vmem:[#allocation3 + $0x18] sm:$0xff] }
  0xe5   : > { %v2944_v37 = vld [vmem:[#allocation3 + $0x20] sm:$0xff] }
  0xea   : > { %773 = vmatpush.bf16.xpose.msra.mxu0 %v2252_v43  ;;  %2397 = vmatpush.bf16.xpose.msra.mxu2 %v2252_v43  ;;  %v2961_v43 = vld [vmem:[#allocation3 + $0x50] sm:$0xff] }
  0xf2   : > { %774 = vmatpush.bf16.xpose.msra.mxu0 %v2251_v44  ;;  %2398 = vmatpush.bf16.xpose.msra.mxu2 %v2251_v44 }
  0xfa   : > { %775 = vmatpush.bf16.xpose.msra.mxu0 %v2250_v45  ;;  %2399 = vmatpush.bf16.xpose.msra.mxu2 %v2250_v45  ;;  %v2963_v45 = vld [vmem:[#allocation3 + $0x28] sm:$0xff] }
 0x102   : > { %776 = vmatpush.bf16.xpose.msra.mxu0 %v2249_v46  ;;  %2400 = vmatpush.bf16.xpose.msra.mxu2 %v2249_v46 }
 0x10a   : > { %777 = vmatpush.bf16.xpose.msra.mxu0 %v2248_v47  ;;  %2401 = vmatpush.bf16.xpose.msra.mxu2 %v2248_v47 }
 0x112   : > { %778 = vmatpush.bf16.xpose.msra.mxu0 %v2247_v48  ;;  %2402 = vmatpush.bf16.xpose.msra.mxu2 %v2247_v48 }
 0x11a   : > { %779 = vmatpush.bf16.xpose.msra.mxu0 %v2246_v49  ;;  %2403 = vmatpush.bf16.xpose.msra.mxu2 %v2246_v49  ;;  %v2976_v49 = vld [vmem:[#allocation3 + $0x58] sm:$0xff] }
 0x121   : > { %780 = vmatmul.bf16.vlgmr.msra.gmra.mxu0 %v2262_v50  ;;  %795 = vmatmul.bf16.vlgmr.msra.gmra.mxu2 %v2265_v51 }
 0x131   : > { %785 = vmatmul.bf16.gmra.mxu0 %v2263_v52  ;;  %800 = vmatmul.bf16.gmra.mxu2 %v2266_v53  ;;  %v2985_v52 = vld [vmem:[#allocation3 + $0x60] sm:$0xff] }
 0x141   : > { %790 = vmatmul.bf16.gmra.mxu0 %v2264_v54  ;;  %805 = vmatmul.bf16.gmra.mxu2 %v2267_v55  ;;  %v2994_v55 = vld [vmem:[#allocation3 + $0x68] sm:$0xff] }
 0x151   : > { %810 = vmatmul.bf16.gmra.mxu2 %v2268_v56 }
 0x161   : > { %815 = vmatmul.bf16.gmra.mxu2 %v2269_v57 }
 0x19e   : > { %v2839_v58 = vpop.f32.mrf.mxu0 }
 0x19f   : > { %837 = vmax.xlane.f32.xlu0 %v2839_v58 }
 0x1a4   : > { %v2842_v59 = vpop.f32.mrf.mxu2 }
 0x1a6   : > { %v2844_v60 = vpop.f32.mrf.mxu0 }
 0x1a7   : > { %849 = vmax.xlane.f32.xlu0 %v2842_v59 }
 0x1ac   : > { %v2847_v61 = vpop.f32.mrf.mxu2 }
 0x1ad   : > { %851 = vmax.xlane.f32.xlu1 %v2847_v61 }
 0x1ae   : > { %v2850_v62 = vpop.f32.mrf.mxu0 }
 0x1af   : > { %839 = vmax.xlane.f32.xlu0 %v2844_v60 }
 0x1b4   : > { %v2853_v63 = vpop.f32.mrf.mxu2 }
 0x1b5   : > { %841 = vmax.xlane.f32.xlu1 %v2850_v62  ;;  %853 = vmax.xlane.f32.xlu2 %v2853_v63 }
 0x1b6   : > { %v2857_v0 = vpop.f32.mrf.mxu0 }
 0x1bc   : > { %v2859_v1 = vpop.f32.mrf.mxu2 }
 0x1bd   : > { %855 = vmax.xlane.f32.xlu0 %v2859_v1  ;;  %843 = vmax.xlane.f32.xlu1 %v2857_v0 }
 0x1be   : > { %v2863_v2 = vpop.f32.mrf.mxu0 }
 0x1bf   : > { %845 = vmax.xlane.f32.xlu2 %v2863_v2 }
 0x1c4   : > { %v2866_v3 = vpop.f32.mrf.mxu2 }
 0x1c5   : > { %857 = vmax.xlane.f32.xlu1 %v2866_v3 }
 0x1c6   : > { %v2869_v4 = vpop.f32.mrf.mxu0 }
 0x1c7   : > { %847 = vmax.xlane.f32.xlu2 %v2869_v4 }
 0x1cc   : > { %v2872_v5 = vpop.f32.mrf.mxu2 }
 0x1cf   : > { %859 = vmax.xlane.f32.xlu2 %v2872_v5 }
 0x1d4   : > { %v2875_v6 = vpop.f32.mrf.mxu2 }
 0x1d5   : > { %861 = vmax.xlane.f32.xlu0 %v2875_v6 }
 0x1dc   : > { %v2878_v7 = vpop.f32.mrf.mxu2 }
 0x1dd   : > { %863 = vmax.xlane.f32.xlu1 %v2878_v7 }
 0x1e4   : > { %v2881_v8 = vpop.f32.mrf.mxu2 }
 0x1e5   : > { %865 = vmax.xlane.f32.xlu2 %v2881_v8 }
 0x1ec   : > { %v2884_v9 = vpop.f32.mrf.mxu2 }
 0x1ed   : > { %867 = vmax.xlane.f32.xlu0 %v2884_v9 }
 0x212   : > { %v838_v12 = vpop.xlane.xlu0 %837 }
 0x213   : > { %v2890_v13 = vmax.f32 %v2887_v11, %v838_v12  ;;  %v2261_v12 = vld [vmem:[%s3002_s13 + $0x38] sm:$0xff] }
 0x214   : > { %1189 = vmatpush.bf16.msra.mxu1 %v2261_v12  ;;  %2404 = vmatpush.bf16.msra.mxu3 %v2261_v12  ;;  %v2257_v12 = vld [vmem:[%s3002_s13 + $0x18] sm:$0xff] }
 0x215   : > { %v885_v14 = vsub.f32 %v2887_v11, %v2890_v13  ;;  %1447 = vst.msk [vmem:[#allocation3] sm:$0xff] %vm1286_vm1, %v2890_v13  ;;  %935 = vperm.xlu1 %2496, %v2890_v13   ;;  %v3031_v13 = vld [vmem:[#allocation3 + $0x78] sm:$0xff] }
 0x21a   : > { %v850_v16 = vpop.xlane.xlu0 %849 }
 0x21b   : > { %v2900_v17 = vmax.f32 %v2897_v15, %v850_v16  ;;  %v3011_v16 = vld [vmem:[#allocation3 + $0x70] sm:$0xff] }
 0x21d   : > { %v891_v18 = vsub.f32 %v2897_v15, %v2900_v17  ;;  %1453 = vst.msk [vmem:[#allocation3 + $0x30] sm:$0xff] %vm1286_vm1, %v2900_v17 }
 0x220   : > { %v852_v20 = vpop.xlane.xlu1 %851 }
 0x221   : > { %v2911_v22 = vmax.f32 %v2906_v19, %v852_v20 }
 0x222   : > { %v840_v23 = vpop.xlane.xlu0 %839 }
 0x223   : > { %v892_v24 = vsub.f32 %v2906_v19, %v2911_v22  ;;  %1454 = vst.msk [vmem:[#allocation3 + $0x38] sm:$0xff] %vm1286_vm1, %v2911_v22  ;;  %v2918_v25 = vmax.f32 %v2908_v21, %v840_v23 }
 0x225   : > { %1448 = vst.msk [vmem:[#allocation3 + $0x8] sm:$0xff] %vm1286_vm1, %v2918_v25  ;;  %940 = vperm.xlu2 %2497, %v2918_v25   ;;  %v915_v15 = vmul.f32 1.442695, %v892_v24 }
 0x228   : > { %v842_v28 = vpop.xlane.xlu1 %841  ;;  %v854_v29 = vpop.xlane.xlu2 %853 }
 0x229   : > { %v2928_v30 = vmax.f32 %v2923_v26, %v842_v28  ;;  %v2931_v31 = vmax.f32 %v2925_v27, %v854_v29  ;;  %v901_v28 = vmul.f32 1.442695, %v885_v14  ;;  %v886_v29 = vsub.f32 %v2908_v21, %v2918_v25 }
 0x22b   : > { %1449 = vst.msk [vmem:[#allocation3 + $0x10] sm:$0xff] %vm1286_vm1, %v2928_v30  ;;  %v893_v32 = vsub.f32 %v2925_v27, %v2931_v31  ;;  %945 = vperm.xlu0 %2498, %v2928_v30   ;;  %2499 = vpow2.f32 %v901_v28  ;;  %v903_v14 = vmul.f32 1.442695, %v886_v29  ;;  %v2256_v28 = vld [vmem:[%s3002_s13 + $0x10] sm:$0xff]  ;;  %v2255_v29 = vld [vmem:[%s3002_s13 + $0x8] sm:$0xff]  ;;  %v2254_v27 = vld [vmem:[%s3002_s13] sm:$0xff] }
 0x22c   : > { %1455 = vst.msk [vmem:[#allocation3 + $0x40] sm:$0xff] %vm1286_vm1, %v2931_v31 }
 0x22d   : > { %2501 = vpow2.f32 %v903_v14 }
 0x230   : > { %v856_v35 = vpop.xlane.xlu0 %855  ;;  %v844_v36 = vpop.xlane.xlu1 %843 }
 0x231   : > { %v2947_v38 = vmax.f32 %v2940_v33, %v856_v35  ;;  %v872_v39 = vmax.f32 %v2942_v34, %v844_v36  ;;  %v887_v36 = vsub.f32 %v2923_v26, %v2928_v30 }
 0x232   : > { %v846_v40 = vpop.xlane.xlu2 %845 }
 0x233   : > { %v894_v41 = vsub.f32 %v2940_v33, %v2947_v38  ;;  %1456 = vst.msk [vmem:[#allocation3 + $0x48] sm:$0xff] %vm1286_vm1, %v2947_v38  ;;  %v2955_v42 = vmax.f32 %v2944_v37, %v846_v40  ;;  %950 = vperm.xlu2 %2497, %v872_v39   ;;  %v2260_v40 = vld [vmem:[%s3002_s13 + $0x30] sm:$0xff]  ;;  %v888_v11 = vsub.f32 %v2942_v34, %v872_v39  ;;  %v905_v21 = vmul.f32 1.442695, %v887_v36  ;;  %v3045_v34 = vpop.eup %2499 }
 0x234   : > { %1450 = vst.msk [vmem:[#allocation3 + $0x18] sm:$0xff] %vm1286_vm1, %v872_v39  ;;  %1190 = vmatpush.bf16.msra.mxu1 %v2260_v40  ;;  %2405 = vmatpush.bf16.msra.mxu3 %v2260_v40 }
 0x235   : > { %1451 = vst.msk [vmem:[#allocation3 + $0x20] sm:$0xff] %vm1286_vm1, %v2955_v42  ;;  %955 = vperm.xlu1 %2496, %v2955_v42   ;;  %v889_v26 = vsub.f32 %v2944_v37, %v2955_v42  ;;  %2503 = vpow2.f32 %v905_v21  ;;  %v2258_v37 = vld [vmem:[%s3002_s13 + $0x20] sm:$0xff]  ;;  %v919_v40 = vmul.f32 1.442695, %v894_v41 }
 0x237   : > { %v909_v42 = vmul.f32 1.442695, %v889_v26 }
 0x238   : > { %v858_v44 = vpop.xlane.xlu1 %857 }
 0x239   : > { %v2966_v46 = vmax.f32 %v2961_v43, %v858_v44  ;;  %v2259_v44 = vld [vmem:[%s3002_s13 + $0x28] sm:$0xff] }
 0x23a   : > { %v848_v47 = vpop.xlane.xlu2 %847  ;;  %1191 = vmatpush.bf16.msra.mxu1 %v2259_v44  ;;  %2406 = vmatpush.bf16.msra.mxu3 %v2259_v44 }
 0x23b   : > { %1457 = vst.msk [vmem:[#allocation3 + $0x50] sm:$0xff] %vm1286_vm1, %v2966_v46  ;;  %v2971_v48 = vmax.f32 %v2963_v45, %v848_v47  ;;  %985 = vperm.xlu2 %2497, %v2966_v46   ;;  %v895_v19 = vsub.f32 %v2961_v43, %v2966_v46 }
 0x23d   : > { %1452 = vst.msk [vmem:[#allocation3 + $0x28] sm:$0xff] %vm1286_vm1, %v2971_v48  ;;  %v890_v39 = vsub.f32 %v2963_v45, %v2971_v48  ;;  %v913_v45 = vmul.f32 1.442695, %v891_v18 }
 0x23e   : > { %1192 = vmatpush.bf16.msra.mxu1 %v2258_v37  ;;  %2407 = vmatpush.bf16.msra.mxu3 %v2258_v37 }
 0x242   : > { %v860_v50 = vpop.xlane.xlu2 %859  ;;  %1193 = vmatpush.bf16.msra.mxu1 %v2257_v12  ;;  %2408 = vmatpush.bf16.msra.mxu3 %v2257_v12 }
 0x243   : > { %v2979_v51 = vmax.f32 %v2976_v49, %v860_v50  ;;  %960 = vperm.xlu2 %2497, %v2971_v48   ;;  %v907_v50 = vmul.f32 1.442695, %v888_v11 }
 0x245   : > { %1458 = vst.msk [vmem:[#allocation3 + $0x58] sm:$0xff] %vm1286_vm1, %v2979_v51  ;;  %990 = vperm.xlu1 %2496, %v2979_v51   ;;  %2505 = vpow2.f32 %v907_v50  ;;  %v896_v24 = vsub.f32 %v2976_v49, %v2979_v51 }
 0x246   : > { %2507 = vpow2.f32 %v909_v42  ;;  %1194 = vmatpush.bf16.msra.mxu1 %v2256_v28  ;;  %2409 = vmatpush.bf16.msra.mxu3 %v2256_v28 }
 0x247   : > { %v923_v33 = vmul.f32 1.442695, %v896_v24 }
 0x248   : > { %v862_v53 = vpop.xlane.xlu0 %861 }
 0x249   : > { %v2988_v54 = vmax.f32 %v2985_v52, %v862_v53  ;;  %v911_v53 = vmul.f32 1.442695, %v890_v39 }
 0x24a   : > { %1195 = vmatpush.bf16.msra.mxu1 %v2255_v29  ;;  %2410 = vmatpush.bf16.msra.mxu3 %v2255_v29 }
 0x24b   : > { %1459 = vst.msk [vmem:[#allocation3 + $0x60] sm:$0xff] %vm1286_vm1, %v2988_v54  ;;  %965 = vperm.xlu2 %2497, %v2900_v17   ;;  %2509 = vpow2.f32 %v911_v53  ;;  %v917_v17 = vmul.f32 1.442695, %v893_v32  ;;  %v921_v32 = vmul.f32 1.442695, %v895_v19 }
 0x24c   : > { %2511 = vpow2.f32 %v913_v45 }
 0x24d   : > { %995 = vperm.xlu1 %2496, %v2988_v54   ;;  %2513 = vpow2.f32 %v915_v15 }
 0x24e   : > { %2515 = vpow2.f32 %v917_v17  ;;  %1196 = vmatpush.bf16.msra.mxu1 %v2254_v27  ;;  %2411 = vmatpush.bf16.msra.mxu3 %v2254_v27 }
 0x24f   : > { %2517 = vpow2.f32 %v919_v40 }
 0x250   : > { %v864_v56 = vpop.xlane.xlu1 %863  ;;  %2519 = vpow2.f32 %v921_v32 }
 0x251   : > { %v2997_v57 = vmax.f32 %v2994_v55, %v864_v56  ;;  %v3051_v56 = vpop.eup %2501  ;;  %2521 = vpow2.f32 %v923_v33 }
 0x253   : > { %v898_v10 = vsub.f32 %v2994_v55, %v2997_v57  ;;  %1460 = vst.msk [vmem:[#allocation3 + $0x68] sm:$0xff] %vm1286_vm1, %v2997_v57  ;;  %1000 = vperm.xlu0 %2498, %v2997_v57   ;;  %v1303_v55 = vld [vmem:[#allocation5] sm:$0xff] }
 0x255   : > { %970 = vperm.xlu1 %2496, %v2911_v22  }
 0x258   : > { %v866_v20 = vpop.xlane.xlu2 %865 }
 0x259   : > { %v3014_v23 = vmax.f32 %v3011_v16, %v866_v20  ;;  %v3054_v20 = vpop.eup %2503 }
 0x25a   : > { %v3061_v48 = vpop.eup %2505 }
 0x25b   : > { %v899_v35 = vsub.f32 %v3011_v16, %v3014_v23  ;;  %1461 = vst.msk [vmem:[#allocation3 + $0x70] sm:$0xff] %vm1286_vm1, %v3014_v23  ;;  %1005 = vperm.xlu0 %2498, %v3014_v23   ;;  %v3071_v18 = vpop.eup %2507  ;;  %v1304_v16 = vld [vmem:[#allocation5 + $0x18] sm:$0xff]  ;;  %v1238_v23 = vld [vmem:[#allocation4] sm:$0xff] }
 0x25c   : > { %v3074_v36 = vpop.eup %2509 }
 0x25d   : > { %975 = vperm.xlu1 %2496, %v2931_v31   ;;  %v3083_v22 = vpop.eup %2511  ;;  %v897_v31 = vsub.f32 %v2985_v52, %v2988_v54 }
 0x25f   : > { %v925_v43 = vmul.f32 1.442695, %v897_v31 }
 0x260   : > { %v868_v25 = vpop.xlane.xlu0 %867 }
 0x261   : > { %v3035_v47 = vmax.f32 %v3031_v13, %v868_v25  ;;  %2523 = vpow2.f32 %v925_v43 }
 0x263   : > { %v900_v30 = vsub.f32 %v3031_v13, %v3035_v47  ;;  %1462 = vst.msk [vmem:[#allocation3 + $0x78] sm:$0xff] %vm1286_vm1, %v3035_v47  ;;  %1010 = vperm.xlu2 %2497, %v3035_v47   ;;  %980 = vperm.xlu0 %2498, %v2947_v38   ;;  %v3091_v38 = vpop.eup %2513  ;;  %v929_v13 = vmul.f32 1.442695, %v899_v35 }
 0x264   : > { %v3093_v41 = vpop.eup %2515 }
 0x265   : > { %1321 = vperm.xlu1 %2496, %v3045_v34   ;;  %v3097_v46 = vpop.eup %2517 }
 0x266   : > { %v3100_v49 = vpop.eup %2519 }
 0x267   : > { %v3102_v51 = vpop.eup %2521 }
 0x268   : > { %v3106_v52 = vpop.eup %2523 }
 0x26b   : > { %1326 = vperm.xlu2 %2497, %v3051_v56   ;;  %1331 = vperm.xlu0 %2498, %v3054_v20  }
 0x26d   : > { %1336 = vperm.xlu1 %2496, %v3061_v48  }
 0x273   : > { %1346 = vperm.xlu2 %2497, %v3074_v36   ;;  %1341 = vperm.xlu0 %2498, %v3071_v18  }
 0x275   : > { %1351 = vperm.xlu1 %2496, %v3083_v22  }
 0x27b   : > { %1361 = vperm.xlu2 %2497, %v3093_v41   ;;  %1356 = vperm.xlu0 %2498, %v3091_v38  }
 0x27d   : > { %1366 = vperm.xlu1 %2496, %v3097_v46  }
 0x27f   : > { %v941_v54 = vpop.permute.xlu2 %940 }
 0x280   : > { %v1014_v14 = vsub.f32 %v2844_v60, %v941_v54 }
 0x283   : > { %1376 = vperm.xlu2 %2497, %v3102_v51   ;;  %1371 = vperm.xlu0 %2498, %v3100_v49  }
 0x285   : > { %1381 = vperm.xlu1 %2496, %v3106_v52  }
 0x287   : > { %v936_v11 = vpop.permute.xlu1 %935 }
 0x288   : > { %v1013_v21 = vsub.f32 %v2839_v58, %v936_v11 }
 0x28a   : > { %v1029_v25 = vpack.c.bf16 %v1014_v14, %v1013_v21 }
 0x28c   : > { %v1037_v44 = vunpack.c.l.bf16 %v1029_v25  ;;  %v1038_v50 = vunpack.c.h.bf16 %v1029_v25 }
 0x28d   : > { %v951_v37 = vpop.permute.xlu2 %950 }
 0x28e   : > { %v1053_v26 = vmul.f32 1.442695, %v1037_v44  ;;  %v1055_v39 = vmul.f32 1.442695, %v1038_v50  ;;  %v1016_v15 = vsub.f32 %v2857_v0, %v951_v37 }
 0x290   : > { %2525 = vpow2.f32 %v1053_v26 }
 0x291   : > { %2527 = vpow2.f32 %v1055_v39 }
 0x295   : > { %v986_v45 = vpop.permute.xlu2 %985 }
 0x296   : > { %v2526_v42 = vpop.eup %2525 }
 0x297   : > { %v2528_v53 = vpop.eup %2527 }
 0x298   : > { %v1085_v12 = vpack.c.bf16 %v2528_v53, %v2526_v42 }
 0x29a   : > { %1197 = vmatmul.bf16.vlgmr.msra.gmra.mxu1 %v1085_v12  ;;  %v1093_v43 = vunpack.c.l.bf16 %v1085_v12  ;;  %v1094_v14 = vunpack.c.h.bf16 %v1085_v12 }
 0x29d   : > { %v946_v28 = vpop.permute.xlu0 %945  ;;  %v961_v24 = vpop.permute.xlu2 %960 }
 0x29e   : > { %v1015_v60 = vsub.f32 %v2850_v62, %v946_v28  ;;  %v1018_v31 = vsub.f32 %v2869_v4, %v961_v24  ;;  %v1023_v4 = vsub.f32 %v2866_v3, %v986_v45 }
 0x2a0   : > { %v1030_v17 = vpack.c.bf16 %v1016_v15, %v1015_v60 }
 0x2a2   : > { %v1039_v58 = vunpack.c.l.bf16 %v1030_v17  ;;  %v1040_v29 = vunpack.c.h.bf16 %v1030_v17 }
 0x2a4   : > { %v1057_v40 = vmul.f32 1.442695, %v1039_v58  ;;  %v1059_v19 = vmul.f32 1.442695, %v1040_v29 }
 0x2a5   : > { %v966_v58 = vpop.permute.xlu2 %965 }
 0x2a6   : > { %2529 = vpow2.f32 %v1057_v40  ;;  %v1019_v24 = vsub.f32 %v2842_v59, %v966_v58 }
 0x2a7   : > { %2531 = vpow2.f32 %v1059_v19  ;;  %v956_v27 = vpop.permute.xlu1 %955 }
 0x2a8   : > { %v1017_v32 = vsub.f32 %v2863_v2, %v956_v27 }
 0x2aa   : > { %v1031_v33 = vpack.c.bf16 %v1018_v31, %v1017_v32 }
 0x2ac   : > { %v2530_v54 = vpop.eup %2529  ;;  %v1041_v11 = vunpack.c.l.bf16 %v1031_v33  ;;  %1109 = vadd.xlane.f32.xlu2 %v1093_v43  ;;  %v1042_v62 = vunpack.c.h.bf16 %v1031_v33 }
 0x2ad   : > { %v2532_v0 = vpop.eup %2531 }
 0x2ae   : > { %v3115_v21 = vpack.c.bf16 %v2532_v0, %v2530_v54  ;;  %v1061_v25 = vmul.f32 1.442695, %v1041_v11  ;;  %v1063_v44 = vmul.f32 1.442695, %v1042_v62 }
 0x2af   : > { %1111 = vadd.xlane.f32.xlu1 %v1094_v14 }
 0x2b0   : > { %1202 = vmatmul.bf16.gmra.mxu1 %v3115_v21  ;;  %v1096_v50 = vunpack.c.h.bf16 %v3115_v21  ;;  %2533 = vpow2.f32 %v1061_v25 }
 0x2b1   : > { %2535 = vpow2.f32 %v1063_v44 }
 0x2b4   : > { %1115 = vadd.xlane.f32.xlu2 %v1096_v50 }
 0x2b6   : > { %v2534_v39 = vpop.eup %2533 }
 0x2b7   : > { %v991_v2 = vpop.permute.xlu1 %990  ;;  %v2536_v42 = vpop.eup %2535 }
 0x2b8   : > { %v1024_v26 = vsub.f32 %v2872_v5, %v991_v2  ;;  %v3121_v60 = vpack.c.bf16 %v2536_v42, %v2534_v39 }
 0x2ba   : > { %v1034_v37 = vpack.c.bf16 %v1024_v26, %v1023_v4 }
 0x2bc   : > { %v1047_v53 = vunpack.c.l.bf16 %v1034_v37  ;;  %v1048_v12 = vunpack.c.h.bf16 %v1034_v37 }
 0x2bd   : > { %v1011_v11 = vpop.permute.xlu2 %1010 }
 0x2be   : > { %v1073_v28 = vmul.f32 1.442695, %v1047_v53  ;;  %v1075_v15 = vmul.f32 1.442695, %v1048_v12 }
 0x2bf   : > { %v996_v17 = vpop.permute.xlu1 %995 }
 0x2c0   : > { %2537 = vpow2.f32 %v1073_v28  ;;  %1207 = vmatmul.bf16.gmra.mxu1 %v3121_v60  ;;  %v1025_v3 = vsub.f32 %v2875_v6, %v996_v17 }
 0x2c1   : > { %2539 = vpow2.f32 %v1075_v15 }
 0x2c5   : > { %v1001_v29 = vpop.permute.xlu0 %1000 }
 0x2c6   : > { %v2538_v40 = vpop.eup %2537  ;;  %v1026_v5 = vsub.f32 %v2878_v7, %v1001_v29 }
 0x2c7   : > { %v2540_v45 = vpop.eup %2539  ;;  %v971_v19 = vpop.permute.xlu1 %970 }
 0x2c8   : > { %v1035_v27 = vpack.c.bf16 %v1026_v5, %v1025_v3  ;;  %v1020_v31 = vsub.f32 %v2847_v61, %v971_v19  ;;  %v3128_v32 = vpack.c.bf16 %v2540_v45, %v2538_v40  ;;  %v1028_v61 = vsub.f32 %v2884_v9, %v1011_v11 }
 0x2ca   : > { %v1049_v33 = vunpack.c.l.bf16 %v1035_v27  ;;  %v1050_v43 = vunpack.c.h.bf16 %v1035_v27  ;;  %v1032_v54 = vpack.c.bf16 %v1020_v31, %v1019_v24  ;;  %1222 = vmatmul.bf16.vlgmr.msra.gmra.mxu3 %v3128_v32 }
 0x2cc   : > { %v1077_v0 = vmul.f32 1.442695, %v1049_v33  ;;  %v1079_v62 = vmul.f32 1.442695, %v1050_v43  ;;  %v1043_v6 = vunpack.c.l.bf16 %v1032_v54  ;;  %v1044_v14 = vunpack.c.h.bf16 %v1032_v54 }
 0x2cd   : > { %v1006_v7 = vpop.permute.xlu0 %1005 }
 0x2ce   : > { %2541 = vpow2.f32 %v1077_v0  ;;  %v1065_v25 = vmul.f32 1.442695, %v1043_v6  ;;  %v1067_v44 = vmul.f32 1.442695, %v1044_v14  ;;  %v1027_v59 = vsub.f32 %v2881_v8, %v1006_v7 }
 0x2cf   : > { %2543 = vpow2.f32 %v1079_v62  ;;  %v976_v2 = vpop.permute.xlu1 %975  ;;  %v1103_v62 = vunpack.c.l.bf16 %v3128_v32  ;;  %v1098_v14 = vunpack.c.h.bf16 %v3121_v60 }
 0x2d0   : > { %2545 = vpow2.f32 %v1065_v25  ;;  %v1036_v50 = vpack.c.bf16 %v1028_v61, %v1027_v59  ;;  %v1021_v53 = vsub.f32 %v2853_v63, %v976_v2  ;;  %v1097_v63 = vunpack.c.l.bf16 %v3121_v60  ;;  %v1327_v59 = vpop.permute.xlu2 %1326 }
 0x2d1   : > { %2547 = vpow2.f32 %v1067_v44  ;;  %v1104_v44 = vunpack.c.h.bf16 %v3128_v32  ;;  %v1400_v35 = vmul.f32 %v1327_v59, %v1304_v16 }
 0x2d2   : > { %v1051_v39 = vunpack.c.l.bf16 %v1036_v50  ;;  %v1052_v15 = vunpack.c.h.bf16 %v1036_v50 }
 0x2d4   : > { %v2542_v4 = vpop.eup %2541  ;;  %v1081_v9 = vmul.f32 1.442695, %v1051_v39  ;;  %v1083_v45 = vmul.f32 1.442695, %v1052_v15  ;;  %v1254_v15 = vmul.f32 %v3045_v34, %v1238_v23  ;;  %v1305_v34 = vld [vmem:[#allocation5 + $0x50] sm:$0xff] }
 0x2d5   : > { %v2544_v26 = vpop.eup %2543  ;;  %v981_v37 = vpop.permute.xlu0 %980 }
 0x2d6   : > { %v2546_v42 = vpop.eup %2545  ;;  %v1022_v12 = vsub.f32 %v2859_v1, %v981_v37  ;;  %v1091_v58 = vpack.c.bf16 %v2544_v26, %v2542_v4  ;;  %2549 = vpow2.f32 %v1081_v9  ;;  %v1095_v1 = vunpack.c.l.bf16 %v3115_v21 }
 0x2d7   : > { %v2548_v28 = vpop.eup %2547  ;;  %v1322_v21 = vpop.permute.xlu1 %1321  ;;  %v931_v4 = vmul.f32 1.442695, %v900_v30  ;;  %v927_v26 = vmul.f32 1.442695, %v898_v10 }
 0x2d8   : > { %v1033_v17 = vpack.c.bf16 %v1022_v12, %v1021_v53  ;;  %v1088_v8 = vpack.c.bf16 %v2548_v28, %v2546_v42  ;;  %v1106_v7 = vunpack.c.h.bf16 %v1091_v58  ;;  %v1105_v25 = vunpack.c.l.bf16 %v1091_v58  ;;  %v1347_v60 = vpop.permute.xlu2 %1346 }
 0x2d9   : > { %v1399_v57 = vmul.f32 %v1322_v21, %v1303_v55 }
 0x2da   : > { %v1045_v29 = vunpack.c.l.bf16 %v1033_v17  ;;  %v1046_v40 = vunpack.c.h.bf16 %v1033_v17  ;;  %1212 = vmatmul.bf16.gmra.mxu1 %v1088_v8  ;;  %1227 = vmatmul.bf16.gmra.mxu3 %v1091_v58  ;;  %v1100_v3 = vunpack.c.h.bf16 %v1088_v8  ;;  %v1099_v5 = vunpack.c.l.bf16 %v1088_v8  ;;  %v1239_v17 = vld [vmem:[#allocation4 + $0x8] sm:$0xff] }
 0x2dc   : > { %v1069_v19 = vmul.f32 1.442695, %v1045_v29  ;;  %v1071_v24 = vmul.f32 1.442695, %v1046_v40  ;;  %1123 = vadd.xlane.f32.xlu1 %v1100_v3  ;;  %1121 = vadd.xlane.f32.xlu0 %v1099_v5  ;;  %v2550_v27 = vpop.eup %2549  ;;  %v1255_v40 = vmul.f32 %v3051_v56, %v1239_v17  ;;  %v1306_v56 = vld [vmem:[#allocation5 + $0x60] sm:$0xff] }
 0x2dd   : > { %v1242_v17 = vld [vmem:[#allocation4 + $0x20] sm:$0xff] }
 0x2de   : > { %2551 = vpow2.f32 %v1069_v19 }
 0x2df   : > { %2553 = vpow2.f32 %v1071_v24  ;;  %v1337_v50 = vpop.permute.xlu1 %1336 }
 0x2e0   : > { %2555 = vpow2.f32 %v1083_v45  ;;  %v3150_v37 = vpop.permute.xlu2 %1361  ;;  %v1241_v45 = vld [vmem:[#allocation4 + $0x18] sm:$0xff] }
 0x2e1   : > { %2557 = vpow2.f32 %v931_v4  ;;  %v1257_v19 = vmul.f32 %v3061_v48, %v1241_v45  ;;  %v1245_v4 = vld [vmem:[#allocation4 + $0x38] sm:$0xff] }
 0x2e2   : > { %2559 = vpow2.f32 %v927_v26  ;;  %v1244_v26 = vld [vmem:[#allocation4 + $0x30] sm:$0xff] }
 0x2e3   : > { %2561 = vpow2.f32 %v929_v13 }
 0x2e4   : > { %v2552_v31 = vpop.eup %2551  ;;  %1117 = vadd.xlane.f32.xlu1 %v1097_v63  ;;  %1113 = vadd.xlane.f32.xlu0 %v1095_v1  ;;  %v1332_v1 = vpop.permute.xlu0 %1331 }
 0x2e5   : > { %v2554_v33 = vpop.eup %2553 }
 0x2e6   : > { %v2556_v43 = vpop.eup %2555  ;;  %v1089_v54 = vpack.c.bf16 %v2554_v33, %v2552_v31 }
 0x2e7   : > { %v1092_v0 = vpack.c.bf16 %v2556_v43, %v2550_v27  ;;  %v3146_v39 = vpop.permute.xlu1 %1351  ;;  %v3148_v32 = vpop.eup %2557  ;;  %v1401_v27 = vmul.f32 %v1332_v1, %v1305_v34  ;;  %v1246_v1 = vld [vmem:[#allocation4 + $0x40] sm:$0xff] }
 0x2e8   : > { %v1101_v11 = vunpack.c.l.bf16 %v1089_v54  ;;  %v1102_v6 = vunpack.c.h.bf16 %v1089_v54  ;;  %v3153_v42 = vpop.eup %2559  ;;  %v3161_v10 = vpop.permute.xlu2 %1376 }
 0x2e9   : > { %v1108_v61 = vunpack.c.h.bf16 %v1092_v0  ;;  %v1107_v2 = vunpack.c.l.bf16 %v1092_v0  ;;  %v3163_v12 = vpop.eup %2561 }
 0x2ea   : > { %1125 = vadd.xlane.f32.xlu2 %v1101_v11  ;;  %1217 = vmatmul.bf16.gmra.mxu1 %v1089_v54  ;;  %v1402_v54 = vmul.f32 %v1337_v50, %v1306_v56 }
 0x2eb   : > { %1232 = vmatmul.bf16.gmra.mxu3 %v1092_v0 }
 0x2ec   : > { %1129 = vadd.xlane.f32.xlu1 %v1103_v62  ;;  %1127 = vadd.xlane.f32.xlu0 %v1102_v6  ;;  %v1342_v43 = vpop.permute.xlu0 %1341  ;;  %v1307_v62 = vld [vmem:[#allocation5 + $0x68] sm:$0xff] }
 0x2ed   : > { %v1403_v6 = vmul.f32 %v1342_v43, %v1307_v62 }
 0x2ef   : > { %v3158_v47 = vpop.permute.xlu1 %1366 }
 0x2f2   : > { %1119 = vadd.xlane.f32.xlu2 %v1098_v14 }
 0x2f4   : > { %1135 = vadd.xlane.f32.xlu1 %v1106_v7  ;;  %1133 = vadd.xlane.f32.xlu0 %v1105_v25  ;;  %v1357_v14 = vpop.permute.xlu0 %1356  ;;  %v1308_v7 = vld [vmem:[#allocation5 + $0x20] sm:$0xff] }
 0x2f5   : > { %v1404_v25 = vmul.f32 %v1347_v60, %v1308_v7  ;;  %v1314_v60 = vld [vmem:[#allocation5 + $0x8] sm:$0xff] }
 0x2f7   : > { %v3165_v28 = vpop.permute.xlu1 %1381 }
 0x2fa   : > { %1131 = vadd.xlane.f32.xlu2 %v1104_v44 }
 0x2fc   : > { %1139 = vadd.xlane.f32.xlu0 %v1108_v61  ;;  %v1372_v61 = vpop.permute.xlu0 %1371 }
 0x302   : > { %1137 = vadd.xlane.f32.xlu2 %v1107_v2  ;;  %v1313_v2 = vld [vmem:[#allocation5 + $0x38] sm:$0xff] }
 0x303   : > { %v1409_v13 = vmul.f32 %v1372_v61, %v1313_v2 }
 0x30d   : > { %1396 = vperm.xlu1 %2496, %v3148_v32  }
 0x310   : > { %1386 = vperm.xlu0 %2498, %v3153_v42  }
 0x317   : > { %v1198_v30 = vpop.f32.mrf.mxu1 }
 0x318   : > { %v1415_v53 = vadd.f32 %v1399_v57, %v1198_v30  ;;  %v1261_v57 = vmul.f32 %v3091_v38, %v1245_v4  ;;  %v1260_v30 = vmul.f32 %v3083_v22, %v1244_v26  ;;  %v1258_v22 = vmul.f32 %v3071_v18, %v1242_v17 }
 0x319   : > { %v1262_v18 = vmul.f32 %v3093_v41, %v1246_v1  ;;  %v1243_v41 = vld [vmem:[#allocation4 + $0x28] sm:$0xff] }
 0x31a   : > { %1431 = vst [vmem:[#allocation5] sm:$0xff] %v1415_v53  ;;  %1391 = vperm.xlu2 %2497, %v3163_v12  }
 0x31f   : > { %v1200_v8 = vpop.f32.mrf.mxu1  ;;  %v1110_v58 = vpop.xlane.xlu2 %1109 }
 0x320   : > { %v1416_v9 = vadd.f32 %v1400_v35, %v1200_v8  ;;  %v1270_v29 = vadd.f32 %v1254_v15, %v1110_v58  ;;  %v1309_v15 = vld [vmem:[#allocation5 + $0x70] sm:$0xff]  ;;  %v1410_v8 = vmul.f32 %v3161_v10, %v1314_v60 }
 0x321   : > { %v1240_v58 = vld [vmem:[#allocation4 + $0x10] sm:$0xff]  ;;  %v1405_v38 = vmul.f32 %v3146_v39, %v1309_v15 }
 0x322   : > { %1432 = vst [vmem:[#allocation5 + $0x18] sm:$0xff] %v1416_v9  ;;  %v1112_v3 = vpop.xlane.xlu1 %1111  ;;  %v1310_v10 = vld [vmem:[#allocation5 + $0x10] sm:$0xff] }
 0x323   : > { %1287 = vst.msk [vmem:[#allocation4] sm:$0xff] %vm1286_vm1, %v1270_v29  ;;  %v1271_v5 = vadd.f32 %v1255_v40, %v1112_v3  ;;  %v1406_v56 = vmul.f32 %v1357_v14, %v1310_v10  ;;  %v1251_v14 = vld [vmem:[#allocation4 + $0x68] sm:$0xff] }
 0x324   : > { %v1267_v2 = vmul.f32 %v3153_v42, %v1251_v14  ;;  %v1253_v42 = vld [vmem:[#allocation4 + $0x78] sm:$0xff] }
 0x325   : > { %1288 = vst.msk [vmem:[#allocation4 + $0x8] sm:$0xff] %vm1286_vm1, %v1271_v5  ;;  %v1256_v5 = vmul.f32 %v3054_v20, %v1240_v58  ;;  %v1269_v15 = vmul.f32 %v3148_v32, %v1253_v42 }
 0x327   : > { %v1116_v24 = vpop.xlane.xlu2 %1115 }
 0x328   : > { %v1273_v63 = vadd.f32 %v1257_v19, %v1116_v24 }
 0x32a   : > { %1290 = vst.msk [vmem:[#allocation4 + $0x18] sm:$0xff] %vm1286_vm1, %v1273_v63  ;;  %v1315_v63 = vld [vmem:[#allocation5 + $0x58] sm:$0xff] }
 0x32b   : > { %v1411_v39 = vmul.f32 %v3165_v28, %v1315_v63 }
 0x32d   : > { %v1203_v31 = vpop.f32.mrf.mxu1 }
 0x32e   : > { %v1417_v33 = vadd.f32 %v1401_v27, %v1203_v31  ;;  %v1248_v27 = vld [vmem:[#allocation4 + $0x50] sm:$0xff]  ;;  %v1247_v31 = vld [vmem:[#allocation4 + $0x48] sm:$0xff] }
 0x330   : > { %1433 = vst [vmem:[#allocation5 + $0x50] sm:$0xff] %v1417_v33 }
 0x335   : > { %v1205_v11 = vpop.f32.mrf.mxu1 }
 0x336   : > { %v1418_v0 = vadd.f32 %v1402_v54, %v1205_v11  ;;  %v1264_v11 = vmul.f32 %v3100_v49, %v1248_v27  ;;  %v1259_v49 = vmul.f32 %v3074_v36, %v1243_v41  ;;  %v1312_v36 = vld [vmem:[#allocation5 + $0x40] sm:$0xff] }
 0x338   : > { %1434 = vst [vmem:[#allocation5 + $0x60] sm:$0xff] %v1418_v0 }
 0x33d   : > { %v1208_v48 = vpop.f32.mrf.mxu1 }
 0x33e   : > { %v1419_v21 = vadd.f32 %v1403_v6, %v1208_v48  ;;  %v1263_v6 = vmul.f32 %v3097_v46, %v1247_v31 }
 0x340   : > { %1435 = vst [vmem:[#allocation5 + $0x68] sm:$0xff] %v1419_v21 }
 0x345   : > { %v1210_v44 = vpop.f32.mrf.mxu1 }
 0x346   : > { %v1420_v59 = vadd.f32 %v1404_v25, %v1210_v44  ;;  %v1311_v25 = vld [vmem:[#allocation5 + $0x28] sm:$0xff]  ;;  %v1250_v44 = vld [vmem:[#allocation4 + $0x60] sm:$0xff] }
 0x347   : > { %v1407_v46 = vmul.f32 %v3150_v37, %v1311_v25 }
 0x348   : > { %1436 = vst [vmem:[#allocation5 + $0x20] sm:$0xff] %v1420_v59 }
 0x34d   : > { %v1223_v50 = vpop.f32.mrf.mxu3 }
 0x34e   : > { %v1425_v55 = vadd.f32 %v1409_v13, %v1223_v50  ;;  %v1266_v13 = vmul.f32 %v3106_v52, %v1250_v44  ;;  %v1408_v52 = vmul.f32 %v3158_v47, %v1312_v36  ;;  %v1317_v47 = vld [vmem:[#allocation5 + $0x78] sm:$0xff] }
 0x34f   : > { %v1124_v53 = vpop.xlane.xlu1 %1123  ;;  %v1122_v16 = vpop.xlane.xlu0 %1121 }
 0x350   : > { %1441 = vst [vmem:[#allocation5 + $0x38] sm:$0xff] %v1425_v55  ;;  %v1277_v23 = vadd.f32 %v1261_v57, %v1124_v53  ;;  %v1276_v35 = vadd.f32 %v1260_v30, %v1122_v16  ;;  %v1249_v53 = vld [vmem:[#allocation4 + $0x58] sm:$0xff] }
 0x351   : > { %v1265_v37 = vmul.f32 %v3102_v51, %v1249_v53 }
 0x352   : > { %1294 = vst.msk [vmem:[#allocation4 + $0x38] sm:$0xff] %vm1286_vm1, %v1277_v23 }
 0x353   : > { %1293 = vst.msk [vmem:[#allocation4 + $0x30] sm:$0xff] %vm1286_vm1, %v1276_v35 }
 0x355   : > { %v1225_v9 = vpop.f32.mrf.mxu3 }
 0x356   : > { %v1426_v29 = vadd.f32 %v1410_v8, %v1225_v9  ;;  %v1252_v9 = vld [vmem:[#allocation4 + $0x70] sm:$0xff] }
 0x357   : > { %v1213_v40 = vpop.f32.mrf.mxu1  ;;  %v1118_v3 = vpop.xlane.xlu1 %1117  ;;  %v1268_v51 = vmul.f32 %v3163_v12, %v1252_v9 }
 0x358   : > { %1442 = vst [vmem:[#allocation5 + $0x8] sm:$0xff] %v1426_v29  ;;  %v1421_v45 = vadd.f32 %v1405_v38, %v1213_v40  ;;  %v1274_v19 = vadd.f32 %v1258_v22, %v1118_v3  ;;  %v1114_v24 = vpop.xlane.xlu0 %1113  ;;  %v1318_v3 = vld [vmem:[#allocation5 + $0x30] sm:$0xff] }
 0x359   : > { %v1272_v34 = vadd.f32 %v1256_v5, %v1114_v24  ;;  %v1316_v24 = vld [vmem:[#allocation5 + $0x48] sm:$0xff] }
 0x35a   : > { %1437 = vst [vmem:[#allocation5 + $0x70] sm:$0xff] %v1421_v45 }
 0x35b   : > { %1291 = vst.msk [vmem:[#allocation4 + $0x20] sm:$0xff] %vm1286_vm1, %v1274_v19 }
 0x35c   : > { %1289 = vst.msk [vmem:[#allocation4 + $0x10] sm:$0xff] %vm1286_vm1, %v1272_v34 }
 0x35d   : > { %v1228_v20 = vpop.f32.mrf.mxu3  ;;  %v1126_v33 = vpop.xlane.xlu2 %1125 }
 0x35e   : > { %v1427_v43 = vadd.f32 %v1411_v39, %v1228_v20  ;;  %v1278_v54 = vadd.f32 %v1262_v18, %v1126_v33 }
 0x35f   : > { %v1215_v0 = vpop.f32.mrf.mxu1  ;;  %v1130_v62 = vpop.xlane.xlu1 %1129 }
 0x360   : > { %1443 = vst [vmem:[#allocation5 + $0x58] sm:$0xff] %v1427_v43  ;;  %v1422_v48 = vadd.f32 %v1406_v56, %v1215_v0  ;;  %v1280_v21 = vadd.f32 %v1264_v11, %v1130_v62  ;;  %v1128_v28 = vpop.xlane.xlu0 %1127 }
 0x361   : > { %1295 = vst.msk [vmem:[#allocation4 + $0x40] sm:$0xff] %vm1286_vm1, %v1278_v54  ;;  %v1279_v7 = vadd.f32 %v1263_v6, %v1128_v28 }
 0x362   : > { %1438 = vst [vmem:[#allocation5 + $0x10] sm:$0xff] %v1422_v48 }
 0x363   : > { %1297 = vst.msk [vmem:[#allocation4 + $0x50] sm:$0xff] %vm1286_vm1, %v1280_v21 }
 0x364   : > { %1296 = vst.msk [vmem:[#allocation4 + $0x48] sm:$0xff] %vm1286_vm1, %v1279_v7 }
 0x365   : > { %v1120_v59 = vpop.xlane.xlu2 %1119  ;;  %v1230_v16 = vpop.f32.mrf.mxu3 }
 0x366   : > { %v1275_v61 = vadd.f32 %v1259_v49, %v1120_v59 }
 0x367   : > { %v1218_v4 = vpop.f32.mrf.mxu1  ;;  %v1136_v26 = vpop.xlane.xlu1 %1135 }
 0x368   : > { %1292 = vst.msk [vmem:[#allocation4 + $0x28] sm:$0xff] %vm1286_vm1, %v1275_v61  ;;  %v1423_v50 = vadd.f32 %v1407_v46, %v1218_v4  ;;  %v1283_v55 = vadd.f32 %v1267_v2, %v1136_v26  ;;  %v1134_v57 = vpop.xlane.xlu0 %1133 }
 0x369   : > { %v1282_v30 = vadd.f32 %v1266_v13, %v1134_v57 }
 0x36a   : > { %1439 = vst [vmem:[#allocation5 + $0x28] sm:$0xff] %v1423_v50 }
 0x36b   : > { %1300 = vst.msk [vmem:[#allocation4 + $0x68] sm:$0xff] %vm1286_vm1, %v1283_v55 }
 0x36c   : > { %1299 = vst.msk [vmem:[#allocation4 + $0x60] sm:$0xff] %vm1286_vm1, %v1282_v30 }
 0x36d   : > { %v1132_v23 = vpop.xlane.xlu2 %1131 }
 0x36e   : > { %v1281_v35 = vadd.f32 %v1265_v37, %v1132_v23  ;;  %v1233_v22 = vpop.f32.mrf.mxu3 }
 0x36f   : > { %v1220_v60 = vpop.f32.mrf.mxu1 }
 0x370   : > { %1298 = vst.msk [vmem:[#allocation4 + $0x58] sm:$0xff] %vm1286_vm1, %v1281_v35  ;;  %v1424_v17 = vadd.f32 %v1408_v52, %v1220_v60  ;;  %v1140_v8 = vpop.xlane.xlu0 %1139 }
 0x371   : > { %v1285_v58 = vadd.f32 %v1269_v15, %v1140_v8 }
 0x372   : > { %1440 = vst [vmem:[#allocation5 + $0x40] sm:$0xff] %v1424_v17 }
 0x373   : > { %1302 = vst.msk [vmem:[#allocation4 + $0x78] sm:$0xff] %vm1286_vm1, %v1285_v58 }
 0x375   : > { %v1138_v38 = vpop.xlane.xlu2 %1137 }
 0x376   : > { %v1284_v29 = vadd.f32 %v1268_v51, %v1138_v38  ;;  %v1235_v63 = vpop.f32.mrf.mxu3 }
 0x378   : > { %1301 = vst.msk [vmem:[#allocation4 + $0x70] sm:$0xff] %vm1286_vm1, %v1284_v29 }
 0x37d   : > { %v1392_v40 = vpop.permute.xlu2 %1391 }
 0x37e   : > { %v1413_v32 = vmul.f32 %v1392_v40, %v1317_v47 }
 0x37f   : > { %v1397_v5 = vpop.permute.xlu1 %1396 }
 0x380   : > { %v1429_v45 = vadd.f32 %v1413_v32, %v1233_v22  ;;  %v1414_v19 = vmul.f32 %v1397_v5, %v1318_v3 }
 0x382   : > { %1445 = vst [vmem:[#allocation5 + $0x78] sm:$0xff] %v1429_v45  ;;  %v1430_v34 = vadd.f32 %v1414_v19, %v1235_v63  ;;  %v1387_v1 = vpop.permute.xlu0 %1386 }
 0x383   : > { %v1412_v10 = vmul.f32 %v1387_v1, %v1316_v24  ;;  %1466 = sbr.rel (%p2193_p10) target bundleno = 1237 (0x4d5), region = 48 }
 0x384   : > { %1446 = vst [vmem:[#allocation5 + $0x30] sm:$0xff] %v1430_v34 }
 0x385   : > { %v1428_v12 = vadd.f32 %v1412_v10, %v1230_v16 }
 0x387   : > { %1444 = vst [vmem:[#allocation5 + $0x48] sm:$0xff] %v1428_v12 }
 0x388   : > { %v1491_v27 = vld [vmem:[#allocation4 + $0x40] sm:$0xff]  ;;  %v2657_v31 = vmov 0   ;;  %v1492_v20 = vld [vmem:[#allocation4 + $0x48] sm:$0xff]  ;;  %v1486_v6 = vld [vmem:[#allocation4 + $0x18] sm:$0xff]  ;;  %vm1838_vm2 = vcmask 1040384  }
 0x389   : > { %v1487_v39 = vld [vmem:[#allocation4 + $0x20] sm:$0xff]  ;;  %2565 = vset.pattern.permute.xlu2 %v2657_v31  ;;  %2564 = vset.pattern.permute.xlu1 %v2657_v31  ;;  %2566 = vrcp.f32 %v1491_v27  ;;  %v1488_v33 = vld [vmem:[#allocation4 + $0x28] sm:$0xff]  ;;  %v1485_v21 = vld [vmem:[#allocation4 + $0x10] sm:$0xff] }
 0x38a   : > { %v1483_v18 = vld [vmem:[#allocation4] sm:$0xff]  ;;  %2563 = vset.pattern.permute.xlu0 %v2657_v31  ;;  %2568 = vrcp.f32 %v1487_v39  ;;  %v1484_v56 = vld [vmem:[#allocation4 + $0x8] sm:$0xff]  ;;  %v2277_v7 = vld [vmem:[%s3264_s4 + $0x38] sm:$0xff] }
 0x38b   : > { %2570 = vrcp.f32 %v1483_v18  ;;  %v1495_v0 = vld [vmem:[#allocation4 + $0x60] sm:$0xff]  ;;  %v1490_v41 = vld [vmem:[#allocation4 + $0x38] sm:$0xff]  ;;  %2413 = vmatpush.bf16.msra.mxu2 %v2277_v7  ;;  %1683 = vmatpush.bf16.msra.mxu0 %v2277_v7  ;;  %v1489_v14 = vld [vmem:[#allocation4 + $0x30] sm:$0xff] }
 0x38c   : > { %2572 = vrcp.f32 %v1492_v20  ;;  %2412 = vmatpush.bf16.msra.mxu1 %v2277_v7  ;;  %2414 = vmatpush.bf16.msra.mxu3 %v2277_v7  ;;  %v1496_v44 = vld [vmem:[#allocation4 + $0x68] sm:$0xff]  ;;  %v1497_v46 = vld [vmem:[#allocation4 + $0x70] sm:$0xff]  ;;  %v1494_v2 = vld [vmem:[#allocation4 + $0x58] sm:$0xff] }
 0x38d   : > { %2574 = vrcp.f32 %v1488_v33  ;;  %v1493_v26 = vld [vmem:[#allocation4 + $0x50] sm:$0xff]  ;;  %v1498_v57 = vld [vmem:[#allocation4 + $0x78] sm:$0xff]  ;;  %v2275_v37 = vld [vmem:[%s3264_s4 + $0x28] sm:$0xff] }
 0x38e   : > { %2576 = vrcp.f32 %v1484_v56  ;;  %v2276_v36 = vld [vmem:[%s3264_s4 + $0x30] sm:$0xff]  ;;  %v2274_v42 = vld [vmem:[%s3264_s4 + $0x20] sm:$0xff]  ;;  %v2273_v16 = vld [vmem:[%s3264_s4 + $0x18] sm:$0xff] }
 0x38f   : > { %v2567_v43 = vpop.eup %2566  ;;  %2578 = vrcp.f32 %v1495_v0  ;;  %2416 = vmatpush.bf16.msra.mxu2 %v2276_v36  ;;  %1684 = vmatpush.bf16.msra.mxu0 %v2276_v36  ;;  %v2272_v23 = vld [vmem:[%s3264_s4 + $0x10] sm:$0xff]  ;;  %v2271_v52 = vld [vmem:[%s3264_s4 + $0x8] sm:$0xff]  ;;  %v2270_v35 = vld [vmem:[%s3264_s4] sm:$0xff] }
 0x390   : > { %v2569_v54 = vpop.eup %2568  ;;  %1557 = vperm.xlu2 %2565, %v2567_v43   ;;  %2580 = vrcp.f32 %v1486_v6  ;;  %2415 = vmatpush.bf16.msra.mxu1 %v2276_v36  ;;  %v1475_v15 = vld [vmem:[#allocation5 + $0x28] sm:$0xff]  ;;  %v1476_v17 = vld [vmem:[#allocation5 + $0x40] sm:$0xff]  ;;  %v1468_v3 = vld [vmem:[#allocation5 + $0x18] sm:$0xff] }
 0x391   : > { %v2571_v11 = vpop.eup %2570  ;;  %1537 = vperm.xlu1 %2564, %v2569_v54   ;;  %2582 = vrcp.f32 %v1485_v21  ;;  %2417 = vmatpush.bf16.msra.mxu3 %v2276_v36  ;;  %v1471_v22 = vld [vmem:[#allocation5 + $0x68] sm:$0xff]  ;;  %v1472_v47 = vld [vmem:[#allocation5 + $0x20] sm:$0xff]  ;;  %v1469_v18 = vld [vmem:[#allocation5 + $0x50] sm:$0xff] }
 0x392   : > { %1517 = vperm.xlu0 %2563, %v2571_v11   ;;  %v2573_v62 = vpop.eup %2572  ;;  %2584 = vrcp.f32 %v1490_v41  ;;  %v1467_v40 = vld [vmem:[#allocation5] sm:$0xff]  ;;  %v1474_v31 = vld [vmem:[#allocation5 + $0x10] sm:$0xff]  ;;  %v1479_v33 = vld [vmem:[#allocation5 + $0x58] sm:$0xff] }
 0x393   : > { %v2575_v48 = vpop.eup %2574  ;;  %2586 = vrcp.f32 %v1489_v14  ;;  %2419 = vmatpush.bf16.msra.mxu2 %v2275_v37  ;;  %1685 = vmatpush.bf16.msra.mxu0 %v2275_v37  ;;  %v1470_v39 = vld [vmem:[#allocation5 + $0x60] sm:$0xff]  ;;  %v1473_v20 = vld [vmem:[#allocation5 + $0x70] sm:$0xff]  ;;  %v1480_v56 = vld [vmem:[#allocation5 + $0x48] sm:$0xff] }
 0x394   : > { %v2577_v28 = vpop.eup %2576  ;;  %2588 = vrcp.f32 %v1496_v44  ;;  %2418 = vmatpush.bf16.msra.mxu1 %v2275_v37  ;;  %v1478_v14 = vld [vmem:[#allocation5 + $0x8] sm:$0xff] }
 0x395   : > { %v2579_v25 = vpop.eup %2578  ;;  %2590 = vrcp.f32 %v1497_v46  ;;  %2420 = vmatpush.bf16.msra.mxu3 %v2275_v37 }
 0x396   : > { %v2581_v49 = vpop.eup %2580  ;;  %2592 = vrcp.f32 %v1494_v2 }
 0x397   : > { %v2583_v59 = vpop.eup %2582  ;;  %2594 = vrcp.f32 %v1493_v26  ;;  %2422 = vmatpush.bf16.msra.mxu2 %v2274_v42  ;;  %1686 = vmatpush.bf16.msra.mxu0 %v2274_v42  ;;  %v1481_v26 = vld [vmem:[#allocation5 + $0x78] sm:$0xff] }
 0x398   : > { %1562 = vperm.xlu2 %2565, %v2573_v62   ;;  %v2585_v61 = vpop.eup %2584  ;;  %2596 = vrcp.f32 %v1498_v57  ;;  %2421 = vmatpush.bf16.msra.mxu1 %v2274_v42 }
 0x399   : > { %1542 = vperm.xlu1 %2564, %v2575_v48   ;;  %v2587_v4 = vpop.eup %2586  ;;  %2423 = vmatpush.bf16.msra.mxu3 %v2274_v42 }
 0x39a   : > { %1522 = vperm.xlu0 %2563, %v2577_v28   ;;  %v2589_v13 = vpop.eup %2588 }
 0x39b   : > { %v2591_v50 = vpop.eup %2590  ;;  %2425 = vmatpush.bf16.msra.mxu2 %v2273_v16  ;;  %1687 = vmatpush.bf16.msra.mxu0 %v2273_v16 }
 0x39c   : > { %v2593_v55 = vpop.eup %2592  ;;  %2424 = vmatpush.bf16.msra.mxu1 %v2273_v16 }
 0x39d   : > { %v2595_v30 = vpop.eup %2594  ;;  %2426 = vmatpush.bf16.msra.mxu3 %v2273_v16 }
 0x39e   : > { %v2597_v53 = vpop.eup %2596 }
 0x39f   : > { %2428 = vmatpush.bf16.msra.mxu2 %v2272_v23  ;;  %1688 = vmatpush.bf16.msra.mxu0 %v2272_v23 }
 0x3a0   : > { %1577 = vperm.xlu2 %2565, %v2579_v25   ;;  %2427 = vmatpush.bf16.msra.mxu1 %v2272_v23 }
 0x3a1   : > { %1532 = vperm.xlu1 %2564, %v2581_v49   ;;  %2429 = vmatpush.bf16.msra.mxu3 %v2272_v23  ;;  %v1477_v49 = vld [vmem:[#allocation5 + $0x38] sm:$0xff] }
 0x3a2   : > { %1527 = vperm.xlu0 %2563, %v2583_v59  }
 0x3a3   : > { %2431 = vmatpush.bf16.msra.mxu2 %v2271_v52  ;;  %1689 = vmatpush.bf16.msra.mxu0 %v2271_v52 }
 0x3a4   : > { %2430 = vmatpush.bf16.msra.mxu1 %v2271_v52 }
 0x3a5   : > { %2432 = vmatpush.bf16.msra.mxu3 %v2271_v52 }
 0x3a7   : > { %2434 = vmatpush.bf16.msra.mxu2 %v2270_v35  ;;  %1690 = vmatpush.bf16.msra.mxu0 %v2270_v35 }
 0x3a8   : > { %1552 = vperm.xlu2 %2565, %v2585_v61   ;;  %2433 = vmatpush.bf16.msra.mxu1 %v2270_v35 }
 0x3a9   : > { %1547 = vperm.xlu1 %2564, %v2587_v4   ;;  %2435 = vmatpush.bf16.msra.mxu3 %v2270_v35 }
 0x3aa   : > { %1582 = vperm.xlu0 %2563, %v2589_v13   ;;  %v1482_v13 = vld [vmem:[#allocation5 + $0x30] sm:$0xff] }
 0x3b0   : > { %1587 = vperm.xlu2 %2565, %v2591_v50  }
 0x3b1   : > { %1572 = vperm.xlu1 %2564, %v2593_v55  }
 0x3b2   : > { %1567 = vperm.xlu0 %2563, %v2595_v30  }
 0x3ba   : > { %1592 = vperm.xlu0 %2563, %v2597_v53  }
 0x3ea   : > { %v1558_v60 = vpop.permute.xlu2 %1557 }
 0x3eb   : > { %v1603_v8 = vmul.f32 %v1558_v60, %v1475_v15 }
 0x3f2   : > { %v1563_v58 = vpop.permute.xlu2 %1562 }
 0x3f3   : > { %v1604_v9 = vmul.f32 %v1563_v58, %v1476_v17 }
 0x3f5   : > { %v1615_v51 = vpack.c.bf16 %v1604_v9, %v1603_v8 }
 0x3f7   : > { %1711 = vmatmul.bf16.vlgmr.msra.gmra.mxu2 %v1615_v51 }
 0x3fa   : > { %v1578_v10 = vpop.permute.xlu2 %1577 }
 0x3fb   : > { %v1607_v21 = vmul.f32 %v1578_v10, %v1479_v33 }
 0x402   : > { %v1553_v43 = vpop.permute.xlu2 %1552 }
 0x403   : > { %v1538_v38 = vpop.permute.xlu1 %1537  ;;  %v1602_v62 = vmul.f32 %v1553_v43, %v1474_v31 }
 0x404   : > { %v1518_v29 = vpop.permute.xlu0 %1517  ;;  %v1599_v5 = vmul.f32 %v1538_v38, %v1471_v22 }
 0x405   : > { %v1595_v24 = vmul.f32 %v1518_v29, %v1467_v40 }
 0x40a   : > { %v1588_v4 = vpop.permute.xlu2 %1587 }
 0x40b   : > { %v1543_v32 = vpop.permute.xlu1 %1542  ;;  %v1609_v55 = vmul.f32 %v1588_v4, %v1481_v26 }
 0x40c   : > { %v1600_v45 = vmul.f32 %v1543_v32, %v1472_v47  ;;  %v1523_v19 = vpop.permute.xlu0 %1522 }
 0x40d   : > { %v1596_v63 = vmul.f32 %v1523_v19, %v1468_v3 }
 0x40e   : > { %v1613_v34 = vpack.c.bf16 %v1600_v45, %v1599_v5 }
 0x40f   : > { %v1611_v1 = vpack.c.bf16 %v1596_v63, %v1595_v24 }
 0x410   : > { %1701 = vmatmul.bf16.vlgmr.msra.gmra.mxu1 %v1613_v34 }
 0x411   : > { %1691 = vmatmul.bf16.vlgmr.msra.gmra.mxu0 %v1611_v1 }
 0x413   : > { %v1533_v12 = vpop.permute.xlu1 %1532 }
 0x414   : > { %v1528_v27 = vpop.permute.xlu0 %1527  ;;  %v1598_v54 = vmul.f32 %v1533_v12, %v1470_v39 }
 0x415   : > { %v1597_v11 = vmul.f32 %v1528_v27, %v1469_v18 }
 0x417   : > { %v1612_v41 = vpack.c.bf16 %v1598_v54, %v1597_v11 }
 0x41b   : > { %v1548_v0 = vpop.permute.xlu1 %1547 }
 0x41c   : > { %v1601_v6 = vmul.f32 %v1548_v0, %v1473_v20  ;;  %v1583_v48 = vpop.permute.xlu0 %1582 }
 0x41d   : > { %v1608_v28 = vmul.f32 %v1583_v48, %v1480_v56 }
 0x41e   : > { %v1614_v7 = vpack.c.bf16 %v1602_v62, %v1601_v6 }
 0x41f   : > { %v1617_v25 = vpack.c.bf16 %v1608_v28, %v1607_v21 }
 0x420   : > { %1706 = vmatmul.bf16.gmra.mxu1 %v1614_v7 }
 0x421   : > { %1696 = vmatmul.bf16.gmra.mxu0 %v1612_v41  ;;  %1721 = vmatmul.bf16.vlgmr.msra.gmra.mxu3 %v1617_v25 }
 0x423   : > { %v1573_v44 = vpop.permute.xlu1 %1572 }
 0x424   : > { %v1606_v59 = vmul.f32 %v1573_v44, %v1478_v14  ;;  %v1568_v46 = vpop.permute.xlu0 %1567 }
 0x425   : > { %v1605_v61 = vmul.f32 %v1568_v46, %v1477_v49 }
 0x427   : > { %v1616_v2 = vpack.c.bf16 %v1606_v59, %v1605_v61 }
 0x429   : > { %1716 = vmatmul.bf16.gmra.mxu2 %v1616_v2 }
 0x42c   : > { %v1593_v50 = vpop.permute.xlu0 %1592 }
 0x42d   : > { %v1610_v57 = vmul.f32 %v1593_v50, %v1482_v13 }
 0x42f   : > { %v1618_v30 = vpack.c.bf16 %v1610_v57, %v1609_v55 }
 0x431   : > { %1726 = vmatmul.bf16.gmra.mxu3 %v1618_v30 }
 0x47a   : > { %v1712_v53 = vpop.f32.mrf.mxu2 }
 0x47b   : > { %v1740_v54 = vpack.c.bf16 %v1712_v53, %v1712_v53 }
 0x47d   : > { %v1772_v44 = vunpack.c.l.bf16 %v1740_v54 }
 0x47f   : > { %v1809_v55 = vmul.f32 %v1772_v44, %v1772_v44 }
 0x482   : > { %v1714_v36 = vpop.f32.mrf.mxu2 }
 0x483   : > { %v2341_v37 = vpack.c.bf16 %v1714_v36, %v1712_v53  ;;  %v1741_v28 = vpack.c.bf16 %v1714_v36, %v1714_v36 }
 0x485   : > { %2368 = vst [vmem:[%s2759_s7 + $0x20] sm:$0xff] %v2341_v37   ;;  %v1773_v4 = vunpack.c.l.bf16 %v1741_v28 }
 0x48d   : > { %v1702_v42 = vpop.f32.mrf.mxu1 }
 0x48e   : > { %v1692_v16 = vpop.f32.mrf.mxu0  ;;  %v1736_v22 = vpack.c.bf16 %v1702_v42, %v1702_v42 }
 0x48f   : > { %v1732_v8 = vpack.c.bf16 %v1692_v16, %v1692_v16 }
 0x490   : > { %v1768_v10 = vunpack.c.l.bf16 %v1736_v22 }
 0x491   : > { %v1764_v38 = vunpack.c.l.bf16 %v1732_v8 }
 0x492   : > { %v1805_v62 = vmul.f32 %v1768_v10, %v1768_v10 }
 0x493   : > { %v1801_v32 = vmul.f32 %v1764_v38, %v1764_v38 }
 0x495   : > { %v1704_v23 = vpop.f32.mrf.mxu1 }
 0x496   : > { %v1694_v52 = vpop.f32.mrf.mxu0  ;;  %v2331_v35 = vpack.c.bf16 %v1704_v23, %v1702_v42  ;;  %v1737_v5 = vpack.c.bf16 %v1704_v23, %v1704_v23 }
 0x497   : > { %v2321_v60 = vpack.c.bf16 %v1694_v52, %v1692_v16  ;;  %v1733_v15 = vpack.c.bf16 %v1694_v52, %v1694_v52  ;;  %v1810_v52 = vmul.f32 %v1773_v4, %v1773_v4 }
 0x498   : > { %2366 = vst [vmem:[%s2759_s7 + $0x10] sm:$0xff] %v2331_v35   ;;  %v1769_v31 = vunpack.c.l.bf16 %v1737_v5 }
 0x499   : > { %2322 = vst [vmem:[%s2759_s7] sm:$0xff] %v2321_v60   ;;  %v1765_v51 = vunpack.c.l.bf16 %v1733_v15 }
 0x49a   : > { %v1806_v41 = vmul.f32 %v1769_v31, %v1769_v31 }
 0x49b   : > { %v1802_v40 = vmul.f32 %v1765_v51, %v1765_v51  ;;  %v1780_v24 = vadd.f32 %v1765_v51, %v1764_v38 }
 0x49d   : > { %v1707_v17 = vpop.f32.mrf.mxu1  ;;  %v1817_v12 = vadd.f32 %v1802_v40, %v1801_v32 }
 0x49e   : > { %v1697_v58 = vpop.f32.mrf.mxu0  ;;  %v1738_v39 = vpack.c.bf16 %v1707_v17, %v1707_v17 }
 0x49f   : > { %v1734_v9 = vpack.c.bf16 %v1697_v58, %v1697_v58 }
 0x4a0   : > { %v1770_v6 = vunpack.c.l.bf16 %v1738_v39 }
 0x4a1   : > { %v1766_v29 = vunpack.c.l.bf16 %v1734_v9 }
 0x4a2   : > { %v1807_v46 = vmul.f32 %v1770_v6, %v1770_v6 }
 0x4a3   : > { %v1803_v63 = vmul.f32 %v1766_v29, %v1766_v29  ;;  %v1781_v27 = vadd.f32 %v1780_v24, %v1766_v29 }
 0x4a4   : > { %v1722_v47 = vpop.f32.mrf.mxu3 }
 0x4a5   : > { %v1709_v3 = vpop.f32.mrf.mxu1  ;;  %v1818_v20 = vadd.f32 %v1817_v12, %v1803_v63  ;;  %v1744_v57 = vpack.c.bf16 %v1722_v47, %v1722_v47 }
 0x4a6   : > { %v1699_v45 = vpop.f32.mrf.mxu0  ;;  %v2336_v19 = vpack.c.bf16 %v1709_v3, %v1707_v17  ;;  %v1739_v43 = vpack.c.bf16 %v1709_v3, %v1709_v3 }
 0x4a7   : > { %v1735_v34 = vpack.c.bf16 %v1699_v45, %v1699_v45  ;;  %v2326_v1 = vpack.c.bf16 %v1699_v45, %v1697_v58  ;;  %v1776_v8 = vunpack.c.l.bf16 %v1744_v57 }
 0x4a8   : > { %2367 = vst [vmem:[%s2759_s7 + $0x18] sm:$0xff] %v2336_v19   ;;  %v1771_v14 = vunpack.c.l.bf16 %v1739_v43 }
 0x4a9   : > { %2365 = vst [vmem:[%s2759_s7 + $0x8] sm:$0xff] %v2326_v1   ;;  %v1767_v18 = vunpack.c.l.bf16 %v1735_v34  ;;  %v1813_v3 = vmul.f32 %v1776_v8, %v1776_v8 }
 0x4aa   : > { %v1808_v13 = vmul.f32 %v1771_v14, %v1771_v14 }
 0x4ab   : > { %v1782_v33 = vadd.f32 %v1781_v27, %v1767_v18  ;;  %v1804_v56 = vmul.f32 %v1767_v18, %v1767_v18 }
 0x4ac   : > { %v1717_v11 = vpop.f32.mrf.mxu2  ;;  %v1724_v0 = vpop.f32.mrf.mxu3 }
 0x4ad   : > { %v1783_v48 = vadd.f32 %v1782_v33, %v1768_v10  ;;  %v1819_v21 = vadd.f32 %v1818_v20, %v1804_v56  ;;  %v2351_v7 = vpack.c.bf16 %v1724_v0, %v1722_v47  ;;  %v1742_v59 = vpack.c.bf16 %v1717_v11, %v1717_v11 }
 0x4ae   : > { %v1745_v15 = vpack.c.bf16 %v1724_v0, %v1724_v0 }
 0x4af   : > { %v1820_v25 = vadd.f32 %v1819_v21, %v1805_v62  ;;  %v1784_v49 = vadd.f32 %v1783_v48, %v1769_v31  ;;  %2370 = vst [vmem:[%s2759_s7 + $0x30] sm:$0xff] %v2351_v7   ;;  %v1774_v30 = vunpack.c.l.bf16 %v1742_v59 }
 0x4b0   : > { %v1777_v22 = vunpack.c.l.bf16 %v1745_v15 }
 0x4b1   : > { %v1785_v61 = vadd.f32 %v1784_v49, %v1770_v6  ;;  %v1821_v2 = vadd.f32 %v1820_v25, %v1806_v41  ;;  %v1811_v51 = vmul.f32 %v1774_v30, %v1774_v30 }
 0x4b2   : > { %v1814_v34 = vmul.f32 %v1777_v22, %v1777_v22 }
 0x4b3   : > { %v1786_v26 = vadd.f32 %v1785_v61, %v1771_v14  ;;  %v1822_v50 = vadd.f32 %v1821_v2, %v1807_v46 }
 0x4b4   : > { %v1719_v53 = vpop.f32.mrf.mxu2  ;;  %v1727_v36 = vpop.f32.mrf.mxu3 }
 0x4b5   : > { %v1787_v37 = vadd.f32 %v1786_v26, %v1772_v44  ;;  %v1823_v42 = vadd.f32 %v1822_v50, %v1808_v13  ;;  %v1743_v16 = vpack.c.bf16 %v1719_v53, %v1719_v53  ;;  %v2346_v23 = vpack.c.bf16 %v1719_v53, %v1717_v11 }
 0x4b6   : > { %v1746_v58 = vpack.c.bf16 %v1727_v36, %v1727_v36 }
 0x4b7   : > { %v1824_v35 = vadd.f32 %v1823_v42, %v1809_v55  ;;  %v1788_v60 = vadd.f32 %v1787_v37, %v1773_v4  ;;  %2369 = vst [vmem:[%s2759_s7 + $0x28] sm:$0xff] %v2346_v23   ;;  %v1775_v17 = vunpack.c.l.bf16 %v1743_v16 }
 0x4b8   : > { %v1778_v32 = vunpack.c.l.bf16 %v1746_v58 }
 0x4b9   : > { %v1789_v9 = vadd.f32 %v1788_v60, %v1774_v30  ;;  %v1825_v38 = vadd.f32 %v1824_v35, %v1810_v52  ;;  %v1812_v40 = vmul.f32 %v1775_v17, %v1775_v17 }
 0x4ba   : > { %v1815_v39 = vmul.f32 %v1778_v32, %v1778_v32 }
 0x4bb   : > { %v1826_v29 = vadd.f32 %v1825_v38, %v1811_v51  ;;  %v1790_v47 = vadd.f32 %v1789_v9, %v1775_v17 }
 0x4bc   : > { %v1729_v5 = vpop.f32.mrf.mxu3 }
 0x4bd   : > { %v1791_v45 = vadd.f32 %v1790_v47, %v1776_v8  ;;  %v1827_v19 = vadd.f32 %v1826_v29, %v1812_v40  ;;  %v1747_v24 = vpack.c.bf16 %v1729_v5, %v1729_v5  ;;  %v2356_v63 = vpack.c.bf16 %v1729_v5, %v1727_v36 }
 0x4bf   : > { %v1828_v1 = vadd.f32 %v1827_v19, %v1813_v3  ;;  %v1792_v10 = vadd.f32 %v1791_v45, %v1777_v22  ;;  %2371 = vst [vmem:[%s2759_s7 + $0x38] sm:$0xff] %v2356_v63   ;;  %v1779_v12 = vunpack.c.l.bf16 %v1747_v24 }
 0x4c1   : > { %v1793_v27 = vadd.f32 %v1792_v10, %v1778_v32  ;;  %v1829_v18 = vadd.f32 %v1828_v1, %v1814_v34  ;;  %v1816_v33 = vmul.f32 %v1779_v12, %v1779_v12 }
 0x4c3   : > { %v1830_v31 = vadd.f32 %v1829_v18, %v1815_v39  ;;  %v1794_v20 = vadd.f32 %v1793_v27, %v1779_v12 }
 0x4c5   : > { %v1795_v56 = vrot.slane %v1794_v20, 4  ;;  %v1831_v43 = vadd.f32 %v1830_v31, %v1816_v33 }
 0x4c7   : > { %v1796_v54 = vadd.f32 %v1795_v56, %v1794_v20  ;;  %v1832_v11 = vrot.slane %v1831_v43, 4 }
 0x4c9   : > { %v1797_v0 = vrot.slane %v1796_v54, 2  ;;  %v1833_v62 = vadd.f32 %v1832_v11, %v1831_v43 }
 0x4cb   : > { %v1798_v6 = vadd.f32 %v1797_v0, %v1796_v54  ;;  %v1834_v48 = vrot.slane %v1833_v62, 2 }
 0x4cd   : > { %v1799_v21 = vrot.slane %v1798_v6, 1  ;;  %v1835_v28 = vadd.f32 %v1834_v48, %v1833_v62 }
 0x4cf   : > { %v1836_v7 = vrot.slane %v1835_v28, 1  ;;  %v1800_v41 = vadd.f32 %v1799_v21, %v1798_v6 }
 0x4d1   : > { %v1837_v25 = vadd.f32 %v1836_v7, %v1835_v28 }
 0x4d3   : > { %v1839_v14 = vsel %vm1838_vm2, %v1800_v41, %v1837_v25 }
 0x4d4   : > { %1840 = vst [vmem:[%s2765_s15] sm:$0x3] %v1839_v14 }
 0x4d5 PF: > { %s17_s27 = sadd.s32 1, %s2652_s27   ;;  %s3271_s7 = sld [smem:[#allocation6_spill]] }
 0x4d6   : > { %p14_p11 = scmp.ge.s32.totalorder %s17_s27, 34   ;;  %s3272_s1 = sld [smem:[#allocation7_spill]] }
 0x4d7   : > { %s3273_s21 = smov %s2640_s24  ;;  %s3274_s22 = smov %s2644_s25 }
 0x4d8   : > { %s3275_s23 = smov %s2648_s26  ;;  %s3276_s24 = smov %s3280_s28 }
 0x4d9   :  { %16 = sbr.rel (!%p14_p11) target bundleno = 4 (0x4), region = 98 }
 0x4db   : > { %s3277_s25 = smov %s3271_s7 }
 0x4dc   : > { %s3278_s26 = smov %s3272_s1 }

// kernel: mossformer_masknet.5
= control target key start
LH: loop header
LB: loop body
LE: loop exit
PB: predicated region body
PF: predicated region fallthrough
CT: control target
= control target key end

     0   :  { %s6874_s0 = inlined_call_operand.vmem [shape: bf16[2,512,128], index: 0, kind: input, shape index: {}]   ;;  %s6875_s1 = inlined_call_operand.vmem [shape: bf16[2,512,128], index: 1, kind: input, shape index: {}]   ;;  %s6876_s2 = inlined_call_operand.vmem [shape: f32[2,1,128], index: 2, kind: input, shape index: {}]   ;;  %s6877_s3 = inlined_call_operand.vmem [shape: f32[2,1,128], index: 3, kind: input, shape index: {}]   ;;  %s6878_s4 = inlined_call_operand.<no memory space> [shape: f32[1,1], index: 4, kind: input, shape index: {}]   ;;  %s6879_s5 = inlined_call_operand.vmem [shape: bf16[128,256], index: 5, kind: input, shape index: {}]   ;;  %s6880_s6 = inlined_call_operand.vmem [shape: f32[1,256], index: 6, kind: input, shape index: {}]   ;;  %s6881_s7 = inlined_call_operand.vmem [shape: bf16[128,256], index: 7, kind: input, shape index: {}]   ;;  %s6882_s8 = inlined_call_operand.vmem [shape: f32[1,256], index: 8, kind: input, shape index: {}]   ;;  %s6883_s9 = inlined_call_operand.vmem [shape: bf16[128,128], index: 9, kind: input, shape index: {}]   ;;  %s6884_s10 = inlined_call_operand.hbm [shape: f32[2,2,8,512], index: 10, kind: output, shape index: {}]  }
   0x1   :  { %6891 = sst [smem:[#allocation13_spill]] %s6876_s2 }
   0x2   :  { %15 = sst [smem:[#allocation2]] %s6878_s4 }
   0x3   :  { %16 = vsyncpa [#allocation4], 0 }
   0x4   :  { %18 = vsyncpa [#allocation4 + $0x1], 0  ;;  %s4866_s15 = smov 0   ;;  %s4868_s16 = smov 0  }
   0x5   :  { %s4870_s17 = smov 0   ;;  %s4872_s18 = smov 0  }
   0x6   :  { %s4874_s19 = smov 0   ;;  %s4876_s20 = smov 0  }
   0x7   :  { %s4878_s21 = smov 0   ;;  %s4880_s22 = smov 0  }
   0x8 LB: > { %6892 = sst [smem:[#allocation6_spill]] %s4783_s17  ;;  %s3687_s4 = sadd.s32 4294967295, %s4803_s22   ;;  %s4803_s22 = sphi %s4880_s22, %s24_s22   ;;  %s4799_s21 = sphi %s4878_s21, %s6970_s21   ;;  %s4795_s20 = sphi %s4876_s20, %s6969_s20   ;;  %s4791_s19 = sphi %s4874_s19, %s6968_s19   ;;  %s4787_s18 = sphi %s4872_s18, %s6967_s18   ;;  %s4783_s17 = sphi %s4870_s17, %s6966_s17   ;;  %s4779_s16 = sphi %s4868_s16, %s6972_s16   ;;  %s4775_s15 = sphi %s4866_s15, %s6971_s15  }
   0x9   : > { %6893 = sst [smem:[#allocation7_spill]] %s4795_s20  ;;  %s3688_s23 = sadd.s32 4294967294, %s4803_s22  }
   0xa   : > { %6894 = sst [smem:[#allocation8_spill]] %s4799_s21  ;;  %s33_s24 = sadd.s32 1, %s4795_s20 }
   0xb   : > { %p34_p0 = scmp.ge.s32.totalorder %s33_s24, 2  ;;  %s36_s25 = sadd.s32 1, %s4799_s21 }
   0xc   : > { %p289_p1 = scmp.ne.s32.totalorder %s4783_s17, %s4779_s16  ;;  %p290_p2 = scmp.eq.s32.totalorder %s3687_s4, 3 }
   0xd   : > { %s6974_s24 = smov (%p34_p0, %s33_s24), 0  ;;  %s6976_s25 = smov (!%p34_p0, %s36_s25), %s4799_s21 }
   0xe   : > { %6895 = sst [smem:[#allocation9_spill]] %s6974_s24  ;;  %s275_s26 = ssub.s32 %s4795_s20, %s6974_s24 }
   0xf   : > { %p4917_p3 = por %p290_p2, %p289_p1  ;;  %p38_p4 = scmp.ge.s32.totalorder %s6976_s25, 2 }
  0x10   : > { %p295_p5 = scmp.ne.s32.totalorder %s4779_s16, %s4775_s15  ;;  %p296_p6 = scmp.eq.s32.totalorder %s3688_s23, 3 }
  0x11   : > { %p3691_p7 = scmp.ge.s32.totalorder %s4803_s22, 1  ;;  %s6978_s25 = smov (%p38_p4, %s6976_s25), 0 }
  0x12   : > { %6897 = sst [smem:[#allocation10_spill]] %s6978_s25  ;;  %p4926_p8 = por %p296_p6, %p295_p5 }
  0x13   : > { %p370_p9 = scmp.lt.s32.totalorder %s4803_s22, 5  ;;  %s274_s29 = ssub.s32 %s4799_s21, %s6978_s25 }
  0x14   : > { %s6898_s28 = scalar_select %p4926_p8, 1, 0 }
  0x15   : > { %s279_s30 = sadd.s32 1, %s4783_s17  ;;  %s276_s11 = sor.u32 %s275_s26, %s274_s29 }
  0x16   : > { %6899 = sst [smem:[#allocation11_spill]] %s6898_s28  ;;  %p371_p10 = pnand %p3691_p7, %p370_p9 }
  0x17   : > { %p277_p11 = scmp.eq.s32.totalorder %s276_s11, 0  ;;  %s3693_s4 = sshll.u32 (!%p371_p10), %s4787_s18, 5 }
  0x18   : > { %374 = sbr.rel (%p371_p10) target bundleno = 1063 (0x427), region = 60  ;;  %p428_p12 = scmp.lt.s32.totalorder (!%p371_p10), %s4791_s19, 1 }
  0x19   : > { %s4935_s12 = scalar_select %p277_p11, %s4783_s17, %s279_s30  }
  0x1a   : > { %p430_p13 = scmp.lt.s32.totalorder (!%p371_p10), %s3693_s4, 63  ;;  %s6901_s2 = sld [smem:[#allocation13_spill]] (!%p371_p10) }
  0x1b   : > { %6900 = sst [smem:[#allocation12_spill]] %s4935_s12  ;;  %s4023_s28 = sshll.u32 (!%p371_p10), %s4791_s19, 2 }
  0x1c   : > { %s4993_s20 = sld [smem:[#allocation2]] (!%p371_p10) }
  0x1d   : > { %v3757_v0 = vld [vmem:[%s6879_s5 + $0x70] sm:$0xf]  ;;  %v4042_v1 = vld [vmem:[%s6879_s5 + $0x74] sm:$0xf0]  ;;  %v3749_v2 = vld [vmem:[%s6879_s5 + $0x60] sm:$0xf] }
  0x1e   : > { %v3758_v3 = vor.u32 %v4042_v1, %v3757_v0  ;;  %v4040_v4 = vld [vmem:[%s6879_s5 + $0x64] sm:$0xf0]  ;;  %v3741_v6 = vld [vmem:[%s6879_s5 + $0x50] sm:$0xf]  ;;  %v4038_v7 = vld [vmem:[%s6879_s5 + $0x54] sm:$0xf0] }
  0x1f   : > { %v3750_v5 = vor.u32 %v4040_v4, %v3749_v2  ;;  %v4041_v8 = vld [vmem:[%s6879_s5 + $0x74] sm:$0xf]  ;;  %v3759_v9 = vld [vmem:[%s6879_s5 + $0x78] sm:$0xf0]  ;;  %v3742_v10 = vor.u32 %v4038_v7, %v3741_v6  ;;  %s4964_s29 = scalar_select %p428_p12, %s4791_s19, 1 }
  0x20   : > { %902 = vmatpush.bf16.msra.mxu0 %v3758_v3  ;;  %v3762_v11 = vor.u32 %v4041_v8, %v3759_v9  ;;  %v4039_v12 = vld [vmem:[%s6879_s5 + $0x64] sm:$0xf]  ;;  %v3751_v13 = vld [vmem:[%s6879_s5 + $0x68] sm:$0xf0]  ;;  %v3733_v14 = vld [vmem:[%s6879_s5 + $0x40] sm:$0xf] }
  0x21   : > { %v4036_v15 = vld [vmem:[%s6879_s5 + $0x44] sm:$0xf0]  ;;  %s6980_s4 = smov (!%p430_p13, %s3693_s4), 63  ;;  %s3694_s21 = sshll.u32 %s4964_s29, 6  ;;  %v3754_v16 = vor.u32 %v4039_v12, %v3751_v13  ;;  %v4037_v17 = vld [vmem:[%s6879_s5 + $0x54] sm:$0xf] }
  0x22   : > { %s449_s17 = scalar_lea.vmem %s6901_s2, %s4964_s29  ;;  %991 = vmatpush.bf16.msra.mxu1 %v3762_v11  ;;  %s433_s30 = sadd.s32 %s3694_s21, %s6980_s4  ;;  %v3743_v18 = vld [vmem:[%s6879_s5 + $0x58] sm:$0xf0]  ;;  %v3734_v19 = vor.u32 %v4036_v15, %v3733_v14  ;;  %v3725_v20 = vld [vmem:[%s6879_s5 + $0x30] sm:$0xf]  ;;  %v4034_v21 = vld [vmem:[%s6879_s5 + $0x34] sm:$0xf0]  ;;  %v5046_v48 = vstv %s4993_s20 }
  0x23   : > { %s452_s14 = scalar_lea.vmem %s6877_s3, %s4964_s29  ;;  %s3695_s26 = sshll.u32 %s433_s30, 2  ;;  %v5011_v22 = vld [vmem:[%s449_s17] ss:$0 sm:$0xff]  ;;  %v3746_v25 = vor.u32 %v4037_v17, %v3743_v18  ;;  %v4035_v29 = vld [vmem:[%s6879_s5 + $0x44] sm:$0xf]  ;;  %v3726_v31 = vor.u32 %v4034_v21, %v3725_v20 }
  0x24   : > { %903 = vmatpush.bf16.msra.mxu0 %v3750_v5  ;;  %s5004_s11 = scalar_lea.vmem %s6874_s0, %s3695_s26  ;;  %s5009_s30 = scalar_lea.vmem %s6875_s1, %s3695_s26  ;;  %v5015_v28 = vld [vmem:[%s452_s14] ss:$0 sm:$0xff]  ;;  %v3735_v30 = vld [vmem:[%s6879_s5 + $0x48] sm:$0xf0]  ;;  %v4032_v33 = vld [vmem:[%s6879_s5 + $0x24] sm:$0xf0] }
  0x25   : > { %v4092_v23 = vld [vmem:[%s5004_s11] sm:$0xff]   ;;  %v3738_v38 = vor.u32 %v4035_v29, %v3735_v30  ;;  %v4033_v41 = vld [vmem:[%s6879_s5 + $0x34] sm:$0xf]  ;;  %v3727_v42 = vld [vmem:[%s6879_s5 + $0x38] sm:$0xf0]  ;;  %s424_s4 = sand.u32 1, %s4779_s16  }
  0x26   : > { %v4156_v24 = vld [vmem:[%s5009_s30] sm:$0xff]   ;;  %992 = vmatpush.bf16.msra.mxu1 %v3754_v16  ;;  %v4093_v26 = vunpack.c.l.bf16 %v4092_v23  ;;  %v4094_v27 = vunpack.c.h.bf16 %v4092_v23  ;;  %v3709_v44 = vld [vmem:[%s6879_s5 + $0x10] sm:$0xf]  ;;  %v4030_v45 = vld [vmem:[%s6879_s5 + $0x14] sm:$0xf0]  ;;  %v3730_v50 = vor.u32 %v4033_v41, %v3727_v42  ;;  %s3692_s14 = sshll.u32 %s424_s4, 5 }
  0x27   : > { %v3717_v32 = vld [vmem:[%s6879_s5 + $0x20] sm:$0xf]  ;;  %v4157_v34 = vunpack.c.l.bf16 %v4156_v24  ;;  %v4158_v35 = vunpack.c.h.bf16 %v4156_v24  ;;  %v4219_v49 = vld [vmem:[%s5004_s11 + $0x8] sm:$0xff]   ;;  %v3710_v51 = vor.u32 %v4030_v45, %v3709_v44  ;;  %v4031_v52 = vld [vmem:[%s6879_s5 + $0x24] sm:$0xf]  ;;  %s426_s29 = scalar_lea.vmem [#allocation3], %s3692_s14 }
  0x28   : > { %904 = vmatpush.bf16.msra.mxu0 %v3742_v10  ;;  %v586_v36 = vmul.f32 %v5011_v22, %v4093_v26  ;;  %v587_v37 = vmul.f32 %v5011_v22, %v4094_v27  ;;  %v3718_v43 = vor.u32 %v4032_v33, %v3717_v32  ;;  %v3719_v53 = vld [vmem:[%s6879_s5 + $0x28] sm:$0xf0]  ;;  %v3701_v54 = vld [vmem:[%s6879_s5] sm:$0xf]  ;;  %v4028_v55 = vld [vmem:[%s6879_s5 + $0x4] sm:$0xf0]  ;;  %v4097_v58 = vunpack.c.l.bf16 %v4219_v49 }
  0x29   : > { %v4098_v59 = vunpack.c.h.bf16 %v4219_v49  ;;  %v3722_v60 = vor.u32 %v4031_v52, %v3719_v53  ;;  %v3702_v61 = vor.u32 %v4028_v55, %v3701_v54  ;;  %v4029_v62 = vld [vmem:[%s6879_s5 + $0x14] sm:$0xf]  ;;  %v3711_v63 = vld [vmem:[%s6879_s5 + $0x18] sm:$0xf0]  ;;  %v4234_v4 = vld [vmem:[%s5009_s30 + $0x8] sm:$0xff]   ;;  %s4022_s20 = sshll.u32 %s4787_s18, 1 }
  0x2a   : > { %993 = vmatpush.bf16.msra.mxu1 %v3746_v25  ;;  %v622_v39 = vadd.f32 %v5015_v28, %v586_v36  ;;  %v623_v40 = vadd.f32 %v5015_v28, %v587_v37  ;;  %v588_v2 = vmul.f32 %v5011_v22, %v4097_v58  ;;  %v3714_v5 = vor.u32 %v4029_v62, %v3711_v63  ;;  %v4027_v7 = vld [vmem:[%s6879_s5 + $0x4] sm:$0xf]  ;;  %v3703_v8 = vld [vmem:[%s6879_s5 + $0x8] sm:$0xf0]  ;;  %v4220_v16 = vld [vmem:[%s5004_s11 + $0x10] sm:$0xff]   ;;  %s3563_s13 = sadd.s32 %s4023_s28, %s4022_s20  ;;  %s3566_s24 = sshll.u32 %s426_s29, 4  ;;  %s3567_s24 = int_to_ptr.vmem [resolvable:$true] %s3566_s24 }
  0x2b   : > { %v589_v3 = vmul.f32 %v5011_v22, %v4098_v59  ;;  %v4161_v9 = vunpack.c.l.bf16 %v4234_v4  ;;  %v4162_v10 = vunpack.c.h.bf16 %v4234_v4  ;;  %v3706_v13 = vor.u32 %v4027_v7, %v3703_v8  ;;  %v4235_v26 = vld [vmem:[%s5009_s30 + $0x10] sm:$0xff]   ;;  %v4236_v44 = vld [vmem:[%s5009_s30 + $0x18] sm:$0xff]   ;;  %v4222_v53 = vld [vmem:[%s5004_s11 + $0x20] sm:$0xff]   ;;  %s4024_s23 = sshll.u32 %s3563_s13, 3  ;;  %s3552_s12 = scalar_lea.sflag [#allocation4], %s424_s4 }
  0x2c   : > { %905 = vmatpush.bf16.msra.mxu0 %v3734_v19  ;;  %v654_v46 = vadd.f32 %v4157_v34, %v622_v39  ;;  %v655_v47 = vadd.f32 %v4158_v35, %v623_v40  ;;  %v624_v11 = vadd.f32 %v5015_v28, %v588_v2  ;;  %v4101_v19 = vunpack.c.l.bf16 %v4220_v16  ;;  %v4221_v35 = vld [vmem:[%s5004_s11 + $0x18] sm:$0xff]   ;;  %v4237_v62 = vld [vmem:[%s5009_s30 + $0x20] sm:$0xff]   ;;  %s4729_s21 = scalar_lea.hbm %s6884_s10, 128 }
  0x2d   : > { %v625_v12 = vadd.f32 %v5015_v28, %v589_v3  ;;  %v4102_v20 = vunpack.c.h.bf16 %v4220_v16  ;;  %v4165_v29 = vunpack.c.l.bf16 %v4235_v26  ;;  %v4166_v30 = vunpack.c.h.bf16 %v4235_v26 }
  0x2e   : > { %994 = vmatpush.bf16.msra.mxu1 %v3738_v38  ;;  %v720_v56 = vmul.f32 %v5046_v48, %v654_v46  ;;  %v721_v57 = vmul.f32 %v5046_v48, %v655_v47  ;;  %vm687_vm0 = vcmp.gt.f32.partialorder %v654_v46, 0.0  ;;  %vm688_vm1 = vcmp.gt.f32.partialorder %v655_v47, 0.0 }
  0x2f   : > { %v656_v14 = vadd.f32 %v4161_v9, %v624_v11  ;;  %v657_v15 = vadd.f32 %v4162_v10, %v625_v12  ;;  %v590_v24 = vmul.f32 %v5011_v22, %v4101_v19  ;;  %v591_v25 = vmul.f32 %v5011_v22, %v4102_v20 }
  0x30   : > { %906 = vmatpush.bf16.msra.mxu0 %v3726_v31  ;;  %v752_v0 = vsel %vm687_vm0, %v654_v46, %v720_v56  ;;  %v753_v1 = vsel %vm688_vm1, %v655_v47, %v721_v57  ;;  %v4105_v38 = vunpack.c.l.bf16 %v4221_v35  ;;  %v4106_v39 = vunpack.c.h.bf16 %v4221_v35  ;;  %v3815_v35 = vld [vmem:[%s6881_s7 + $0x68] sm:$0xf0] }
  0x31   : > { %v784_v6 = vpack.c.bf16 %v753_v1, %v752_v0  ;;  %v722_v17 = vmul.f32 %v5046_v48, %v656_v14  ;;  %v723_v18 = vmul.f32 %v5046_v48, %v657_v15  ;;  %vm689_vm2 = vcmp.gt.f32.partialorder %v656_v14, 0.0 }
  0x32   : > { %995 = vmatpush.bf16.msra.mxu1 %v3730_v50  ;;  %vm690_vm3 = vcmp.gt.f32.partialorder %v657_v15, 0.0  ;;  %v626_v31 = vadd.f32 %v5015_v28, %v590_v24  ;;  %v627_v32 = vadd.f32 %v5015_v28, %v591_v25  ;;  %v592_v42 = vmul.f32 %v5011_v22, %v4105_v38  ;;  %v4057_v24 = vld [vmem:[%s6881_s7 + $0x74] sm:$0xf] }
  0x33   : > { %v754_v21 = vsel %vm689_vm2, %v656_v14, %v722_v17  ;;  %v755_v23 = vsel %vm690_vm3, %v657_v15, %v723_v18  ;;  %v4169_v46 = vunpack.c.l.bf16 %v4236_v44  ;;  %v4170_v47 = vunpack.c.h.bf16 %v4236_v44  ;;  %v4238_v15 = vld [vmem:[%s5009_s30 + $0x28] sm:$0xff]  }
  0x34   : > { %907 = vmatpush.bf16.msra.mxu0 %v3718_v43  ;;  %v785_v27 = vpack.c.bf16 %v755_v23, %v754_v21  ;;  %v658_v33 = vadd.f32 %v4165_v29, %v626_v31  ;;  %v659_v34 = vadd.f32 %v4166_v30, %v627_v32  ;;  %v593_v43 = vmul.f32 %v5011_v22, %v4106_v39  ;;  %v3821_v21 = vld [vmem:[%s6881_s7 + $0x70] sm:$0xf]  ;;  %v4058_v23 = vld [vmem:[%s6881_s7 + $0x74] sm:$0xf0]  ;;  %v3823_v29 = vld [vmem:[%s6881_s7 + $0x78] sm:$0xf0] }
  0x35   : > { %v628_v49 = vadd.f32 %v5015_v28, %v592_v42  ;;  %v4109_v56 = vunpack.c.l.bf16 %v4222_v53  ;;  %v4110_v57 = vunpack.c.h.bf16 %v4222_v53  ;;  %v4173_v0 = vunpack.c.l.bf16 %v4237_v62  ;;  %v3813_v30 = vld [vmem:[%s6881_s7 + $0x60] sm:$0xf]  ;;  %v4056_v31 = vld [vmem:[%s6881_s7 + $0x64] sm:$0xf0]  ;;  %v4224_v32 = vld [vmem:[%s5004_s11 + $0x30] sm:$0xff]  }
  0x36   : > { %996 = vmatpush.bf16.msra.mxu1 %v3722_v60  ;;  %v724_v36 = vmul.f32 %v5046_v48, %v658_v33  ;;  %v725_v37 = vmul.f32 %v5046_v48, %v659_v34  ;;  %vm691_vm4 = vcmp.gt.f32.partialorder %v658_v33, 0.0  ;;  %vm692_vm5 = vcmp.gt.f32.partialorder %v659_v34, 0.0  ;;  %v4225_v53 = vld [vmem:[%s5004_s11 + $0x38] sm:$0xff]  }
  0x37   : > { %v629_v50 = vadd.f32 %v5015_v28, %v593_v43  ;;  %v594_v60 = vmul.f32 %v5011_v22, %v4109_v56  ;;  %v4174_v1 = vunpack.c.h.bf16 %v4237_v62  ;;  %v4177_v17 = vunpack.c.l.bf16 %v4238_v15  ;;  %v4053_v56 = vld [vmem:[%s6881_s7 + $0x54] sm:$0xf]  ;;  %v4052_v62 = vld [vmem:[%s6881_s7 + $0x44] sm:$0xf0] }
  0x38   : > { %908 = vmatpush.bf16.msra.mxu0 %v3710_v51  ;;  %v756_v40 = vsel %vm691_vm4, %v658_v33, %v724_v36  ;;  %v757_v41 = vsel %vm692_vm5, %v659_v34, %v725_v37  ;;  %v660_v51 = vadd.f32 %v4169_v46, %v628_v49  ;;  %v4178_v18 = vunpack.c.h.bf16 %v4238_v15  ;;  %v4055_v34 = vld [vmem:[%s6881_s7 + $0x64] sm:$0xf]  ;;  %v4239_v46 = vld [vmem:[%s5009_s30 + $0x30] sm:$0xff]  }
  0x39   : > { %v786_v45 = vpack.c.bf16 %v757_v41, %v756_v40  ;;  %v661_v52 = vadd.f32 %v4170_v47, %v629_v50  ;;  %v630_v2 = vadd.f32 %v5015_v28, %v594_v60  ;;  %v3826_v33 = vor.u32 %v4057_v24, %v3823_v29  ;;  %v3807_v60 = vld [vmem:[%s6881_s7 + $0x58] sm:$0xf0]  ;;  %v4048_v24 = vld [vmem:[%s6881_s7 + $0x24] sm:$0xf0] }
  0x3a   : > { %997 = vmatpush.bf16.msra.mxu1 %v3714_v5  ;;  %v726_v54 = vmul.f32 %v5046_v48, %v660_v51  ;;  %vm693_vm6 = vcmp.gt.f32.partialorder %v660_v51, 0.0  ;;  %v3814_v36 = vor.u32 %v4056_v31, %v3813_v30  ;;  %v3818_v37 = vor.u32 %v4055_v34, %v3815_v35  ;;  %v3783_v30 = vld [vmem:[%s6881_s7 + $0x28] sm:$0xf0]  ;;  %v4046_v34 = vld [vmem:[%s6881_s7 + $0x14] sm:$0xf0] }
  0x3b   : > { %v727_v55 = vmul.f32 %v5046_v48, %v661_v52  ;;  %vm694_vm7 = vcmp.gt.f32.partialorder %v661_v52, 0.0  ;;  %v662_v4 = vadd.f32 %v4173_v0, %v630_v2  ;;  %1287 = vmatpush.bf16.msra.mxu3 %v3826_v33  ;;  %v4117_v40 = vunpack.c.l.bf16 %v4224_v32  ;;  %v4051_v0 = vld [vmem:[%s6881_s7 + $0x44] sm:$0xf]  ;;  %v3773_v33 = vld [vmem:[%s6881_s7 + $0x10] sm:$0xf] }
  0x3c   : > { %909 = vmatpush.bf16.msra.mxu0 %v3702_v61  ;;  %v758_v58 = vsel %vm693_vm6, %v660_v51, %v726_v54  ;;  %v595_v61 = vmul.f32 %v5011_v22, %v4110_v57  ;;  %v4118_v41 = vunpack.c.h.bf16 %v4224_v32  ;;  %v4181_v49 = vunpack.c.l.bf16 %v4239_v46  ;;  %v3805_v54 = vld [vmem:[%s6881_s7 + $0x50] sm:$0xf]  ;;  %v4045_v35 = vld [vmem:[%s6881_s7 + $0x14] sm:$0xf] }
  0x3d   : > { %v759_v59 = vsel %vm694_vm7, %v661_v52, %v727_v55  ;;  %v728_v7 = vmul.f32 %v5046_v48, %v662_v4  ;;  %vm695_vm8 = vcmp.gt.f32.partialorder %v662_v4, 0.0  ;;  %v598_v44 = vmul.f32 %v5011_v22, %v4117_v40  ;;  %v4054_v55 = vld [vmem:[%s6881_s7 + $0x54] sm:$0xf0] }
  0x3e   : > { %998 = vmatpush.bf16.msra.mxu1 %v3706_v13  ;;  %v787_v63 = vpack.c.bf16 %v759_v59, %v758_v58  ;;  %v631_v3 = vadd.f32 %v5015_v28, %v595_v61  ;;  %v4182_v50 = vunpack.c.h.bf16 %v4239_v46  ;;  %v3806_v59 = vor.u32 %v4054_v55, %v3805_v54  ;;  %v3797_v61 = vld [vmem:[%s6881_s7 + $0x40] sm:$0xf] }
  0x3f   : > { %910 = vmatmul.bf16.vlgmr.msra.gmra.mxu0 %v784_v6  ;;  %v760_v11 = vsel %vm695_vm8, %v662_v4, %v728_v7  ;;  %1288 = vmatpush.bf16.msra.mxu3 %v3818_v37  ;;  %v634_v51 = vadd.f32 %v5015_v28, %v598_v44  ;;  %v3798_v2 = vor.u32 %v4052_v62, %v3797_v61  ;;  %v4043_v44 = vld [vmem:[%s6881_s7 + $0x4] sm:$0xf] }
  0x40   : > { %v663_v5 = vadd.f32 %v4174_v1, %v631_v3  ;;  %v3799_v1 = vld [vmem:[%s6881_s7 + $0x48] sm:$0xf0]  ;;  %v4121_v3 = vunpack.c.l.bf16 %v4225_v53  ;;  %v3774_v37 = vor.u32 %v4046_v34, %v3773_v33  ;;  %v3949_v34 = vld [vmem:[%s6881_s7 + $0x70] sm:$0xf] }
  0x41   : > { %999 = vmatmul.bf16.vlgmr.msra.gmra.mxu1 %v784_v6  ;;  %v4223_v6 = vld [vmem:[%s5004_s11 + $0x28] sm:$0xff]   ;;  %v666_v57 = vadd.f32 %v4181_v49, %v634_v51  ;;  %v3802_v4 = vor.u32 %v4051_v0, %v3799_v1 }
  0x42   : > { %v729_v8 = vmul.f32 %v5046_v48, %v663_v5  ;;  %v4113_v9 = vunpack.c.l.bf16 %v4223_v6  ;;  %v4114_v10 = vunpack.c.h.bf16 %v4223_v6  ;;  %vm696_vm9 = vcmp.gt.f32.partialorder %v663_v5, 0.0  ;;  %v4050_v6 = vld [vmem:[%s6881_s7 + $0x34] sm:$0xf0] }
  0x43   : > { %v732_v7 = vmul.f32 %v5046_v48, %v666_v57  ;;  %vm699_vm12 = vcmp.gt.f32.partialorder %v666_v57, 0.0 }
  0x44   : > { %v761_v12 = vsel %vm696_vm9, %v663_v5, %v729_v8  ;;  %v596_v13 = vmul.f32 %v5011_v22, %v4113_v9  ;;  %v597_v14 = vmul.f32 %v5011_v22, %v4114_v10  ;;  %v3789_v5 = vld [vmem:[%s6881_s7 + $0x30] sm:$0xf]  ;;  %v4122_v9 = vunpack.c.h.bf16 %v4225_v53  ;;  %v4049_v10 = vld [vmem:[%s6881_s7 + $0x34] sm:$0xf] }
  0x45   : > { %v788_v16 = vpack.c.bf16 %v761_v12, %v760_v11  ;;  %v3791_v11 = vld [vmem:[%s6881_s7 + $0x38] sm:$0xf0]  ;;  %v3790_v12 = vor.u32 %v4050_v6, %v3789_v5  ;;  %v764_v15 = vsel %vm699_vm12, %v666_v57, %v732_v7  ;;  %v4081_v57 = vld [vmem:[%s6881_s7 + $0x74] sm:$0xf] }
  0x46   : > { %v632_v19 = vadd.f32 %v5015_v28, %v596_v13  ;;  %v633_v20 = vadd.f32 %v5015_v28, %v597_v14  ;;  %v600_v13 = vmul.f32 %v5011_v22, %v4121_v3  ;;  %v3794_v14 = vor.u32 %v4049_v10, %v3791_v11  ;;  %v4227_v3 = vld [vmem:[%s5004_s11 + $0x48] sm:$0xff]  }
  0x47   : > { %v4129_v6 = vunpack.c.l.bf16 %v4227_v3  ;;  %v4130_v7 = vunpack.c.h.bf16 %v4227_v3 }
  0x48   : > { %v664_v25 = vadd.f32 %v4177_v17, %v632_v19  ;;  %v665_v26 = vadd.f32 %v4178_v18, %v633_v20  ;;  %v4240_v17 = vld [vmem:[%s5009_s30 + $0x38] sm:$0xff]   ;;  %v601_v18 = vmul.f32 %v5011_v22, %v4122_v9 }
  0x49   : > { %v4185_v20 = vunpack.c.l.bf16 %v4240_v17  ;;  %v604_v10 = vmul.f32 %v5011_v22, %v4129_v6  ;;  %v605_v11 = vmul.f32 %v5011_v22, %v4130_v7  ;;  %v4244_v6 = vld [vmem:[%s5009_s30 + $0x58] sm:$0xff]  }
  0x4a   : > { %v730_v38 = vmul.f32 %v5046_v48, %v664_v25  ;;  %v731_v39 = vmul.f32 %v5046_v48, %v665_v26  ;;  %vm697_vm10 = vcmp.gt.f32.partialorder %v664_v25, 0.0  ;;  %vm698_vm11 = vcmp.gt.f32.partialorder %v665_v26, 0.0 }
  0x4c   : > { %v762_v42 = vsel %vm697_vm10, %v664_v25, %v730_v38  ;;  %v763_v43 = vsel %vm698_vm11, %v665_v26, %v731_v39  ;;  %v4047_v25 = vld [vmem:[%s6881_s7 + $0x24] sm:$0xf]  ;;  %v4186_v26 = vunpack.c.h.bf16 %v4240_v17  ;;  %v3775_v38 = vld [vmem:[%s6881_s7 + $0x18] sm:$0xf0]  ;;  %v640_v17 = vadd.f32 %v5015_v28, %v604_v10 }
  0x4d   : > { %v789_v47 = vpack.c.bf16 %v763_v43, %v762_v42  ;;  %v3786_v31 = vor.u32 %v4047_v25, %v3783_v30  ;;  %v4226_v39 = vld [vmem:[%s5004_s11 + $0x40] sm:$0xff]   ;;  %v3778_v40 = vor.u32 %v4045_v35, %v3775_v38  ;;  %v4044_v43 = vld [vmem:[%s6881_s7 + $0x4] sm:$0xf0]  ;;  %v4082_v35 = vld [vmem:[%s6881_s7 + $0x74] sm:$0xf0]  ;;  %v4201_v10 = vunpack.c.l.bf16 %v4244_v6 }
  0x4e   : > { %v3765_v42 = vld [vmem:[%s6881_s7] sm:$0xf]  ;;  %v4125_v46 = vunpack.c.l.bf16 %v4226_v39 }
  0x4f   : > { %915 = vmatmul.bf16.gmra.mxu0 %v785_v27  ;;  %v3766_v49 = vor.u32 %v4044_v43, %v3765_v42  ;;  %v4243_v42 = vld [vmem:[%s5009_s30 + $0x50] sm:$0xff]   ;;  %v4079_v43 = vld [vmem:[%s6881_s7 + $0x64] sm:$0xf] }
  0x50   : > { %v602_v54 = vmul.f32 %v5011_v22, %v4125_v46 }
  0x51   : > { %1004 = vmatmul.bf16.gmra.mxu1 %v785_v27  ;;  %v3822_v27 = vor.u32 %v4058_v23, %v3821_v21  ;;  %v636_v21 = vadd.f32 %v5015_v28, %v600_v13  ;;  %v3781_v23 = vld [vmem:[%s6881_s7 + $0x20] sm:$0xf] }
  0x52   : > { %v3782_v29 = vor.u32 %v4048_v24, %v3781_v23  ;;  %v4228_v24 = vld [vmem:[%s5004_s11 + $0x50] sm:$0xff]  }
  0x53   : > { %1198 = vmatpush.bf16.msra.mxu2 %v3822_v27  ;;  %v637_v27 = vadd.f32 %v5015_v28, %v601_v18  ;;  %v668_v32 = vadd.f32 %v4185_v20, %v636_v21  ;;  %v641_v18 = vadd.f32 %v5015_v28, %v605_v11  ;;  %v4133_v30 = vunpack.c.l.bf16 %v4228_v24 }
  0x54   : > { %v4202_v11 = vunpack.c.h.bf16 %v4244_v6 }
  0x55   : > { %vm701_vm14 = vcmp.gt.f32.partialorder %v668_v32, 0.0 }
  0x57   : > { %1199 = vmatpush.bf16.msra.mxu2 %v3814_v36  ;;  %v669_v36 = vadd.f32 %v4186_v26, %v637_v27 }
  0x59   : > { %vm702_vm15 = vcmp.gt.f32.partialorder %v669_v36, 0.0 }
  0x5b   : > { %1200 = vmatpush.bf16.msra.mxu2 %v3806_v59 }
  0x5f   : > { %920 = vmatmul.bf16.gmra.mxu0 %v786_v45  ;;  %1201 = vmatpush.bf16.msra.mxu2 %v3798_v2 }
  0x61   : > { %1009 = vmatmul.bf16.gmra.mxu1 %v786_v45  ;;  %v599_v45 = vmul.f32 %v5011_v22, %v4118_v41  ;;  %v734_v41 = vmul.f32 %v5046_v48, %v668_v32 }
  0x63   : > { %v635_v52 = vadd.f32 %v5015_v28, %v599_v45  ;;  %1202 = vmatpush.bf16.msra.mxu2 %v3790_v12  ;;  %v735_v45 = vmul.f32 %v5046_v48, %v669_v36  ;;  %v4242_v12 = vld [vmem:[%s5009_s30 + $0x48] sm:$0xff]  }
  0x65   : > { %v667_v58 = vadd.f32 %v4182_v50, %v635_v52  ;;  %v3767_v50 = vld [vmem:[%s6881_s7 + $0x8] sm:$0xf0]  ;;  %v766_v52 = vsel %vm701_vm14, %v668_v32, %v734_v41  ;;  %v767_v53 = vsel %vm702_vm15, %v669_v36, %v735_v45  ;;  %v3950_v36 = vor.u32 %v4082_v35, %v3949_v34 }
  0x66   : > { %v3770_v51 = vor.u32 %v4043_v44, %v3767_v50  ;;  %v3943_v44 = vld [vmem:[%s6881_s7 + $0x68] sm:$0xf0]  ;;  %v4197_v50 = vunpack.c.l.bf16 %v4243_v42 }
  0x67   : > { %v733_v8 = vmul.f32 %v5046_v48, %v667_v58  ;;  %vm700_vm13 = vcmp.gt.f32.partialorder %v667_v58, 0.0  ;;  %1203 = vmatpush.bf16.msra.mxu2 %v3782_v29  ;;  %2433 = vmatpush.bf16.msrb.mxu1 %v3950_v36  ;;  %v3946_v46 = vor.u32 %v4079_v43, %v3943_v44 }
  0x6b   : > { %1204 = vmatpush.bf16.msra.mxu2 %v3774_v37 }
  0x6f   : > { %925 = vmatmul.bf16.gmra.mxu0 %v787_v63  ;;  %1205 = vmatpush.bf16.msra.mxu2 %v3766_v49 }
  0x71   : > { %1014 = vmatmul.bf16.gmra.mxu1 %v787_v63  ;;  %v3810_v63 = vor.u32 %v4053_v56, %v3807_v60  ;;  %v4241_v56 = vld [vmem:[%s5009_s30 + $0x40] sm:$0xff]   ;;  %v791_v60 = vpack.c.bf16 %v767_v53, %v766_v52 }
  0x72   : > { %v4189_v61 = vunpack.c.l.bf16 %v4241_v56  ;;  %v4190_v62 = vunpack.c.h.bf16 %v4241_v56  ;;  %v4229_v56 = vld [vmem:[%s5004_s11 + $0x58] sm:$0xff]  }
  0x73   : > { %1289 = vmatpush.bf16.msra.mxu3 %v3810_v63  ;;  %v638_v63 = vadd.f32 %v5015_v28, %v602_v54 }
  0x75   : > { %v670_v1 = vadd.f32 %v4189_v61, %v638_v63  ;;  %v4137_v61 = vunpack.c.l.bf16 %v4229_v56 }
  0x77   : > { %1290 = vmatpush.bf16.msra.mxu3 %v3802_v4  ;;  %v736_v4 = vmul.f32 %v5046_v48, %v670_v1  ;;  %vm703_vm0 = vcmp.gt.f32.partialorder %v670_v1, 0.0 }
  0x7b   : > { %1291 = vmatpush.bf16.msra.mxu3 %v3794_v14 }
  0x7f   : > { %930 = vmatmul.bf16.gmra.mxu0 %v788_v16  ;;  %1292 = vmatpush.bf16.msra.mxu3 %v3786_v31  ;;  %v4134_v31 = vunpack.c.h.bf16 %v4228_v24 }
  0x81   : > { %1019 = vmatmul.bf16.gmra.mxu1 %v788_v16  ;;  %v765_v16 = vsel %vm700_vm13, %v667_v58, %v733_v8  ;;  %v3951_v58 = vld [vmem:[%s6881_s7 + $0x78] sm:$0xf0]  ;;  %v768_v8 = vsel %vm703_vm0, %v670_v1, %v736_v4  ;;  %v607_v41 = vmul.f32 %v5011_v22, %v4134_v31  ;;  %v608_v4 = vmul.f32 %v5011_v22, %v4137_v61  ;;  %v4080_v31 = vld [vmem:[%s6881_s7 + $0x64] sm:$0xf0] }
  0x82   : > { %v790_v19 = vpack.c.bf16 %v765_v16, %v764_v15  ;;  %v3954_v59 = vor.u32 %v4081_v57, %v3951_v58  ;;  %v4193_v15 = vunpack.c.l.bf16 %v4242_v12  ;;  %v4194_v16 = vunpack.c.h.bf16 %v4242_v12 }
  0x83   : > { %1293 = vmatpush.bf16.msra.mxu3 %v3778_v40  ;;  %v606_v40 = vmul.f32 %v5011_v22, %v4133_v30  ;;  %v643_v53 = vadd.f32 %v5015_v28, %v607_v41  ;;  %v644_v12 = vadd.f32 %v5015_v28, %v608_v4  ;;  %v3941_v30 = vld [vmem:[%s6881_s7 + $0x60] sm:$0xf]  ;;  %v4246_v4 = vld [vmem:[%s5009_s30 + $0x68] sm:$0xff]  }
  0x84   : > { %2522 = vmatpush.bf16.msrb.mxu2 %v3954_v59  ;;  %v672_v20 = vadd.f32 %v4193_v15, %v640_v17  ;;  %v673_v21 = vadd.f32 %v4194_v16, %v641_v18  ;;  %v4230_v16 = vld [vmem:[%s5004_s11 + $0x60] sm:$0xff]  }
  0x85   : > { %v642_v52 = vadd.f32 %v5015_v28, %v606_v40  ;;  %v4141_v24 = vunpack.c.l.bf16 %v4230_v16  ;;  %v3935_v40 = vld [vmem:[%s6881_s7 + $0x58] sm:$0xf0] }
  0x86   : > { %v738_v27 = vmul.f32 %v5046_v48, %v672_v20  ;;  %v739_v29 = vmul.f32 %v5046_v48, %v673_v21  ;;  %vm705_vm2 = vcmp.gt.f32.partialorder %v672_v20, 0.0  ;;  %vm706_vm3 = vcmp.gt.f32.partialorder %v673_v21, 0.0 }
  0x87   : > { %1294 = vmatpush.bf16.msra.mxu3 %v3770_v51  ;;  %v4198_v51 = vunpack.c.h.bf16 %v4243_v42  ;;  %v674_v54 = vadd.f32 %v4197_v50, %v642_v52  ;;  %v610_v36 = vmul.f32 %v5011_v22, %v4141_v24 }
  0x88   : > { %v770_v38 = vsel %vm705_vm2, %v672_v20, %v738_v27  ;;  %2523 = vmatpush.bf16.msrb.mxu2 %v3946_v46 }
  0x89   : > { %v740_v59 = vmul.f32 %v5046_v48, %v674_v54  ;;  %vm707_vm4 = vcmp.gt.f32.partialorder %v674_v54, 0.0 }
  0x8f   : > { %935 = vmatmul.bf16.gmra.mxu0 %v789_v47 }
  0x91   : > { %1024 = vmatmul.bf16.gmra.mxu1 %v789_v47  ;;  %v4126_v47 = vunpack.c.h.bf16 %v4226_v39  ;;  %v771_v39 = vsel %vm706_vm3, %v673_v21, %v739_v29 }
  0x93   : > { %v603_v55 = vmul.f32 %v5011_v22, %v4126_v47  ;;  %v793_v47 = vpack.c.bf16 %v771_v39, %v770_v38  ;;  %v4245_v38 = vld [vmem:[%s5009_s30 + $0x60] sm:$0xff]   ;;  %v4077_v39 = vld [vmem:[%s6881_s7 + $0x54] sm:$0xf] }
  0x94   : > { %v3938_v42 = vor.u32 %v4077_v39, %v3935_v40  ;;  %v4205_v46 = vunpack.c.l.bf16 %v4245_v38  ;;  %v4075_v39 = vld [vmem:[%s6881_s7 + $0x44] sm:$0xf]  ;;  %v3927_v40 = vld [vmem:[%s6881_s7 + $0x48] sm:$0xf0] }
  0x95   : > { %v639_v0 = vadd.f32 %v5015_v28, %v603_v55  ;;  %v675_v55 = vadd.f32 %v4198_v51, %v643_v53  ;;  %v4231_v53 = vld [vmem:[%s5004_s11 + $0x68] sm:$0xff]  }
  0x96   : > { %2524 = vmatpush.bf16.msrb.mxu2 %v3938_v42 }
  0x97   : > { %v671_v2 = vadd.f32 %v4190_v62, %v639_v0  ;;  %v4138_v62 = vunpack.c.h.bf16 %v4229_v56  ;;  %vm708_vm5 = vcmp.gt.f32.partialorder %v675_v55, 0.0 }
  0x99   : > { %v737_v5 = vmul.f32 %v5046_v48, %v671_v2  ;;  %vm704_vm1 = vcmp.gt.f32.partialorder %v671_v2, 0.0 }
  0x9b   : > { %v769_v9 = vsel %vm704_vm1, %v671_v2, %v737_v5  ;;  %v772_v2 = vsel %vm707_vm4, %v674_v54, %v740_v59  ;;  %v609_v5 = vmul.f32 %v5011_v22, %v4138_v62  ;;  %v4145_v59 = vunpack.c.l.bf16 %v4231_v53 }
  0x9c   : > { %v792_v13 = vpack.c.bf16 %v769_v9, %v768_v8 }
  0x9f   : > { %940 = vmatmul.bf16.gmra.mxu0 %v790_v19 }
  0xa1   : > { %1029 = vmatmul.bf16.gmra.mxu1 %v790_v19  ;;  %v5249_v19 = vld [vmem:[%s6880_s6] sm:$0x3] }
  0xa2   : > { %v5252_v23 = vperm.slane %v5249_v19, 0 }
  0xaf   : > { %945 = vmatmul.bf16.gmra.mxu0 %v791_v60 }
  0xb1   : > { %1034 = vmatmul.bf16.gmra.mxu1 %v791_v60  ;;  %v741_v60 = vmul.f32 %v5046_v48, %v675_v55 }
  0xb3   : > { %v773_v3 = vsel %vm708_vm5, %v675_v55, %v741_v60  ;;  %v4146_v60 = vunpack.c.h.bf16 %v4231_v53 }
  0xb4   : > { %v794_v8 = vpack.c.bf16 %v773_v3, %v772_v2  ;;  %v612_v2 = vmul.f32 %v5011_v22, %v4145_v59 }
  0xb5   : > { %v613_v3 = vmul.f32 %v5011_v22, %v4146_v60 }
  0xbc   : > { %v911_v14 = vpop.f32.mrf.mxu0 }
  0xbd   : > { %v912_v32 = vadd.f32 %v911_v14, %v5252_v23  ;;  %v676_v14 = vadd.f32 %v4201_v10, %v644_v12  ;;  %v4210_v10 = vunpack.c.h.bf16 %v4246_v4  ;;  %v649_v12 = vadd.f32 %v5015_v28, %v613_v3 }
  0xbe   : > { %v5255_v25 = vpop.f32.mrf.mxu1 }
  0xbf   : > { %950 = vmatmul.bf16.gmra.mxu0 %v792_v13  ;;  %v742_v20 = vmul.f32 %v5046_v48, %v676_v14  ;;  %vm709_vm6 = vcmp.gt.f32.partialorder %v676_v14, 0.0 }
  0xc1   : > { %1039 = vmatmul.bf16.gmra.mxu1 %v792_v13  ;;  %v645_v13 = vadd.f32 %v5015_v28, %v609_v5  ;;  %v774_v34 = vsel %vm709_vm6, %v676_v14, %v742_v20  ;;  %v681_v14 = vadd.f32 %v4210_v10, %v649_v12 }
  0xc3   : > { %v677_v15 = vadd.f32 %v4202_v11, %v645_v13  ;;  %v648_v11 = vadd.f32 %v5015_v28, %v612_v2  ;;  %vm714_vm11 = vcmp.gt.f32.partialorder %v681_v14, 0.0 }
  0xc4   : > { %v913_v26 = vpop.f32.mrf.mxu0 }
  0xc5   : > { %v914_v33 = vadd.f32 %v913_v26, %v5252_v23  ;;  %v743_v21 = vmul.f32 %v5046_v48, %v677_v15  ;;  %v4142_v26 = vunpack.c.h.bf16 %v4230_v16  ;;  %vm710_vm7 = vcmp.gt.f32.partialorder %v677_v15, 0.0 }
  0xc6   : > { %v5276_v45 = vpop.f32.mrf.mxu1 }
  0xc7   : > { %v1080_v37 = vpack.c.bf16 %v914_v33, %v912_v32  ;;  %v3942_v32 = vor.u32 %v4080_v31, %v3941_v30  ;;  %v775_v35 = vsel %vm710_vm7, %v677_v15, %v743_v21  ;;  %v4232_v15 = vld [vmem:[%s5004_s11 + $0x70] sm:$0xff]   ;;  %v747_v21 = vmul.f32 %v5046_v48, %v681_v14  ;;  %v4078_v31 = vld [vmem:[%s6881_s7 + $0x54] sm:$0xf0] }
  0xc8   : > { %v795_v43 = vpack.c.bf16 %v775_v35, %v774_v34  ;;  %v4149_v24 = vunpack.c.l.bf16 %v4232_v15  ;;  %v3933_v30 = vld [vmem:[%s6881_s7 + $0x50] sm:$0xf] }
  0xc9   : > { %1206 = vmatmul.bf16.vlgmr.msra.gmra.mxu2 %v1080_v37  ;;  %1295 = vmatmul.bf16.vlgmr.msra.gmra.mxu3 %v1080_v37  ;;  %v611_v37 = vmul.f32 %v5011_v22, %v4142_v26  ;;  %v4150_v26 = vunpack.c.h.bf16 %v4232_v15  ;;  %v779_v35 = vsel %vm714_vm11, %v681_v14, %v747_v21 }
  0xca   : > { %2434 = vmatpush.bf16.msrb.mxu1 %v3942_v32  ;;  %v3934_v32 = vor.u32 %v4078_v31, %v3933_v30  ;;  %v4076_v30 = vld [vmem:[%s6881_s7 + $0x44] sm:$0xf0] }
  0xcb   : > { %v647_v50 = vadd.f32 %v5015_v28, %v611_v37  ;;  %v615_v37 = vmul.f32 %v5011_v22, %v4150_v26 }
  0xcc   : > { %v916_v49 = vpop.f32.mrf.mxu0 }
  0xcd   : > { %v917_v63 = vadd.f32 %v916_v49, %v5252_v23  ;;  %v646_v49 = vadd.f32 %v5015_v28, %v610_v36  ;;  %v614_v36 = vmul.f32 %v5011_v22, %v4149_v24 }
  0xce   : > { %v5281_v57 = vpop.f32.mrf.mxu1  ;;  %2435 = vmatpush.bf16.msrb.mxu1 %v3934_v32 }
  0xcf   : > { %955 = vmatmul.bf16.gmra.mxu0 %v793_v47  ;;  %v678_v51 = vadd.f32 %v4205_v46, %v646_v49 }
  0xd1   : > { %1044 = vmatmul.bf16.gmra.mxu1 %v793_v47  ;;  %v4206_v47 = vunpack.c.h.bf16 %v4245_v38  ;;  %v744_v56 = vmul.f32 %v5046_v48, %v678_v51  ;;  %vm711_vm8 = vcmp.gt.f32.partialorder %v678_v51, 0.0  ;;  %v4247_v38 = vld [vmem:[%s5009_s30 + $0x70] sm:$0xff]  }
  0xd2   : > { %v4214_v49 = vunpack.c.h.bf16 %v4247_v38 }
  0xd3   : > { %v679_v52 = vadd.f32 %v4206_v47, %v647_v50  ;;  %v4213_v47 = vunpack.c.l.bf16 %v4247_v38  ;;  %v650_v50 = vadd.f32 %v5015_v28, %v614_v36 }
  0xd4   : > { %v918_v58 = vpop.f32.mrf.mxu0 }
  0xd5   : > { %v919_v0 = vadd.f32 %v918_v58, %v5252_v23  ;;  %v745_v58 = vmul.f32 %v5046_v48, %v679_v52  ;;  %vm712_vm9 = vcmp.gt.f32.partialorder %v679_v52, 0.0 }
  0xd6   : > { %v5290_v7 = vpop.f32.mrf.mxu1 }
  0xd7   : > { %v1081_v1 = vpack.c.bf16 %v919_v0, %v917_v63  ;;  %v776_v0 = vsel %vm711_vm8, %v678_v51, %v744_v56  ;;  %v651_v51 = vadd.f32 %v5015_v28, %v615_v37 }
  0xd9   : > { %1211 = vmatmul.bf16.gmra.mxu2 %v1081_v1  ;;  %1300 = vmatmul.bf16.gmra.mxu3 %v1081_v1  ;;  %v777_v1 = vsel %vm712_vm9, %v679_v52, %v745_v58  ;;  %v682_v52 = vadd.f32 %v4213_v47, %v650_v50  ;;  %v683_v53 = vadd.f32 %v4214_v49, %v651_v51  ;;  %v4072_v47 = vld [vmem:[%s6881_s7 + $0x24] sm:$0xf0] }
  0xda   : > { %v796_v6 = vpack.c.bf16 %v777_v1, %v776_v0 }
  0xdb   : > { %v748_v59 = vmul.f32 %v5046_v48, %v682_v52  ;;  %v749_v60 = vmul.f32 %v5046_v48, %v683_v53  ;;  %vm715_vm12 = vcmp.gt.f32.partialorder %v682_v52, 0.0  ;;  %vm716_vm13 = vcmp.gt.f32.partialorder %v683_v53, 0.0 }
  0xdc   : > { %v921_v9 = vpop.f32.mrf.mxu0 }
  0xdd   : > { %v922_v27 = vadd.f32 %v921_v9, %v5252_v23  ;;  %v4209_v9 = vunpack.c.l.bf16 %v4246_v4  ;;  %v780_v2 = vsel %vm715_vm12, %v682_v52, %v748_v59  ;;  %v781_v3 = vsel %vm716_vm13, %v683_v53, %v749_v60  ;;  %v3901_v53 = vld [vmem:[%s6881_s7 + $0x10] sm:$0xf]  ;;  %v4066_v60 = vld [vmem:[%s6883_s9 + $0x38] sm:$0xff] }
  0xde   : > { %v5295_v17 = vpop.f32.mrf.mxu1  ;;  %2128 = vmatpush.bf16.msrb.mxu0 %v4066_v60 }
  0xdf   : > { %960 = vmatmul.bf16.gmra.mxu0 %v794_v8  ;;  %v680_v13 = vadd.f32 %v4209_v9, %v648_v11  ;;  %v798_v9 = vpack.c.bf16 %v781_v3, %v780_v2  ;;  %v4065_v2 = vld [vmem:[%s6883_s9 + $0x30] sm:$0xff] }
  0xe1   : > { %1049 = vmatmul.bf16.gmra.mxu1 %v794_v8  ;;  %v746_v20 = vmul.f32 %v5046_v48, %v680_v13  ;;  %vm713_vm10 = vcmp.gt.f32.partialorder %v680_v13, 0.0 }
  0xe2   : > { %2129 = vmatpush.bf16.msrb.mxu0 %v4065_v2 }
  0xe3   : > { %v778_v34 = vsel %vm713_vm10, %v680_v13, %v746_v20 }
  0xe4   : > { %v923_v18 = vpop.f32.mrf.mxu0 }
  0xe5   : > { %v924_v29 = vadd.f32 %v923_v18, %v5252_v23 }
  0xe6   : > { %v5316_v41 = vpop.f32.mrf.mxu1 }
  0xe7   : > { %v1082_v33 = vpack.c.bf16 %v924_v29, %v922_v27 }
  0xe9   : > { %1216 = vmatmul.bf16.gmra.mxu2 %v1082_v33  ;;  %1305 = vmatmul.bf16.gmra.mxu3 %v1082_v33 }
  0xec   : > { %v926_v44 = vpop.f32.mrf.mxu0 }
  0xed   : > { %v927_v61 = vadd.f32 %v926_v44, %v5252_v23  ;;  %v797_v44 = vpack.c.bf16 %v779_v35, %v778_v34  ;;  %v4073_v34 = vld [vmem:[%s6881_s7 + $0x34] sm:$0xf]  ;;  %v3919_v35 = vld [vmem:[%s6881_s7 + $0x38] sm:$0xf0] }
  0xee   : > { %v5321_v54 = vpop.f32.mrf.mxu1  ;;  %v3922_v36 = vor.u32 %v4073_v34, %v3919_v35 }
  0xef   : > { %965 = vmatmul.bf16.gmra.mxu0 %v795_v43 }
  0xf1   : > { %1054 = vmatmul.bf16.gmra.mxu1 %v795_v43  ;;  %v3930_v43 = vor.u32 %v4075_v39, %v3927_v40  ;;  %v3917_v39 = vld [vmem:[%s6881_s7 + $0x30] sm:$0xf]  ;;  %v4074_v40 = vld [vmem:[%s6881_s7 + $0x34] sm:$0xf0] }
  0xf3   : > { %2525 = vmatpush.bf16.msrb.mxu2 %v3930_v43  ;;  %v3918_v43 = vor.u32 %v4074_v40, %v3917_v39 }
  0xf4   : > { %v928_v55 = vpop.f32.mrf.mxu0 }
  0xf5   : > { %v929_v62 = vadd.f32 %v928_v55, %v5252_v23  ;;  %v4233_v55 = vld [vmem:[%s5004_s11 + $0x78] sm:$0xff]  }
  0xf6   : > { %v5330_v5 = vpop.f32.mrf.mxu1 }
  0xf7   : > { %v1083_v63 = vpack.c.bf16 %v929_v62, %v927_v61  ;;  %v4153_v61 = vunpack.c.l.bf16 %v4233_v55  ;;  %v4154_v62 = vunpack.c.h.bf16 %v4233_v55  ;;  %2526 = vmatpush.bf16.msrb.mxu2 %v3922_v36  ;;  %v4070_v55 = vld [vmem:[%s6881_s7 + $0x14] sm:$0xf0] }
  0xf9   : > { %1221 = vmatmul.bf16.gmra.mxu2 %v1083_v63  ;;  %1310 = vmatmul.bf16.gmra.mxu3 %v1083_v63  ;;  %v616_v4 = vmul.f32 %v5011_v22, %v4153_v61  ;;  %v5418_v61 = vperm.slane %v5249_v19, 1 }
  0xfb   : > { %v652_v14 = vadd.f32 %v5015_v28, %v616_v4  ;;  %v1001_v3 = vadd.f32 %v5255_v25, %v5418_v61  ;;  %v1003_v4 = vadd.f32 %v5276_v45, %v5418_v61 }
  0xfc   : > { %v931_v8 = vpop.f32.mrf.mxu0 }
  0xfd   : > { %v932_v27 = vadd.f32 %v931_v8, %v5252_v23  ;;  %v4248_v8 = vld [vmem:[%s5009_s30 + $0x78] sm:$0xff]   ;;  %s3565_s30 = scalar_lea.hbm %s6884_s10, %s4024_s23 }
  0xfe   : > { %v5335_v16 = vpop.f32.mrf.mxu1  ;;  %v4217_v12 = vunpack.c.l.bf16 %v4248_v8  ;;  %v4218_v13 = vunpack.c.h.bf16 %v4248_v8  ;;  %v5438_v8 = vpack.c.bf16 %v1003_v4, %v1001_v3  ;;  %s3568_s25 = sshll.u32 %s3565_s30, 4  ;;  %s3569_s25 = int_to_ptr.hbm [resolvable:$true] %s3568_s25 }
  0xff   : > { %970 = vmatmul.bf16.gmra.mxu0 %v796_v6  ;;  %s4723_s17 = sshra.s32 %s3569_s25, 4  ;;  %s4724_s17 = int_to_ptr.hbm [resolvable:$true] %s4723_s17 }
 0x100   : > { %s4725_s26 = scalar_lea.hbm %s4724_s17, 32  ;;  %p4730_p4 = scmp.lt.s32.totalorder %s4724_s17, %s6884_s10 }
 0x101   : > { %1059 = vmatmul.bf16.gmra.mxu1 %v796_v6  ;;  %v617_v6 = vmul.f32 %v5011_v22, %v4154_v62  ;;  %p4726_p0 = scmp.ne.s32.totalorder %s4724_s17, %s4725_s26  ;;  %p4731_p5 = scmp.lt.s32.totalorder %s4729_s21, %s4725_s26 }
 0x103   : > { %v653_v15 = vadd.f32 %v5015_v28, %v617_v6  ;;  %v3925_v28 = vld [vmem:[%s6881_s7 + $0x40] sm:$0xf]  ;;  %v4064_v6 = vld [vmem:[%s6883_s9 + $0x28] sm:$0xff]  ;;  %p4727_p1 = pnand %p4726_p0, %p4917_p3  ;;  %p4732_p6 = por %p4731_p5, %p4730_p4 }
 0x104   : > { %v933_v18 = vpop.f32.mrf.mxu0  ;;  %v3926_v31 = vor.u32 %v4076_v30, %v3925_v28  ;;  %2130 = vmatpush.bf16.msrb.mxu0 %v4064_v6 }
 0x105   : > { %v934_v29 = vadd.f32 %v933_v18, %v5252_v23  ;;  %v684_v18 = vadd.f32 %v4217_v12, %v652_v14  ;;  %v685_v20 = vadd.f32 %v4218_v13, %v653_v15  ;;  %v1112_v14 = vld [vmem:[%s6882_s8] sm:$0x3]  ;;  %v4062_v15 = vld [vmem:[%s6883_s9 + $0x18] sm:$0xff]  ;;  %p4728_p2 = pneg %p4727_p1 }
 0x106   : > { %v5356_v42 = vpop.f32.mrf.mxu1  ;;  %2436 = vmatpush.bf16.msrb.mxu1 %v3926_v31  ;;  %v4060_v31 = vld [vmem:[%s6883_s9 + $0x8] sm:$0xff] }
 0x107   : > { %v1084_v33 = vpack.c.bf16 %v934_v29, %v932_v27  ;;  %v750_v24 = vmul.f32 %v5046_v48, %v684_v18  ;;  %v751_v22 = vmul.f32 %v5046_v48, %v685_v20  ;;  %vm717_vm14 = vcmp.gt.f32.partialorder %v684_v18, 0.0  ;;  %p4733_p7 = pnand %p4732_p6, %p4728_p2 }
 0x108   : > { %vm718_vm15 = vcmp.gt.f32.partialorder %v685_v20, 0.0 }
 0x109   : > { %1226 = vmatmul.bf16.gmra.mxu2 %v1084_v33  ;;  %1315 = vmatmul.bf16.gmra.mxu3 %v1084_v33  ;;  %v782_v48 = vsel %vm717_vm14, %v684_v18, %v750_v24  ;;  %v783_v33 = vsel %vm718_vm15, %v685_v20, %v751_v22  ;;  %v5454_v18 = vperm.slane %v1112_v14, 1  ;;  %v4061_v20 = vld [vmem:[%s6883_s9 + $0x10] sm:$0xff]  ;;  %v1006_v22 = vadd.f32 %v5281_v57, %v5418_v61  ;;  %v4059_v57 = vld [vmem:[%s6883_s9] sm:$0xff] }
 0x10a   : > { %v799_v37 = vpack.c.bf16 %v783_v33, %v782_v48  ;;  %2437 = vmatpush.bf16.msrb.mxu1 %v3918_v43 }
 0x10c   : > { %v936_v46 = vpop.f32.mrf.mxu0 }
 0x10d   : > { %v937_v63 = vadd.f32 %v936_v46, %v5252_v23  ;;  %v3909_v46 = vld [vmem:[%s6881_s7 + $0x20] sm:$0xf] }
 0x10e   : > { %v5361_v56 = vpop.f32.mrf.mxu1  ;;  %v3910_v49 = vor.u32 %v4072_v47, %v3909_v46 }
 0x10f   : > { %975 = vmatmul.bf16.gmra.mxu0 %v797_v44 }
 0x110   : > { %2438 = vmatpush.bf16.msrb.mxu1 %v3910_v49 }
 0x111   : > { %1064 = vmatmul.bf16.gmra.mxu1 %v797_v44 }
 0x114   : > { %v938_v58 = vpop.f32.mrf.mxu0 }
 0x115   : > { %v939_v0 = vadd.f32 %v938_v58, %v5252_v23  ;;  %v3902_v58 = vor.u32 %v4070_v55, %v3901_v53  ;;  %v1013_v53 = vadd.f32 %v5316_v41, %v5418_v61  ;;  %v5507_v41 = vperm.slane %v1112_v14, 0 }
 0x116   : > { %v5370_v10 = vpop.f32.mrf.mxu1 }
 0x117   : > { %v1085_v1 = vpack.c.bf16 %v939_v0, %v937_v63  ;;  %2439 = vmatpush.bf16.msrb.mxu1 %v3902_v58  ;;  %v3893_v63 = vld [vmem:[%s6881_s7] sm:$0xf]  ;;  %v4068_v0 = vld [vmem:[%s6881_s7 + $0x4] sm:$0xf0] }
 0x119   : > { %1231 = vmatmul.bf16.gmra.mxu2 %v1085_v1  ;;  %1320 = vmatmul.bf16.gmra.mxu3 %v1085_v1  ;;  %v3894_v1 = vor.u32 %v4068_v0, %v3893_v63 }
 0x11b   : > { %2440 = vmatpush.bf16.msrb.mxu1 %v3894_v1 }
 0x11c   : > { %v941_v11 = vpop.f32.mrf.mxu0 }
 0x11d   : > { %v942_v26 = vadd.f32 %v941_v11, %v5252_v23  ;;  %v4063_v11 = vld [vmem:[%s6883_s9 + $0x20] sm:$0xff] }
 0x11e   : > { %v5378_v29 = vpop.f32.mrf.mxu1  ;;  %2131 = vmatpush.bf16.msrb.mxu0 %v4063_v11 }
 0x11f   : > { %980 = vmatmul.bf16.gmra.mxu0 %v798_v9 }
 0x121   : > { %1069 = vmatmul.bf16.gmra.mxu1 %v798_v9 }
 0x122   : > { %2132 = vmatpush.bf16.msrb.mxu0 %v4062_v15 }
 0x124   : > { %v943_v21 = vpop.f32.mrf.mxu0 }
 0x125   : > { %v944_v27 = vadd.f32 %v943_v21, %v5252_v23 }
 0x126   : > { %v5398_v44 = vpop.f32.mrf.mxu1  ;;  %2133 = vmatpush.bf16.msrb.mxu0 %v4061_v20 }
 0x127   : > { %v1086_v32 = vpack.c.bf16 %v944_v27, %v942_v26  ;;  %v1008_v26 = vadd.f32 %v5290_v7, %v5418_v61 }
 0x129   : > { %1236 = vmatmul.bf16.gmra.mxu2 %v1086_v32  ;;  %1325 = vmatmul.bf16.gmra.mxu3 %v1086_v32  ;;  %v5469_v48 = vpack.c.bf16 %v1008_v26, %v1006_v22 }
 0x12a   : > { %2134 = vmatpush.bf16.msrb.mxu0 %v4060_v31 }
 0x12c   : > { %v946_v38 = vpop.f32.mrf.mxu0 }
 0x12d   : > { %v947_v51 = vadd.f32 %v946_v38, %v5252_v23 }
 0x12e   : > { %v5420_v62 = vpop.f32.mrf.mxu1  ;;  %2135 = vmatpush.bf16.msrb.mxu0 %v4059_v57 }
 0x12f   : > { %985 = vmatmul.bf16.gmra.mxu0 %v799_v37 }
 0x131   : > { %1074 = vmatmul.bf16.gmra.mxu1 %v799_v37 }
 0x134   : > { %v948_v50 = vpop.f32.mrf.mxu0 }
 0x135   : > { %v949_v52 = vadd.f32 %v948_v50, %v5252_v23  ;;  %v4071_v50 = vld [vmem:[%s6881_s7 + $0x24] sm:$0xf] }
 0x136   : > { %v5440_v9 = vpop.f32.mrf.mxu1 }
 0x137   : > { %v1087_v59 = vpack.c.bf16 %v949_v52, %v947_v51  ;;  %v3911_v51 = vld [vmem:[%s6881_s7 + $0x28] sm:$0xf0]  ;;  %v1011_v52 = vadd.f32 %v5295_v17, %v5418_v61 }
 0x138   : > { %v3914_v58 = vor.u32 %v4071_v50, %v3911_v51 }
 0x139   : > { %1241 = vmatmul.bf16.gmra.mxu2 %v1087_v59  ;;  %1330 = vmatmul.bf16.gmra.mxu3 %v1087_v59  ;;  %v5498_v1 = vpack.c.bf16 %v1013_v53, %v1011_v52 }
 0x13a   : > { %2527 = vmatpush.bf16.msrb.mxu2 %v3914_v58 }
 0x13c   : > { %v951_v19 = vpop.f32.mrf.mxu0 }
 0x13d   : > { %v952_v25 = vadd.f32 %v951_v19, %v5252_v23 }
 0x13e   : > { %v5463_v28 = vpop.f32.mrf.mxu1 }
 0x141   : > { %2441 = vmatmul.bf16.vlgmr.msrb.gmra.mxu1 %v5438_v8 }
 0x144   : > { %v953_v12 = vpop.f32.mrf.mxu0 }
 0x145   : > { %v954_v13 = vadd.f32 %v953_v12, %v5252_v23 }
 0x146   : > { %v5478_v39 = vpop.f32.mrf.mxu1 }
 0x147   : > { %v1088_v45 = vpack.c.bf16 %v954_v13, %v952_v25 }
 0x149   : > { %1246 = vmatmul.bf16.gmra.mxu2 %v1088_v45  ;;  %1335 = vmatmul.bf16.gmra.mxu3 %v1088_v45 }
 0x14c   : > { %v956_v21 = vpop.f32.mrf.mxu0  ;;  %v1207_v24 = vpop.f32.mrf.mxu2 }
 0x14d   : > { %v1296_v27 = vpop.f32.mrf.mxu3  ;;  %v957_v34 = vadd.f32 %v956_v21, %v5252_v23  ;;  %v1208_v14 = vadd.f32 %v1207_v24, %v5507_v41 }
 0x14e   : > { %v1297_v30 = vadd.f32 %v1296_v27, %v5454_v18  ;;  %v5502_v19 = vpop.f32.mrf.mxu1 }
 0x150   : > { %v3827_v32 = vmul.f32 -1.442695, %v1297_v30 }
 0x151   : > { %2446 = vmatmul.bf16.gmra.mxu1 %v5469_v48 }
 0x152   : > { %4325 = vpow2.f32 %v3827_v32  ;;  %v1016_v32 = vadd.f32 %v5321_v54, %v5418_v61  ;;  %v1018_v54 = vadd.f32 %v5330_v5, %v5418_v61 }
 0x154   : > { %v958_v7 = vpop.f32.mrf.mxu0  ;;  %v1209_v33 = vpop.f32.mrf.mxu2  ;;  %v5553_v58 = vpack.c.bf16 %v1018_v54, %v1016_v32 }
 0x155   : > { %v959_v35 = vadd.f32 %v958_v7, %v5252_v23  ;;  %v1298_v36 = vpop.f32.mrf.mxu3  ;;  %v1210_v26 = vadd.f32 %v1209_v33, %v5507_v41 }
 0x156   : > { %v1299_v37 = vadd.f32 %v1298_v36, %v5454_v18  ;;  %v5526_v24 = vpop.f32.mrf.mxu1  ;;  %v4090_v36 = vld [vmem:[%s6883_s9 + $0x38] sm:$0xff] }
 0x157   : > { %v1089_v38 = vpack.c.bf16 %v959_v35, %v957_v34  ;;  %3363 = vmatpush.bf16.msrb.mxu3 %v4090_v36 }
 0x158   : > { %v4326_v40 = vpop.eup %4325  ;;  %v3828_v43 = vmul.f32 -1.442695, %v1299_v37 }
 0x159   : > { %v5480_v46 = vadd.f32 1.0, %v4326_v40  ;;  %1251 = vmatmul.bf16.gmra.mxu2 %v1089_v38  ;;  %1340 = vmatmul.bf16.gmra.mxu3 %v1089_v38 }
 0x15a   : > { %4327 = vpow2.f32 %v3828_v43 }
 0x15b   : > { %4329 = vrcp.f32 %v5480_v46  ;;  %v1547_v57 = vand.u32 2147483648, %v5480_v46  ;;  %vm1541_vm1 = vweird.f32 %v5480_v46  ;;  %v1545_v35 = vand.u32 2147483647, %v5480_v46 }
 0x15c   : > { %v961_v47 = vpop.f32.mrf.mxu0  ;;  %v5483_v49 = vpop.f32.mrf.mxu2 }
 0x15d   : > { %v1301_v55 = vpop.f32.mrf.mxu3  ;;  %v962_v11 = vadd.f32 %v961_v47, %v5252_v23  ;;  %v1548_v5 = vor.u32 1.1754944e-38, %v1547_v57  ;;  %vm1546_vm4 = vcmp.eq.f32.partialorder %v1545_v35, 8.507059e+37  ;;  %v1213_v57 = vadd.f32 %v5483_v49, %v5507_v41 }
 0x15e   : > { %v1302_v59 = vadd.f32 %v1301_v55, %v5454_v18  ;;  %v1021_v49 = vadd.f32 %v5335_v16, %v5418_v61  ;;  %v4069_v16 = vld [vmem:[%s6881_s7 + $0x14] sm:$0xf] }
 0x160   : > { %v4328_v60 = vpop.eup %4327  ;;  %v3829_v63 = vmul.f32 -1.442695, %v1302_v59 }
 0x161   : > { %v5496_v0 = vpop.eup %4329  ;;  %v5500_v2 = vadd.f32 1.0, %v4328_v60  ;;  %2451 = vmatmul.bf16.gmra.mxu1 %v5498_v1 }
 0x162   : > { %v1537_v17 = vmul.f32 %v5496_v0, %v5480_v46  ;;  %4331 = vpow2.f32 %v3829_v63  ;;  %vm1542_vm0 = vweird.f32 %v5496_v0 }
 0x163   : > { %4333 = vrcp.f32 %v5500_v2  ;;  %vm5540_vm2 = vmor %vm1541_vm1, %vm1542_vm0  ;;  %v1560_v40 = vand.u32 2147483647, %v5500_v2  ;;  %v1562_v43 = vand.u32 2147483648, %v5500_v2  ;;  %vm1556_vm5 = vweird.f32 %v5500_v2 }
 0x164   : > { %v1538_v3 = vsub.f32 1.0, %v1537_v17  ;;  %v963_v4 = vpop.f32.mrf.mxu0  ;;  %v5509_v6 = vpop.f32.mrf.mxu2 }
 0x165   : > { %v964_v12 = vadd.f32 %v963_v4, %v5252_v23  ;;  %v1303_v25 = vpop.f32.mrf.mxu3  ;;  %v1563_v63 = vor.u32 1.1754944e-38, %v1562_v43  ;;  %vm1561_vm7 = vcmp.eq.f32.partialorder %v1560_v40, 8.507059e+37  ;;  %v1215_v35 = vadd.f32 %v5509_v6, %v5507_v41 }
 0x166   : > { %v1539_v13 = vmul.f32 %v5496_v0, %v1538_v3  ;;  %v1304_v45 = vadd.f32 %v1303_v25, %v5454_v18  ;;  %v1023_v40 = vadd.f32 %v5356_v42, %v5418_v61 }
 0x167   : > { %v1090_v15 = vpack.c.bf16 %v964_v12, %v962_v11 }
 0x168   : > { %v4332_v20 = vpop.eup %4331  ;;  %v3830_v21 = vmul.f32 -1.442695, %v1304_v45  ;;  %v1540_v31 = vadd.f32 %v5496_v0, %v1539_v13 }
 0x169   : > { %v4334_v22 = vpop.eup %4333  ;;  %v5518_v27 = vadd.f32 1.0, %v4332_v20  ;;  %1256 = vmatmul.bf16.gmra.mxu2 %v1090_v15  ;;  %1345 = vmatmul.bf16.gmra.mxu3 %v1090_v15 }
 0x16a   : > { %v1552_v30 = vmul.f32 %v4334_v22, %v5500_v2  ;;  %4335 = vpow2.f32 %v3830_v21  ;;  %v1544_v47 = vsel %vm5540_vm2, %v5496_v0, %v1540_v31  ;;  %vm1557_vm3 = vweird.f32 %v4334_v22  ;;  %v5564_v21 = vpop.f32.mrf.mxu1 }
 0x16b   : > { %4337 = vrcp.f32 %v5518_v27  ;;  %v1549_v60 = vsel %vm1546_vm4, %v1548_v5, %v1544_v47  ;;  %vm1558_vm6 = vmor %vm1556_vm5, %vm1557_vm3  ;;  %v1575_v38 = vand.u32 2147483647, %v5518_v27  ;;  %v1577_v6 = vand.u32 2147483648, %v5518_v27 }
 0x16c   : > { %4339 = vtanh.f32 %v1208_v14  ;;  %v1553_v7 = vsub.f32 1.0, %v1552_v30  ;;  %v966_v33 = vpop.f32.mrf.mxu0  ;;  %v5530_v34 = vpop.f32.mrf.mxu2  ;;  %vm1571_vm9 = vweird.f32 %v5518_v27 }
 0x16d   : > { %4341 = vtanh.f32 %v1210_v26  ;;  %v1306_v37 = vpop.f32.mrf.mxu3  ;;  %v967_v15 = vadd.f32 %v966_v33, %v5252_v23  ;;  %vm1576_vm12 = vcmp.eq.f32.partialorder %v1575_v38, 8.507059e+37 }
 0x16e   : > { %v1307_v46 = vadd.f32 %v1306_v37, %v5454_v18  ;;  %v1554_v50 = vmul.f32 %v4334_v22, %v1553_v7 }
 0x170   : > { %v4336_v51 = vpop.eup %4335  ;;  %v3831_v52 = vmul.f32 -1.442695, %v1307_v46  ;;  %v1555_v53 = vadd.f32 %v4334_v22, %v1554_v50  ;;  %v3903_v50 = vld [vmem:[%s6881_s7 + $0x18] sm:$0xf0] }
 0x171   : > { %v5551_v55 = vpop.eup %4337  ;;  %v5555_v59 = vadd.f32 1.0, %v4336_v51  ;;  %2456 = vmatmul.bf16.gmra.mxu1 %v5553_v58 }
 0x172   : > { %v4340_v0 = vpop.eup %4339  ;;  %v1567_v17 = vmul.f32 %v5551_v55, %v5518_v27  ;;  %4343 = vpow2.f32 %v3831_v52  ;;  %v1559_v3 = vsel %vm1558_vm6, %v4334_v22, %v1555_v53  ;;  %vm1572_vm8 = vweird.f32 %v5551_v55 }
 0x173   : > { %v4342_v4 = vpop.eup %4341  ;;  %4345 = vrcp.f32 %v5555_v59  ;;  %v1564_v2 = vsel %vm1561_vm7, %v1563_v63, %v1559_v3  ;;  %v2016_v13 = vmul.f32 %v4340_v0, %v1549_v60  ;;  %vm5596_vm10 = vmor %vm1571_vm9, %vm1572_vm8  ;;  %v1590_v51 = vand.u32 2147483647, %v5555_v59  ;;  %v5606_v0 = vpop.f32.mrf.mxu1 }
 0x174   : > { %v1568_v11 = vsub.f32 1.0, %v1567_v17  ;;  %v968_v12 = vpop.f32.mrf.mxu0  ;;  %v5560_v25 = vpop.f32.mrf.mxu2  ;;  %v2017_v45 = vmul.f32 %v4342_v4, %v1564_v2  ;;  %v1592_v27 = vand.u32 2147483648, %v5555_v59  ;;  %v3906_v52 = vor.u32 %v4069_v16, %v3903_v50 }
 0x175   : > { %v969_v20 = vadd.f32 %v968_v12, %v5252_v23  ;;  %v1308_v14 = vpop.f32.mrf.mxu3  ;;  %v1578_v17 = vor.u32 1.1754944e-38, %v1577_v6  ;;  %vm1586_vm13 = vweird.f32 %v5555_v59  ;;  %v5611_v12 = vpack.c.bf16 %v1023_v40, %v1021_v49 }
 0x176   : > { %v1309_v22 = vadd.f32 %v1308_v14, %v5454_v18  ;;  %v2048_v26 = vpack.c.bf16 %v2017_v45, %v2016_v13  ;;  %v1569_v30 = vmul.f32 %v5551_v55, %v1568_v11  ;;  %2528 = vmatpush.bf16.msrb.mxu2 %v3906_v52  ;;  %vm1591_vm15 = vcmp.eq.f32.partialorder %v1590_v51, 8.507059e+37 }
 0x177   : > { %v1091_v31 = vpack.c.bf16 %v969_v20, %v967_v15  ;;  %v1218_v40 = vadd.f32 %v5530_v34, %v5507_v41  ;;  %v1026_v34 = vadd.f32 %v5361_v56, %v5418_v61  ;;  %v1028_v56 = vadd.f32 %v5370_v10, %v5418_v61 }
 0x178   : > { %v4344_v32 = vpop.eup %4343  ;;  %v3832_v7 = vmul.f32 -1.442695, %v1309_v22  ;;  %2136 = vmatmul.bf16.vlgmr.msrb.gmra.mxu0 %v2048_v26  ;;  %v1570_v37 = vadd.f32 %v5551_v55, %v1569_v30 }
 0x179   : > { %v4346_v33 = vpop.eup %4345  ;;  %v5573_v36 = vadd.f32 1.0, %v4344_v32  ;;  %1261 = vmatmul.bf16.gmra.mxu2 %v1091_v31  ;;  %1350 = vmatmul.bf16.gmra.mxu3 %v1091_v31 }
 0x17a   : > { %v1582_v54 = vmul.f32 %v4346_v33, %v5555_v59  ;;  %4347 = vpow2.f32 %v3832_v7  ;;  %v1574_v60 = vsel %vm5596_vm10, %v5551_v55, %v1570_v37  ;;  %vm1587_vm11 = vweird.f32 %v4346_v33 }
 0x17b   : > { %4349 = vrcp.f32 %v5573_v36  ;;  %v1579_v45 = vsel %vm1576_vm12, %v1578_v17, %v1574_v60  ;;  %vm1588_vm14 = vmor %vm1586_vm13, %vm1587_vm11  ;;  %v1593_v55 = vor.u32 1.1754944e-38, %v1592_v27  ;;  %vm1601_vm1 = vweird.f32 %v5573_v36 }
 0x17c   : > { %4351 = vtanh.f32 %v1213_v57  ;;  %v1583_v43 = vsub.f32 1.0, %v1582_v54  ;;  %v971_v46 = vpop.f32.mrf.mxu0  ;;  %v5585_v47 = vpop.f32.mrf.mxu2  ;;  %v1605_v60 = vand.u32 2147483647, %v5573_v36 }
 0x17d   : > { %4353 = vtanh.f32 %v1215_v35  ;;  %v1311_v5 = vpop.f32.mrf.mxu3  ;;  %v972_v7 = vadd.f32 %v971_v46, %v5252_v23  ;;  %v1220_v46 = vadd.f32 %v5560_v25, %v5507_v41  ;;  %v1607_v25 = vand.u32 2147483648, %v5573_v36 }
 0x17e   : > { %v1312_v53 = vadd.f32 %v1311_v5, %v5454_v18  ;;  %v1584_v63 = vmul.f32 %v4346_v33, %v1583_v43  ;;  %v5631_v5 = vpop.f32.mrf.mxu1  ;;  %vm1606_vm4 = vcmp.eq.f32.partialorder %v1605_v60, 8.507059e+37 }
 0x17f   : > { %v1608_v10 = vor.u32 1.1754944e-38, %v1607_v25 }
 0x180   : > { %v4348_v3 = vpop.eup %4347  ;;  %v3833_v4 = vmul.f32 -1.442695, %v1312_v53  ;;  %v1585_v2 = vadd.f32 %v4346_v33, %v1584_v63  ;;  %v4089_v63 = vld [vmem:[%s6883_s9 + $0x30] sm:$0xff] }
 0x181   : > { %v5609_v11 = vpop.eup %4349  ;;  %v5613_v13 = vadd.f32 1.0, %v4348_v3  ;;  %2461 = vmatmul.bf16.gmra.mxu1 %v5611_v12  ;;  %3364 = vmatpush.bf16.msrb.mxu3 %v4089_v63 }
 0x182   : > { %v4352_v15 = vpop.eup %4351  ;;  %v1597_v20 = vmul.f32 %v5609_v11, %v5573_v36  ;;  %4355 = vpow2.f32 %v3833_v4  ;;  %v1589_v14 = vsel %vm1588_vm14, %v4346_v33, %v1585_v2  ;;  %vm1602_vm0 = vweird.f32 %v5609_v11 }
 0x183   : > { %v4354_v22 = vpop.eup %4353  ;;  %4357 = vrcp.f32 %v5613_v13  ;;  %v1594_v59 = vsel %vm1591_vm15, %v1593_v55, %v1589_v14  ;;  %v2018_v32 = vmul.f32 %v4352_v15, %v1579_v45  ;;  %vm5649_vm2 = vmor %vm1601_vm1, %vm1602_vm0  ;;  %v1620_v4 = vand.u32 2147483647, %v5613_v13 }
 0x184   : > { %v1598_v26 = vsub.f32 1.0, %v1597_v20  ;;  %v973_v30 = vpop.f32.mrf.mxu0  ;;  %v5618_v31 = vpop.f32.mrf.mxu2  ;;  %v2019_v57 = vmul.f32 %v4354_v22, %v1594_v59  ;;  %v1622_v2 = vand.u32 2147483648, %v5613_v13  ;;  %vm1616_vm5 = vweird.f32 %v5613_v13 }
 0x185   : > { %v974_v35 = vadd.f32 %v973_v30, %v5252_v23  ;;  %v1313_v54 = vpop.f32.mrf.mxu3  ;;  %v5662_v59 = vpack.c.bf16 %v1028_v56, %v1026_v34  ;;  %vm1621_vm7 = vcmp.eq.f32.partialorder %v1620_v4, 8.507059e+37 }
 0x186   : > { %v1314_v33 = vadd.f32 %v1313_v54, %v5454_v18  ;;  %v2049_v37 = vpack.c.bf16 %v2019_v57, %v2018_v32  ;;  %v1599_v49 = vmul.f32 %v5609_v11, %v1598_v26  ;;  %v1623_v32 = vor.u32 1.1754944e-38, %v1622_v2 }
 0x187   : > { %v1092_v38 = vpack.c.bf16 %v974_v35, %v972_v7  ;;  %v1033_v2 = vadd.f32 %v5398_v44, %v5418_v61 }
 0x188   : > { %v4356_v6 = vpop.eup %4355  ;;  %v3834_v43 = vmul.f32 -1.442695, %v1314_v33  ;;  %2141 = vmatmul.bf16.gmra.mxu0 %v2049_v37  ;;  %v1600_v51 = vadd.f32 %v5609_v11, %v1599_v49 }
 0x189   : > { %v4358_v16 = vpop.eup %4357  ;;  %v5629_v50 = vadd.f32 1.0, %v4356_v6  ;;  %1266 = vmatmul.bf16.gmra.mxu2 %v1092_v38  ;;  %1355 = vmatmul.bf16.gmra.mxu3 %v1092_v38 }
 0x18a   : > { %v1612_v42 = vmul.f32 %v4358_v16, %v5613_v13  ;;  %4359 = vpow2.f32 %v3834_v43  ;;  %v1604_v36 = vsel %vm5649_vm2, %v5609_v11, %v1600_v51  ;;  %vm1617_vm3 = vweird.f32 %v4358_v16  ;;  %v5669_v13 = vpop.f32.mrf.mxu1 }
 0x18b   : > { %4361 = vrcp.f32 %v5629_v50  ;;  %v1609_v30 = vsel %vm1606_vm4, %v1608_v10, %v1604_v36  ;;  %vm1618_vm6 = vmor %vm1616_vm5, %vm1617_vm3  ;;  %v1635_v4 = vand.u32 2147483647, %v5629_v50  ;;  %vm1631_vm9 = vweird.f32 %v5629_v50  ;;  %v3895_v10 = vld [vmem:[%s6881_s7 + $0x8] sm:$0xf0] }
 0x18c   : > { %4363 = vtanh.f32 %v1218_v40  ;;  %v1613_v27 = vsub.f32 1.0, %v1612_v42  ;;  %v976_v52 = vpop.f32.mrf.mxu0  ;;  %v5640_v53 = vpop.f32.mrf.mxu2 }
 0x18d   : > { %4365 = vtanh.f32 %v1220_v46  ;;  %v1316_v17 = vpop.f32.mrf.mxu3  ;;  %v977_v40 = vadd.f32 %v976_v52, %v5252_v23  ;;  %v1225_v52 = vadd.f32 %v5618_v31, %v5507_v41  ;;  %v1637_v31 = vand.u32 2147483648, %v5629_v50 }
 0x18e   : > { %v1317_v45 = vadd.f32 %v1316_v17, %v5454_v18  ;;  %v1614_v55 = vmul.f32 %v4358_v16, %v1613_v27  ;;  %v1223_v27 = vadd.f32 %v5585_v47, %v5507_v41  ;;  %v1031_v47 = vadd.f32 %v5378_v29, %v5418_v61  ;;  %v4067_v29 = vld [vmem:[%s6881_s7 + $0x4] sm:$0xf] }
 0x18f   : > { %vm1636_vm12 = vcmp.eq.f32.partialorder %v1635_v4, 8.507059e+37 }
 0x190   : > { %v4360_v15 = vpop.eup %4359  ;;  %v3835_v20 = vmul.f32 -1.442695, %v1317_v45  ;;  %v1615_v14 = vadd.f32 %v4358_v16, %v1614_v55 }
 0x191   : > { %v5660_v22 = vpop.eup %4361  ;;  %v5664_v26 = vadd.f32 1.0, %v4360_v15  ;;  %2466 = vmatmul.bf16.gmra.mxu1 %v5662_v59 }
 0x192   : > { %v4364_v11 = vpop.eup %4363  ;;  %v1627_v57 = vmul.f32 %v5660_v22, %v5629_v50  ;;  %4367 = vpow2.f32 %v3835_v20  ;;  %v1619_v7 = vsel %vm1618_vm6, %v4358_v16, %v1615_v14  ;;  %vm1632_vm8 = vweird.f32 %v5660_v22 }
 0x193   : > { %v4366_v35 = vpop.eup %4365  ;;  %4369 = vrcp.f32 %v5664_v26  ;;  %v1624_v54 = vsel %vm1621_vm7, %v1623_v32, %v1619_v7  ;;  %v2020_v38 = vmul.f32 %v4364_v11, %v1609_v30  ;;  %vm5705_vm10 = vmor %vm1631_vm9, %vm1632_vm8  ;;  %v1650_v20 = vand.u32 2147483647, %v5664_v26  ;;  %v5711_v30 = vpop.f32.mrf.mxu1 }
 0x194   : > { %v1628_v33 = vsub.f32 1.0, %v1627_v57  ;;  %v978_v37 = vpop.f32.mrf.mxu0  ;;  %v5671_v49 = vpop.f32.mrf.mxu2  ;;  %v2021_v6 = vmul.f32 %v4366_v35, %v1624_v54  ;;  %v1652_v50 = vand.u32 2147483648, %v5664_v26  ;;  %v3898_v14 = vor.u32 %v4067_v29, %v3895_v10 }
 0x195   : > { %v979_v43 = vadd.f32 %v978_v37, %v5252_v23  ;;  %v1318_v46 = vpop.f32.mrf.mxu3  ;;  %v1638_v7 = vor.u32 1.1754944e-38, %v1637_v31  ;;  %vm1646_vm13 = vweird.f32 %v5664_v26  ;;  %vm1651_vm15 = vcmp.eq.f32.partialorder %v1650_v20, 8.507059e+37 }
 0x196   : > { %v1319_v16 = vadd.f32 %v1318_v46, %v5454_v18  ;;  %v2050_v42 = vpack.c.bf16 %v2021_v6, %v2020_v38  ;;  %v1629_v51 = vmul.f32 %v5660_v22, %v1628_v33  ;;  %2529 = vmatpush.bf16.msrb.mxu2 %v3898_v14  ;;  %v5720_v38 = vpack.c.bf16 %v1033_v2, %v1031_v47 }
 0x197   : > { %v1093_v34 = vpack.c.bf16 %v979_v43, %v977_v40  ;;  %v1653_v43 = vor.u32 1.1754944e-38, %v1652_v50 }
 0x198   : > { %v4368_v25 = vpop.eup %4367  ;;  %v3836_v60 = vmul.f32 -1.442695, %v1319_v16  ;;  %2146 = vmatmul.bf16.gmra.mxu0 %v2050_v42  ;;  %v1630_v3 = vadd.f32 %v5660_v22, %v1629_v51 }
 0x199   : > { %v4370_v63 = vpop.eup %4369  ;;  %v5682_v56 = vadd.f32 1.0, %v4368_v25  ;;  %1271 = vmatmul.bf16.gmra.mxu2 %v1093_v34  ;;  %1360 = vmatmul.bf16.gmra.mxu3 %v1093_v34 }
 0x19a   : > { %v1642_v17 = vmul.f32 %v4370_v63, %v5664_v26  ;;  %4371 = vpow2.f32 %v3836_v60  ;;  %v1634_v11 = vsel %vm5705_vm10, %v5660_v22, %v1630_v3  ;;  %vm1647_vm11 = vweird.f32 %v4370_v63 }
 0x19b   : > { %4373 = vrcp.f32 %v5682_v56  ;;  %v1639_v40 = vsel %vm1636_vm12, %v1638_v7, %v1634_v11  ;;  %vm1648_vm14 = vmor %vm1646_vm13, %vm1647_vm11  ;;  %v5736_v29 = vpop.f32.mrf.mxu1  ;;  %v1667_v14 = vand.u32 2147483648, %v5682_v56  ;;  %vm1661_vm1 = vweird.f32 %v5682_v56  ;;  %v4088_v7 = vld [vmem:[%s6883_s9 + $0x28] sm:$0xff] }
 0x19c   : > { %4375 = vtanh.f32 %v1223_v27  ;;  %v1643_v45 = vsub.f32 1.0, %v1642_v17  ;;  %v981_v36 = vpop.f32.mrf.mxu0  ;;  %v5694_v55 = vpop.f32.mrf.mxu2  ;;  %3365 = vmatpush.bf16.msrb.mxu3 %v4088_v7 }
 0x19d   : > { %4377 = vtanh.f32 %v1225_v52  ;;  %v1321_v15 = vpop.f32.mrf.mxu3  ;;  %v982_v52 = vadd.f32 %v981_v36, %v5252_v23 }
 0x19e   : > { %v1322_v32 = vadd.f32 %v1321_v15, %v5454_v18  ;;  %v1644_v57 = vmul.f32 %v4370_v63, %v1643_v45  ;;  %v1228_v45 = vadd.f32 %v5640_v53, %v5507_v41  ;;  %v1230_v15 = vadd.f32 %v5671_v49, %v5507_v41 }
 0x19f   : > { %v1036_v53 = vadd.f32 %v5420_v62, %v5418_v61  ;;  %v1038_v62 = vadd.f32 %v5440_v9, %v5418_v61  ;;  %v1668_v9 = vor.u32 1.1754944e-38, %v1667_v14 }
 0x1a0   : > { %v4372_v35 = vpop.eup %4371  ;;  %v3837_v54 = vmul.f32 -1.442695, %v1322_v32  ;;  %v1645_v33 = vadd.f32 %v4370_v63, %v1644_v57  ;;  %v1665_v57 = vand.u32 2147483647, %v5682_v56 }
 0x1a1   : > { %v5718_v37 = vpop.eup %4373  ;;  %v5722_v6 = vadd.f32 1.0, %v4372_v35  ;;  %2471 = vmatmul.bf16.gmra.mxu1 %v5720_v38 }
 0x1a2   : > { %v4376_v22 = vpop.eup %4375  ;;  %v1657_v46 = vmul.f32 %v5718_v37, %v5682_v56  ;;  %4379 = vpow2.f32 %v3837_v54  ;;  %v1649_v16 = vsel %vm1648_vm14, %v4370_v63, %v1645_v33  ;;  %vm1662_vm0 = vweird.f32 %v5718_v37 }
 0x1a3   : > { %v4378_v42 = vpop.eup %4377  ;;  %4381 = vrcp.f32 %v5722_v6  ;;  %v1654_v26 = vsel %vm1651_vm15, %v1653_v43, %v1649_v16  ;;  %v2022_v27 = vmul.f32 %v4376_v22, %v1639_v40  ;;  %vm5758_vm2 = vmor %vm1661_vm1, %vm1662_vm0  ;;  %v1680_v33 = vand.u32 2147483647, %v5722_v6 }
 0x1a4   : > { %v1658_v51 = vsub.f32 1.0, %v1657_v46  ;;  %v983_v34 = vpop.f32.mrf.mxu0  ;;  %v5727_v25 = vpop.f32.mrf.mxu2  ;;  %v2023_v60 = vmul.f32 %v4378_v42, %v1654_v26  ;;  %v1682_v40 = vand.u32 2147483648, %v5722_v6  ;;  %vm1666_vm4 = vcmp.eq.f32.partialorder %v1665_v57, 8.507059e+37 }
 0x1a5   : > { %v984_v17 = vadd.f32 %v983_v34, %v5252_v23  ;;  %v1323_v3 = vpop.f32.mrf.mxu3  ;;  %vm1676_vm5 = vweird.f32 %v5722_v6  ;;  %vm1681_vm7 = vcmp.eq.f32.partialorder %v1680_v33, 8.507059e+37  ;;  %v1233_v57 = vadd.f32 %v5694_v55, %v5507_v41 }
 0x1a6   : > { %v1324_v63 = vadd.f32 %v1323_v3, %v5454_v18  ;;  %v2051_v47 = vpack.c.bf16 %v2023_v60, %v2022_v27  ;;  %v1659_v4 = vmul.f32 %v5718_v37, %v1658_v51  ;;  %v5771_v51 = vpack.c.bf16 %v1038_v62, %v1036_v53 }
 0x1a7   : > { %v1094_v31 = vpack.c.bf16 %v984_v17, %v982_v52  ;;  %v1683_v60 = vor.u32 1.1754944e-38, %v1682_v40  ;;  %v5777_v17 = vpop.f32.mrf.mxu1  ;;  %v1041_v55 = vadd.f32 %v5463_v28, %v5418_v61  ;;  %v4087_v28 = vld [vmem:[%s6883_s9 + $0x20] sm:$0xff] }
 0x1a8   : > { %v4380_v2 = vpop.eup %4379  ;;  %v3838_v10 = vmul.f32 -1.442695, %v1324_v63  ;;  %2151 = vmatmul.bf16.gmra.mxu0 %v2051_v47  ;;  %v1660_v50 = vadd.f32 %v5718_v37, %v1659_v4  ;;  %3366 = vmatpush.bf16.msrb.mxu3 %v4087_v28 }
 0x1a9   : > { %v4382_v36 = vpop.eup %4381  ;;  %v5740_v44 = vadd.f32 1.0, %v4380_v2  ;;  %1276 = vmatmul.bf16.gmra.mxu2 %v1094_v31  ;;  %1365 = vmatmul.bf16.gmra.mxu3 %v1094_v31 }
 0x1aa   : > { %v1672_v20 = vmul.f32 %v4382_v36, %v5722_v6  ;;  %4383 = vpow2.f32 %v3838_v10  ;;  %v1664_v56 = vsel %vm5758_vm2, %v5718_v37, %v1660_v50  ;;  %vm1677_vm3 = vweird.f32 %v4382_v36 }
 0x1ab   : > { %4385 = vrcp.f32 %v5740_v44  ;;  %v1669_v27 = vsel %vm1666_vm4, %v1668_v9, %v1664_v56  ;;  %vm1678_vm6 = vmor %vm1676_vm5, %vm1677_vm3  ;;  %v1697_v33 = vand.u32 2147483648, %v5740_v44  ;;  %vm1691_vm9 = vweird.f32 %v5740_v44 }
 0x1ac   : > { %4387 = vtanh.f32 %v1228_v45  ;;  %v1673_v49 = vsub.f32 1.0, %v1672_v20  ;;  %v986_v32 = vpop.f32.mrf.mxu0  ;;  %v5749_v11 = vpop.f32.mrf.mxu2  ;;  %v1695_v56 = vand.u32 2147483647, %v5740_v44 }
 0x1ad   : > { %4389 = vtanh.f32 %v1230_v15  ;;  %v1326_v35 = vpop.f32.mrf.mxu3  ;;  %v987_v10 = vadd.f32 %v986_v32, %v5252_v23  ;;  %v1235_v32 = vadd.f32 %v5727_v25, %v5507_v41 }
 0x1ae   : > { %v1327_v43 = vadd.f32 %v1326_v35, %v5454_v18  ;;  %v1674_v22 = vmul.f32 %v4382_v36, %v1673_v49  ;;  %vm1696_vm12 = vcmp.eq.f32.partialorder %v1695_v56, 8.507059e+37 }
 0x1af   : > { %v5800_v40 = vpop.f32.mrf.mxu1 }
 0x1b0   : > { %v4384_v46 = vpop.eup %4383  ;;  %v3839_v16 = vmul.f32 -1.442695, %v1327_v43  ;;  %v1675_v42 = vadd.f32 %v4382_v36, %v1674_v22  ;;  %v1043_v22 = vadd.f32 %v5478_v39, %v5418_v61 }
 0x1b1   : > { %v5769_v26 = vpop.eup %4385  ;;  %v5773_v34 = vadd.f32 1.0, %v4384_v46  ;;  %2476 = vmatmul.bf16.gmra.mxu1 %v5771_v51 }
 0x1b2   : > { %v4388_v37 = vpop.eup %4387  ;;  %v1687_v52 = vmul.f32 %v5769_v26, %v5740_v44  ;;  %4391 = vpow2.f32 %v3839_v16  ;;  %v1679_v3 = vsel %vm1678_vm6, %v4382_v36, %v1675_v42  ;;  %vm1692_vm8 = vweird.f32 %v5769_v26 }
 0x1b3   : > { %v4390_v63 = vpop.eup %4389  ;;  %4393 = vrcp.f32 %v5773_v34  ;;  %v1684_v6 = vsel %vm1681_vm7, %v1683_v60, %v1679_v3  ;;  %v2024_v2 = vmul.f32 %v4388_v37, %v1669_v27  ;;  %vm5808_vm10 = vmor %vm1691_vm9, %vm1692_vm8  ;;  %v1710_v46 = vand.u32 2147483647, %v5773_v34 }
 0x1b4   : > { %v1688_v47 = vsub.f32 1.0, %v1687_v52  ;;  %v988_v4 = vpop.f32.mrf.mxu0  ;;  %v5780_v31 = vpop.f32.mrf.mxu2  ;;  %v2025_v45 = vmul.f32 %v4390_v63, %v1684_v6  ;;  %v1712_v16 = vand.u32 2147483648, %v5773_v34  ;;  %v1698_v60 = vor.u32 1.1754944e-38, %v1697_v33 }
 0x1b5   : > { %v989_v15 = vadd.f32 %v988_v4, %v5252_v23  ;;  %v1328_v20 = vpop.f32.mrf.mxu3  ;;  %vm1706_vm13 = vweird.f32 %v5773_v34  ;;  %v5821_v63 = vpack.c.bf16 %v1043_v22, %v1041_v55  ;;  %vm1711_vm15 = vcmp.eq.f32.partialorder %v1710_v46, 8.507059e+37 }
 0x1b6   : > { %v1329_v36 = vadd.f32 %v1328_v20, %v5454_v18  ;;  %v2052_v50 = vpack.c.bf16 %v2025_v45, %v2024_v2  ;;  %v1689_v53 = vmul.f32 %v5769_v26, %v1688_v47  ;;  %v1713_v4 = vor.u32 1.1754944e-38, %v1712_v16 }
 0x1b7   : > { %v1095_v14 = vpack.c.bf16 %v989_v15, %v987_v10  ;;  %v1240_v55 = vadd.f32 %v5780_v31, %v5507_v41  ;;  %v1048_v46 = vadd.f32 %v5526_v24, %v5418_v61  ;;  %v1053_v16 = vadd.f32 %v5606_v0, %v5418_v61 }
 0x1b8   : > { %v4392_v49 = vpop.eup %4391  ;;  %v3840_v7 = vmul.f32 -1.442695, %v1329_v36  ;;  %2156 = vmatmul.bf16.gmra.mxu0 %v2052_v50  ;;  %v1690_v54 = vadd.f32 %v5769_v26, %v1689_v53 }
 0x1b9   : > { %v4394_v62 = vpop.eup %4393  ;;  %v5791_v23 = vadd.f32 1.0, %v4392_v49  ;;  %1281 = vmatmul.bf16.gmra.mxu2 %v1095_v14  ;;  %1370 = vmatmul.bf16.gmra.mxu3 %v1095_v14  ;;  %v5831_v14 = vpop.f32.mrf.mxu1 }
 0x1ba   : > { %v1702_v35 = vmul.f32 %v4394_v62, %v5773_v34  ;;  %4395 = vpow2.f32 %v3840_v7  ;;  %v1694_v27 = vsel %vm5808_vm10, %v5769_v26, %v1690_v54  ;;  %vm1707_vm11 = vweird.f32 %v4394_v62 }
 0x1bb   : > { %4397 = vrcp.f32 %v5791_v23  ;;  %v1699_v47 = vsel %vm1696_vm12, %v1698_v60, %v1694_v27  ;;  %vm1708_vm14 = vmor %vm1706_vm13, %vm1707_vm11  ;;  %v1727_v22 = vand.u32 2147483648, %v5791_v23  ;;  %vm1721_vm1 = vweird.f32 %v5791_v23 }
 0x1bc   : > { %4399 = vtanh.f32 %v1233_v57  ;;  %v1703_v25 = vsub.f32 1.0, %v1702_v35  ;;  %v5802_v43 = vpop.f32.mrf.mxu2 }
 0x1bd   : > { %4401 = vtanh.f32 %v1235_v32  ;;  %v1331_v9 = vpop.f32.mrf.mxu3  ;;  %v1238_v32 = vadd.f32 %v5749_v11, %v5507_v41  ;;  %v1046_v11 = vadd.f32 %v5502_v19, %v5418_v61  ;;  %v1728_v24 = vor.u32 1.1754944e-38, %v1727_v22 }
 0x1be   : > { %v1332_v42 = vadd.f32 %v1331_v9, %v5454_v18  ;;  %v1704_v44 = vmul.f32 %v4394_v62, %v1703_v25 }
 0x1c0   : > { %v4396_v39 = vpop.eup %4395  ;;  %v3841_v37 = vmul.f32 -1.442695, %v1332_v42  ;;  %v1705_v52 = vadd.f32 %v4394_v62, %v1704_v44 }
 0x1c1   : > { %v5819_v3 = vpop.eup %4397  ;;  %v5823_v6 = vadd.f32 1.0, %v4396_v39  ;;  %2481 = vmatmul.bf16.gmra.mxu1 %v5821_v63 }
 0x1c2   : > { %v4400_v2 = vpop.eup %4399  ;;  %v1717_v26 = vmul.f32 %v5819_v3, %v5791_v23  ;;  %4403 = vpow2.f32 %v3841_v37  ;;  %v1709_v45 = vsel %vm1708_vm14, %v4394_v62, %v1705_v52  ;;  %vm1722_vm0 = vweird.f32 %v5819_v3  ;;  %v5868_v37 = vpop.f32.mrf.mxu1 }
 0x1c3   : > { %v4402_v10 = vpop.eup %4401  ;;  %4405 = vrcp.f32 %v5823_v6  ;;  %v1714_v34 = vsel %vm1711_vm15, %v1713_v4, %v1709_v45  ;;  %v2026_v36 = vmul.f32 %v4400_v2, %v1699_v47  ;;  %vm5858_vm2 = vmor %vm1721_vm1, %vm1722_vm0  ;;  %v1740_v42 = vand.u32 2147483647, %v5823_v6 }
 0x1c4   : > { %v1718_v15 = vsub.f32 1.0, %v1717_v26  ;;  %v5828_v20 = vpop.f32.mrf.mxu2  ;;  %v2027_v50 = vmul.f32 %v4402_v10, %v1714_v34  ;;  %v1742_v27 = vand.u32 2147483648, %v5823_v6  ;;  %vm1736_vm5 = vweird.f32 %v5823_v6 }
 0x1c5   : > { %v1333_v53 = vpop.f32.mrf.mxu3  ;;  %v5873_v2 = vpack.c.bf16 %v1048_v46, %v1046_v11  ;;  %vm1741_vm7 = vcmp.eq.f32.partialorder %v1740_v42, 8.507059e+37  ;;  %v1245_v11 = vadd.f32 %v5828_v20, %v5507_v41 }
 0x1c6   : > { %v1334_v49 = vadd.f32 %v1333_v53, %v5454_v18  ;;  %v2053_v57 = vpack.c.bf16 %v2027_v50, %v2026_v36  ;;  %v1719_v7 = vmul.f32 %v5819_v3, %v1718_v15 }
 0x1c8   : > { %v4404_v62 = vpop.eup %4403  ;;  %v3842_v35 = vmul.f32 -1.442695, %v1334_v49  ;;  %2161 = vmatmul.bf16.gmra.mxu0 %v2053_v57  ;;  %v1720_v56 = vadd.f32 %v5819_v3, %v1719_v7 }
 0x1c9   : > { %v4406_v54 = vpop.eup %4405  ;;  %v5839_v33 = vadd.f32 1.0, %v4404_v62  ;;  %2530 = vmatmul.bf16.vlgmr.msrb.gmra.mxu2 %v5438_v8  ;;  %v1725_v8 = vand.u32 2147483647, %v5791_v23 }
 0x1ca   : > { %v1732_v25 = vmul.f32 %v4406_v54, %v5823_v6  ;;  %4407 = vpow2.f32 %v3842_v35  ;;  %v1724_v23 = vsel %vm5858_vm2, %v5819_v3, %v1720_v56  ;;  %vm1737_vm3 = vweird.f32 %v4406_v54 }
 0x1cb   : > { %4409 = vrcp.f32 %v5839_v33  ;;  %vm1726_vm4 = vcmp.eq.f32.partialorder %v1725_v8, 8.507059e+37  ;;  %vm1738_vm6 = vmor %vm1736_vm5, %vm1737_vm3  ;;  %v1743_v3 = vor.u32 1.1754944e-38, %v1742_v27  ;;  %v5893_v8 = vpop.f32.mrf.mxu1  ;;  %v1757_v20 = vand.u32 2147483648, %v5839_v33 }
 0x1cc   : > { %4411 = vtanh.f32 %v1238_v32  ;;  %v1733_v31 = vsub.f32 1.0, %v1732_v25  ;;  %v5849_v9 = vpop.f32.mrf.mxu2  ;;  %v1729_v45 = vsel %vm1726_vm4, %v1728_v24, %v1724_v23  ;;  %vm1751_vm9 = vweird.f32 %v5839_v33 }
 0x1cd   : > { %4413 = vtanh.f32 %v1240_v55  ;;  %v1336_v19 = vpop.f32.mrf.mxu3  ;;  %v1758_v24 = vor.u32 1.1754944e-38, %v1757_v20  ;;  %v1058_v27 = vadd.f32 %v5669_v13, %v5418_v61 }
 0x1ce   : > { %v1337_v44 = vadd.f32 %v1336_v19, %v5454_v18  ;;  %v1734_v60 = vmul.f32 %v4406_v54, %v1733_v31 }
 0x1d0   : > { %v4408_v39 = vpop.eup %4407  ;;  %v3843_v52 = vmul.f32 -1.442695, %v1337_v44  ;;  %v1735_v47 = vadd.f32 %v4406_v54, %v1734_v60 }
 0x1d1   : > { %v5871_v4 = vpop.eup %4409  ;;  %v5875_v26 = vadd.f32 1.0, %v4408_v39  ;;  %2486 = vmatmul.bf16.gmra.mxu1 %v5873_v2 }
 0x1d2   : > { %v4412_v10 = vpop.eup %4411  ;;  %v1747_v34 = vmul.f32 %v5871_v4, %v5839_v33  ;;  %4415 = vpow2.f32 %v3843_v52  ;;  %v1739_v15 = vsel %vm1738_vm6, %v4406_v54, %v1735_v47  ;;  %v1243_v54 = vadd.f32 %v5802_v43, %v5507_v41 }
 0x1d3   : > { %v4414_v36 = vpop.eup %4413  ;;  %4417 = vrcp.f32 %v5875_v26  ;;  %v1744_v6 = vsel %vm1741_vm7, %v1743_v3, %v1739_v15  ;;  %v2028_v49 = vmul.f32 %v4412_v10, %v1729_v45  ;;  %vm1752_vm8 = vweird.f32 %v5871_v4 }
 0x1d4   : > { %v1748_v50 = vsub.f32 1.0, %v1747_v34  ;;  %v5880_v53 = vpop.f32.mrf.mxu2  ;;  %v2029_v57 = vmul.f32 %v4414_v36, %v1744_v6  ;;  %v1051_v43 = vadd.f32 %v5564_v21, %v5418_v61  ;;  %vm5907_vm10 = vmor %vm1751_vm9, %vm1752_vm8  ;;  %v1770_v21 = vand.u32 2147483647, %v5875_v26 }
 0x1d5   : > { %v1338_v7 = vpop.f32.mrf.mxu3  ;;  %v1772_v44 = vand.u32 2147483648, %v5875_v26  ;;  %vm1766_vm13 = vweird.f32 %v5875_v26 }
 0x1d6   : > { %v1339_v62 = vadd.f32 %v1338_v7, %v5454_v18  ;;  %v2054_v32 = vpack.c.bf16 %v2029_v57, %v2028_v49  ;;  %v1749_v35 = vmul.f32 %v5871_v4, %v1748_v50  ;;  %v5920_v45 = vpack.c.bf16 %v1053_v16, %v1051_v43  ;;  %v5927_v49 = vpop.f32.mrf.mxu1 }
 0x1d7   : > { %v1773_v34 = vor.u32 1.1754944e-38, %v1772_v44  ;;  %vm1771_vm15 = vcmp.eq.f32.partialorder %v1770_v21, 8.507059e+37 }
 0x1d8   : > { %v4416_v55 = vpop.eup %4415  ;;  %v3844_v25 = vmul.f32 -1.442695, %v1339_v62  ;;  %2166 = vmatmul.bf16.gmra.mxu0 %v2054_v32  ;;  %v1750_v28 = vadd.f32 %v5871_v4, %v1749_v35 }
 0x1d9   : > { %v4418_v56 = vpop.eup %4417  ;;  %v5889_v22 = vadd.f32 1.0, %v4416_v55  ;;  %2535 = vmatmul.bf16.gmra.mxu2 %v5469_v48  ;;  %v1755_v48 = vand.u32 2147483647, %v5839_v33 }
 0x1da   : > { %v1762_v31 = vmul.f32 %v4418_v56, %v5875_v26  ;;  %4419 = vpow2.f32 %v3844_v25  ;;  %v1754_v60 = vsel %vm5907_vm10, %v5871_v4, %v1750_v28  ;;  %vm1767_vm11 = vweird.f32 %v4418_v56 }
 0x1db   : > { %4421 = vrcp.f32 %v5889_v22  ;;  %vm1756_vm12 = vcmp.eq.f32.partialorder %v1755_v48, 8.507059e+37  ;;  %vm1768_vm14 = vmor %vm1766_vm13, %vm1767_vm11  ;;  %v1250_v28 = vadd.f32 %v5880_v53, %v5507_v41  ;;  %v1787_v48 = vand.u32 2147483648, %v5889_v22 }
 0x1dc   : > { %4423 = vtanh.f32 %v1243_v54  ;;  %v1763_v46 = vsub.f32 1.0, %v1762_v31  ;;  %v5901_v19 = vpop.f32.mrf.mxu2  ;;  %v1759_v10 = vsel %vm1756_vm12, %v1758_v24, %v1754_v60  ;;  %vm1781_vm1 = vweird.f32 %v5889_v22 }
 0x1dd   : > { %4425 = vtanh.f32 %v1245_v11  ;;  %v1341_v42 = vpop.f32.mrf.mxu3  ;;  %v1788_v13 = vor.u32 1.1754944e-38, %v1787_v48 }
 0x1de   : > { %v1342_v23 = vadd.f32 %v1341_v42, %v5454_v18  ;;  %v1764_v33 = vmul.f32 %v4418_v56, %v1763_v46  ;;  %v4086_v42 = vld [vmem:[%s6883_s9 + $0x18] sm:$0xff]  ;;  %v5963_v60 = vpop.f32.mrf.mxu1 }
 0x1df   : > { %3367 = vmatpush.bf16.msrb.mxu3 %v4086_v42 }
 0x1e0   : > { %v4420_v0 = vpop.eup %4419  ;;  %v3845_v39 = vmul.f32 -1.442695, %v1342_v23  ;;  %v1765_v52 = vadd.f32 %v4418_v56, %v1764_v33 }
 0x1e1   : > { %v5918_v47 = vpop.eup %4421  ;;  %v5922_v3 = vadd.f32 1.0, %v4420_v0  ;;  %2491 = vmatmul.bf16.gmra.mxu1 %v5920_v45 }
 0x1e2   : > { %v4424_v15 = vpop.eup %4423  ;;  %v1777_v4 = vmul.f32 %v5918_v47, %v5889_v22  ;;  %4427 = vpow2.f32 %v3845_v39  ;;  %v1769_v36 = vsel %vm1768_vm14, %v4418_v56, %v1765_v52  ;;  %v1248_v56 = vadd.f32 %v5849_v9, %v5507_v41 }
 0x1e3   : > { %v4426_v6 = vpop.eup %4425  ;;  %4429 = vrcp.f32 %v5922_v3  ;;  %v1774_v26 = vsel %vm1771_vm15, %v1773_v34, %v1769_v36  ;;  %v2030_v7 = vmul.f32 %v4424_v15, %v1759_v10  ;;  %vm1782_vm0 = vweird.f32 %v5918_v47 }
 0x1e4   : > { %v1778_v50 = vsub.f32 1.0, %v1777_v4  ;;  %v5929_v57 = vpop.f32.mrf.mxu2  ;;  %v2031_v62 = vmul.f32 %v4426_v6, %v1774_v26  ;;  %v1056_v9 = vadd.f32 %v5631_v5, %v5418_v61  ;;  %vm5957_vm2 = vmor %vm1781_vm1, %vm1782_vm0  ;;  %v1800_v44 = vand.u32 2147483647, %v5922_v3 }
 0x1e5   : > { %v1343_v32 = vpop.f32.mrf.mxu3  ;;  %v1802_v23 = vand.u32 2147483648, %v5922_v3  ;;  %vm1796_vm5 = vweird.f32 %v5922_v3 }
 0x1e6   : > { %v1344_v35 = vadd.f32 %v1343_v32, %v5454_v18  ;;  %v2055_v55 = vpack.c.bf16 %v2031_v62, %v2030_v7  ;;  %v1779_v54 = vmul.f32 %v5918_v47, %v1778_v50  ;;  %v5972_v34 = vpack.c.bf16 %v1058_v27, %v1056_v9 }
 0x1e7   : > { %v1803_v36 = vor.u32 1.1754944e-38, %v1802_v23  ;;  %vm1801_vm7 = vcmp.eq.f32.partialorder %v1800_v44, 8.507059e+37 }
 0x1e8   : > { %v4428_v25 = vpop.eup %4427  ;;  %v3846_v11 = vmul.f32 -1.442695, %v1344_v35  ;;  %2171 = vmatmul.bf16.gmra.mxu0 %v2055_v55  ;;  %v1780_v46 = vadd.f32 %v5918_v47, %v1779_v54 }
 0x1e9   : > { %v4430_v31 = vpop.eup %4429  ;;  %v5938_v43 = vadd.f32 1.0, %v4428_v25  ;;  %2540 = vmatmul.bf16.gmra.mxu2 %v5498_v1  ;;  %v1785_v1 = vand.u32 2147483647, %v5889_v22 }
 0x1ea   : > { %v1792_v20 = vmul.f32 %v4430_v31, %v5922_v3  ;;  %4431 = vpow2.f32 %v3846_v11  ;;  %v1784_v33 = vsel %vm5957_vm2, %v5918_v47, %v1780_v46  ;;  %vm1797_vm3 = vweird.f32 %v4430_v31  ;;  %v5986_v46 = vpop.f32.mrf.mxu1 }
 0x1eb   : > { %4433 = vrcp.f32 %v5938_v43  ;;  %vm1786_vm4 = vcmp.eq.f32.partialorder %v1785_v1, 8.507059e+37  ;;  %vm1798_vm6 = vmor %vm1796_vm5, %vm1797_vm3  ;;  %vm1811_vm9 = vweird.f32 %v5938_v43  ;;  %v1815_v23 = vand.u32 2147483647, %v5938_v43 }
 0x1ec   : > { %4435 = vtanh.f32 %v1248_v56  ;;  %v1793_v53 = vsub.f32 1.0, %v1792_v20  ;;  %v5948_v16 = vpop.f32.mrf.mxu2  ;;  %v1789_v4 = vsel %vm1786_vm4, %v1788_v13, %v1784_v33  ;;  %v1253_v20 = vadd.f32 %v5901_v19, %v5507_v41 }
 0x1ed   : > { %4437 = vtanh.f32 %v1250_v28  ;;  %v1346_v5 = vpop.f32.mrf.mxu3  ;;  %v1061_v19 = vadd.f32 %v5711_v30, %v5418_v61  ;;  %vm1816_vm12 = vcmp.eq.f32.partialorder %v1815_v23, 8.507059e+37 }
 0x1ee   : > { %v1347_v22 = vadd.f32 %v1346_v5, %v5454_v18  ;;  %v1794_v24 = vmul.f32 %v4430_v31, %v1793_v53  ;;  %v1255_v53 = vadd.f32 %v5929_v57, %v5507_v41  ;;  %v1817_v57 = vand.u32 2147483648, %v5938_v43 }
 0x1ef   : > { %v1063_v5 = vadd.f32 %v5736_v29, %v5418_v61 }
 0x1f0   : > { %v4432_v0 = vpop.eup %4431  ;;  %v3847_v39 = vmul.f32 -1.442695, %v1347_v22  ;;  %v1795_v52 = vadd.f32 %v4430_v31, %v1794_v24 }
 0x1f1   : > { %v5970_v10 = vpop.eup %4433  ;;  %v5974_v15 = vadd.f32 1.0, %v4432_v0  ;;  %2496 = vmatmul.bf16.gmra.mxu1 %v5972_v34 }
 0x1f2   : > { %v4436_v47 = vpop.eup %4435  ;;  %v1807_v6 = vmul.f32 %v5970_v10, %v5938_v43  ;;  %4439 = vpow2.f32 %v3847_v39  ;;  %v1799_v26 = vsel %vm1798_vm6, %v4430_v31, %v1795_v52  ;;  %vm1812_vm8 = vweird.f32 %v5970_v10 }
 0x1f3   : > { %v4438_v50 = vpop.eup %4437  ;;  %4441 = vrcp.f32 %v5974_v15  ;;  %v1804_v3 = vsel %vm1801_vm7, %v1803_v36, %v1799_v26  ;;  %v2032_v32 = vmul.f32 %v4436_v47, %v1789_v4  ;;  %vm6005_vm10 = vmor %vm1811_vm9, %vm1812_vm8  ;;  %v1830_v24 = vand.u32 2147483647, %v5974_v15 }
 0x1f4   : > { %v1808_v7 = vsub.f32 1.0, %v1807_v6  ;;  %v5979_v62 = vpop.f32.mrf.mxu2  ;;  %v2033_v35 = vmul.f32 %v4438_v50, %v1804_v3  ;;  %v1832_v29 = vand.u32 2147483648, %v5974_v15  ;;  %v1818_v52 = vor.u32 1.1754944e-38, %v1817_v57 }
 0x1f5   : > { %v1348_v55 = vpop.f32.mrf.mxu3  ;;  %v2137_v54 = vpop.f32.mrf.mxu0  ;;  %vm1826_vm13 = vweird.f32 %v5974_v15  ;;  %vm1831_vm15 = vcmp.eq.f32.partialorder %v1830_v24, 8.507059e+37 }
 0x1f6   : > { %v1349_v25 = vadd.f32 %v1348_v55, %v5454_v18  ;;  %v2056_v56 = vpack.c.bf16 %v2033_v35, %v2032_v32  ;;  %v2217_v11 = vmax.f32 %v2137_v54, 0.0  ;;  %v1809_v31 = vmul.f32 %v5970_v10, %v1808_v7  ;;  %v6023_v7 = vpop.f32.mrf.mxu1 }
 0x1f7   : > { %v1833_v50 = vor.u32 1.1754944e-38, %v1832_v29  ;;  %v4085_v29 = vld [vmem:[%s6883_s9 + $0x10] sm:$0xff] }
 0x1f8   : > { %v4440_v28 = vpop.eup %4439  ;;  %v3848_v9 = vmul.f32 -1.442695, %v1349_v25  ;;  %2176 = vmatmul.bf16.gmra.mxu0 %v2056_v56  ;;  %2249 = vxpose.xlu0.b32.start [1/16] (narrow) %v2217_v11, 8  ;;  %v1810_v42 = vadd.f32 %v5970_v10, %v1809_v31 }
 0x1f9   : > { %v4442_v48 = vpop.eup %4441  ;;  %v5990_v1 = vadd.f32 1.0, %v4440_v28  ;;  %2545 = vmatmul.bf16.gmra.mxu2 %v5553_v58  ;;  %3368 = vmatpush.bf16.msrb.mxu3 %v4085_v29 }
 0x1fa   : > { %v1822_v27 = vmul.f32 %v4442_v48, %v5974_v15  ;;  %4443 = vpow2.f32 %v3848_v9  ;;  %v1814_v33 = vsel %vm6005_vm10, %v5970_v10, %v1810_v42  ;;  %vm1827_vm11 = vweird.f32 %v4442_v48 }
 0x1fb   : > { %4445 = vrcp.f32 %v5990_v1  ;;  %v6019_v10 = vpack.c.bf16 %v1063_v5, %v1061_v19  ;;  %v1819_v26 = vsel %vm1816_vm12, %v1818_v52, %v1814_v33  ;;  %vm1828_vm14 = vmor %vm1826_vm13, %vm1827_vm11  ;;  %v1260_v5 = vadd.f32 %v5979_v62, %v5507_v41 }
 0x1fc   : > { %4447 = vtanh.f32 %v1253_v20  ;;  %v1823_v58 = vsub.f32 1.0, %v1822_v27  ;;  %v6003_v21 = vpop.f32.mrf.mxu2  ;;  %v1258_v27 = vadd.f32 %v5948_v16, %v5507_v41  ;;  %v1066_v16 = vadd.f32 %v5777_v17, %v5418_v61 }
 0x1fd   : > { %4449 = vtanh.f32 %v1255_v53  ;;  %v1351_v30 = vpop.f32.mrf.mxu3  ;;  %v2139_v22 = vpop.f32.mrf.mxu0  ;;  %vm1841_vm1 = vweird.f32 %v5990_v1  ;;  %v1847_v62 = vand.u32 2147483648, %v5990_v1  ;;  %v1845_v17 = vand.u32 2147483647, %v5990_v1 }
 0x1fe   : > { %v1352_v13 = vadd.f32 %v1351_v30, %v5454_v18  ;;  %v2218_v0 = vmax.f32 %v2139_v22, 0.0  ;;  %v1824_v39 = vmul.f32 %v4442_v48, %v1823_v58  ;;  %v1068_v30 = vadd.f32 %v5800_v40, %v5418_v61 }
 0x1ff   : > { %vm1846_vm4 = vcmp.eq.f32.partialorder %v1845_v17, 8.507059e+37 }
 0x200   : > { %v4444_v4 = vpop.eup %4443  ;;  %v3849_v36 = vmul.f32 -1.442695, %v1352_v13  ;;  %2250 = vxpose.xlu0.b32.cont [2/16] (narrow) %v2218_v0, 8  ;;  %v1825_v43 = vadd.f32 %v4442_v48, %v1824_v39 }
 0x201   : > { %v6017_v47 = vpop.eup %4445  ;;  %v6021_v6 = vadd.f32 1.0, %v4444_v4  ;;  %2501 = vmatmul.bf16.gmra.mxu1 %v6019_v10 }
 0x202   : > { %v4448_v3 = vpop.eup %4447  ;;  %v1837_v32 = vmul.f32 %v6017_v47, %v5990_v1  ;;  %4451 = vpow2.f32 %v3849_v36  ;;  %v1829_v35 = vsel %vm1828_vm14, %v4442_v48, %v1825_v43  ;;  %vm1842_vm0 = vweird.f32 %v6017_v47 }
 0x203   : > { %v4450_v55 = vpop.eup %4449  ;;  %4453 = vrcp.f32 %v6021_v6  ;;  %v1834_v15 = vsel %vm1831_vm15, %v1833_v50, %v1829_v35  ;;  %v2034_v56 = vmul.f32 %v4448_v3, %v1819_v26  ;;  %vm6054_vm2 = vmor %vm1841_vm1, %vm1842_vm0  ;;  %v1860_v39 = vand.u32 2147483647, %v6021_v6 }
 0x204   : > { %v1838_v54 = vsub.f32 1.0, %v1837_v32  ;;  %v6028_v25 = vpop.f32.mrf.mxu2  ;;  %v2035_v11 = vmul.f32 %v4450_v55, %v1834_v15  ;;  %v1862_v52 = vand.u32 2147483648, %v6021_v6  ;;  %v1848_v1 = vor.u32 1.1754944e-38, %v1847_v62 }
 0x205   : > { %v1353_v31 = vpop.f32.mrf.mxu3  ;;  %v2142_v28 = vpop.f32.mrf.mxu0  ;;  %vm1856_vm5 = vweird.f32 %v6021_v6  ;;  %vm1861_vm7 = vcmp.eq.f32.partialorder %v1860_v39, 8.507059e+37 }
 0x206   : > { %v1354_v20 = vadd.f32 %v1353_v31, %v5454_v18  ;;  %v2219_v9 = vmax.f32 %v2142_v28, 0.0  ;;  %v2057_v53 = vpack.c.bf16 %v2035_v11, %v2034_v56  ;;  %v1839_v48 = vmul.f32 %v6017_v47, %v1838_v54 }
 0x207   : > { %v1863_v15 = vor.u32 1.1754944e-38, %v1862_v52 }
 0x208   : > { %v4452_v42 = vpop.eup %4451  ;;  %v3850_v19 = vmul.f32 -1.442695, %v1354_v20  ;;  %2181 = vmatmul.bf16.gmra.mxu0 %v2057_v53  ;;  %2251 = vxpose.xlu0.b32.cont [3/16] (narrow) %v2219_v9, 8  ;;  %v1840_v44 = vadd.f32 %v6017_v47, %v1839_v48 }
 0x209   : > { %v4454_v57 = vpop.eup %4453  ;;  %v6037_v58 = vadd.f32 1.0, %v4452_v42  ;;  %2550 = vmatmul.bf16.gmra.mxu2 %v5611_v12  ;;  %v6050_v12 = vpop.f32.mrf.mxu1 }
 0x20a   : > { %v1852_v23 = vmul.f32 %v4454_v57, %v6021_v6  ;;  %4455 = vpow2.f32 %v3850_v19  ;;  %v1844_v40 = vsel %vm6054_vm2, %v6017_v47, %v1840_v44  ;;  %vm1857_vm3 = vweird.f32 %v4454_v57 }
 0x20b   : > { %4457 = vrcp.f32 %v6037_v58  ;;  %v6071_v47 = vpack.c.bf16 %v1068_v30, %v1066_v16  ;;  %v1849_v55 = vsel %vm1846_vm4, %v1848_v1, %v1844_v40  ;;  %vm1858_vm6 = vmor %vm1856_vm5, %vm1857_vm3  ;;  %v1263_v16 = vadd.f32 %v6003_v21, %v5507_v41 }
 0x20c   : > { %4459 = vtanh.f32 %v1258_v27  ;;  %v1853_v22 = vsub.f32 1.0, %v1852_v23  ;;  %v6052_v33 = vpop.f32.mrf.mxu2  ;;  %v1071_v21 = vadd.f32 %v5831_v14, %v5418_v61  ;;  %vm1871_vm9 = vweird.f32 %v6037_v58 }
 0x20d   : > { %4461 = vtanh.f32 %v1260_v5  ;;  %v1356_v13 = vpop.f32.mrf.mxu3  ;;  %v2144_v0 = vpop.f32.mrf.mxu0  ;;  %v1875_v39 = vand.u32 2147483647, %v6037_v58 }
 0x20e   : > { %v1357_v4 = vadd.f32 %v1356_v13, %v5454_v18  ;;  %v2220_v36 = vmax.f32 %v2144_v0, 0.0  ;;  %v1854_v43 = vmul.f32 %v4454_v57, %v1853_v22  ;;  %v1265_v22 = vadd.f32 %v6028_v25, %v5507_v41 }
 0x20f   : > { %v1877_v25 = vand.u32 2147483648, %v6037_v58  ;;  %v1073_v13 = vadd.f32 %v5868_v37, %v5418_v61  ;;  %vm1876_vm12 = vcmp.eq.f32.partialorder %v1875_v39, 8.507059e+37 }
 0x210   : > { %v4456_v26 = vpop.eup %4455  ;;  %v3851_v50 = vmul.f32 -1.442695, %v1357_v4  ;;  %2252 = vxpose.xlu0.b32.cont [4/16] (narrow) %v2220_v36, 8  ;;  %v1855_v3 = vadd.f32 %v4454_v57, %v1854_v43 }
 0x211   : > { %v6069_v32 = vpop.eup %4457  ;;  %v6073_v35 = vadd.f32 1.0, %v4456_v26  ;;  %2506 = vmatmul.bf16.gmra.mxu1 %v6071_v47  ;;  %v6081_v27 = vpop.f32.mrf.mxu1 }
 0x212   : > { %v4460_v54 = vpop.eup %4459  ;;  %v1867_v56 = vmul.f32 %v6069_v32, %v6037_v58  ;;  %4463 = vpow2.f32 %v3851_v50  ;;  %v1859_v11 = vsel %vm1858_vm6, %v4454_v57, %v1855_v3  ;;  %vm1872_vm8 = vweird.f32 %v6069_v32 }
 0x213   : > { %v4462_v31 = vpop.eup %4461  ;;  %4465 = vrcp.f32 %v6073_v35  ;;  %v1864_v6 = vsel %vm1861_vm7, %v1863_v15, %v1859_v11  ;;  %v2036_v9 = vmul.f32 %v4460_v54, %v1849_v55  ;;  %vm6104_vm10 = vmor %vm1871_vm9, %vm1872_vm8  ;;  %v1890_v36 = vand.u32 2147483647, %v6073_v35 }
 0x214   : > { %v1868_v28 = vsub.f32 1.0, %v1867_v56  ;;  %v6078_v20 = vpop.f32.mrf.mxu2  ;;  %v2037_v53 = vmul.f32 %v4462_v31, %v1864_v6  ;;  %v1892_v37 = vand.u32 2147483648, %v6073_v35  ;;  %v1878_v50 = vor.u32 1.1754944e-38, %v1877_v25 }
 0x215   : > { %v1358_v48 = vpop.f32.mrf.mxu3  ;;  %v2147_v42 = vpop.f32.mrf.mxu0  ;;  %vm1886_vm13 = vweird.f32 %v6073_v35  ;;  %v6120_v54 = vpack.c.bf16 %v1073_v13, %v1071_v21  ;;  %vm1891_vm15 = vcmp.eq.f32.partialorder %v1890_v36, 8.507059e+37  ;;  %v1270_v25 = vadd.f32 %v6078_v20, %v5507_v41 }
 0x216   : > { %v1359_v19 = vadd.f32 %v1358_v48, %v5454_v18  ;;  %v2221_v5 = vmax.f32 %v2147_v42, 0.0  ;;  %v2058_v57 = vpack.c.bf16 %v2037_v53, %v2036_v9  ;;  %v1869_v44 = vmul.f32 %v6069_v32, %v1868_v28 }
 0x217   : > { %v1893_v31 = vor.u32 1.1754944e-38, %v1892_v37 }
 0x218   : > { %v4464_v23 = vpop.eup %4463  ;;  %v3852_v62 = vmul.f32 -1.442695, %v1359_v19  ;;  %2186 = vmatmul.bf16.gmra.mxu0 %v2058_v57  ;;  %2253 = vxpose.xlu0.b32.cont [5/16] (narrow) %v2221_v5, 8  ;;  %v1870_v17 = vadd.f32 %v6069_v32, %v1869_v44 }
 0x219   : > { %v4466_v30 = vpop.eup %4465  ;;  %v6089_v24 = vadd.f32 1.0, %v4464_v23  ;;  %2555 = vmatmul.bf16.gmra.mxu2 %v5662_v59  ;;  %v6115_v55 = vpop.f32.mrf.mxu1 }
 0x21a   : > { %v1882_v29 = vmul.f32 %v4466_v30, %v6073_v35  ;;  %4467 = vpow2.f32 %v3852_v62  ;;  %v1874_v4 = vsel %vm6104_vm10, %v6069_v32, %v1870_v17  ;;  %vm1887_vm11 = vweird.f32 %v4466_v30 }
 0x21b   : > { %4469 = vrcp.f32 %v6089_v24  ;;  %v1879_v11 = vsel %vm1876_vm12, %v1878_v50, %v1874_v4  ;;  %vm1888_vm14 = vmor %vm1886_vm13, %vm1887_vm11  ;;  %v1268_v17 = vadd.f32 %v6052_v33, %v5507_v41  ;;  %v1076_v33 = vadd.f32 %v5893_v8, %v5418_v61  ;;  %v4084_v8 = vld [vmem:[%s6883_s9 + $0x8] sm:$0xff] }
 0x21c   : > { %4471 = vtanh.f32 %v1263_v16  ;;  %v1883_v59 = vsub.f32 1.0, %v1882_v29  ;;  %v6102_v0 = vpop.f32.mrf.mxu2  ;;  %vm1901_vm1 = vweird.f32 %v6089_v24  ;;  %v1907_v20 = vand.u32 2147483648, %v6089_v24  ;;  %3369 = vmatpush.bf16.msrb.mxu3 %v4084_v8 }
 0x21d   : > { %4473 = vtanh.f32 %v1265_v22  ;;  %v1361_v14 = vpop.f32.mrf.mxu3  ;;  %v2149_v52 = vpop.f32.mrf.mxu0  ;;  %v1905_v36 = vand.u32 2147483647, %v6089_v24 }
 0x21e   : > { %v1362_v43 = vadd.f32 %v1361_v14, %v5454_v18  ;;  %v2222_v1 = vmax.f32 %v2149_v52, 0.0  ;;  %v1884_v26 = vmul.f32 %v4466_v30, %v1883_v59 }
 0x21f   : > { %vm1906_vm4 = vcmp.eq.f32.partialorder %v1905_v36, 8.507059e+37 }
 0x220   : > { %v4468_v3 = vpop.eup %4467  ;;  %v3853_v58 = vmul.f32 -1.442695, %v1362_v43  ;;  %2254 = vxpose.xlu0.b32.cont [6/16] (narrow) %v2222_v1, 8  ;;  %v1885_v15 = vadd.f32 %v4466_v30, %v1884_v26 }
 0x221   : > { %v6118_v32 = vpop.eup %4469  ;;  %v6122_v56 = vadd.f32 1.0, %v4468_v3  ;;  %2511 = vmatmul.bf16.gmra.mxu1 %v6120_v54  ;;  %v6141_v40 = vpop.f32.mrf.mxu1 }
 0x222   : > { %v4472_v6 = vpop.eup %4471  ;;  %v1897_v28 = vmul.f32 %v6118_v32, %v6089_v24  ;;  %4475 = vpow2.f32 %v3853_v58  ;;  %v1889_v9 = vsel %vm1888_vm14, %v4466_v30, %v1885_v15  ;;  %vm1902_vm0 = vweird.f32 %v6118_v32 }
 0x223   : > { %v4474_v53 = vpop.eup %4473  ;;  %4477 = vrcp.f32 %v6122_v56  ;;  %v1894_v35 = vsel %vm1891_vm15, %v1893_v31, %v1889_v9  ;;  %v2038_v19 = vmul.f32 %v4472_v6, %v1879_v11  ;;  %vm6153_vm2 = vmor %vm1901_vm1, %vm1902_vm0  ;;  %v1922_v1 = vand.u32 2147483648, %v6122_v56 }
 0x224   : > { %v1898_v48 = vsub.f32 1.0, %v1897_v28  ;;  %v6127_v42 = vpop.f32.mrf.mxu2  ;;  %v2039_v5 = vmul.f32 %v4474_v53, %v1894_v35  ;;  %v1908_v24 = vor.u32 1.1754944e-38, %v1907_v20  ;;  %vm1916_vm5 = vweird.f32 %v6122_v56 }
 0x225   : > { %v1363_v57 = vpop.f32.mrf.mxu3  ;;  %v2152_v44 = vpop.f32.mrf.mxu0  ;;  %v1923_v9 = vor.u32 1.1754944e-38, %v1922_v1  ;;  %v1275_v20 = vadd.f32 %v6127_v42, %v5507_v41 }
 0x226   : > { %v1364_v23 = vadd.f32 %v1363_v57, %v5454_v18  ;;  %v2223_v16 = vmax.f32 %v2152_v44, 0.0  ;;  %v2059_v62 = vpack.c.bf16 %v2039_v5, %v2038_v19  ;;  %v1899_v30 = vmul.f32 %v6118_v32, %v1898_v48 }
 0x228   : > { %v4476_v22 = vpop.eup %4475  ;;  %v3854_v29 = vmul.f32 -1.442695, %v1364_v23  ;;  %2191 = vmatmul.bf16.gmra.mxu0 %v2059_v62  ;;  %2255 = vxpose.xlu0.b32.cont [7/16] (narrow) %v2223_v16, 8  ;;  %v1900_v59 = vadd.f32 %v6118_v32, %v1899_v30 }
 0x229   : > { %v4478_v21 = vpop.eup %4477  ;;  %v6136_v13 = vadd.f32 1.0, %v4476_v22  ;;  %2560 = vmatmul.bf16.gmra.mxu2 %v5720_v38  ;;  %v1078_v38 = vadd.f32 %v5927_v49, %v5418_v61  ;;  %v1920_v49 = vand.u32 2147483647, %v6122_v56  ;;  %v6177_v5 = vpop.f32.mrf.mxu1 }
 0x22a   : > { %v1912_v39 = vmul.f32 %v4478_v21, %v6122_v56  ;;  %4479 = vpow2.f32 %v3854_v29  ;;  %v1904_v61 = vsel %vm6153_vm2, %v6118_v32, %v1900_v59  ;;  %vm1917_vm3 = vweird.f32 %v4478_v21 }
 0x22b   : > { %4481 = vrcp.f32 %v6136_v13  ;;  %v6170_v32 = vpack.c.bf16 %v1078_v38, %v1076_v33  ;;  %v1909_v28 = vsel %vm1906_vm4, %v1908_v24, %v1904_v61  ;;  %vm1918_vm6 = vmor %vm1916_vm5, %vm1917_vm3  ;;  %vm1921_vm7 = vcmp.eq.f32.partialorder %v1920_v49, 8.507059e+37 }
 0x22c   : > { %4483 = vtanh.f32 %v1268_v17  ;;  %v1913_v14 = vsub.f32 1.0, %v1912_v39  ;;  %v6151_v52 = vpop.f32.mrf.mxu2  ;;  %v1273_v59 = vadd.f32 %v6102_v0, %v5507_v41  ;;  %vm1931_vm9 = vweird.f32 %v6136_v13 }
 0x22d   : > { %4485 = vtanh.f32 %v1270_v25  ;;  %v1366_v37 = vpop.f32.mrf.mxu3  ;;  %v2154_v43 = vpop.f32.mrf.mxu0  ;;  %v1937_v0 = vand.u32 2147483648, %v6136_v13 }
 0x22e   : > { %v1367_v26 = vadd.f32 %v1366_v37, %v5454_v18  ;;  %v2224_v50 = vmax.f32 %v2154_v43, 0.0  ;;  %v1914_v3 = vmul.f32 %v4478_v21, %v1913_v14 }
 0x22f   : > { %v1938_v24 = vor.u32 1.1754944e-38, %v1937_v0 }
 0x230   : > { %v4480_v58 = vpop.eup %4479  ;;  %v3855_v15 = vmul.f32 -1.442695, %v1367_v26  ;;  %2256 = vxpose.xlu0.b32.cont [8/16] (narrow) %v2224_v50, 8  ;;  %v1915_v11 = vadd.f32 %v4478_v21, %v1914_v3 }
 0x231   : > { %v6168_v31 = vpop.eup %4481  ;;  %v6172_v6 = vadd.f32 1.0, %v4480_v58  ;;  %2516 = vmatmul.bf16.gmra.mxu1 %v6170_v32 }
 0x232   : > { %v4484_v53 = vpop.eup %4483  ;;  %v1927_v35 = vmul.f32 %v6168_v31, %v6136_v13  ;;  %4487 = vpow2.f32 %v3855_v15  ;;  %v1919_v48 = vsel %vm1918_vm6, %v4478_v21, %v1915_v11  ;;  %vm1932_vm8 = vweird.f32 %v6168_v31 }
 0x233   : > { %v4486_v19 = vpop.eup %4485  ;;  %4489 = vrcp.f32 %v6172_v6  ;;  %v1924_v56 = vsel %vm1921_vm7, %v1923_v9, %v1919_v48  ;;  %v2040_v23 = vmul.f32 %v4484_v53, %v1909_v28  ;;  %vm6199_vm10 = vmor %vm1931_vm9, %vm1932_vm8  ;;  %v1950_v49 = vand.u32 2147483647, %v6172_v6 }
 0x234   : > { %v1928_v57 = vsub.f32 1.0, %v1927_v35  ;;  %v6179_v44 = vpop.f32.mrf.mxu2  ;;  %v2041_v16 = vmul.f32 %v4486_v19, %v1924_v56  ;;  %v1952_v1 = vand.u32 2147483648, %v6172_v6  ;;  %vm1946_vm13 = vweird.f32 %v6172_v6 }
 0x235   : > { %v1368_v62 = vpop.f32.mrf.mxu3  ;;  %v2157_v30 = vpop.f32.mrf.mxu0  ;;  %vm1951_vm15 = vcmp.eq.f32.partialorder %v1950_v49, 8.507059e+37 }
 0x236   : > { %v1369_v22 = vadd.f32 %v1368_v62, %v5454_v18  ;;  %v2225_v17 = vmax.f32 %v2157_v30, 0.0  ;;  %v2060_v29 = vpack.c.bf16 %v2041_v16, %v2040_v23  ;;  %v1929_v21 = vmul.f32 %v6168_v31, %v1928_v57 }
 0x237   : > { %v1953_v9 = vor.u32 1.1754944e-38, %v1952_v1 }
 0x238   : > { %v4488_v25 = vpop.eup %4487  ;;  %v3856_v39 = vmul.f32 -1.442695, %v1369_v22  ;;  %2196 = vmatmul.bf16.gmra.mxu0 %v2060_v29  ;;  %2257 = vxpose.xlu0.b32.cont [9/16] (narrow) %v2225_v17, 8  ;;  %v1930_v14 = vadd.f32 %v6168_v31, %v1929_v21 }
 0x239   : > { %v4490_v33 = vpop.eup %4489  ;;  %v6188_v38 = vadd.f32 1.0, %v4488_v25  ;;  %2565 = vmatmul.bf16.gmra.mxu2 %v5771_v51  ;;  %v1935_v51 = vand.u32 2147483647, %v6136_v13 }
 0x23a   : > { %v1942_v4 = vmul.f32 %v4490_v33, %v6172_v6  ;;  %4491 = vpow2.f32 %v3856_v39  ;;  %v1934_v61 = vsel %vm6199_vm10, %v6168_v31, %v1930_v14  ;;  %vm1947_vm11 = vweird.f32 %v4490_v33 }
 0x23b   : > { %4493 = vrcp.f32 %v6188_v38  ;;  %vm1936_vm12 = vcmp.eq.f32.partialorder %v1935_v51, 8.507059e+37  ;;  %vm1948_vm14 = vmor %vm1946_vm13, %vm1947_vm11  ;;  %v1278_v39 = vadd.f32 %v6151_v52, %v5507_v41  ;;  %v1967_v52 = vand.u32 2147483648, %v6188_v38 }
 0x23c   : > { %4495 = vtanh.f32 %v1273_v59  ;;  %v1943_v36 = vsub.f32 1.0, %v1942_v4  ;;  %v6197_v42 = vpop.f32.mrf.mxu2  ;;  %v1939_v28 = vsel %vm1936_vm12, %v1938_v24, %v1934_v61  ;;  %v6225_v59 = vld [vmem:[%s6882_s8] sm:$0x3]  ;;  %vm1961_vm1 = vweird.f32 %v6188_v38 }
 0x23d   : > { %4497 = vtanh.f32 %v1275_v20  ;;  %v1371_v37 = vpop.f32.mrf.mxu3  ;;  %v2159_v43 = vpop.f32.mrf.mxu0  ;;  %v6235_v4 = vperm.slane %v6225_v59, 1  ;;  %v1965_v51 = vand.u32 2147483647, %v6188_v38  ;;  %v1968_v24 = vor.u32 1.1754944e-38, %v1967_v52 }
 0x23e   : > { %v1372_v26 = vadd.f32 %v1371_v37, %v5454_v18  ;;  %v2226_v50 = vmax.f32 %v2159_v43, 0.0  ;;  %v1944_v3 = vmul.f32 %v4490_v33, %v1943_v36 }
 0x23f   : > { %vm1966_vm4 = vcmp.eq.f32.partialorder %v1965_v51, 8.507059e+37 }
 0x240   : > { %v4492_v58 = vpop.eup %4491  ;;  %v3857_v15 = vmul.f32 -1.442695, %v1372_v26  ;;  %2258 = vxpose.xlu0.b32.cont [10/16] (narrow) %v2226_v50, 8  ;;  %v1945_v13 = vadd.f32 %v4490_v33, %v1944_v3 }
 0x241   : > { %v6211_v11 = vpop.eup %4493  ;;  %v6213_v31 = vadd.f32 1.0, %v4492_v58 }
 0x242   : > { %v4496_v53 = vpop.eup %4495  ;;  %v1957_v35 = vmul.f32 %v6211_v11, %v6188_v38  ;;  %4499 = vpow2.f32 %v3857_v15  ;;  %v1949_v48 = vsel %vm1948_vm14, %v4490_v33, %v1945_v13  ;;  %vm1962_vm0 = vweird.f32 %v6211_v11 }
 0x243   : > { %v4498_v19 = vpop.eup %4497  ;;  %4501 = vrcp.f32 %v6213_v31  ;;  %v1954_v56 = vsel %vm1951_vm15, %v1953_v9, %v1949_v48  ;;  %v2042_v23 = vmul.f32 %v4496_v53, %v1939_v28  ;;  %vm6248_vm2 = vmor %vm1961_vm1, %vm1962_vm0  ;;  %v1980_v49 = vand.u32 2147483647, %v6213_v31 }
 0x244   : > { %v1958_v57 = vsub.f32 1.0, %v1957_v35  ;;  %v6218_v6 = vpop.f32.mrf.mxu2  ;;  %v2043_v16 = vmul.f32 %v4498_v19, %v1954_v56  ;;  %v1982_v1 = vand.u32 2147483648, %v6213_v31  ;;  %vm1976_vm5 = vweird.f32 %v6213_v31 }
 0x245   : > { %v1373_v62 = vpop.f32.mrf.mxu3  ;;  %v2162_v30 = vpop.f32.mrf.mxu0  ;;  %vm1981_vm7 = vcmp.eq.f32.partialorder %v1980_v49, 8.507059e+37 }
 0x246   : > { %v1374_v22 = vadd.f32 %v1373_v62, %v5454_v18  ;;  %v2227_v17 = vmax.f32 %v2162_v30, 0.0  ;;  %v2061_v29 = vpack.c.bf16 %v2043_v16, %v2042_v23  ;;  %v1959_v21 = vmul.f32 %v6211_v11, %v1958_v57 }
 0x247   : > { %v1280_v18 = vadd.f32 %v6179_v44, %v5507_v41  ;;  %v4083_v44 = vld [vmem:[%s6883_s9] sm:$0xff]  ;;  %v1983_v53 = vor.u32 1.1754944e-38, %v1982_v1 }
 0x248   : > { %v4500_v25 = vpop.eup %4499  ;;  %v3858_v33 = vmul.f32 -1.442695, %v1374_v22  ;;  %2201 = vmatmul.bf16.gmra.mxu0 %v2061_v29  ;;  %2259 = vxpose.xlu0.b32.cont [11/16] (narrow) %v2227_v17, 8  ;;  %v1960_v36 = vadd.f32 %v6211_v11, %v1959_v21 }
 0x249   : > { %v4502_v20 = vpop.eup %4501  ;;  %v6231_v14 = vadd.f32 1.0, %v4500_v25  ;;  %2570 = vmatmul.bf16.gmra.mxu2 %v5821_v63  ;;  %3370 = vmatpush.bf16.msrb.mxu3 %v4083_v44 }
 0x24a   : > { %v1972_v0 = vmul.f32 %v4502_v20, %v6213_v31  ;;  %4503 = vpow2.f32 %v3858_v33  ;;  %v1964_v50 = vsel %vm6248_vm2, %v6211_v11, %v1960_v36  ;;  %vm1977_vm3 = vweird.f32 %v4502_v20 }
 0x24b   : > { %4505 = vrcp.f32 %v6231_v14  ;;  %v1969_v9 = vsel %vm1966_vm4, %v1968_v24, %v1964_v50  ;;  %vm1978_vm6 = vmor %vm1976_vm5, %vm1977_vm3  ;;  %vm1991_vm9 = vweird.f32 %v6231_v14 }
 0x24c   : > { %4507 = vtanh.f32 %v1278_v39  ;;  %v1973_v63 = vsub.f32 1.0, %v1972_v0  ;;  %v2531_v8 = vpop.f32.mrf.mxu2  ;;  %v1283_v39 = vadd.f32 %v6197_v42, %v5507_v41  ;;  %v1997_v42 = vand.u32 2147483648, %v6231_v14 }
 0x24d   : > { %4509 = vtanh.f32 %v1280_v18  ;;  %v2164_v37 = vpop.f32.mrf.mxu0  ;;  %v2532_v43 = vadd.f32 %v2531_v8, %v6235_v4  ;;  %v1285_v18 = vadd.f32 %v6218_v6, %v5507_v41  ;;  %v1995_v41 = vand.u32 2147483647, %v6231_v14 }
 0x24e   : > { %v2228_v26 = vmax.f32 %v2164_v37, 0.0  ;;  %v1974_v3 = vmul.f32 %v4502_v20, %v1973_v63  ;;  %v1998_v1 = vor.u32 1.1754944e-38, %v1997_v42 }
 0x24f   : > { %v3955_v38 = vmul.f32 -1.442695, %v2532_v43  ;;  %vm1996_vm12 = vcmp.eq.f32.partialorder %v1995_v41, 8.507059e+37 }
 0x250   : > { %v4504_v58 = vpop.eup %4503  ;;  %2260 = vxpose.xlu0.b32.cont [12/16] (narrow) %v2228_v26, 8  ;;  %v1975_v15 = vadd.f32 %v4502_v20, %v1974_v3 }
 0x251   : > { %v6258_v13 = vpop.eup %4505  ;;  %v6260_v28 = vadd.f32 1.0, %v4504_v58  ;;  %4511 = vpow2.f32 %v3955_v38 }
 0x252   : > { %v4508_v35 = vpop.eup %4507  ;;  %v1987_v11 = vmul.f32 %v6258_v13, %v6231_v14  ;;  %v1979_v48 = vsel %vm1978_vm6, %v4502_v20, %v1975_v15  ;;  %vm1992_vm8 = vweird.f32 %v6258_v13 }
 0x253   : > { %v4510_v19 = vpop.eup %4509  ;;  %4513 = vrcp.f32 %v6260_v28  ;;  %v1984_v56 = vsel %vm1981_vm7, %v1983_v53, %v1979_v48  ;;  %v2044_v23 = vmul.f32 %v4508_v35, %v1969_v9  ;;  %vm6282_vm10 = vmor %vm1991_vm9, %vm1992_vm8  ;;  %v2010_v8 = vand.u32 2147483647, %v6260_v28 }
 0x254   : > { %v1988_v57 = vsub.f32 1.0, %v1987_v11  ;;  %v2533_v31 = vpop.f32.mrf.mxu2  ;;  %v2045_v16 = vmul.f32 %v4510_v19, %v1984_v56  ;;  %v2012_v51 = vand.u32 2147483648, %v6260_v28  ;;  %vm2006_vm13 = vweird.f32 %v6260_v28 }
 0x255   : > { %v2167_v62 = vpop.f32.mrf.mxu0  ;;  %v2534_v30 = vadd.f32 %v2533_v31, %v6235_v4  ;;  %vm2011_vm15 = vcmp.eq.f32.partialorder %v2010_v8, 8.507059e+37  ;;  %v6300_v53 = vperm.slane %v6225_v59, 0 }
 0x256   : > { %v2229_v22 = vmax.f32 %v2167_v62, 0.0  ;;  %v2062_v17 = vpack.c.bf16 %v2045_v16, %v2044_v23  ;;  %v1989_v29 = vmul.f32 %v6258_v13, %v1988_v57  ;;  %v2013_v58 = vor.u32 1.1754944e-38, %v2012_v51 }
 0x257   : > { %v4512_v21 = vpop.eup %4511  ;;  %v3956_v25 = vmul.f32 -1.442695, %v2534_v30  ;;  %v2443_v30 = vadd.f32 %v5963_v60, %v6300_v53  ;;  %v2445_v59 = vadd.f32 %v5986_v46, %v6300_v53 }
 0x258   : > { %v6269_v33 = vadd.f32 1.0, %v4512_v21  ;;  %2206 = vmatmul.bf16.gmra.mxu0 %v2062_v17  ;;  %2261 = vxpose.xlu0.b32.cont [13/16] (narrow) %v2229_v22, 8  ;;  %v1990_v36 = vadd.f32 %v6258_v13, %v1989_v29 }
 0x259   : > { %v4514_v20 = vpop.eup %4513  ;;  %4515 = vpow2.f32 %v3956_v25  ;;  %2575 = vmatmul.bf16.gmra.mxu2 %v5873_v2 }
 0x25a   : > { %v2002_v0 = vmul.f32 %v4514_v20, %v6260_v28  ;;  %4517 = vrcp.f32 %v6269_v33  ;;  %v1994_v43 = vsel %vm6282_vm10, %v6258_v13, %v1990_v36  ;;  %vm2007_vm11 = vweird.f32 %v4514_v20 }
 0x25b   : > { %4519 = vtanh.f32 %v1283_v39  ;;  %v1999_v24 = vsel %vm1996_vm12, %v1998_v1, %v1994_v43  ;;  %vm2008_vm14 = vmor %vm2006_vm13, %vm2007_vm11  ;;  %v2782_v60 = vand.u32 2147483648, %v6269_v33  ;;  %vm2776_vm1 = vweird.f32 %v6269_v33 }
 0x25c   : > { %v2003_v52 = vsub.f32 1.0, %v2002_v0  ;;  %v2536_v44 = vpop.f32.mrf.mxu2  ;;  %4521 = vtanh.f32 %v1285_v18  ;;  %v2780_v39 = vand.u32 2147483647, %v6269_v33 }
 0x25d   : > { %v2169_v6 = vpop.f32.mrf.mxu0  ;;  %v2537_v2 = vadd.f32 %v2536_v44, %v6235_v4  ;;  %v2783_v41 = vor.u32 1.1754944e-38, %v2782_v60 }
 0x25e   : > { %v2230_v37 = vmax.f32 %v2169_v6, 0.0  ;;  %v2004_v61 = vmul.f32 %v4514_v20, %v2003_v52  ;;  %vm2781_vm4 = vcmp.eq.f32.partialorder %v2780_v39, 8.507059e+37 }
 0x25f   : > { %v4516_v14 = vpop.eup %4515  ;;  %v3957_v49 = vmul.f32 -1.442695, %v2537_v2  ;;  %v6328_v2 = vpop.f32.mrf.mxu1 }
 0x260   : > { %v6291_v26 = vpop.eup %4517  ;;  %v6293_v50 = vadd.f32 1.0, %v4516_v14  ;;  %2262 = vxpose.xlu0.b32.cont [14/16] (narrow) %v2230_v37, 8  ;;  %v2005_v3 = vadd.f32 %v4514_v20, %v2004_v61 }
 0x261   : > { %v2772_v38 = vmul.f32 %v6291_v26, %v6269_v33  ;;  %4523 = vpow2.f32 %v3957_v49  ;;  %v4520_v15 = vpop.eup %4519  ;;  %vm2777_vm0 = vweird.f32 %v6291_v26 }
 0x262   : > { %4525 = vrcp.f32 %v6293_v50  ;;  %v2009_v13 = vsel %vm2008_vm14, %v4514_v20, %v2005_v3  ;;  %v4522_v9 = vpop.eup %4521  ;;  %v2046_v28 = vmul.f32 %v4520_v15, %v1999_v24  ;;  %vm6318_vm2 = vmor %vm2776_vm1, %vm2777_vm0  ;;  %v2797_v0 = vand.u32 2147483648, %v6293_v50 }
 0x263   : > { %v2773_v35 = vsub.f32 1.0, %v2772_v38  ;;  %v2014_v11 = vsel %vm2011_vm15, %v2013_v58, %v2009_v13  ;;  %vm2791_vm5 = vweird.f32 %v6293_v50 }
 0x264   : > { %v2538_v48 = vpop.f32.mrf.mxu2  ;;  %v2047_v19 = vmul.f32 %v4522_v9, %v2014_v11  ;;  %v2798_v61 = vor.u32 1.1754944e-38, %v2797_v0 }
 0x265   : > { %v2774_v56 = vmul.f32 %v6291_v26, %v2773_v35  ;;  %v2172_v57 = vpop.f32.mrf.mxu0  ;;  %v2539_v31 = vadd.f32 %v2538_v48, %v6235_v4 }
 0x266   : > { %v2231_v23 = vmax.f32 %v2172_v57, 0.0  ;;  %v2063_v16 = vpack.c.bf16 %v2047_v19, %v2046_v28  ;;  %v2448_v28 = vadd.f32 %v6023_v7, %v6300_v53  ;;  %v2450_v57 = vadd.f32 %v6050_v12, %v6300_v53 }
 0x267   : > { %v4524_v62 = vpop.eup %4523  ;;  %v3958_v22 = vmul.f32 -1.442695, %v2539_v31  ;;  %v2775_v25 = vadd.f32 %v6291_v26, %v2774_v56 }
 0x268   : > { %v4526_v17 = vpop.eup %4525  ;;  %v6308_v29 = vadd.f32 1.0, %v4524_v62  ;;  %2211 = vmatmul.bf16.gmra.mxu0 %v2063_v16  ;;  %2263 = vxpose.xlu0.b32.cont [15/16] (narrow) %v2231_v23, 8  ;;  %v6346_v23 = vpop.f32.mrf.mxu1 }
 0x269   : > { %v2787_v21 = vmul.f32 %v4526_v17, %v6293_v50  ;;  %4527 = vpow2.f32 %v3958_v22  ;;  %2580 = vmatmul.bf16.gmra.mxu2 %v5920_v45  ;;  %v2795_v45 = vand.u32 2147483647, %v6293_v50  ;;  %v2779_v52 = vsel %vm6318_vm2, %v6291_v26, %v2775_v25 }
 0x26a   : > { %4529 = vrcp.f32 %v6308_v29  ;;  %vm2792_vm3 = vweird.f32 %v4526_v17  ;;  %v2784_v43 = vsel %vm2781_vm4, %v2783_v41, %v2779_v52  ;;  %v2812_v7 = vand.u32 2147483648, %v6308_v29 }
 0x26b   : > { %4531 = vtanh.f32 %v2443_v30  ;;  %v2788_v46 = vsub.f32 1.0, %v2787_v21  ;;  %vm2793_vm6 = vmor %vm2791_vm5, %vm2792_vm3  ;;  %vm2796_vm7 = vcmp.eq.f32.partialorder %v2795_v45, 8.507059e+37  ;;  %vm2806_vm9 = vweird.f32 %v6308_v29 }
 0x26c   : > { %4533 = vtanh.f32 %v2445_v59  ;;  %v2541_v20 = vpop.f32.mrf.mxu2  ;;  %v2810_v30 = vand.u32 2147483647, %v6308_v29  ;;  %v2813_v39 = vor.u32 1.1754944e-38, %v2812_v7 }
 0x26d   : > { %v2174_v36 = vpop.f32.mrf.mxu0  ;;  %v2542_v42 = vadd.f32 %v2541_v20, %v6235_v4  ;;  %v2789_v44 = vmul.f32 %v4526_v17, %v2788_v46 }
 0x26e   : > { %v2232_v33 = vmax.f32 %v2174_v36, 0.0  ;;  %vm2811_vm12 = vcmp.eq.f32.partialorder %v2810_v30, 8.507059e+37 }
 0x26f   : > { %v4528_v6 = vpop.eup %4527  ;;  %v3959_v63 = vmul.f32 -1.442695, %v2542_v42  ;;  %v2790_v8 = vadd.f32 %v4526_v17, %v2789_v44 }
 0x270   : > { %v6331_v51 = vpop.eup %4529  ;;  %v6333_v37 = vadd.f32 1.0, %v4528_v6  ;;  %2264 = vxpose.xlu0.b32.end [16/16] (narrow) %v2232_v33, 8 }
 0x271   : > { %v4532_v14 = vpop.eup %4531  ;;  %v2802_v49 = vmul.f32 %v6331_v51, %v6308_v29  ;;  %4535 = vpow2.f32 %v3959_v63  ;;  %v2794_v1 = vsel %vm2793_vm6, %v4526_v17, %v2790_v8  ;;  %vm2807_vm8 = vweird.f32 %v6331_v51  ;;  %v6374_v8 = vpop.f32.mrf.mxu1 }
 0x272   : > { %v4534_v26 = vpop.eup %4533  ;;  %4537 = vrcp.f32 %v6333_v37  ;;  %v2799_v3 = vsel %vm2796_vm7, %v2798_v61, %v2794_v1  ;;  %v3251_v38 = vmul.f32 %v4532_v14, %v2784_v43  ;;  %vm6356_vm10 = vmor %vm2806_vm9, %vm2807_vm8  ;;  %v2827_v59 = vand.u32 2147483648, %v6333_v37 }
 0x273   : > { %v2803_v50 = vsub.f32 1.0, %v2802_v49  ;;  %v3252_v24 = vmul.f32 %v4534_v26, %v2799_v3  ;;  %vm2821_vm13 = vweird.f32 %v6333_v37 }
 0x274   : > { %v2543_v58 = vpop.f32.mrf.mxu2  ;;  %v2828_v52 = vor.u32 1.1754944e-38, %v2827_v59 }
 0x275   : > { %v2177_v15 = vpop.f32.mrf.mxu0  ;;  %v2544_v13 = vadd.f32 %v2543_v58, %v6235_v4  ;;  %v3283_v9 = vpack.c.bf16 %v3252_v24, %v3251_v38  ;;  %v2804_v35 = vmul.f32 %v6331_v51, %v2803_v50  ;;  %v2453_v38 = vadd.f32 %v6081_v27, %v6300_v53 }
 0x276   : > { %v2233_v11 = vmax.f32 %v2177_v15, 0.0  ;;  %v2455_v15 = vadd.f32 %v6115_v55, %v6300_v53 }
 0x277   : > { %v4536_v48 = vpop.eup %4535  ;;  %v3960_v19 = vmul.f32 -1.442695, %v2544_v13  ;;  %3371 = vmatmul.bf16.vlgmr.msrb.gmra.mxu3 %v3283_v9  ;;  %v2805_v62 = vadd.f32 %v6331_v51, %v2804_v35 }
 0x278   : > { %v4538_v56 = vpop.eup %4537  ;;  %v6344_v31 = vadd.f32 1.0, %v4536_v48  ;;  %2281 = vxpose.xlu1.b32.start [1/16] (narrow) %v2233_v11, 8 }
 0x279   : > { %v2817_v16 = vmul.f32 %v4538_v56, %v6333_v37  ;;  %4539 = vpow2.f32 %v3960_v19  ;;  %2585 = vmatmul.bf16.gmra.mxu2 %v5972_v34  ;;  %v2825_v34 = vand.u32 2147483647, %v6333_v37  ;;  %v2809_v60 = vsel %vm6356_vm10, %v6331_v51, %v2805_v62 }
 0x27a   : > { %4541 = vrcp.f32 %v6344_v31  ;;  %vm2822_vm11 = vweird.f32 %v4538_v56  ;;  %v2814_v42 = vsel %vm2811_vm12, %v2813_v39, %v2809_v60  ;;  %v2842_v27 = vand.u32 2147483648, %v6344_v31 }
 0x27b   : > { %4543 = vtanh.f32 %v2448_v28  ;;  %v2818_v12 = vsub.f32 1.0, %v2817_v16  ;;  %vm2823_vm14 = vmor %vm2821_vm13, %vm2822_vm11  ;;  %vm2826_vm15 = vcmp.eq.f32.partialorder %v2825_v34, 8.507059e+37  ;;  %vm2836_vm1 = vweird.f32 %v6344_v31 }
 0x27c   : > { %4545 = vtanh.f32 %v2450_v57  ;;  %v2546_v22 = vpop.f32.mrf.mxu2  ;;  %v2840_v55 = vand.u32 2147483647, %v6344_v31 }
 0x27d   : > { %v2179_v21 = vpop.f32.mrf.mxu0  ;;  %v2547_v25 = vadd.f32 %v2546_v22, %v6235_v4  ;;  %v2819_v46 = vmul.f32 %v4538_v56, %v2818_v12  ;;  %v2843_v12 = vor.u32 1.1754944e-38, %v2842_v27 }
 0x27e   : > { %v2234_v29 = vmax.f32 %v2179_v21, 0.0  ;;  %vm2841_vm4 = vcmp.eq.f32.partialorder %v2840_v55, 8.507059e+37 }
 0x27f   : > { %v4540_v20 = vpop.eup %4539  ;;  %v3961_v18 = vmul.f32 -1.442695, %v2547_v25  ;;  %v2820_v45 = vadd.f32 %v4538_v56, %v2819_v46 }
 0x280   : > { %v6367_v0 = vpop.eup %4541  ;;  %v6369_v36 = vadd.f32 1.0, %v4540_v20  ;;  %2282 = vxpose.xlu1.b32.cont [2/16] (narrow) %v2234_v29, 8 }
 0x281   : > { %v4544_v44 = vpop.eup %4543  ;;  %v2832_v33 = vmul.f32 %v6367_v0, %v6344_v31  ;;  %4547 = vpow2.f32 %v3961_v18  ;;  %v2824_v41 = vsel %vm2823_vm14, %v4538_v56, %v2820_v45  ;;  %vm2837_vm0 = vweird.f32 %v6367_v0  ;;  %v6398_v56 = vpop.f32.mrf.mxu1 }
 0x282   : > { %v4546_v6 = vpop.eup %4545  ;;  %4549 = vrcp.f32 %v6369_v36  ;;  %v2829_v63 = vsel %vm2826_vm15, %v2828_v52, %v2824_v41  ;;  %v3253_v37 = vmul.f32 %v4544_v44, %v2814_v42  ;;  %vm6392_vm2 = vmor %vm2836_vm1, %vm2837_vm0  ;;  %v2857_v19 = vand.u32 2147483648, %v6369_v36 }
 0x283   : > { %v2833_v51 = vsub.f32 1.0, %v2832_v33  ;;  %v3254_v43 = vmul.f32 %v4546_v6, %v2829_v63  ;;  %vm2851_vm5 = vweird.f32 %v6369_v36  ;;  %v2458_v63 = vadd.f32 %v6141_v40, %v6300_v53 }
 0x284   : > { %v2548_v61 = vpop.f32.mrf.mxu2  ;;  %v2858_v25 = vor.u32 1.1754944e-38, %v2857_v19 }
 0x285   : > { %v2182_v14 = vpop.f32.mrf.mxu0  ;;  %v2549_v49 = vadd.f32 %v2548_v61, %v6235_v4  ;;  %v3284_v1 = vpack.c.bf16 %v3254_v43, %v3253_v37  ;;  %v2834_v26 = vmul.f32 %v6367_v0, %v2833_v51  ;;  %v2460_v61 = vadd.f32 %v6177_v5, %v6300_v53 }
 0x286   : > { %v2235_v3 = vmax.f32 %v2182_v14, 0.0 }
 0x287   : > { %v4548_v50 = vpop.eup %4547  ;;  %v3962_v24 = vmul.f32 -1.442695, %v2549_v49  ;;  %3376 = vmatmul.bf16.gmra.mxu3 %v3284_v1  ;;  %v2835_v35 = vadd.f32 %v6367_v0, %v2834_v26 }
 0x288   : > { %v4550_v58 = vpop.eup %4549  ;;  %v6382_v13 = vadd.f32 1.0, %v4548_v50  ;;  %2283 = vxpose.xlu1.b32.cont [3/16] (narrow) %v2235_v3, 8 }
 0x289   : > { %v2847_v9 = vmul.f32 %v4550_v58, %v6369_v36  ;;  %4551 = vpow2.f32 %v3962_v24  ;;  %2590 = vmatmul.bf16.gmra.mxu2 %v6019_v10  ;;  %v2855_v10 = vand.u32 2147483647, %v6369_v36  ;;  %v2839_v62 = vsel %vm6392_vm2, %v6367_v0, %v2835_v35  ;;  %v6416_v51 = vpop.f32.mrf.mxu1 }
 0x28a   : > { %4553 = vrcp.f32 %v6382_v13  ;;  %vm2852_vm3 = vweird.f32 %v4550_v58  ;;  %v2844_v21 = vsel %vm2841_vm4, %v2843_v12, %v2839_v62  ;;  %v2872_v40 = vand.u32 2147483648, %v6382_v13 }
 0x28b   : > { %4555 = vtanh.f32 %v2453_v38  ;;  %v2848_v11 = vsub.f32 1.0, %v2847_v9  ;;  %vm2853_vm6 = vmor %vm2851_vm5, %vm2852_vm3  ;;  %vm2856_vm7 = vcmp.eq.f32.partialorder %v2855_v10, 8.507059e+37  ;;  %vm2866_vm9 = vweird.f32 %v6382_v13 }
 0x28c   : > { %4557 = vtanh.f32 %v2455_v15  ;;  %v2551_v48 = vpop.f32.mrf.mxu2  ;;  %v2870_v5 = vand.u32 2147483647, %v6382_v13  ;;  %v2873_v35 = vor.u32 1.1754944e-38, %v2872_v40 }
 0x28d   : > { %v2184_v57 = vpop.f32.mrf.mxu0  ;;  %v2552_v16 = vadd.f32 %v2551_v48, %v6235_v4  ;;  %v2849_v31 = vmul.f32 %v4550_v58, %v2848_v11 }
 0x28e   : > { %v2236_v7 = vmax.f32 %v2184_v57, 0.0  ;;  %vm2871_vm12 = vcmp.eq.f32.partialorder %v2870_v5, 8.507059e+37 }
 0x28f   : > { %v4552_v30 = vpop.eup %4551  ;;  %v3963_v22 = vmul.f32 -1.442695, %v2552_v16  ;;  %v2850_v17 = vadd.f32 %v4550_v58, %v2849_v31 }
 0x290   : > { %v6405_v34 = vpop.eup %4553  ;;  %v6407_v59 = vadd.f32 1.0, %v4552_v30  ;;  %2284 = vxpose.xlu1.b32.cont [4/16] (narrow) %v2236_v7, 8 }
 0x291   : > { %v4556_v60 = vpop.eup %4555  ;;  %v2862_v46 = vmul.f32 %v6405_v34, %v6382_v13  ;;  %4559 = vpow2.f32 %v3963_v22  ;;  %v2854_v29 = vsel %vm2853_vm6, %v4550_v58, %v2850_v17  ;;  %vm2867_vm8 = vweird.f32 %v6405_v34  ;;  %v6445_v16 = vpop.f32.mrf.mxu1 }
 0x292   : > { %v4558_v39 = vpop.eup %4557  ;;  %4561 = vrcp.f32 %v6407_v59  ;;  %v2859_v20 = vsel %vm2856_vm7, %v2858_v25, %v2854_v29  ;;  %v3255_v45 = vmul.f32 %v4556_v60, %v2844_v21  ;;  %vm6430_vm10 = vmor %vm2866_vm9, %vm2867_vm8  ;;  %v2887_v38 = vand.u32 2147483648, %v6407_v59 }
 0x293   : > { %v2863_v18 = vsub.f32 1.0, %v2862_v46  ;;  %v3256_v0 = vmul.f32 %v4558_v39, %v2859_v20  ;;  %vm2881_vm13 = vweird.f32 %v6407_v59  ;;  %v2463_v39 = vadd.f32 %v6328_v2, %v6300_v53 }
 0x294   : > { %v2553_v36 = vpop.f32.mrf.mxu2  ;;  %v2888_v19 = vor.u32 1.1754944e-38, %v2887_v38 }
 0x295   : > { %v2187_v42 = vpop.f32.mrf.mxu0  ;;  %v2554_v52 = vadd.f32 %v2553_v36, %v6235_v4  ;;  %v3285_v44 = vpack.c.bf16 %v3256_v0, %v3255_v45  ;;  %v2864_v33 = vmul.f32 %v6405_v34, %v2863_v18  ;;  %v2465_v45 = vadd.f32 %v6346_v23, %v6300_v53 }
 0x296   : > { %v2237_v41 = vmax.f32 %v2187_v42, 0.0 }
 0x297   : > { %v4560_v6 = vpop.eup %4559  ;;  %v3964_v37 = vmul.f32 -1.442695, %v2554_v52  ;;  %3381 = vmatmul.bf16.gmra.mxu3 %v3285_v44  ;;  %v2865_v1 = vadd.f32 %v6405_v34, %v2864_v33 }
 0x298   : > { %v4562_v43 = vpop.eup %4561  ;;  %v6420_v14 = vadd.f32 1.0, %v4560_v6  ;;  %2285 = vxpose.xlu1.b32.cont [5/16] (narrow) %v2237_v41, 8 }
 0x299   : > { %v2877_v49 = vmul.f32 %v4562_v43, %v6407_v59  ;;  %4563 = vpow2.f32 %v3964_v37  ;;  %2595 = vmatmul.bf16.gmra.mxu2 %v6071_v47  ;;  %v2885_v47 = vand.u32 2147483647, %v6407_v59  ;;  %v2869_v15 = vsel %vm6430_vm10, %v6405_v34, %v2865_v1  ;;  %v6464_v52 = vpop.f32.mrf.mxu1 }
 0x29a   : > { %4565 = vrcp.f32 %v6420_v14  ;;  %vm2882_vm11 = vweird.f32 %v4562_v43  ;;  %v2874_v10 = vsel %vm2871_vm12, %v2873_v35, %v2869_v15  ;;  %v2902_v2 = vand.u32 2147483648, %v6420_v14 }
 0x29b   : > { %4567 = vtanh.f32 %v2458_v63  ;;  %v2878_v26 = vsub.f32 1.0, %v2877_v49  ;;  %vm2883_vm14 = vmor %vm2881_vm13, %vm2882_vm11  ;;  %vm2886_vm15 = vcmp.eq.f32.partialorder %v2885_v47, 8.507059e+37  ;;  %vm2896_vm1 = vweird.f32 %v6420_v14 }
 0x29c   : > { %4569 = vtanh.f32 %v2460_v61  ;;  %v2556_v3 = vpop.f32.mrf.mxu2  ;;  %v2900_v44 = vand.u32 2147483647, %v6420_v14  ;;  %v2903_v49 = vor.u32 1.1754944e-38, %v2902_v2 }
 0x29d   : > { %v2189_v24 = vpop.f32.mrf.mxu0  ;;  %v2557_v58 = vadd.f32 %v2556_v3, %v6235_v4  ;;  %v2879_v9 = vmul.f32 %v4562_v43, %v2878_v26 }
 0x29e   : > { %v2238_v13 = vmax.f32 %v2189_v24, 0.0  ;;  %vm2901_vm4 = vcmp.eq.f32.partialorder %v2900_v44, 8.507059e+37 }
 0x29f   : > { %v4564_v27 = vpop.eup %4563  ;;  %v3965_v11 = vmul.f32 -1.442695, %v2557_v58  ;;  %v2880_v55 = vadd.f32 %v4562_v43, %v2879_v9 }
 0x2a0   : > { %v6441_v48 = vpop.eup %4565  ;;  %v6443_v28 = vadd.f32 1.0, %v4564_v27  ;;  %2286 = vxpose.xlu1.b32.cont [6/16] (narrow) %v2238_v13, 8 }
 0x2a1   : > { %v4568_v57 = vpop.eup %4567  ;;  %v2892_v62 = vmul.f32 %v6441_v48, %v6420_v14  ;;  %4571 = vpow2.f32 %v3965_v11  ;;  %v2884_v31 = vsel %vm2883_vm14, %v4562_v43, %v2880_v55  ;;  %vm2897_vm0 = vweird.f32 %v6441_v48  ;;  %v6486_v55 = vpop.f32.mrf.mxu1 }
 0x2a2   : > { %v4570_v7 = vpop.eup %4569  ;;  %4573 = vrcp.f32 %v6443_v28  ;;  %v2889_v12 = vsel %vm2886_vm15, %v2888_v19, %v2884_v31  ;;  %v3257_v22 = vmul.f32 %v4568_v57, %v2874_v10  ;;  %vm6468_vm2 = vmor %vm2896_vm1, %vm2897_vm0  ;;  %v2915_v41 = vand.u32 2147483647, %v6443_v28 }
 0x2a3   : > { %v2893_v30 = vsub.f32 1.0, %v2892_v62  ;;  %v3258_v17 = vmul.f32 %v4570_v7, %v2889_v12  ;;  %v2917_v6 = vand.u32 2147483648, %v6443_v28  ;;  %vm2911_vm5 = vweird.f32 %v6443_v28 }
 0x2a4   : > { %v2558_v34 = vpop.f32.mrf.mxu2  ;;  %vm2916_vm7 = vcmp.eq.f32.partialorder %v2915_v41, 8.507059e+37  ;;  %v2468_v31 = vadd.f32 %v6374_v8, %v6300_v53 }
 0x2a5   : > { %v2192_v59 = vpop.f32.mrf.mxu0  ;;  %v2559_v21 = vadd.f32 %v2558_v34, %v6235_v4  ;;  %v3286_v25 = vpack.c.bf16 %v3258_v17, %v3257_v22  ;;  %v2894_v60 = vmul.f32 %v6441_v48, %v2893_v30  ;;  %v2918_v47 = vor.u32 1.1754944e-38, %v2917_v6 }
 0x2a6   : > { %v2239_v46 = vmax.f32 %v2192_v59, 0.0  ;;  %v2470_v30 = vadd.f32 %v6398_v56, %v6300_v53 }
 0x2a7   : > { %v4572_v29 = vpop.eup %4571  ;;  %v3966_v20 = vmul.f32 -1.442695, %v2559_v21  ;;  %3386 = vmatmul.bf16.gmra.mxu3 %v3286_v25  ;;  %v2895_v42 = vadd.f32 %v6441_v48, %v2894_v60 }
 0x2a8   : > { %v4574_v18 = vpop.eup %4573  ;;  %v6456_v0 = vadd.f32 1.0, %v4572_v29  ;;  %2287 = vxpose.xlu1.b32.cont [7/16] (narrow) %v2239_v46, 8 }
 0x2a9   : > { %v2907_v36 = vmul.f32 %v4574_v18, %v6443_v28  ;;  %4575 = vpow2.f32 %v3966_v20  ;;  %2600 = vmatmul.bf16.gmra.mxu2 %v6120_v54  ;;  %v2899_v43 = vsel %vm6468_vm2, %v6441_v48, %v2895_v42  ;;  %vm2912_vm3 = vweird.f32 %v4574_v18 }
 0x2aa   : > { %4577 = vrcp.f32 %v6456_v0  ;;  %v2904_v50 = vsel %vm2901_vm4, %v2903_v49, %v2899_v43  ;;  %vm2913_vm6 = vmor %vm2911_vm5, %vm2912_vm3  ;;  %v2932_v8 = vand.u32 2147483648, %v6456_v0  ;;  %vm2926_vm9 = vweird.f32 %v6456_v0 }
 0x2ab   : > { %4579 = vtanh.f32 %v2463_v39  ;;  %v2908_v23 = vsub.f32 1.0, %v2907_v36  ;;  %v2930_v56 = vand.u32 2147483647, %v6456_v0  ;;  %v6514_v36 = vpop.f32.mrf.mxu1 }
 0x2ac   : > { %4581 = vtanh.f32 %v2465_v45  ;;  %v2561_v33 = vpop.f32.mrf.mxu2  ;;  %v2933_v45 = vor.u32 1.1754944e-38, %v2932_v8 }
 0x2ad   : > { %v2194_v63 = vpop.f32.mrf.mxu0  ;;  %v2562_v37 = vadd.f32 %v2561_v33, %v6235_v4  ;;  %v2909_v61 = vmul.f32 %v4574_v18, %v2908_v23  ;;  %vm2931_vm12 = vcmp.eq.f32.partialorder %v2930_v56, 8.507059e+37 }
 0x2ae   : > { %v2240_v14 = vmax.f32 %v2194_v63, 0.0 }
 0x2af   : > { %v4576_v1 = vpop.eup %4575  ;;  %v3967_v40 = vmul.f32 -1.442695, %v2562_v37  ;;  %v2910_v26 = vadd.f32 %v4574_v18, %v2909_v61 }
 0x2b0   : > { %v6479_v5 = vpop.eup %4577  ;;  %v6481_v3 = vadd.f32 1.0, %v4576_v1  ;;  %2288 = vxpose.xlu1.b32.cont [8/16] (narrow) %v2240_v14, 8 }
 0x2b1   : > { %v4580_v38 = vpop.eup %4579  ;;  %v2922_v24 = vmul.f32 %v6479_v5, %v6456_v0  ;;  %4583 = vpow2.f32 %v3967_v40  ;;  %v2914_v58 = vsel %vm2913_vm6, %v4574_v18, %v2910_v26  ;;  %vm2927_vm8 = vweird.f32 %v6479_v5 }
 0x2b2   : > { %v4582_v15 = vpop.eup %4581  ;;  %4585 = vrcp.f32 %v6481_v3  ;;  %v2919_v9 = vsel %vm2916_vm7, %v2918_v47, %v2914_v58  ;;  %v3259_v35 = vmul.f32 %v4580_v38, %v2904_v50  ;;  %vm6504_vm10 = vmor %vm2926_vm9, %vm2927_vm8  ;;  %v2947_v60 = vand.u32 2147483648, %v6481_v3 }
 0x2b3   : > { %v2923_v13 = vsub.f32 1.0, %v2922_v24  ;;  %v3260_v27 = vmul.f32 %v4582_v15, %v2919_v9  ;;  %vm2941_vm13 = vweird.f32 %v6481_v3  ;;  %v2473_v38 = vadd.f32 %v6416_v51, %v6300_v53 }
 0x2b4   : > { %v2563_v11 = vpop.f32.mrf.mxu2  ;;  %v2948_v54 = vor.u32 1.1754944e-38, %v2947_v60  ;;  %v2475_v15 = vadd.f32 %v6445_v16, %v6300_v53 }
 0x2b5   : > { %v2197_v48 = vpop.f32.mrf.mxu0  ;;  %v2564_v28 = vadd.f32 %v2563_v11, %v6235_v4  ;;  %v3287_v10 = vpack.c.bf16 %v3260_v27, %v3259_v35  ;;  %v2924_v19 = vmul.f32 %v6479_v5, %v2923_v13  ;;  %v6532_v13 = vpop.f32.mrf.mxu1 }
 0x2b6   : > { %v2241_v57 = vmax.f32 %v2197_v48, 0.0 }
 0x2b7   : > { %v4584_v62 = vpop.eup %4583  ;;  %v3968_v7 = vmul.f32 -1.442695, %v2564_v28  ;;  %3391 = vmatmul.bf16.gmra.mxu3 %v3287_v10  ;;  %v2925_v34 = vadd.f32 %v6479_v5, %v2924_v19 }
 0x2b8   : > { %v4586_v12 = vpop.eup %4585  ;;  %v6494_v22 = vadd.f32 1.0, %v4584_v62  ;;  %2289 = vxpose.xlu1.b32.cont [9/16] (narrow) %v2241_v57, 8 }
 0x2b9   : > { %v2937_v17 = vmul.f32 %v4586_v12, %v6481_v3  ;;  %4587 = vpow2.f32 %v3968_v7  ;;  %2605 = vmatmul.bf16.gmra.mxu2 %v6170_v32  ;;  %v2945_v32 = vand.u32 2147483647, %v6481_v3  ;;  %v2929_v39 = vsel %vm6504_vm10, %v6479_v5, %v2925_v34 }
 0x2ba   : > { %4589 = vrcp.f32 %v6494_v22  ;;  %vm2942_vm11 = vweird.f32 %v4586_v12  ;;  %v2934_v33 = vsel %vm2931_vm12, %v2933_v45, %v2929_v39  ;;  %v2962_v51 = vand.u32 2147483648, %v6494_v22 }
 0x2bb   : > { %4591 = vtanh.f32 %v2468_v31  ;;  %v2938_v59 = vsub.f32 1.0, %v2937_v17  ;;  %vm2943_vm14 = vmor %vm2941_vm13, %vm2942_vm11  ;;  %vm2946_vm15 = vcmp.eq.f32.partialorder %v2945_v32, 8.507059e+37  ;;  %vm2956_vm1 = vweird.f32 %v6494_v22 }
 0x2bc   : > { %4593 = vtanh.f32 %v2470_v30  ;;  %v2566_v21 = vpop.f32.mrf.mxu2  ;;  %v2960_v16 = vand.u32 2147483647, %v6494_v22  ;;  %v2963_v30 = vor.u32 1.1754944e-38, %v2962_v51 }
 0x2bd   : > { %v2199_v46 = vpop.f32.mrf.mxu0  ;;  %v2567_v29 = vadd.f32 %v2566_v21, %v6235_v4  ;;  %v2939_v20 = vmul.f32 %v4586_v12, %v2938_v59  ;;  %v6559_v39 = vpop.f32.mrf.mxu1 }
 0x2be   : > { %v2242_v18 = vmax.f32 %v2199_v46, 0.0  ;;  %vm2961_vm4 = vcmp.eq.f32.partialorder %v2960_v16, 8.507059e+37 }
 0x2bf   : > { %v4588_v0 = vpop.eup %4587  ;;  %v3969_v42 = vmul.f32 -1.442695, %v2567_v29  ;;  %v2940_v2 = vadd.f32 %v4586_v12, %v2939_v20 }
 0x2c0   : > { %v6517_v23 = vpop.eup %4589  ;;  %v6519_v44 = vadd.f32 1.0, %v4588_v0  ;;  %2290 = vxpose.xlu1.b32.cont [10/16] (narrow) %v2242_v18, 8 }
 0x2c1   : > { %v4592_v41 = vpop.eup %4591  ;;  %v2952_v6 = vmul.f32 %v6517_v23, %v6494_v22  ;;  %4595 = vpow2.f32 %v3969_v42  ;;  %v2944_v63 = vsel %vm2943_vm14, %v4586_v12, %v2940_v2  ;;  %vm2957_vm0 = vweird.f32 %v6517_v23 }
 0x2c2   : > { %v4594_v37 = vpop.eup %4593  ;;  %4597 = vrcp.f32 %v6519_v44  ;;  %v2949_v43 = vsel %vm2946_vm15, %v2948_v54, %v2944_v63  ;;  %v3261_v14 = vmul.f32 %v4592_v41, %v2934_v33  ;;  %vm6541_vm2 = vmor %vm2956_vm1, %vm2957_vm0  ;;  %v2975_v10 = vand.u32 2147483647, %v6519_v44 }
 0x2c3   : > { %v2953_v61 = vsub.f32 1.0, %v2952_v6  ;;  %v3262_v49 = vmul.f32 %v4594_v37, %v2949_v43  ;;  %v2977_v19 = vand.u32 2147483648, %v6519_v44  ;;  %vm2971_vm5 = vweird.f32 %v6519_v44 }
 0x2c4   : > { %v2568_v1 = vpop.f32.mrf.mxu2  ;;  %vm2976_vm7 = vcmp.eq.f32.partialorder %v2975_v10, 8.507059e+37  ;;  %v2478_v41 = vadd.f32 %v6464_v52, %v6300_v53  ;;  %v2480_v37 = vadd.f32 %v6486_v55, %v6300_v53 }
 0x2c5   : > { %v2202_v40 = vpop.f32.mrf.mxu0  ;;  %v2569_v26 = vadd.f32 %v2568_v1, %v6235_v4  ;;  %v3288_v5 = vpack.c.bf16 %v3262_v49, %v3261_v14  ;;  %v2954_v3 = vmul.f32 %v6517_v23, %v2953_v61  ;;  %v2978_v21 = vor.u32 1.1754944e-38, %v2977_v19 }
 0x2c6   : > { %v2243_v50 = vmax.f32 %v2202_v40, 0.0 }
 0x2c7   : > { %v4596_v47 = vpop.eup %4595  ;;  %v3970_v24 = vmul.f32 -1.442695, %v2569_v26  ;;  %3396 = vmatmul.bf16.gmra.mxu3 %v3288_v5  ;;  %v2955_v27 = vadd.f32 %v6517_v23, %v2954_v3  ;;  %v6582_v3 = vpop.f32.mrf.mxu1 }
 0x2c8   : > { %v4598_v58 = vpop.eup %4597  ;;  %v6530_v9 = vadd.f32 1.0, %v4596_v47  ;;  %2291 = vxpose.xlu1.b32.cont [11/16] (narrow) %v2243_v50, 8 }
 0x2c9   : > { %v2967_v35 = vmul.f32 %v4598_v58, %v6519_v44  ;;  %4599 = vpow2.f32 %v3970_v24  ;;  %v2959_v31 = vsel %vm6541_vm2, %v6517_v23, %v2955_v27  ;;  %vm2972_vm3 = vweird.f32 %v4598_v58 }
 0x2ca   : > { %4601 = vrcp.f32 %v6530_v9  ;;  %v2964_v56 = vsel %vm2961_vm4, %v2963_v30, %v2959_v31  ;;  %vm2973_vm6 = vmor %vm2971_vm5, %vm2972_vm3  ;;  %v2992_v52 = vand.u32 2147483648, %v6530_v9  ;;  %vm2986_vm9 = vweird.f32 %v6530_v9 }
 0x2cb   : > { %4603 = vtanh.f32 %v2473_v38  ;;  %v2968_v11 = vsub.f32 1.0, %v2967_v35  ;;  %v2990_v55 = vand.u32 2147483647, %v6530_v9 }
 0x2cc   : > { %4605 = vtanh.f32 %v2475_v15  ;;  %v2571_v48 = vpop.f32.mrf.mxu2  ;;  %v2993_v15 = vor.u32 1.1754944e-38, %v2992_v52 }
 0x2cd   : > { %v2204_v57 = vpop.f32.mrf.mxu0  ;;  %v2572_v62 = vadd.f32 %v2571_v48, %v6235_v4  ;;  %v2969_v7 = vmul.f32 %v4598_v58, %v2968_v11  ;;  %vm2991_vm12 = vcmp.eq.f32.partialorder %v2990_v55, 8.507059e+37 }
 0x2ce   : > { %v2244_v12 = vmax.f32 %v2204_v57, 0.0 }
 0x2cf   : > { %v4600_v22 = vpop.eup %4599  ;;  %v3971_v17 = vmul.f32 -1.442695, %v2572_v62  ;;  %v2970_v34 = vadd.f32 %v4598_v58, %v2969_v7 }
 0x2d0   : > { %v6552_v8 = vpop.eup %4601  ;;  %v6554_v59 = vadd.f32 1.0, %v4600_v22  ;;  %2292 = vxpose.xlu1.b32.cont [12/16] (narrow) %v2244_v12, 8 }
 0x2d1   : > { %v4604_v25 = vpop.eup %4603  ;;  %v2982_v32 = vmul.f32 %v6552_v8, %v6530_v9  ;;  %4607 = vpow2.f32 %v3971_v17  ;;  %v2974_v60 = vsel %vm2973_vm6, %v4598_v58, %v2970_v34  ;;  %vm2987_vm8 = vweird.f32 %v6552_v8 }
 0x2d2   : > { %v4606_v46 = vpop.eup %4605  ;;  %4609 = vrcp.f32 %v6554_v59  ;;  %v2979_v29 = vsel %vm2976_vm7, %v2978_v21, %v2974_v60  ;;  %v3263_v18 = vmul.f32 %v4604_v25, %v2964_v56  ;;  %vm6576_vm10 = vmor %vm2986_vm9, %vm2987_vm8  ;;  %v3005_v26 = vand.u32 2147483647, %v6554_v59  ;;  %v6600_v25 = vpop.f32.mrf.mxu1 }
 0x2d3   : > { %v2983_v20 = vsub.f32 1.0, %v2982_v32  ;;  %v3264_v45 = vmul.f32 %v4606_v46, %v2979_v29  ;;  %v3007_v5 = vand.u32 2147483648, %v6554_v59  ;;  %vm3001_vm13 = vweird.f32 %v6554_v59 }
 0x2d4   : > { %v2573_v0 = vpop.f32.mrf.mxu2  ;;  %vm3006_vm15 = vcmp.eq.f32.partialorder %v3005_v26, 8.507059e+37  ;;  %v2483_v21 = vadd.f32 %v6514_v36, %v6300_v53  ;;  %v2485_v46 = vadd.f32 %v6532_v13, %v6300_v53 }
 0x2d5   : > { %v2207_v42 = vpop.f32.mrf.mxu0  ;;  %v2574_v2 = vadd.f32 %v2573_v0, %v6235_v4  ;;  %v3289_v23 = vpack.c.bf16 %v3264_v45, %v3263_v18  ;;  %v2984_v44 = vmul.f32 %v6552_v8, %v2983_v20  ;;  %v3008_v48 = vor.u32 1.1754944e-38, %v3007_v5 }
 0x2d6   : > { %v2245_v33 = vmax.f32 %v2207_v42, 0.0 }
 0x2d7   : > { %v4608_v54 = vpop.eup %4607  ;;  %v3972_v6 = vmul.f32 -1.442695, %v2574_v2  ;;  %3401 = vmatmul.bf16.gmra.mxu3 %v3289_v23  ;;  %v2985_v14 = vadd.f32 %v6552_v8, %v2984_v44 }
 0x2d8   : > { %v4610_v63 = vpop.eup %4609  ;;  %v6567_v43 = vadd.f32 1.0, %v4608_v54  ;;  %2293 = vxpose.xlu1.b32.cont [13/16] (narrow) %v2245_v33, 8 }
 0x2d9   : > { %v2997_v61 = vmul.f32 %v4610_v63, %v6554_v59  ;;  %4611 = vpow2.f32 %v3972_v6  ;;  %v2989_v38 = vsel %vm6576_vm10, %v6552_v8, %v2985_v14  ;;  %vm3002_vm11 = vweird.f32 %v4610_v63 }
 0x2da   : > { %4613 = vrcp.f32 %v6567_v43  ;;  %v2994_v16 = vsel %vm2991_vm12, %v2993_v15, %v2989_v38  ;;  %vm3003_vm14 = vmor %vm3001_vm13, %vm3002_vm11  ;;  %v3022_v36 = vand.u32 2147483648, %v6567_v43  ;;  %vm3016_vm1 = vweird.f32 %v6567_v43  ;;  %v6628_v40 = vpop.f32.mrf.mxu1 }
 0x2db   : > { %4615 = vtanh.f32 %v2478_v41  ;;  %v2998_v49 = vsub.f32 1.0, %v2997_v61  ;;  %v3020_v13 = vand.u32 2147483647, %v6567_v43  ;;  %v2488_v15 = vadd.f32 %v6559_v39, %v6300_v53 }
 0x2dc   : > { %4617 = vtanh.f32 %v2480_v37  ;;  %v2576_v1 = vpop.f32.mrf.mxu2 }
 0x2dd   : > { %v2209_v50 = vpop.f32.mrf.mxu0  ;;  %v2577_v47 = vadd.f32 %v2576_v1, %v6235_v4  ;;  %v2999_v24 = vmul.f32 %v4610_v63, %v2998_v49  ;;  %vm3021_vm4 = vcmp.eq.f32.partialorder %v3020_v13, 8.507059e+37 }
 0x2de   : > { %v2246_v58 = vmax.f32 %v2209_v50, 0.0 }
 0x2df   : > { %v4612_v9 = vpop.eup %4611  ;;  %v3973_v35 = vmul.f32 -1.442695, %v2577_v47  ;;  %v3000_v27 = vadd.f32 %v4610_v63, %v2999_v24 }
 0x2e0   : > { %v6589_v51 = vpop.eup %4613  ;;  %v6591_v11 = vadd.f32 1.0, %v4612_v9  ;;  %2294 = vxpose.xlu1.b32.cont [14/16] (narrow) %v2246_v58, 8 }
 0x2e1   : > { %v4616_v28 = vpop.eup %4615  ;;  %v3012_v10 = vmul.f32 %v6589_v51, %v6567_v43  ;;  %4619 = vpow2.f32 %v3973_v35  ;;  %v3004_v19 = vsel %vm3003_vm14, %v4610_v63, %v3000_v27  ;;  %vm3017_vm0 = vweird.f32 %v6589_v51 }
 0x2e2   : > { %v4618_v57 = vpop.eup %4617  ;;  %4621 = vrcp.f32 %v6591_v11  ;;  %v3009_v62 = vsel %vm3006_vm15, %v3008_v48, %v3004_v19  ;;  %v3265_v7 = vmul.f32 %v4616_v28, %v2994_v16  ;;  %vm6613_vm2 = vmor %vm3016_vm1, %vm3017_vm0  ;;  %v3035_v2 = vand.u32 2147483647, %v6591_v11 }
 0x2e3   : > { %v3013_v31 = vsub.f32 1.0, %v3012_v10  ;;  %v3266_v12 = vmul.f32 %v4618_v57, %v3009_v62  ;;  %v3037_v23 = vand.u32 2147483648, %v6591_v11  ;;  %v3023_v63 = vor.u32 1.1754944e-38, %v3022_v36 }
 0x2e4   : > { %v2578_v30 = vpop.f32.mrf.mxu2  ;;  %vm3031_vm5 = vweird.f32 %v6591_v11  ;;  %vm3036_vm7 = vcmp.eq.f32.partialorder %v3035_v2, 8.507059e+37  ;;  %v2490_v28 = vadd.f32 %v6582_v3, %v6300_v53 }
 0x2e5   : > { %v2212_v22 = vpop.f32.mrf.mxu0  ;;  %v2579_v17 = vadd.f32 %v2578_v30, %v6235_v4  ;;  %v3290_v34 = vpack.c.bf16 %v3266_v12, %v3265_v7  ;;  %v3014_v8 = vmul.f32 %v6589_v51, %v3013_v31  ;;  %v3038_v55 = vor.u32 1.1754944e-38, %v3037_v23  ;;  %v6646_v31 = vpop.f32.mrf.mxu1 }
 0x2e6   : > { %v2247_v59 = vmax.f32 %v2212_v22, 0.0 }
 0x2e7   : > { %v4620_v56 = vpop.eup %4619  ;;  %v3974_v32 = vmul.f32 -1.442695, %v2579_v17  ;;  %3406 = vmatmul.bf16.gmra.mxu3 %v3290_v34  ;;  %v3015_v18 = vadd.f32 %v6589_v51, %v3014_v8 }
 0x2e8   : > { %v4622_v60 = vpop.eup %4621  ;;  %v6604_v29 = vadd.f32 1.0, %v4620_v56  ;;  %2295 = vxpose.xlu1.b32.cont [15/16] (narrow) %v2247_v59, 8 }
 0x2e9   : > { %v3027_v20 = vmul.f32 %v4622_v60, %v6591_v11  ;;  %4623 = vpow2.f32 %v3974_v32  ;;  %v3019_v54 = vsel %vm6613_vm2, %v6589_v51, %v3015_v18  ;;  %vm3032_vm3 = vweird.f32 %v4622_v60 }
 0x2ea   : > { %4625 = vrcp.f32 %v6604_v29  ;;  %v3024_v49 = vsel %vm3021_vm4, %v3023_v63, %v3019_v54  ;;  %vm3033_vm6 = vmor %vm3031_vm5, %vm3032_vm3  ;;  %v3052_v62 = vand.u32 2147483648, %v6604_v29  ;;  %vm3046_vm9 = vweird.f32 %v6604_v29 }
 0x2eb   : > { %4627 = vtanh.f32 %v2483_v21  ;;  %v3028_v45 = vsub.f32 1.0, %v3027_v20  ;;  %v3050_v3 = vand.u32 2147483647, %v6604_v29 }
 0x2ec   : > { %4629 = vtanh.f32 %v2485_v46  ;;  %v2581_v0 = vpop.f32.mrf.mxu2  ;;  %v3053_v32 = vor.u32 1.1754944e-38, %v3052_v62 }
 0x2ed   : > { %v2214_v44 = vpop.f32.mrf.mxu0  ;;  %v2582_v33 = vadd.f32 %v2581_v0, %v6235_v4  ;;  %v3029_v41 = vmul.f32 %v4622_v60, %v3028_v45  ;;  %vm3051_vm12 = vcmp.eq.f32.partialorder %v3050_v3, 8.507059e+37 }
 0x2ee   : > { %v2248_v6 = vmax.f32 %v2214_v44, 0.0 }
 0x2ef   : > { %v4624_v37 = vpop.eup %4623  ;;  %v3975_v43 = vmul.f32 -1.442695, %v2582_v33  ;;  %v3030_v61 = vadd.f32 %v4622_v60, %v3029_v41 }
 0x2f0   : > { %v6624_v14 = vpop.eup %4625  ;;  %v6626_v52 = vadd.f32 1.0, %v4624_v37  ;;  %2296 = vxpose.xlu1.b32.end [16/16] (narrow) %v2248_v6, 8  ;;  %v2493_v6 = vadd.f32 %v6600_v25, %v6300_v53  ;;  %v6670_v37 = vpop.f32.mrf.mxu1 }
 0x2f1   : > { %v4628_v1 = vpop.eup %4627  ;;  %v3042_v26 = vmul.f32 %v6624_v14, %v6604_v29  ;;  %4631 = vpow2.f32 %v3975_v43  ;;  %v3034_v5 = vsel %vm3033_vm6, %v4622_v60, %v3030_v61  ;;  %vm3047_vm8 = vweird.f32 %v6624_v14 }
 0x2f2   : > { %v4630_v50 = vpop.eup %4629  ;;  %4633 = vrcp.f32 %v6626_v52  ;;  %v3039_v47 = vsel %vm3036_vm7, %v3038_v55, %v3034_v5  ;;  %v3267_v24 = vmul.f32 %v4628_v1, %v3024_v49  ;;  %vm6650_vm10 = vmor %vm3046_vm9, %vm3047_vm8  ;;  %v3065_v17 = vand.u32 2147483647, %v6626_v52 }
 0x2f3   : > { %v3043_v38 = vsub.f32 1.0, %v3042_v26  ;;  %v3268_v58 = vmul.f32 %v4630_v50, %v3039_v47  ;;  %4635 = vtanh.f32 %v2488_v15  ;;  %v3067_v34 = vand.u32 2147483648, %v6626_v52 }
 0x2f4   : > { %v2583_v9 = vpop.f32.mrf.mxu2  ;;  %vm3061_vm13 = vweird.f32 %v6626_v52  ;;  %vm3066_vm15 = vcmp.eq.f32.partialorder %v3065_v17, 8.507059e+37  ;;  %v2495_v1 = vadd.f32 %v6628_v40, %v6300_v53 }
 0x2f5   : > { %v2584_v35 = vadd.f32 %v2583_v9, %v6235_v4  ;;  %v3291_v27 = vpack.c.bf16 %v3268_v58, %v3267_v24  ;;  %v3044_v51 = vmul.f32 %v6624_v14, %v3043_v38  ;;  %v3068_v45 = vor.u32 1.1754944e-38, %v3067_v34 }
 0x2f7   : > { %v4632_v11 = vpop.eup %4631  ;;  %v3976_v16 = vmul.f32 -1.442695, %v2584_v35  ;;  %3411 = vmatmul.bf16.gmra.mxu3 %v3291_v27  ;;  %v3045_v39 = vadd.f32 %v6624_v14, %v3044_v51 }
 0x2f8   : > { %v4634_v48 = vpop.eup %4633  ;;  %v6639_v10 = vadd.f32 1.0, %v4632_v11 }
 0x2f9   : > { %v3057_v19 = vmul.f32 %v4634_v48, %v6626_v52  ;;  %4637 = vpow2.f32 %v3976_v16  ;;  %v3049_v59 = vsel %vm6650_vm10, %v6624_v14, %v3045_v39  ;;  %vm3062_vm11 = vweird.f32 %v4634_v48  ;;  %v4636_v21 = vpop.eup %4635 }
 0x2fa   : > { %4639 = vrcp.f32 %v6639_v10  ;;  %v3372_v57 = vpop.f32.mrf.mxu3  ;;  %v3054_v36 = vsel %vm3051_vm12, %v3053_v32, %v3049_v59  ;;  %vm3063_vm14 = vmor %vm3061_vm13, %vm3062_vm11  ;;  %v3082_v47 = vand.u32 2147483648, %v6639_v10  ;;  %vm3076_vm1 = vweird.f32 %v6639_v10 }
 0x2fb   : > { %v3058_v7 = vsub.f32 1.0, %v3057_v19  ;;  %v3452_v12 = vmax.f32 %v3372_v57, 0.0  ;;  %4641 = vtanh.f32 %v2490_v28  ;;  %v3269_v54 = vmul.f32 %v4636_v21, %v3054_v36 }
 0x2fc   : > { %v2586_v30 = vpop.f32.mrf.mxu2  ;;  %v3080_v40 = vand.u32 2147483647, %v6639_v10  ;;  %v2498_v32 = vadd.f32 %v6646_v31, %v6300_v53 }
 0x2fd   : > { %v2587_v8 = vadd.f32 %v2586_v30, %v6235_v4  ;;  %3484 = vxpose.xlu2.b32.start [1/16] (narrow) %v3452_v12, 8  ;;  %v3059_v56 = vmul.f32 %v4634_v48, %v3058_v7 }
 0x2fe   : > { %vm3081_vm4 = vcmp.eq.f32.partialorder %v3080_v40, 8.507059e+37 }
 0x2ff   : > { %v4638_v60 = vpop.eup %4637  ;;  %v3977_v46 = vmul.f32 -1.442695, %v2587_v8  ;;  %v3060_v29 = vadd.f32 %v4634_v48, %v3059_v56 }
 0x300   : > { %v6661_v20 = vpop.eup %4639  ;;  %v6663_v18 = vadd.f32 1.0, %v4638_v60 }
 0x301   : > { %v3072_v13 = vmul.f32 %v6661_v20, %v6639_v10  ;;  %4643 = vpow2.f32 %v3977_v46  ;;  %v3064_v0 = vsel %vm3063_vm14, %v4634_v48, %v3060_v29  ;;  %v4642_v42 = vpop.eup %4641  ;;  %vm3077_vm0 = vweird.f32 %v6661_v20  ;;  %v6695_v10 = vpop.f32.mrf.mxu1 }
 0x302   : > { %4645 = vrcp.f32 %v6663_v18  ;;  %v3374_v2 = vpop.f32.mrf.mxu3  ;;  %v3069_v23 = vsel %vm3066_vm15, %v3068_v45, %v3064_v0  ;;  %vm6685_vm2 = vmor %vm3076_vm1, %vm3077_vm0  ;;  %v3095_v9 = vand.u32 2147483647, %v6663_v18  ;;  %v3097_v35 = vand.u32 2147483648, %v6663_v18 }
 0x303   : > { %v3073_v44 = vsub.f32 1.0, %v3072_v13  ;;  %v3453_v33 = vmax.f32 %v3374_v2, 0.0  ;;  %v3270_v41 = vmul.f32 %v4642_v42, %v3069_v23  ;;  %4647 = vtanh.f32 %v2493_v6 }
 0x304   : > { %v2588_v63 = vpop.f32.mrf.mxu2  ;;  %v3083_v48 = vor.u32 1.1754944e-38, %v3082_v47  ;;  %vm3091_vm5 = vweird.f32 %v6663_v18  ;;  %v3098_v12 = vor.u32 1.1754944e-38, %v3097_v35  ;;  %vm3096_vm7 = vcmp.eq.f32.partialorder %v3095_v9, 8.507059e+37 }
 0x305   : > { %v2589_v43 = vadd.f32 %v2588_v63, %v6235_v4  ;;  %3485 = vxpose.xlu2.b32.cont [2/16] (narrow) %v3453_v33, 8  ;;  %v3292_v61 = vpack.c.bf16 %v3270_v41, %v3269_v54  ;;  %v3074_v14 = vmul.f32 %v6661_v20, %v3073_v44  ;;  %v2500_v13 = vadd.f32 %v6670_v37, %v6300_v53 }
 0x307   : > { %v4644_v52 = vpop.eup %4643  ;;  %v3978_v49 = vmul.f32 -1.442695, %v2589_v43  ;;  %3416 = vmatmul.bf16.gmra.mxu3 %v3292_v61  ;;  %v3075_v5 = vadd.f32 %v6661_v20, %v3074_v14 }
 0x308   : > { %v4646_v55 = vpop.eup %4645  ;;  %v6676_v26 = vadd.f32 1.0, %v4644_v52 }
 0x309   : > { %v3087_v25 = vmul.f32 %v4646_v55, %v6663_v18  ;;  %4649 = vpow2.f32 %v3978_v49  ;;  %v3079_v51 = vsel %vm6685_vm2, %v6661_v20, %v3075_v5  ;;  %vm3092_vm3 = vweird.f32 %v4646_v55  ;;  %v4648_v16 = vpop.eup %4647  ;;  %v2504_v42 = vpop.f32.mrf.mxu1 }
 0x30a   : > { %4651 = vrcp.f32 %v6676_v26  ;;  %v3377_v50 = vpop.f32.mrf.mxu3  ;;  %v3084_v7 = vsel %vm3081_vm4, %v3083_v48, %v3079_v51  ;;  %vm3093_vm6 = vmor %vm3091_vm5, %vm3092_vm3  ;;  %v3112_v44 = vand.u32 2147483648, %v6676_v26  ;;  %vm3106_vm9 = vweird.f32 %v6676_v26 }
 0x30b   : > { %v3088_v38 = vsub.f32 1.0, %v3087_v25  ;;  %v3454_v24 = vmax.f32 %v3377_v50, 0.0  ;;  %4653 = vtanh.f32 %v2495_v1  ;;  %v3271_v56 = vmul.f32 %v4648_v16, %v3084_v7 }
 0x30c   : > { %v2591_v58 = vpop.f32.mrf.mxu2  ;;  %v3110_v41 = vand.u32 2147483647, %v6676_v26  ;;  %v2503_v48 = vadd.f32 %v6695_v10, %v6300_v53 }
 0x30d   : > { %v2592_v27 = vadd.f32 %v2591_v58, %v6235_v4  ;;  %3486 = vxpose.xlu2.b32.cont [3/16] (narrow) %v3454_v24, 8  ;;  %v3089_v11 = vmul.f32 %v4646_v55, %v3088_v38 }
 0x30e   : > { %vm3111_vm12 = vcmp.eq.f32.partialorder %v3110_v41, 8.507059e+37 }
 0x30f   : > { %v4650_v28 = vpop.eup %4649  ;;  %v3979_v19 = vmul.f32 -1.442695, %v2592_v27  ;;  %v3090_v39 = vadd.f32 %v4646_v55, %v3089_v11 }
 0x310   : > { %v6698_v57 = vpop.eup %4651  ;;  %v6700_v62 = vadd.f32 1.0, %v4650_v28 }
 0x311   : > { %v3102_v3 = vmul.f32 %v6698_v57, %v6676_v26  ;;  %4655 = vpow2.f32 %v3979_v19  ;;  %v3094_v30 = vsel %vm3093_vm6, %v4646_v55, %v3090_v39  ;;  %v4654_v22 = vpop.eup %4653  ;;  %vm3107_vm8 = vweird.f32 %v6698_v57  ;;  %v6738_v35 = vpop.f32.mrf.mxu1 }
 0x312   : > { %4657 = vrcp.f32 %v6700_v62  ;;  %v3379_v17 = vpop.f32.mrf.mxu3  ;;  %v3099_v34 = vsel %vm3096_vm7, %v3098_v12, %v3094_v30  ;;  %vm6720_vm10 = vmor %vm3106_vm9, %vm3107_vm8  ;;  %v3125_v37 = vand.u32 2147483647, %v6700_v62  ;;  %v3127_v43 = vand.u32 2147483648, %v6700_v62 }
 0x313   : > { %v3103_v8 = vsub.f32 1.0, %v3102_v3  ;;  %v3455_v59 = vmax.f32 %v3379_v17, 0.0  ;;  %v3272_v21 = vmul.f32 %v4654_v22, %v3099_v34  ;;  %4659 = vtanh.f32 %v2498_v32 }
 0x314   : > { %v2593_v60 = vpop.f32.mrf.mxu2  ;;  %v3113_v55 = vor.u32 1.1754944e-38, %v3112_v44  ;;  %vm3121_vm13 = vweird.f32 %v6700_v62  ;;  %v3128_v38 = vor.u32 1.1754944e-38, %v3127_v43  ;;  %vm3126_vm15 = vcmp.eq.f32.partialorder %v3125_v37, 8.507059e+37 }
 0x315   : > { %v2594_v46 = vadd.f32 %v2593_v60, %v6235_v4  ;;  %3487 = vxpose.xlu2.b32.cont [4/16] (narrow) %v3455_v59, 8  ;;  %v3293_v29 = vpack.c.bf16 %v3272_v21, %v3271_v56  ;;  %v3104_v20 = vmul.f32 %v6698_v57, %v3103_v8  ;;  %v2505_v3 = vadd.f32 %v2504_v42, %v6300_v53 }
 0x317   : > { %v4656_v18 = vpop.eup %4655  ;;  %v3980_v36 = vmul.f32 -1.442695, %v2594_v46  ;;  %3421 = vmatmul.bf16.gmra.mxu3 %v3293_v29  ;;  %v3105_v2 = vadd.f32 %v6698_v57, %v3104_v20 }
 0x318   : > { %v4658_v45 = vpop.eup %4657  ;;  %v6711_v0 = vadd.f32 1.0, %v4656_v18 }
 0x319   : > { %v3117_v31 = vmul.f32 %v4658_v45, %v6700_v62  ;;  %4661 = vpow2.f32 %v3980_v36  ;;  %v3109_v14 = vsel %vm6720_vm10, %v6698_v57, %v3105_v2  ;;  %vm3122_vm11 = vweird.f32 %v4658_v45  ;;  %v4660_v49 = vpop.eup %4659  ;;  %v2509_v29 = vpop.f32.mrf.mxu1 }
 0x31a   : > { %4663 = vrcp.f32 %v6711_v0  ;;  %v3382_v23 = vpop.f32.mrf.mxu3  ;;  %v3114_v47 = vsel %vm3111_vm12, %v3113_v55, %v3109_v14  ;;  %vm3123_vm14 = vmor %vm3121_vm13, %vm3122_vm11  ;;  %v3142_v34 = vand.u32 2147483648, %v6711_v0  ;;  %vm3136_vm1 = vweird.f32 %v6711_v0 }
 0x31b   : > { %v3118_v33 = vsub.f32 1.0, %v3117_v31  ;;  %v3456_v54 = vmax.f32 %v3382_v23, 0.0  ;;  %4665 = vtanh.f32 %v2500_v13  ;;  %v3273_v11 = vmul.f32 %v4660_v49, %v3114_v47 }
 0x31c   : > { %v2596_v6 = vpop.f32.mrf.mxu2  ;;  %v3140_v56 = vand.u32 2147483647, %v6711_v0  ;;  %v3143_v13 = vor.u32 1.1754944e-38, %v3142_v34  ;;  %v2508_v49 = vadd.f32 %v6738_v35, %v6300_v53 }
 0x31d   : > { %v2597_v61 = vadd.f32 %v2596_v6, %v6235_v4  ;;  %3488 = vxpose.xlu2.b32.cont [5/16] (narrow) %v3456_v54, 8  ;;  %v3119_v52 = vmul.f32 %v4658_v45, %v3118_v33 }
 0x31e   : > { %vm3141_vm4 = vcmp.eq.f32.partialorder %v3140_v56, 8.507059e+37 }
 0x31f   : > { %v4662_v1 = vpop.eup %4661  ;;  %v3981_v26 = vmul.f32 -1.442695, %v2597_v61  ;;  %v3120_v25 = vadd.f32 %v4658_v45, %v3119_v52 }
 0x320   : > { %v6731_v5 = vpop.eup %4663  ;;  %v6733_v50 = vadd.f32 1.0, %v4662_v1 }
 0x321   : > { %v3132_v24 = vmul.f32 %v6731_v5, %v6711_v0  ;;  %4667 = vpow2.f32 %v3981_v26  ;;  %v3124_v40 = vsel %vm3123_vm14, %v4658_v45, %v3120_v25  ;;  %v4666_v58 = vpop.eup %4665  ;;  %vm3137_vm0 = vweird.f32 %v6731_v5 }
 0x322   : > { %4669 = vrcp.f32 %v6733_v50  ;;  %v3384_v15 = vpop.f32.mrf.mxu3  ;;  %v3129_v9 = vsel %vm3126_vm15, %v3128_v38, %v3124_v40  ;;  %vm6754_vm2 = vmor %vm3136_vm1, %vm3137_vm0  ;;  %v3155_v60 = vand.u32 2147483647, %v6733_v50  ;;  %v3157_v46 = vand.u32 2147483648, %v6733_v50 }
 0x323   : > { %v3133_v27 = vsub.f32 1.0, %v3132_v24  ;;  %v3457_v51 = vmax.f32 %v3384_v15, 0.0  ;;  %v3274_v16 = vmul.f32 %v4666_v58, %v3129_v9  ;;  %4671 = vtanh.f32 %v2503_v48 }
 0x324   : > { %v2598_v28 = vpop.f32.mrf.mxu2  ;;  %vm3151_vm5 = vweird.f32 %v6733_v50  ;;  %v3158_v33 = vor.u32 1.1754944e-38, %v3157_v46  ;;  %vm3156_vm7 = vcmp.eq.f32.partialorder %v3155_v60, 8.507059e+37  ;;  %v2510_v24 = vadd.f32 %v2509_v29, %v6300_v53 }
 0x325   : > { %v2599_v19 = vadd.f32 %v2598_v28, %v6235_v4  ;;  %3489 = vxpose.xlu2.b32.cont [6/16] (narrow) %v3457_v51, 8  ;;  %v3294_v39 = vpack.c.bf16 %v3274_v16, %v3273_v11  ;;  %v3134_v57 = vmul.f32 %v6731_v5, %v3133_v27 }
 0x327   : > { %v4668_v62 = vpop.eup %4667  ;;  %v3982_v7 = vmul.f32 -1.442695, %v2599_v19  ;;  %3426 = vmatmul.bf16.gmra.mxu3 %v3294_v39  ;;  %v3135_v10 = vadd.f32 %v6731_v5, %v3134_v57 }
 0x328   : > { %v4670_v12 = vpop.eup %4669  ;;  %v6745_v30 = vadd.f32 1.0, %v4668_v62 }
 0x329   : > { %v3147_v22 = vmul.f32 %v4670_v12, %v6733_v50  ;;  %4673 = vpow2.f32 %v3982_v7  ;;  %v3139_v18 = vsel %vm6754_vm2, %v6731_v5, %v3135_v10  ;;  %vm3152_vm3 = vweird.f32 %v4670_v12  ;;  %v4672_v45 = vpop.eup %4671  ;;  %v2512_v50 = vpop.f32.mrf.mxu1 }
 0x32a   : > { %4675 = vrcp.f32 %v6745_v30  ;;  %v3387_v17 = vpop.f32.mrf.mxu3  ;;  %v3144_v44 = vsel %vm3141_vm4, %v3143_v13, %v3139_v18  ;;  %vm3153_vm6 = vmor %vm3151_vm5, %vm3152_vm3  ;;  %v3172_v35 = vand.u32 2147483648, %v6745_v30  ;;  %vm3166_vm9 = vweird.f32 %v6745_v30 }
 0x32b   : > { %v3148_v8 = vsub.f32 1.0, %v3147_v22  ;;  %v3458_v59 = vmax.f32 %v3387_v17, 0.0  ;;  %4677 = vtanh.f32 %v2505_v3  ;;  %v3275_v14 = vmul.f32 %v4672_v45, %v3144_v44 }
 0x32c   : > { %v2601_v21 = vpop.f32.mrf.mxu2  ;;  %v3170_v11 = vand.u32 2147483647, %v6745_v30  ;;  %v2513_v45 = vadd.f32 %v2512_v50, %v6300_v53 }
 0x32d   : > { %v2602_v20 = vadd.f32 %v2601_v21, %v6235_v4  ;;  %3490 = vxpose.xlu2.b32.cont [7/16] (narrow) %v3458_v59, 8  ;;  %v3149_v36 = vmul.f32 %v4670_v12, %v3148_v8 }
 0x32e   : > { %vm3171_vm12 = vcmp.eq.f32.partialorder %v3170_v11, 8.507059e+37 }
 0x32f   : > { %v4674_v0 = vpop.eup %4673  ;;  %v3983_v42 = vmul.f32 -1.442695, %v2602_v20  ;;  %v3150_v31 = vadd.f32 %v4670_v12, %v3149_v36 }
 0x330   : > { %v6765_v2 = vpop.eup %4675  ;;  %v6767_v23 = vadd.f32 1.0, %v4674_v0 }
 0x331   : > { %v3162_v54 = vmul.f32 %v6765_v2, %v6745_v30  ;;  %4679 = vpow2.f32 %v3983_v42  ;;  %v3154_v41 = vsel %vm3153_vm6, %v4670_v12, %v3150_v31  ;;  %v4678_v6 = vpop.eup %4677  ;;  %vm3167_vm8 = vweird.f32 %v6765_v2  ;;  %v2514_v59 = vpop.f32.mrf.mxu1 }
 0x332   : > { %4681 = vrcp.f32 %v6767_v23  ;;  %v3389_v63 = vpop.f32.mrf.mxu3  ;;  %v3159_v37 = vsel %vm3156_vm7, %v3158_v33, %v3154_v41  ;;  %vm6786_vm10 = vmor %vm3166_vm9, %vm3167_vm8  ;;  %v3185_v28 = vand.u32 2147483647, %v6767_v23  ;;  %v3187_v19 = vand.u32 2147483648, %v6767_v23 }
 0x333   : > { %v3163_v43 = vsub.f32 1.0, %v3162_v54  ;;  %v3459_v61 = vmax.f32 %v3389_v63, 0.0  ;;  %v3276_v52 = vmul.f32 %v4678_v6, %v3159_v37  ;;  %4683 = vtanh.f32 %v2508_v49 }
 0x334   : > { %v2603_v55 = vpop.f32.mrf.mxu2  ;;  %v3173_v12 = vor.u32 1.1754944e-38, %v3172_v35  ;;  %vm3181_vm13 = vweird.f32 %v6767_v23  ;;  %v3188_v8 = vor.u32 1.1754944e-38, %v3187_v19  ;;  %vm3186_vm15 = vcmp.eq.f32.partialorder %v3185_v28, 8.507059e+37 }
 0x335   : > { %v2604_v1 = vadd.f32 %v2603_v55, %v6235_v4  ;;  %3491 = vxpose.xlu2.b32.cont [8/16] (narrow) %v3459_v61, 8  ;;  %v3295_v26 = vpack.c.bf16 %v3276_v52, %v3275_v14  ;;  %v3164_v25 = vmul.f32 %v6765_v2, %v3163_v43  ;;  %v2515_v33 = vadd.f32 %v2514_v59, %v6300_v53 }
 0x337   : > { %v4680_v5 = vpop.eup %4679  ;;  %v3984_v47 = vmul.f32 -1.442695, %v2604_v1  ;;  %3431 = vmatmul.bf16.gmra.mxu3 %v3295_v26  ;;  %v3165_v15 = vadd.f32 %v6765_v2, %v3164_v25 }
 0x338   : > { %v4682_v38 = vpop.eup %4681  ;;  %v6777_v40 = vadd.f32 1.0, %v4680_v5 }
 0x339   : > { %v3177_v58 = vmul.f32 %v4682_v38, %v6767_v23  ;;  %4685 = vpow2.f32 %v3984_v47  ;;  %v3169_v57 = vsel %vm6786_vm10, %v6765_v2, %v3165_v15  ;;  %vm3182_vm11 = vweird.f32 %v4682_v38  ;;  %v4684_v7 = vpop.eup %4683  ;;  %v2517_v37 = vpop.f32.mrf.mxu1 }
 0x33a   : > { %4687 = vrcp.f32 %v6777_v40  ;;  %v3392_v9 = vpop.f32.mrf.mxu3  ;;  %v3174_v34 = vsel %vm3171_vm12, %v3173_v12, %v3169_v57  ;;  %vm3183_vm14 = vmor %vm3181_vm13, %vm3182_vm11  ;;  %v3202_v63 = vand.u32 2147483648, %v6777_v40  ;;  %vm3196_vm1 = vweird.f32 %v6777_v40 }
 0x33b   : > { %v3178_v27 = vsub.f32 1.0, %v3177_v58  ;;  %v3460_v51 = vmax.f32 %v3392_v9, 0.0  ;;  %4689 = vtanh.f32 %v2510_v24  ;;  %v3277_v18 = vmul.f32 %v4684_v7, %v3174_v34 }
 0x33c   : > { %v2606_v16 = vpop.f32.mrf.mxu2  ;;  %v3200_v14 = vand.u32 2147483647, %v6777_v40  ;;  %v3203_v5 = vor.u32 1.1754944e-38, %v3202_v63 }
 0x33d   : > { %v2607_v39 = vadd.f32 %v2606_v16, %v6235_v4  ;;  %3492 = vxpose.xlu2.b32.cont [9/16] (narrow) %v3460_v51, 8  ;;  %v3179_v62 = vmul.f32 %v4682_v38, %v3178_v27 }
 0x33e   : > { %vm3201_vm4 = vcmp.eq.f32.partialorder %v3200_v14, 8.507059e+37 }
 0x33f   : > { %v4686_v3 = vpop.eup %4685  ;;  %v3985_v30 = vmul.f32 -1.442695, %v2607_v39  ;;  %v3180_v22 = vadd.f32 %v4682_v38, %v3179_v62  ;;  %v2518_v62 = vadd.f32 %v2517_v37, %v6300_v53 }
 0x340   : > { %v4688_v10 = vpop.eup %4687  ;;  %v6797_v17 = vadd.f32 1.0, %v4686_v3 }
 0x341   : > { %v3192_v56 = vmul.f32 %v4688_v10, %v6777_v40  ;;  %4691 = vpow2.f32 %v3985_v30  ;;  %v3184_v21 = vsel %vm3183_vm14, %v4682_v38, %v3180_v22  ;;  %v4690_v32 = vpop.eup %4689  ;;  %vm3197_vm0 = vweird.f32 %v4688_v10  ;;  %v2519_v19 = vpop.f32.mrf.mxu1 }
 0x342   : > { %4693 = vrcp.f32 %v6797_v17  ;;  %v3394_v60 = vpop.f32.mrf.mxu3  ;;  %v3189_v46 = vsel %vm3186_vm15, %v3188_v8, %v3184_v21  ;;  %vm6811_vm2 = vmor %vm3196_vm1, %vm3197_vm0  ;;  %v3217_v49 = vand.u32 2147483648, %v6797_v17  ;;  %v3215_v26 = vand.u32 2147483647, %v6797_v17 }
 0x343   : > { %v3193_v29 = vsub.f32 1.0, %v3192_v56  ;;  %v3461_v20 = vmax.f32 %v3394_v60, 0.0  ;;  %v3278_v36 = vmul.f32 %v4690_v32, %v3189_v46  ;;  %4695 = vtanh.f32 %v2513_v45 }
 0x344   : > { %v2608_v13 = vpop.f32.mrf.mxu2  ;;  %vm3211_vm5 = vweird.f32 %v6797_v17  ;;  %v3218_v58 = vor.u32 1.1754944e-38, %v3217_v49  ;;  %vm3216_vm7 = vcmp.eq.f32.partialorder %v3215_v26, 8.507059e+37  ;;  %v2520_v12 = vadd.f32 %v2519_v19, %v6300_v53 }
 0x345   : > { %v2609_v0 = vadd.f32 %v2608_v13, %v6235_v4  ;;  %3493 = vxpose.xlu2.b32.cont [10/16] (narrow) %v3461_v20, 8  ;;  %v3296_v42 = vpack.c.bf16 %v3278_v36, %v3277_v18  ;;  %v3194_v31 = vmul.f32 %v4688_v10, %v3193_v29 }
 0x347   : > { %v4692_v2 = vpop.eup %4691  ;;  %v3986_v23 = vmul.f32 -1.442695, %v2609_v0  ;;  %3436 = vmatmul.bf16.gmra.mxu3 %v3296_v42  ;;  %v3195_v6 = vadd.f32 %v4688_v10, %v3194_v31 }
 0x348   : > { %v4694_v44 = vpop.eup %4693  ;;  %v6804_v54 = vadd.f32 1.0, %v4692_v2 }
 0x349   : > { %v3207_v41 = vmul.f32 %v4694_v44, %v6797_v17  ;;  %4697 = vpow2.f32 %v3986_v23  ;;  %v3199_v55 = vsel %vm6811_vm2, %v4688_v10, %v3195_v6  ;;  %vm3212_vm3 = vweird.f32 %v4694_v44  ;;  %v4696_v25 = vpop.eup %4695 }
 0x34a   : > { %4699 = vrcp.f32 %v6804_v54  ;;  %v3397_v4 = vpop.f32.mrf.mxu3  ;;  %v3204_v40 = vsel %vm3201_vm4, %v3203_v5, %v3199_v55  ;;  %vm3213_vm6 = vmor %vm3211_vm5, %vm3212_vm3  ;;  %v3232_v10 = vand.u32 2147483648, %v6804_v54  ;;  %vm3226_vm9 = vweird.f32 %v6804_v54 }
 0x34b   : > { %v3208_v43 = vsub.f32 1.0, %v3207_v41  ;;  %v3462_v61 = vmax.f32 %v3397_v4, 0.0  ;;  %4701 = vtanh.f32 %v2515_v33  ;;  %v3279_v48 = vmul.f32 %v4696_v25, %v3204_v40 }
 0x34c   : > { %v3230_v8 = vand.u32 2147483647, %v6804_v54  ;;  %v3233_v32 = vor.u32 1.1754944e-38, %v3232_v10 }
 0x34d   : > { %3494 = vxpose.xlu2.b32.cont [11/16] (narrow) %v3462_v61, 8  ;;  %v3209_v1 = vmul.f32 %v4694_v44, %v3208_v43 }
 0x34e   : > { %vm3231_vm12 = vcmp.eq.f32.partialorder %v3230_v8, 8.507059e+37 }
 0x34f   : > { %v4698_v50 = vpop.eup %4697  ;;  %v3210_v47 = vadd.f32 %v4694_v44, %v3209_v1 }
 0x350   : > { %v4700_v38 = vpop.eup %4699  ;;  %v2770_v24 = vadd.f32 1.0, %v4698_v50 }
 0x351   : > { %v3222_v15 = vmul.f32 %v4700_v38, %v6804_v54  ;;  %v3214_v9 = vsel %vm3213_vm6, %v4694_v44, %v3210_v47  ;;  %v4702_v35 = vpop.eup %4701  ;;  %vm3227_vm8 = vweird.f32 %v4700_v38 }
 0x352   : > { %4703 = vrcp.f32 %v2770_v24  ;;  %v3399_v27 = vpop.f32.mrf.mxu3  ;;  %v3219_v51 = vsel %vm3216_vm7, %v3218_v58, %v3214_v9  ;;  %vm3228_vm10 = vmor %vm3226_vm9, %vm3227_vm8  ;;  %v3247_v59 = vand.u32 2147483648, %v2770_v24  ;;  %v3245_v53 = vand.u32 2147483647, %v2770_v24 }
 0x353   : > { %v3223_v11 = vsub.f32 1.0, %v3222_v15  ;;  %v3463_v16 = vmax.f32 %v3399_v27, 0.0  ;;  %v3280_v28 = vmul.f32 %v4702_v35, %v3219_v51  ;;  %4705 = vtanh.f32 %v2518_v62  ;;  %v2265_v27 = vpop.trf.xlu0 }
 0x354   : > { %4707 = vtanh.f32 %v2520_v12  ;;  %vm3241_vm13 = vweird.f32 %v2770_v24  ;;  %v3248_v20 = vor.u32 1.1754944e-38, %v3247_v59  ;;  %vm3246_vm15 = vcmp.eq.f32.partialorder %v3245_v53, 8.507059e+37  ;;  %2313 = vst [vmem:[%s426_s29] sm:$0xff] %v2265_v27 }
 0x355   : > { %3495 = vxpose.xlu2.b32.cont [12/16] (narrow) %v3463_v16, 8  ;;  %v3297_v39 = vpack.c.bf16 %v3280_v28, %v3279_v48  ;;  %v3224_v57 = vmul.f32 %v4700_v38, %v3223_v11 }
 0x357   : > { %3441 = vmatmul.bf16.gmra.mxu3 %v3297_v39  ;;  %v3225_v30 = vadd.f32 %v4700_v38, %v3224_v57 }
 0x358   : > { %v4704_v7 = vpop.eup %4703 }
 0x359   : > { %v3237_v3 = vmul.f32 %v4704_v7, %v2770_v24  ;;  %v3229_v56 = vsel %vm3228_vm10, %v4700_v38, %v3225_v30  ;;  %vm3242_vm11 = vweird.f32 %v4704_v7  ;;  %v4706_v46 = vpop.eup %4705 }
 0x35a   : > { %v3402_v22 = vpop.f32.mrf.mxu3  ;;  %v3234_v29 = vsel %vm3231_vm12, %v3233_v32, %v3229_v56  ;;  %vm3243_vm14 = vmor %vm3241_vm13, %vm3242_vm11  ;;  %v4708_v36 = vpop.eup %4707 }
 0x35b   : > { %v3238_v17 = vsub.f32 1.0, %v3237_v3  ;;  %v3464_v34 = vmax.f32 %v3402_v22, 0.0  ;;  %v3281_v42 = vmul.f32 %v4706_v46, %v3234_v29 }
 0x35d   : > { %3496 = vxpose.xlu2.b32.cont [13/16] (narrow) %v3464_v34, 8  ;;  %v3239_v21 = vmul.f32 %v4704_v7, %v3238_v17 }
 0x35f   : > { %v3240_v60 = vadd.f32 %v4704_v7, %v3239_v21 }
 0x361   : > { %v3244_v18 = vsel %vm3243_vm14, %v4704_v7, %v3240_v60  ;;  %v2297_v7 = vpop.trf.xlu1 }
 0x362   : > { %v3404_v45 = vpop.f32.mrf.mxu3  ;;  %v3249_v13 = vsel %vm3246_vm15, %v3248_v20, %v3244_v18  ;;  %2314 = vst [vmem:[%s426_s29 + $0x8] sm:$0xff] %v2297_v7 }
 0x363   : > { %v3465_v0 = vmax.f32 %v3404_v45, 0.0  ;;  %v3282_v31 = vmul.f32 %v4708_v36, %v3249_v13 }
 0x365   : > { %3497 = vxpose.xlu2.b32.cont [14/16] (narrow) %v3465_v0, 8  ;;  %v3298_v2 = vpack.c.bf16 %v3282_v31, %v3281_v42 }
 0x367   : > { %3446 = vmatmul.bf16.gmra.mxu3 %v3298_v2 }
 0x36a   : > { %v3407_v23 = vpop.f32.mrf.mxu3 }
 0x36b   : > { %v3466_v44 = vmax.f32 %v3407_v23, 0.0 }
 0x36d   : > { %3498 = vxpose.xlu2.b32.cont [15/16] (narrow) %v3466_v44, 8 }
 0x372   : > { %v3409_v33 = vpop.f32.mrf.mxu3 }
 0x373   : > { %v3467_v54 = vmax.f32 %v3409_v33, 0.0 }
 0x375   : > { %3499 = vxpose.xlu2.b32.end [16/16] (narrow) %v3467_v54, 8 }
 0x37a   : > { %v3412_v41 = vpop.f32.mrf.mxu3 }
 0x37b   : > { %v3468_v6 = vmax.f32 %v3412_v41, 0.0 }
 0x37d   : > { %3516 = vxpose.xlu0.b32.start [1/16] (narrow) %v3468_v6, 8 }
 0x382   : > { %v3414_v4 = vpop.f32.mrf.mxu3 }
 0x383   : > { %v3469_v63 = vmax.f32 %v3414_v4, 0.0 }
 0x385   : > { %3517 = vxpose.xlu0.b32.cont [2/16] (narrow) %v3469_v63, 8 }
 0x38a   : > { %v3417_v37 = vpop.f32.mrf.mxu3 }
 0x38b   : > { %v3470_v43 = vmax.f32 %v3417_v37, 0.0 }
 0x38d   : > { %3518 = vxpose.xlu0.b32.cont [3/16] (narrow) %v3470_v43, 8 }
 0x392   : > { %v3419_v61 = vpop.f32.mrf.mxu3 }
 0x393   : > { %v3471_v14 = vmax.f32 %v3419_v61, 0.0 }
 0x395   : > { %3519 = vxpose.xlu0.b32.cont [4/16] (narrow) %v3471_v14, 8 }
 0x396   : > { %v3500_v51 = vpop.trf.xlu2 }
 0x397   : > { %4019 = vst [vmem:[%s426_s29 + $0x10] sm:$0xff] %v3500_v51 }
 0x39a   : > { %v3422_v52 = vpop.f32.mrf.mxu3 }
 0x39b   : > { %v3472_v49 = vmax.f32 %v3422_v52, 0.0 }
 0x39d   : > { %3520 = vxpose.xlu0.b32.cont [5/16] (narrow) %v3472_v49, 8 }
 0x3a2   : > { %v3424_v55 = vpop.f32.mrf.mxu3 }
 0x3a3   : > { %v3473_v1 = vmax.f32 %v3424_v55, 0.0 }
 0x3a5   : > { %3521 = vxpose.xlu0.b32.cont [6/16] (narrow) %v3473_v1, 8 }
 0x3aa   : > { %v3427_v26 = vpop.f32.mrf.mxu3 }
 0x3ab   : > { %v3474_v25 = vmax.f32 %v3427_v26, 0.0 }
 0x3ad   : > { %3522 = vxpose.xlu0.b32.cont [7/16] (narrow) %v3474_v25, 8 }
 0x3b2   : > { %v3429_v5 = vpop.f32.mrf.mxu3 }
 0x3b3   : > { %v3475_v50 = vmax.f32 %v3429_v5, 0.0 }
 0x3b5   : > { %3523 = vxpose.xlu0.b32.cont [8/16] (narrow) %v3475_v50, 8 }
 0x3ba   : > { %v3432_v47 = vpop.f32.mrf.mxu3 }
 0x3bb   : > { %v3476_v38 = vmax.f32 %v3432_v47, 0.0 }
 0x3bd   : > { %3524 = vxpose.xlu0.b32.cont [9/16] (narrow) %v3476_v38, 8 }
 0x3c2   : > { %v3434_v24 = vpop.f32.mrf.mxu3 }
 0x3c3   : > { %v3477_v40 = vmax.f32 %v3434_v24, 0.0 }
 0x3c5   : > { %3525 = vxpose.xlu0.b32.cont [10/16] (narrow) %v3477_v40, 8 }
 0x3ca   : > { %v3437_v58 = vpop.f32.mrf.mxu3 }
 0x3cb   : > { %v3478_v15 = vmax.f32 %v3437_v58, 0.0 }
 0x3cd   : > { %3526 = vxpose.xlu0.b32.cont [11/16] (narrow) %v3478_v15, 8 }
 0x3d2   : > { %v3439_v9 = vpop.f32.mrf.mxu3 }
 0x3d3   : > { %v3479_v35 = vmax.f32 %v3439_v9, 0.0 }
 0x3d5   : > { %3527 = vxpose.xlu0.b32.cont [12/16] (narrow) %v3479_v35, 8 }
 0x3da   : > { %v3442_v11 = vpop.f32.mrf.mxu3 }
 0x3db   : > { %v3480_v16 = vmax.f32 %v3442_v11, 0.0 }
 0x3dd   : > { %3528 = vxpose.xlu0.b32.cont [13/16] (narrow) %v3480_v16, 8 }
 0x3e2   : > { %v3444_v48 = vpop.f32.mrf.mxu3 }
 0x3e3   : > { %v3481_v28 = vmax.f32 %v3444_v48, 0.0 }
 0x3e5   : > { %3529 = vxpose.xlu0.b32.cont [14/16] (narrow) %v3481_v28, 8 }
 0x3ea   : > { %v3447_v19 = vpop.f32.mrf.mxu3 }
 0x3eb   : > { %v3482_v39 = vmax.f32 %v3447_v19, 0.0 }
 0x3ed   : > { %3530 = vxpose.xlu0.b32.cont [15/16] (narrow) %v3482_v39, 8 }
 0x3f2   : > { %v3449_v57 = vpop.f32.mrf.mxu3 }
 0x3f3   : > { %v3483_v62 = vmax.f32 %v3449_v57, 0.0 }
 0x3f5   : > { %3531 = vxpose.xlu0.b32.end [16/16] (narrow) %v3483_v62, 8 }
 0x421   : > { %v3532_v12 = vpop.trf.xlu0 }
 0x422   : > { %4020 = vst [vmem:[%s426_s29 + $0x18] sm:$0xff] %v3532_v12 }
 0x423   : > { %4736 = shalt.err (!%p4733_p7)
}
 0x424   : > { %s4805_s4 = smov 256   ;;  %s4806_s29 = smov 1024  }
 0x425   : > { %s4807_s28 = smov 16  }
 0x426   : > { %4249 = dma.vmem_to_hbm [thread:$0]  (%p4917_p3), %s3567_s24, 512, %s3569_s25, %s3552_s12, %s4805_s4, %s4806_s29, %s4807_s28  }
 0x427 PF: > { %p4255_p9 = scmp.ge.s32.totalorder %s4803_s22, 2  ;;  %s3583_s23 = sand.u32 1, %s4775_s15  }
 0x428   : > { %s3584_s2 = scalar_lea.sflag [#allocation4], %s3583_s23 }
 0x429   : > { %p4252_p10 = pnand %p4255_p9, %p4926_p8 }
 0x42b   : > { %p4253_p11 = pneg %p4252_p10 }
 0x42d   : > { %4770 = dma.done.wait (%p4253_p11), %s3584_s2, 512  }
 0x42e   : > { %4772 = vsyncadd (%p4253_p11), %s3584_s2, 4294966784  ;;  %s24_s22 = sadd.s32 1, %s4803_s22   ;;  %s6965_s11 = sld [smem:[#allocation6_spill]] }
 0x42f   : > { %p21_p12 = scmp.ge.s32.totalorder %s24_s22, 6   ;;  %s6966_s17 = sld [smem:[#allocation12_spill]] }
 0x430   : > { %s6967_s18 = sld [smem:[#allocation7_spill]]  ;;  %s6971_s15 = smov %s4779_s16 }
 0x431   : > { %s6968_s19 = sld [smem:[#allocation8_spill]]  ;;  %23 = sbr.rel (!%p21_p12) target bundleno = 8 (0x8), region = 105 }
 0x432   : > { %s6969_s20 = sld [smem:[#allocation9_spill]] }
 0x433   : > { %s6970_s21 = sld [smem:[#allocation10_spill]] }
 0x434   : > { %s6972_s16 = smov %s6965_s11 }
 0x436   :  { %3590 = vsyncpa [#allocation4], 1 }
 0x437   :  { %3592 = vsyncpa [#allocation4 + $0x1], 1 }

</bundles_post_ra>
